<compile_context>
chip_gen: v5e
topology: v5e:2x2
jax: 0.10.0
libtpu: 0.0.40
codegen_flags: <defaults>
</compile_context>

<pallas_src>
import numpy as np
import jax
import jax.numpy as jnp
from jax import lax
from jax.experimental import pallas as pl
from jax.experimental.pallas import tpu as pltpu

# Module hyper-parameters (defaults of CNNFeatureExtractor).
H_IN, W_IN = 24, 32               # input spatial size
C1, C2 = 16, 32                   # conv1 / conv2 output channels
FC_OUT = 128                      # fc output features
HP1, WP1 = H_IN // 2, W_IN // 2   # after first maxpool: 12, 16
HP2, WP2 = HP1 // 2, WP1 // 2     # after second maxpool: 6, 8
FLAT = C2 * HP2 * WP2             # flat_feature_size = 1536
N1 = 2 * WP1 * C1                 # conv1 output lane width = 512
N2 = 2 * WP2 * C2                 # conv2 output lane width = 512
K1 = 3 * (W_IN + 2)               # fused conv1 K = 102
K2 = 3 * (WP1 * C1)               # fused conv2 K = 768


def _round_up(n, m):
    return ((n + m - 1) // m) * m


def _even_odd_natcols(width, channels):
    # natural column (w*channels + c) that lands at permuted column
    # (w%2)*(width//2*channels) + (w//2)*channels + c
    p = np.arange(2)[:, None, None]
    q = np.arange(width // 2)[None, :, None]
    c = np.arange(channels)[None, None, :]
    return ((2 * q + p) * channels + c).reshape(-1)


_NATCOL1 = _even_odd_natcols(W_IN, C1)     # (512,)
_NATCOL2 = _even_odd_natcols(WP1, C2)      # (512,)

# onehot1[wp, w, dx] = 1 iff wp == w + dx   (conv1 reads the W-padded input)
_ONEHOT1 = np.zeros((W_IN + 2, W_IN, 3), np.float32)
for _w in range(W_IN):
    for _dx in range(3):
        _ONEHOT1[_w + _dx, _w, _dx] = 1.0

# onehot2[wp, w, dx] = 1 iff wp == w + dx - 1 (conv2 input unpadded in W; the
# out-of-range taps are the zero padding and simply have no row in the band)
_ONEHOT2 = np.zeros((WP1, WP1, 3), np.float32)
for _w in range(WP1):
    for _dx in range(3):
        _wp = _w + _dx - 1
        if 0 <= _wp < WP1:
            _ONEHOT2[_wp, _w, _dx] = 1.0


def _cnn_kernel(x_ref, w1_ref, b1_ref, w2_ref, b2_ref, wfc_ref, bfc_ref,
                out_ref):
    f32 = jnp.float32
    bf16 = jnp.bfloat16
    bt = x_ref.shape[0]

    x = x_ref[...]                                           # (bt, 26, 34) f32

    # ---- conv1 (3x3, pad 1) + bias + ReLU: ONE fused banded MXU matmul ----
    # rows = (b, h), K = (ky | padded-W), lanes = (w%2 | w//2 | c1)
    lhs1 = jnp.concatenate(
        [x[:, dy:dy + H_IN, :].reshape(bt * H_IN, W_IN + 2) for dy in range(3)],
        axis=1).astype(bf16)                                 # (bt*24, 102)
    acc1 = jnp.dot(lhs1, w1_ref[...], preferred_element_type=f32)
    a1 = jnp.maximum(acc1 + b1_ref[...], 0.0)                # (bt*24, 512) f32

    # ---- maxpool 2x2 #1: lane-half max (W) then row-pair max (H) ----------
    half1 = WP1 * C1                                         # 256
    mw1 = jnp.maximum(a1[:, :half1], a1[:, half1:])          # (bt*24, 256)
    m4 = mw1.reshape(bt, HP1, 2, half1)
    p1 = jnp.maximum(m4[:, :, 0, :], m4[:, :, 1, :])         # (bt, 12, 256)

    # Value-level H zero-pad (no scratch ref round trip).
    zrow = jnp.zeros((bt, 1, half1), f32)
    p1p = jnp.concatenate([zrow, p1, zrow], axis=1)          # (bt, 14, 256)

    # ---- conv2 (3x3, pad 1) + bias + ReLU: ONE fused banded MXU matmul ----
    # rows = (b, h2), K = (ky | W*C1), lanes = (w%2 | w//2 | c2)
    lhs2 = jnp.concatenate(
        [p1p[:, dy:dy + HP1, :].reshape(bt * HP1, half1) for dy in range(3)],
        axis=1).astype(bf16)                                 # (bt*12, 768)
    acc2 = jnp.dot(lhs2, w2_ref[...], preferred_element_type=f32)
    a2 = jnp.maximum(acc2 + b2_ref[...], 0.0)                # (bt*12, 512) f32

    # ---- maxpool 2x2 #2 + flatten -----------------------------------------
    half2 = WP2 * C2                                         # 256
    mw2 = jnp.maximum(a2[:, :half2], a2[:, half2:])          # (bt*12, 256)
    m42 = mw2.reshape(bt, HP2, 2, half2)
    pooled = jnp.maximum(m42[:, :, 0, :], m42[:, :, 1, :])   # (bt, 6, 256)
    feats = pooled.reshape(bt, FLAT).astype(bf16)            # (bt, 1536)

    # ---- fc: one well-shaped MXU matmul -----------------------------------
    out_ref[...] = (jnp.dot(feats, wfc_ref[...], preferred_element_type=f32)
                    + bfc_ref[...])


def _default_batch_tile(B):
    # Large tiles amortize the ~0.35 us per-step overhead and fill the MXU M
    # dim (conv1 M = bt*24, conv2 M = bt*12, fc M = bt).  Keep >= 2 grid steps
    # when the batch allows, so the single 'parallel' axis can shard across
    # v7x's two TensorCores.
    if B <= 8:
        return 8
    bt = min(128, _round_up(B, 8))
    while bt > 8 and pl.cdiv(B, bt) < 2:
        bt = _round_up(bt // 2, 8)
    return bt


def _vmem_limit_bytes(bt):
    # Rough per-step working set (f32 conv accumulators/activations dominate;
    # matmul LHS slabs and weights are bf16), doubled for pipelining slack.
    per_sample = (
        2 * H_IN * N1 * 4          # acc1 / a1 (f32)
        + H_IN * K1 * 2            # fused conv1 LHS (bf16)
        + 2 * HP1 * N2 * 4         # acc2 / a2 (f32)
        + HP1 * K2 * 2             # fused conv2 LHS (bf16)
        + 2 * (H_IN + 2) * (W_IN + 2) * 4   # input block, double-buffered
        + FLAT * 2 + 2 * FC_OUT * 4)
    fixed = 2 * (2 * (K1 * N1 + K2 * N2 + FLAT * FC_OUT)   # bf16 weights x2 bufs
                 + 4 * (N1 + N2 + FC_OUT))                 # f32 biases x2 bufs
    est = bt * per_sample + fixed + (4 << 20)
    try:
        cap = int(pltpu.get_tpu_info().vmem_capacity_bytes)
    except Exception:  # pragma: no cover - conservative fallback (v7x-sized)
        cap = 64 << 20
    return int(min(max(2 * est, 32 << 20), int(cap * 0.8)))


def cnn_feature_extractor(x, params, *, batch_tile=None):
    """x: (B, 1, 24, 32) float32 NCHW. Returns (B, 128) float32."""
    B = x.shape[0]
    bt = batch_tile if batch_tile is not None else _default_batch_tile(B)
    Bp = _round_up(max(B, bt), bt)

    # Glue: spatial zero-pad for conv1; pad batch up to a multiple of bt.
    xpad = jnp.pad(x[:, 0], ((0, Bp - B), (1, 1), (1, 1)))          # (Bp, 26, 34)

    # Glue: banded ("Toeplitz over W") conv weights, even/odd-W lane order,
    # fused over the 3 ky taps along K, cast to bf16 for the MXU.
    w1k = params["conv1_w"].transpose(2, 3, 1, 0)[:, :, 0, :]       # (3,3,C1) [ky,kx,c]
    w1t = jnp.einsum("pwd,ydc->ypwc", jnp.asarray(_ONEHOT1), w1k)   # (3,34,32,16)
    w1t = w1t.reshape(3, W_IN + 2, W_IN * C1)[:, :, _NATCOL1]       # (3, 34, 512)
    w1t = w1t.reshape(K1, N1).astype(jnp.bfloat16)                  # (102, 512)
    b1row = jnp.tile(params["conv1_b"], 2 * WP1).reshape(1, N1)     # f32

    w2k = params["conv2_w"].transpose(2, 3, 1, 0)                   # (3,3,C1,C2)
    w2t = jnp.einsum("pwd,ydic->ypiwc", jnp.asarray(_ONEHOT2), w2k)  # (3,16,16,16,32)
    w2t = w2t.reshape(3, WP1 * C1, WP1 * C2)[:, :, _NATCOL2]        # (3, 256, 512)
    w2t = w2t.reshape(K2, N2).astype(jnp.bfloat16)                  # (768, 512)
    b2row = jnp.tile(params["conv2_b"], 2 * WP2).reshape(1, N2)     # f32

    # Glue: fc weight permuted to the kernel's (h, w, c) flatten order.
    wfc = (params["fc_w"].reshape(FC_OUT, C2, HP2, WP2)
           .transpose(2, 3, 1, 0).reshape(FLAT, FC_OUT)
           .astype(jnp.bfloat16))                                   # (1536, 128)
    bfc = params["fc_b"].reshape(1, FC_OUT)                         # f32

    grid_spec = pltpu.PrefetchScalarGridSpec(
        num_scalar_prefetch=0,
        grid=(Bp // bt,),
        in_specs=[
            pl.BlockSpec((bt, H_IN + 2, W_IN + 2), lambda b: (b, 0, 0)),
            pl.BlockSpec((K1, N1), lambda b: (0, 0)),
            pl.BlockSpec((1, N1), lambda b: (0, 0)),
            pl.BlockSpec((K2, N2), lambda b: (0, 0)),
            pl.BlockSpec((1, N2), lambda b: (0, 0)),
            pl.BlockSpec((FLAT, FC_OUT), lambda b: (0, 0)),
            pl.BlockSpec((1, FC_OUT), lambda b: (0, 0)),
        ],
        out_specs=pl.BlockSpec((bt, FC_OUT), lambda b: (b, 0)),
    )
    out = pl.pallas_call(
        _cnn_kernel,
        out_shape=jax.ShapeDtypeStruct((Bp, FC_OUT), jnp.float32),
        grid_spec=grid_spec,
        compiler_params=pltpu.CompilerParams(
            dimension_semantics=("parallel",),
            vmem_limit_bytes=_vmem_limit_bytes(bt)),
    )(xpad, w1t, b1row, w2t, b2row, wfc, bfc)
    return out[:B]


def reference_forward(x, params):
    """Pure-JAX f32 reference reproducing the PyTorch forward."""
    dn1 = lax.conv_dimension_numbers(x.shape, params["conv1_w"].shape,
                                     ("NCHW", "OIHW", "NCHW"))
    y = lax.conv_general_dilated(x, params["conv1_w"], (1, 1), ((1, 1), (1, 1)),
                                 dimension_numbers=dn1,
                                 precision=lax.Precision.HIGHEST)
    y = jax.nn.relu(y + params["conv1_b"][None, :, None, None])
    y = lax.reduce_window(y, -jnp.inf, lax.max, (1, 1, 2, 2), (1, 1, 2, 2), "VALID")
    dn2 = lax.conv_dimension_numbers(y.shape, params["conv2_w"].shape,
                                     ("NCHW", "OIHW", "NCHW"))
    y = lax.conv_general_dilated(y, params["conv2_w"], (1, 1), ((1, 1), (1, 1)),
                                 dimension_numbers=dn2,
                                 precision=lax.Precision.HIGHEST)
    y = jax.nn.relu(y + params["conv2_b"][None, :, None, None])
    y = lax.reduce_window(y, -jnp.inf, lax.max, (1, 1, 2, 2), (1, 1, 2, 2), "VALID")
    feat = y.reshape(x.shape[0], -1)
    return feat @ params["fc_w"].T + params["fc_b"]


if __name__ == "__main__":
    key = jax.random.PRNGKey(0)
    k1, k2, k3, k4, k5, k6, kx = jax.random.split(key, 7)

    # Deterministic synthetic parameters (PyTorch layouts: OIHW conv, (out,in) fc).
    params = {
        "conv1_w": 0.20 * jax.random.normal(k1, (C1, 1, 3, 3), jnp.float32),
        "conv1_b": 0.10 * jax.random.normal(k2, (C1,), jnp.float32),
        "conv2_w": 0.08 * jax.random.normal(k3, (C2, C1, 3, 3), jnp.float32),
        "conv2_b": 0.10 * jax.random.normal(k4, (C2,), jnp.float32),
        "fc_w":    0.03 * jax.random.normal(k5, (FC_OUT, FLAT), jnp.float32),
        "fc_b":    0.10 * jax.random.normal(k6, (FC_OUT,), jnp.float32),
    }

    B = 2
    x = jax.random.normal(kx, (B, 1, H_IN, W_IN), jnp.float32)

    forward = jax.jit(cnn_feature_extractor)
    out = forward(x, params)
    out = jax.block_until_ready(out)

    ref = jax.block_until_ready(reference_forward(x, params))
    assert out.shape == (B, FC_OUT), out.shape
    # bf16 matmul operands (f32 accumulation) vs. the f32 HIGHEST reference.
    if not jnp.allclose(out, ref, atol=3e-2, rtol=3e-2):
        raise AssertionError(
            f"mismatch: max abs err {float(jnp.max(jnp.abs(out - ref)))}")

    print("KERNEL_OK")
</pallas_src>

<mosaic_0001>
module attributes {stable_mosaic.version = 11 : i64} {
  func.func @_cnn_kernel(%arg0: i32, %arg1: memref<8x26x34xf32, #tpu.memory_space<vmem>>, %arg2: memref<102x512xbf16, #tpu.memory_space<vmem>>, %arg3: memref<1x512xf32, #tpu.memory_space<vmem>>, %arg4: memref<768x512xbf16, #tpu.memory_space<vmem>>, %arg5: memref<1x512xf32, #tpu.memory_space<vmem>>, %arg6: memref<1536x128xbf16, #tpu.memory_space<vmem>>, %arg7: memref<1x128xf32, #tpu.memory_space<vmem>>, %arg8: memref<8x128xf32, #tpu.memory_space<vmem>>) attributes {dimension_semantics = [#tpu.dimension_semantics<parallel>], iteration_bounds = array<i64: 1>, scalar_prefetch = 0 : i64, scratch_operands = 0 : i64, tpu.core_type = #tpu.core_type<tc>, window_params = [{transform_indices = @transform_0, window_bounds = array<i64: 8, 26, 34>}, {pipeline_mode = #tpu.pipeline_mode<synchronous>, transform_indices = @transform_1, window_bounds = array<i64: 102, 512>}, {pipeline_mode = #tpu.pipeline_mode<synchronous>, transform_indices = @transform_2, window_bounds = array<i64: 1, 512>}, {pipeline_mode = #tpu.pipeline_mode<synchronous>, transform_indices = @transform_3, window_bounds = array<i64: 768, 512>}, {pipeline_mode = #tpu.pipeline_mode<synchronous>, transform_indices = @transform_4, window_bounds = array<i64: 1, 512>}, {pipeline_mode = #tpu.pipeline_mode<synchronous>, transform_indices = @transform_5, window_bounds = array<i64: 1536, 128>}, {pipeline_mode = #tpu.pipeline_mode<synchronous>, transform_indices = @transform_6, window_bounds = array<i64: 1, 128>}, {transform_indices = @transform_7, window_bounds = array<i64: 8, 128>}]} {
    %c0 = arith.constant 0 : index
    %c0_0 = arith.constant 0 : index
    %c0_1 = arith.constant 0 : index
    %0 = vector.load %arg1[%c0, %c0_0, %c0_1] : memref<8x26x34xf32, #tpu.memory_space<vmem>>, vector<8x26x34xf32>
    %1 = vector.extract_strided_slice %0 {offsets = [0, 0, 0], sizes = [8, 24, 34], strides = [1, 1, 1]} : vector<8x26x34xf32> to vector<8x24x34xf32>
    %2 = vector.shape_cast %1 : vector<8x24x34xf32> to vector<192x34xf32>
    %3 = vector.extract_strided_slice %0 {offsets = [0, 1, 0], sizes = [8, 24, 34], strides = [1, 1, 1]} : vector<8x26x34xf32> to vector<8x24x34xf32>
    %4 = vector.shape_cast %3 : vector<8x24x34xf32> to vector<192x34xf32>
    %5 = vector.extract_strided_slice %0 {offsets = [0, 2, 0], sizes = [8, 24, 34], strides = [1, 1, 1]} : vector<8x26x34xf32> to vector<8x24x34xf32>
    %6 = vector.shape_cast %5 : vector<8x24x34xf32> to vector<192x34xf32>
    %7 = tpu.concatenate %2, %4, %6 in 1 : vector<192x34xf32>, vector<192x34xf32>, vector<192x34xf32> -> vector<192x102xf32>
    %8 = arith.truncf %7 : vector<192x102xf32> to vector<192x102xbf16>
    %c0_2 = arith.constant 0 : index
    %c0_3 = arith.constant 0 : index
    %9 = vector.load %arg2[%c0_2, %c0_3] : memref<102x512xbf16, #tpu.memory_space<vmem>>, vector<102x512xbf16>
    %cst = arith.constant dense<0.000000e+00> : vector<192x512xf32>
    %10 = tpu.matmul %8, %9, %cst {dimension_numbers = #tpu.dot_dimension_numbers<[1], [0], [0], [1], [0, 0, 1, 1], [], []>} : vector<192x102xbf16>, vector<102x512xbf16>, vector<192x512xf32> -> vector<192x512xf32>
    %c0_4 = arith.constant 0 : index
    %c0_5 = arith.constant 0 : index
    %11 = vector.load %arg3[%c0_4, %c0_5] : memref<1x512xf32, #tpu.memory_space<vmem>>, vector<1x512xf32>
    %12 = vector.broadcast %11 : vector<1x512xf32> to vector<192x512xf32>
    %13 = arith.addf %10, %12 : vector<192x512xf32>
    %cst_6 = arith.constant 0.000000e+00 : f32
    %14 = vector.broadcast %cst_6 : f32 to vector<192x512xf32>
    %15 = arith.maximumf %13, %14 : vector<192x512xf32>
    %16 = vector.extract_strided_slice %15 {offsets = [0, 0], sizes = [192, 256], strides = [1, 1]} : vector<192x512xf32> to vector<192x256xf32>
    %17 = vector.extract_strided_slice %15 {offsets = [0, 256], sizes = [192, 256], strides = [1, 1]} : vector<192x512xf32> to vector<192x256xf32>
    %18 = arith.maximumf %16, %17 : vector<192x256xf32>
    %19 = vector.shape_cast %18 : vector<192x256xf32> to vector<8x12x2x256xf32>
    %20 = vector.extract_strided_slice %19 {offsets = [0, 0, 0, 0], sizes = [8, 12, 1, 256], strides = [1, 1, 1, 1]} : vector<8x12x2x256xf32> to vector<8x12x1x256xf32>
    %21 = vector.shape_cast %20 : vector<8x12x1x256xf32> to vector<8x12x256xf32>
    %22 = vector.extract_strided_slice %19 {offsets = [0, 0, 1, 0], sizes = [8, 12, 1, 256], strides = [1, 1, 1, 1]} : vector<8x12x2x256xf32> to vector<8x12x1x256xf32>
    %23 = vector.shape_cast %22 : vector<8x12x1x256xf32> to vector<8x12x256xf32>
    %24 = arith.maximumf %21, %23 : vector<8x12x256xf32>
    %cst_7 = arith.constant 0.000000e+00 : f32
    %25 = vector.broadcast %cst_7 : f32 to vector<8x1x256xf32>
    %26 = tpu.concatenate %25, %24, %25 in 1 : vector<8x1x256xf32>, vector<8x12x256xf32>, vector<8x1x256xf32> -> vector<8x14x256xf32>
    %27 = vector.extract_strided_slice %26 {offsets = [0, 0, 0], sizes = [8, 12, 256], strides = [1, 1, 1]} : vector<8x14x256xf32> to vector<8x12x256xf32>
    %28 = vector.shape_cast %27 : vector<8x12x256xf32> to vector<96x256xf32>
    %29 = vector.extract_strided_slice %26 {offsets = [0, 1, 0], sizes = [8, 12, 256], strides = [1, 1, 1]} : vector<8x14x256xf32> to vector<8x12x256xf32>
    %30 = vector.shape_cast %29 : vector<8x12x256xf32> to vector<96x256xf32>
    %31 = vector.extract_strided_slice %26 {offsets = [0, 2, 0], sizes = [8, 12, 256], strides = [1, 1, 1]} : vector<8x14x256xf32> to vector<8x12x256xf32>
    %32 = vector.shape_cast %31 : vector<8x12x256xf32> to vector<96x256xf32>
    %33 = tpu.concatenate %28, %30, %32 in 1 : vector<96x256xf32>, vector<96x256xf32>, vector<96x256xf32> -> vector<96x768xf32>
    %34 = arith.truncf %33 : vector<96x768xf32> to vector<96x768xbf16>
    %c0_8 = arith.constant 0 : index
    %c0_9 = arith.constant 0 : index
    %35 = vector.load %arg4[%c0_8, %c0_9] : memref<768x512xbf16, #tpu.memory_space<vmem>>, vector<768x512xbf16>
    %cst_10 = arith.constant dense<0.000000e+00> : vector<96x512xf32>
    %36 = tpu.matmul %34, %35, %cst_10 {dimension_numbers = #tpu.dot_dimension_numbers<[1], [0], [0], [1], [0, 0, 1, 1], [], []>} : vector<96x768xbf16>, vector<768x512xbf16>, vector<96x512xf32> -> vector<96x512xf32>
    %c0_11 = arith.constant 0 : index
    %c0_12 = arith.constant 0 : index
    %37 = vector.load %arg5[%c0_11, %c0_12] : memref<1x512xf32, #tpu.memory_space<vmem>>, vector<1x512xf32>
    %38 = vector.broadcast %37 : vector<1x512xf32> to vector<96x512xf32>
    %39 = arith.addf %36, %38 : vector<96x512xf32>
    %cst_13 = arith.constant 0.000000e+00 : f32
    %40 = vector.broadcast %cst_13 : f32 to vector<96x512xf32>
    %41 = arith.maximumf %39, %40 : vector<96x512xf32>
    %42 = vector.extract_strided_slice %41 {offsets = [0, 0], sizes = [96, 256], strides = [1, 1]} : vector<96x512xf32> to vector<96x256xf32>
    %43 = vector.extract_strided_slice %41 {offsets = [0, 256], sizes = [96, 256], strides = [1, 1]} : vector<96x512xf32> to vector<96x256xf32>
    %44 = arith.maximumf %42, %43 : vector<96x256xf32>
    %45 = vector.shape_cast %44 : vector<96x256xf32> to vector<8x6x2x256xf32>
    %46 = vector.extract_strided_slice %45 {offsets = [0, 0, 0, 0], sizes = [8, 6, 1, 256], strides = [1, 1, 1, 1]} : vector<8x6x2x256xf32> to vector<8x6x1x256xf32>
    %47 = vector.shape_cast %46 : vector<8x6x1x256xf32> to vector<8x6x256xf32>
    %48 = vector.extract_strided_slice %45 {offsets = [0, 0, 1, 0], sizes = [8, 6, 1, 256], strides = [1, 1, 1, 1]} : vector<8x6x2x256xf32> to vector<8x6x1x256xf32>
    %49 = vector.shape_cast %48 : vector<8x6x1x256xf32> to vector<8x6x256xf32>
    %50 = arith.maximumf %47, %49 : vector<8x6x256xf32>
    %51 = vector.shape_cast %50 : vector<8x6x256xf32> to vector<8x1536xf32>
    %52 = arith.truncf %51 : vector<8x1536xf32> to vector<8x1536xbf16>
    %c0_14 = arith.constant 0 : index
    %c0_15 = arith.constant 0 : index
    %53 = vector.load %arg6[%c0_14, %c0_15] : memref<1536x128xbf16, #tpu.memory_space<vmem>>, vector<1536x128xbf16>
    %cst_16 = arith.constant dense<0.000000e+00> : vector<8x128xf32>
    %54 = tpu.matmul %52, %53, %cst_16 {dimension_numbers = #tpu.dot_dimension_numbers<[1], [0], [0], [1], [0, 0, 1, 1], [], []>} : vector<8x1536xbf16>, vector<1536x128xbf16>, vector<8x128xf32> -> vector<8x128xf32>
    %c0_17 = arith.constant 0 : index
    %c0_18 = arith.constant 0 : index
    %55 = vector.load %arg7[%c0_17, %c0_18] : memref<1x128xf32, #tpu.memory_space<vmem>>, vector<1x128xf32>
    %56 = vector.broadcast %55 : vector<1x128xf32> to vector<8x128xf32>
    %57 = arith.addf %54, %56 : vector<8x128xf32>
    %c0_19 = arith.constant 0 : index
    %c0_20 = arith.constant 0 : index
    %58 = vector.load %arg8[%c0_19, %c0_20] : memref<8x128xf32, #tpu.memory_space<vmem>>, vector<8x128xf32>
    tpu.vector_store %arg8[%c0_19, %c0_20], %57 {strides = array<i32>} : memref<8x128xf32, #tpu.memory_space<vmem>>, vector<8x128xf32>,
    return
  }
  func.func @transform_0(%arg0: i32) -> (i32, i32, i32) {
    %c0_i32 = arith.constant 0 : i32
    %c0_i32_0 = arith.constant 0 : i32
    %c0_i32_1 = arith.constant 0 : i32
    return %arg0, %c0_i32, %c0_i32_0 : i32, i32, i32
  }
  func.func @transform_1(%arg0: i32) -> (i32, i32) {
    %c0_i32 = arith.constant 0 : i32
    %c0_i32_0 = arith.constant 0 : i32
    %c0_i32_1 = arith.constant 0 : i32
    return %c0_i32, %c0_i32_0 : i32, i32
  }
  func.func @transform_2(%arg0: i32) -> (i32, i32) {
    %c0_i32 = arith.constant 0 : i32
    %c0_i32_0 = arith.constant 0 : i32
    %c0_i32_1 = arith.constant 0 : i32
    return %c0_i32, %c0_i32_0 : i32, i32
  }
  func.func @transform_3(%arg0: i32) -> (i32, i32) {
    %c0_i32 = arith.constant 0 : i32
    %c0_i32_0 = arith.constant 0 : i32
    %c0_i32_1 = arith.constant 0 : i32
    return %c0_i32, %c0_i32_0 : i32, i32
  }
  func.func @transform_4(%arg0: i32) -> (i32, i32) {
    %c0_i32 = arith.constant 0 : i32
    %c0_i32_0 = arith.constant 0 : i32
    %c0_i32_1 = arith.constant 0 : i32
    return %c0_i32, %c0_i32_0 : i32, i32
  }
  func.func @transform_5(%arg0: i32) -> (i32, i32) {
    %c0_i32 = arith.constant 0 : i32
    %c0_i32_0 = arith.constant 0 : i32
    %c0_i32_1 = arith.constant 0 : i32
    return %c0_i32, %c0_i32_0 : i32, i32
  }
  func.func @transform_6(%arg0: i32) -> (i32, i32) {
    %c0_i32 = arith.constant 0 : i32
    %c0_i32_0 = arith.constant 0 : i32
    %c0_i32_1 = arith.constant 0 : i32
    return %c0_i32, %c0_i32_0 : i32, i32
  }
  func.func @transform_7(%arg0: i32) -> (i32, i32) {
    %c0_i32 = arith.constant 0 : i32
    %c0_i32_0 = arith.constant 0 : i32
    return %arg0, %c0_i32 : i32, i32
  }
}

</mosaic_0001>

<bundles_post_ra>
// kernel: tile.13
= control target key start
LH: loop header
LB: loop body
LE: loop exit
PB: predicated region body
PF: predicated region fallthrough
CT: control target
= control target key end

     0   :  { %s40_s0 = inlined_call_operand.vmem [shape: f32[16], index: 0, kind: input, shape index: {}]   ;;  %s41_s1 = inlined_call_operand.vmem [shape: f32[32,16], index: 1, kind: output, shape index: {}]  }
   0x1   :  { %v4_v0 = vld [vmem:[%s40_s0] ss:$0 sm:$0xff] }
   0x2   :  { %5 = vst [vmem:[%s41_s1] sm:$0xff] %v4_v0 }
   0x3   :  { %12 = vst [vmem:[%s41_s1 + $0x8] sm:$0xff] %v4_v0 }
   0x4   :  { %13 = vst [vmem:[%s41_s1 + $0x10] sm:$0xff] %v4_v0 }
   0x5   :  { %14 = vst [vmem:[%s41_s1 + $0x18] sm:$0xff] %v4_v0 }

// kernel: tile.14
= control target key start
LH: loop header
LB: loop body
LE: loop exit
PB: predicated region body
PF: predicated region fallthrough
CT: control target
= control target key end

     0   :  { %s88_s8 = smov 112   ;;  %s89_s11 = smov 80   ;;  %vm3_vm0 = vcmask 130048   ;;  %vm9_vm1 = vcmask 1048448   ;;  %vm15_vm2 = vcmask 917248   ;;  %vm21_vm3 = vcmask 786048   ;;  %s141_s0 = inlined_call_operand.vmem [shape: f32[32,16], index: 0, kind: input, shape index: {}]   ;;  %s142_s1 = inlined_call_operand.vmem [shape: f32[1,512], index: 1, kind: output, shape index: {}]  }
   0x1   :  { %v71_v0 = vld [vmem:[%s141_s0 + $0x7] ss:$8 sm:$0xf]   ;;  %v73_v1 = vld [vmem:[%s141_s0 + $0x5] ss:$8 sm:$0xf]  }
   0x2   :  { %7 = vrot.lane.b32.xlu0 %v71_v0, %s88_s8  ;;  %19 = vrot.lane.b32.xlu1 %v73_v1, %s89_s11  ;;  %v75_v2 = vld [vmem:[%s141_s0 + $0x3] ss:$8 sm:$0xf]   ;;  %s90_s14 = smov 48   ;;  %s91_s19 = smov 96   ;;  %vm27_vm4 = vcmask 654848  }
   0x3   :  { %31 = vrot.lane.b32.xlu2 %v75_v2, %s90_s14  ;;  %v72_v3 = vld [vmem:[%s141_s0 + $0x6] ss:$8 sm:$0xf]   ;;  %v74_v4 = vld [vmem:[%s141_s0 + $0x4] ss:$8 sm:$0xf]  }
   0x4   :  { %s92_s20 = smov 64   ;;  %v76_v5 = vld [vmem:[%s141_s0 + $0x2] ss:$8 sm:$0xf]   ;;  %s93_s23 = smov 32   ;;  %vm33_vm5 = vcmask 523648  }
   0x5   :  { %v77_v6 = vld [vmem:[%s141_s0 + $0x1] ss:$8 sm:$0xf]   ;;  %s94_s26 = smov 16   ;;  %vm39_vm6 = vcmask 392448   ;;  %vm45_vm7 = vcmask 261248  }
   0x6   :  { %v2_v7 = vld [vmem:[%s141_s0] ss:$8 sm:$0xf]  }
   0x7   :  { %4 = vst.msk [vmem:[#allocation0] ss:$8 sm:$0xf] %vm3_vm0, %v2_v7  }
   0xa   :  { %13 = vrot.lane.b32.xlu0 %v72_v3, %s91_s19  ;;  %25 = vrot.lane.b32.xlu1 %v74_v4, %s92_s20 }
   0xb   :  { %37 = vrot.lane.b32.xlu2 %v76_v5, %s93_s23 }
  0x12   :  { %43 = vrot.lane.b32.xlu0 %v77_v6, %s94_s26 }
  0x5d   :  { %v32_v8 = vpop.permute.xlu2 %31  }
  0x65   :  { %v38_v9 = vpop.permute.xlu2 %37  }
  0x74   :  { %v8_v10 = vpop.permute.xlu0 %7   ;;  %v20_v11 = vpop.permute.xlu1 %19  }
  0x75   :  { %10 = vst.msk [vmem:[#allocation0] ss:$8 sm:$0xf] %vm9_vm1, %v8_v10  }
  0x7c   :  { %v14_v12 = vpop.permute.xlu0 %13   ;;  %v26_v13 = vpop.permute.xlu1 %25  }
  0x7d   :  { %16 = vst.msk [vmem:[#allocation0] ss:$8 sm:$0xf] %vm15_vm2, %v14_v12  }
  0x7e   :  { %22 = vst.msk [vmem:[#allocation0] ss:$8 sm:$0xf] %vm21_vm3, %v20_v11  }
  0x7f   :  { %28 = vst.msk [vmem:[#allocation0] ss:$8 sm:$0xf] %vm27_vm4, %v26_v13  }
  0x80   :  { %34 = vst.msk [vmem:[#allocation0] ss:$8 sm:$0xf] %vm33_vm5, %v32_v8  }
  0x81   :  { %40 = vst.msk [vmem:[#allocation0] ss:$8 sm:$0xf] %vm39_vm6, %v38_v9  }
  0x84   :  { %v44_v14 = vpop.permute.xlu0 %43  }
  0x85   :  { %46 = vst.msk [vmem:[#allocation0] ss:$8 sm:$0xf] %vm45_vm7, %v44_v14  }
  0x8c   :  { %v49_v15 = vld [vmem:[#allocation0] sm:$0x1]  ;;  %v54_v16 = vld [vmem:[#allocation0 + $0x8] sm:$0x1]  ;;  %v60_v17 = vld [vmem:[#allocation0 + $0x10] sm:$0x1] }
  0x8d   :  { %52 = vst [vmem:[%s142_s1] sm:$0x1] %v49_v15  ;;  %v66_v18 = vld [vmem:[#allocation0 + $0x18] sm:$0x1] }
  0x8e   :  { %78 = vst [vmem:[%s142_s1 + $0x1] sm:$0x1] %v54_v16 }
  0x8f   :  { %79 = vst [vmem:[%s142_s1 + $0x2] sm:$0x1] %v60_v17 }
  0x90   :  { %80 = vst [vmem:[%s142_s1 + $0x3] sm:$0x1] %v66_v18 }

// kernel: tile.18
= control target key start
LH: loop header
LB: loop body
LE: loop exit
PB: predicated region body
PF: predicated region fallthrough
CT: control target
= control target key end

     0   :  { %s28_s0 = inlined_call_operand.vmem [shape: f32[32], index: 0, kind: input, shape index: {}]   ;;  %s29_s1 = inlined_call_operand.vmem [shape: f32[16,32], index: 1, kind: output, shape index: {}]  }
   0x1   :  { %v4_v0 = vld [vmem:[%s28_s0] ss:$0 sm:$0xff] }
   0x2   :  { %5 = vst [vmem:[%s29_s1] sm:$0xff] %v4_v0 }
   0x3   :  { %8 = vst [vmem:[%s29_s1 + $0x8] sm:$0xff] %v4_v0 }

// kernel: tile.19
= control target key start
LH: loop header
LB: loop body
LE: loop exit
PB: predicated region body
PF: predicated region fallthrough
CT: control target
= control target key end

     0   :  { %s56_s8 = smov 96   ;;  %s57_s11 = smov 32   ;;  %vm3_vm0 = vcmask 261120   ;;  %vm9_vm1 = vcmask 1048320   ;;  %vm15_vm2 = vcmask 785920   ;;  %vm21_vm3 = vcmask 523520   ;;  %s93_s0 = inlined_call_operand.vmem [shape: f32[16,32], index: 0, kind: input, shape index: {}]   ;;  %s94_s1 = inlined_call_operand.vmem [shape: f32[1,512], index: 1, kind: output, shape index: {}]  }
   0x1   :  { %v47_v0 = vld [vmem:[%s93_s0 + $0x3] ss:$4 sm:$0xf]   ;;  %v49_v1 = vld [vmem:[%s93_s0 + $0x1] ss:$4 sm:$0xf]  }
   0x2   :  { %7 = vrot.lane.b32.xlu0 %v47_v0, %s56_s8  ;;  %19 = vrot.lane.b32.xlu1 %v49_v1, %s57_s11  ;;  %v48_v2 = vld [vmem:[%s93_s0 + $0x2] ss:$4 sm:$0xf]   ;;  %s58_s14 = smov 64  }
   0x3   :  { %v2_v3 = vld [vmem:[%s93_s0] ss:$4 sm:$0xf]  }
   0x4   :  { %4 = vst.msk [vmem:[#allocation0] ss:$8 sm:$0xf] %vm3_vm0, %v2_v3  }
   0xa   :  { %13 = vrot.lane.b32.xlu0 %v48_v2, %s58_s14 }
  0x74   :  { %v8_v4 = vpop.permute.xlu0 %7   ;;  %v20_v5 = vpop.permute.xlu1 %19  }
  0x75   :  { %10 = vst.msk [vmem:[#allocation0] ss:$8 sm:$0xf] %vm9_vm1, %v8_v4  }
  0x7c   :  { %v14_v6 = vpop.permute.xlu0 %13  }
  0x7d   :  { %16 = vst.msk [vmem:[#allocation0] ss:$8 sm:$0xf] %vm15_vm2, %v14_v6  }
  0x7e   :  { %22 = vst.msk [vmem:[#allocation0] ss:$8 sm:$0xf] %vm21_vm3, %v20_v5  }
  0x85   :  { %v25_v7 = vld [vmem:[#allocation0] sm:$0x1]  ;;  %v30_v8 = vld [vmem:[#allocation0 + $0x8] sm:$0x1]  ;;  %v36_v9 = vld [vmem:[#allocation0 + $0x10] sm:$0x1] }
  0x86   :  { %28 = vst [vmem:[%s94_s1] sm:$0x1] %v25_v7  ;;  %v42_v10 = vld [vmem:[#allocation0 + $0x18] sm:$0x1] }
  0x87   :  { %50 = vst [vmem:[%s94_s1 + $0x1] sm:$0x1] %v30_v8 }
  0x88   :  { %51 = vst [vmem:[%s94_s1 + $0x2] sm:$0x1] %v36_v9 }
  0x89   :  { %52 = vst [vmem:[%s94_s1 + $0x3] sm:$0x1] %v42_v10 }

// kernel: cnn_feature_extractor.1
= control target key start
LH: loop header
LB: loop body
LE: loop exit
PB: predicated region body
PF: predicated region fallthrough
CT: control target
= control target key end

     0   :  { %vm91_vm0 = vcmask 1046528   ;;  %vm148_vm1 = vcmask 1045504   ;;  %s8620_s23 = smov 34   ;;  %s8621_s30 = smov 68   ;;  %vm614_vm2 = vcmask 1042432   ;;  %vm12655_vm3 = vcmask 277504   ;;  %s12646_s0 = inlined_call_operand.vmem [shape: f32[8,26,34], index: 0, kind: input, shape index: {}]   ;;  %s12647_s1 = inlined_call_operand.vmem [shape: bf16[102,512], index: 1, kind: input, shape index: {}]   ;;  %s12648_s2 = inlined_call_operand.vmem [shape: f32[1,512], index: 2, kind: input, shape index: {}]   ;;  %s12649_s3 = inlined_call_operand.vmem [shape: bf16[768,512], index: 3, kind: input, shape index: {}]   ;;  %s12650_s4 = inlined_call_operand.vmem [shape: f32[1,512], index: 4, kind: input, shape index: {}]   ;;  %s12651_s5 = inlined_call_operand.vmem [shape: bf16[1536,128], index: 5, kind: input, shape index: {}]   ;;  %s12652_s6 = inlined_call_operand.vmem [shape: f32[1,128], index: 6, kind: input, shape index: {}]   ;;  %s12653_s7 = inlined_call_operand.vmem [shape: f32[8,128], index: 7, kind: output, shape index: {}]  }
   0x1   :  { %v8666_v0 = vld [vmem:[%s12646_s0] sm:$0xff]  ;;  %v8671_v1 = vld [vmem:[%s12646_s0 + $0x8] sm:$0xff]  ;;  %v8676_v2 = vld [vmem:[%s12646_s0 + $0x10] sm:$0xff]  ;;  %vm12654_vm4 = vcmask 556032   ;;  %vm12657_vm5 = vcmask 834560   ;;  %vm1119_vm6 = vcmask 1041408  }
   0x2   :  { %v92_v3 = vrot.slane %v8666_v0, 1  ;;  %v93_v4 = vrot.slane %v8671_v1, 1  ;;  %v95_v5 = vrot.slane %v8676_v2, 1  ;;  %v149_v6 = vrot.slane %v8666_v0, 2  ;;  %v30_v7 = vld [vmem:[%s12646_s0 + $0x18] sm:$0x3] }
   0x3   :  { %v150_v8 = vrot.slane %v8671_v1, 2  ;;  %v152_v9 = vrot.slane %v8676_v2, 2  ;;  %v8690_v10 = vld [vmem:[%s12646_s0 + $0x20] sm:$0xff]  ;;  %v8695_v11 = vld [vmem:[%s12646_s0 + $0x28] sm:$0xff]  ;;  %v97_v12 = vrot.slane %v30_v7, 1  ;;  %v8704_v17 = vld [vmem:[%s12646_s0 + $0x30] sm:$0xff] }
   0x4   :  { %v94_v13 = vsel %vm91_vm0, %v92_v3, %v93_v4  ;;  %v96_v14 = vsel %vm91_vm0, %v93_v4, %v95_v5  ;;  %v99_v15 = vrot.slane %v8690_v10, 1  ;;  %v100_v16 = vrot.slane %v8695_v11, 1  ;;  %v34_v18 = vld [vmem:[%s12646_s0 + $0x38] sm:$0x3]  ;;  %v8713_v22 = vld [vmem:[%s12646_s0 + $0x40] sm:$0xff]  ;;  %v8718_v23 = vld [vmem:[%s12646_s0 + $0x48] sm:$0xff] }
   0x5   :  { %v8497_v19 = vpack.i.bf16 %v96_v14, %v94_v13  ;;  %v98_v20 = vsel %vm91_vm0, %v95_v5, %v97_v12  ;;  %v154_v21 = vrot.slane %v30_v7, 2  ;;  %v8723_v24 = vld [vmem:[%s12646_s0 + $0x50] sm:$0xff]  ;;  %v151_v25 = vsel %vm148_vm1, %v149_v6, %v150_v8  ;;  %v435_v52 = vld [vmem:[%s12647_s1 + $0xc0] sm:$0x77]  ;;  %v436_v53 = vld [vmem:[%s12647_s1 + $0xc8] sm:$0x77] }
   0x6   :  { %v153_v26 = vsel %vm148_vm1, %v150_v8, %v152_v9  ;;  %v101_v27 = vsel %vm91_vm0, %v99_v15, %v100_v16  ;;  %v156_v28 = vrot.slane %v8690_v10, 2  ;;  %v157_v30 = vrot.slane %v8695_v11, 2  ;;  %v38_v54 = vld [vmem:[%s12646_s0 + $0x58] sm:$0x3]  ;;  %v8768_v58 = vld [vmem:[%s12646_s0 + $0x60] sm:$0xff]  ;;  %v8773_v59 = vld [vmem:[%s12646_s0 + $0x68] sm:$0xff] }
   0x7   :  { %8498 = vrot.lane.b32.xlu0 %v8497_v19, %s8620_s23  ;;  %v8507_v29 = vpack.i.bf16 %v101_v27, %v98_v20  ;;  %v102_v31 = vrot.slane %v8704_v17, 1  ;;  %v104_v32 = vrot.slane %v34_v18, 1  ;;  %v106_v33 = vrot.slane %v8713_v22, 1  ;;  %v8778_v61 = vld [vmem:[%s12646_s0 + $0x78] sm:$0x3]  ;;  %v8784_v5 = vld [vmem:[%s12646_s0 + $0x70] sm:$0xff] }
   0x8   :  { %v107_v34 = vrot.slane %v8718_v23, 1  ;;  %v109_v35 = vrot.slane %v8723_v24, 1  ;;  %v161_v38 = vrot.slane %v34_v18, 2  ;;  %v8502_v39 = vpack.i.bf16 %v153_v26, %v151_v25  ;;  %v8202_v18 = vld [vmem:[%s12647_s1 + $0xa4] sm:$0xf] }
   0x9   :  { %8508 = vrot.lane.b32.xlu1 %v8507_v29, %s8620_s23  ;;  %v103_v36 = vsel %vm91_vm0, %v100_v16, %v102_v31  ;;  %v105_v37 = vsel %vm91_vm0, %v102_v31, %v104_v32  ;;  %v155_v40 = vsel %vm148_vm1, %v152_v9, %v154_v21  ;;  %v158_v41 = vsel %vm148_vm1, %v156_v28, %v157_v30  ;;  %v6808_v9 = vld [vmem:[%s12647_s1 + $0xa0] sm:$0xf]  ;;  %v8204_v16 = vld [vmem:[%s12647_s1 + $0xac] sm:$0xf0]  ;;  %v6810_v26 = vld [vmem:[%s12647_s1 + $0xb0] sm:$0xf0] }
   0xa   :  { %v8517_v42 = vpack.i.bf16 %v105_v37, %v103_v36  ;;  %v163_v43 = vrot.slane %v8713_v22, 2  ;;  %v164_v44 = vrot.slane %v8718_v23, 2  ;;  %v166_v45 = vrot.slane %v8723_v24, 2  ;;  %v6816_v27 = vld [vmem:[%s12647_s1 + $0xa8] sm:$0xf] }
   0xb   :  { %v159_v46 = vrot.slane %v8704_v17, 2  ;;  %v108_v47 = vsel %vm91_vm0, %v106_v33, %v107_v34  ;;  %v110_v48 = vsel %vm91_vm0, %v107_v34, %v109_v35  ;;  %v8512_v49 = vpack.i.bf16 %v158_v41, %v155_v40  ;;  %v8205_v32 = vld [vmem:[%s12647_s1 + $0xb4] sm:$0xf0]  ;;  %v6792_v41 = vld [vmem:[%s12647_s1 + $0x80] sm:$0xf] }
   0xc   :  { %8518 = vrot.lane.b32.xlu2 %v8517_v42, %s8620_s23  ;;  %v8527_v55 = vpack.i.bf16 %v110_v48, %v108_v47  ;;  %v8760_v56 = vsel %vm148_vm1, %v163_v43, %v164_v44  ;;  %v167_v57 = vsel %vm148_vm1, %v164_v44, %v166_v45  ;;  %v521_v62 = vunpack.c.l.b16 %v435_v52  ;;  %v8200_v42 = vld [vmem:[%s12647_s1 + $0x8c] sm:$0xf0]  ;;  %v8198_v43 = vld [vmem:[%s12647_s1 + $0x84] sm:$0xf]  ;;  %v6794_v47 = vld [vmem:[%s12647_s1 + $0x90] sm:$0xf0] }
   0xd   :  { %v160_v50 = vsel %vm148_vm1, %v157_v30, %v159_v46  ;;  %v162_v51 = vsel %vm148_vm1, %v159_v46, %v161_v38  ;;  %v522_v63 = vunpack.c.h.b16 %v435_v52  ;;  %v523_v3 = vunpack.c.l.b16 %v436_v53  ;;  %v8203_v38 = vld [vmem:[%s12647_s1 + $0xac] sm:$0xf]  ;;  %v6800_v48 = vld [vmem:[%s12647_s1 + $0x88] sm:$0xf] }
   0xe   :  { %v8522_v60 = vpack.i.bf16 %v162_v51, %v160_v50  ;;  %v168_v4 = vrot.slane %v38_v54, 2  ;;  %v111_v6 = vrot.slane %v38_v54, 1  ;;  %v113_v7 = vrot.slane %v8768_v58, 1 }
   0xf   :  { %8503 = vrot.lane.b32.xlu0 %v8502_v39, %s8621_s30  ;;  %v524_v8 = vunpack.c.h.b16 %v436_v53  ;;  %v170_v12 = vrot.slane %v8768_v58, 2  ;;  %v171_v13 = vrot.slane %v8773_v59, 2  ;;  %v549_v14 = vpack.c.b16 %v521_v62, %v521_v62  ;;  %v6818_v39 = vld [vmem:[%s12647_s1 + $0xb8] sm:$0xf0]  ;;  %v8857_v53 = vld [vmem:[%s12646_s0 + $0x88] sm:$0xff] }
  0x10   :  { %v550_v15 = vpack.c.b16 %v522_v63, %v522_v63  ;;  %v8532_v19 = vpack.i.bf16 %v167_v57, %v8760_v56  ;;  %v114_v20 = vrot.slane %v8773_v59, 1  ;;  %v551_v21 = vpack.c.b16 %v523_v3, %v523_v3  ;;  %v6802_v56 = vld [vmem:[%s12647_s1 + $0x98] sm:$0xf0]  ;;  %v6776_v3 = vld [vmem:[%s12647_s1 + $0x60] sm:$0xf] }
  0x11   :  { %8513 = vrot.lane.b32.xlu1 %v8512_v49, %s8621_s30  ;;  %v552_v25 = vpack.c.b16 %v524_v8, %v524_v8  ;;  %v116_v28 = vrot.slane %v8784_v5, 1  ;;  %v118_v29 = vrot.slane %v8778_v61, 1  ;;  %v616_v30 = vsel %vm614_vm2, %v549_v14, 0  ;;  %v8201_v49 = vld [vmem:[%s12647_s1 + $0x94] sm:$0xf0] }
  0x12   :  { %v619_v31 = vsel %vm614_vm2, %v550_v15, 0  ;;  %v112_v33 = vsel %vm91_vm0, %v109_v35, %v111_v6  ;;  %v115_v34 = vsel %vm91_vm0, %v113_v7, %v114_v20  ;;  %628 = vmatpush.bf16.msra.mxu0 %v616_v30  ;;  %v622_v36 = vsel %vm614_vm2, %v551_v21, 0  ;;  %v8827_v35 = vld [vmem:[%s12646_s0 + $0x80] sm:$0xff] }
  0x13   :  { %697 = vmatpush.bf16.msra.mxu1 %v619_v31  ;;  %v625_v37 = vsel %vm614_vm2, %v552_v25, 0  ;;  %766 = vmatpush.bf16.msra.mxu2 %v622_v36  ;;  %v6809_v40 = vor.u32 %v8204_v16, %v6808_v9  ;;  %v6813_v44 = vor.u32 %v8202_v18, %v6810_v26  ;;  %v6817_v46 = vor.u32 %v8205_v32, %v6816_v27  ;;  %v8194_v9 = vld [vmem:[%s12647_s1 + $0x64] sm:$0xf]  ;;  %v6784_v18 = vld [vmem:[%s12647_s1 + $0x68] sm:$0xf] }
  0x14   :  { %8523 = vrot.lane.b32.xlu2 %v8522_v60, %s8621_s30  ;;  %835 = vmatpush.bf16.msra.mxu3 %v625_v37  ;;  %v169_v50 = vsel %vm148_vm1, %v166_v45, %v168_v4  ;;  %v172_v51 = vsel %vm148_vm1, %v170_v12, %v171_v13  ;;  %v8537_v52 = vpack.i.bf16 %v115_v34, %v112_v33  ;;  %v8871_v60 = vld [vmem:[%s12646_s0 + $0x90] sm:$0xff]  ;;  %v173_v63 = vrot.slane %v8784_v5, 2  ;;  %v8195_v25 = vld [vmem:[%s12647_s1 + $0x6c] sm:$0xf]  ;;  %v6786_v26 = vld [vmem:[%s12647_s1 + $0x78] sm:$0xf0] }
  0x15   :  { %v6821_v54 = vor.u32 %v8203_v38, %v6818_v39  ;;  %v117_v45 = vsel %vm91_vm0, %v114_v20, %v116_v28  ;;  %v119_v57 = vsel %vm91_vm0, %v116_v28, %v118_v29  ;;  %v6793_v62 = vor.u32 %v8200_v42, %v6792_v41  ;;  %v8196_v4 = vld [vmem:[%s12647_s1 + $0x6c] sm:$0xf0]  ;;  %v6778_v12 = vld [vmem:[%s12647_s1 + $0x70] sm:$0xf0] }
  0x16   :  { %629 = vmatpush.bf16.msra.mxu0 %v6809_v40  ;;  %v6797_v6 = vor.u32 %v8198_v43, %v6794_v47  ;;  %v6801_v7 = vor.u32 %v8201_v49, %v6800_v48  ;;  %v175_v8 = vrot.slane %v8778_v61, 2  ;;  %v8542_v14 = vpack.i.bf16 %v172_v51, %v169_v50  ;;  %v8197_v61 = vld [vmem:[%s12647_s1 + $0x74] sm:$0xf0]  ;;  %v6760_v43 = vld [vmem:[%s12647_s1 + $0x40] sm:$0xf] }
  0x17   :  { %8528 = vrot.lane.b32.xlu0 %v8527_v55, %s8620_s23  ;;  %v8199_v55 = vld [vmem:[%s12647_s1 + $0x8c] sm:$0xf]  ;;  %698 = vmatpush.bf16.msra.mxu1 %v6813_v44  ;;  %v120_v15 = vrot.slane %v8827_v35, 1  ;;  %v121_v20 = vrot.slane %v8857_v53, 1  ;;  %v123_v21 = vrot.slane %v8871_v60, 1  ;;  %v177_v27 = vrot.slane %v8827_v35, 2 }
  0x18   :  { %767 = vmatpush.bf16.msra.mxu2 %v6817_v46  ;;  %836 = vmatpush.bf16.msra.mxu3 %v6821_v54  ;;  %v6805_v16 = vor.u32 %v8199_v55, %v6802_v56  ;;  %v174_v28 = vsel %vm148_vm1, %v171_v13, %v173_v63  ;;  %v176_v29 = vsel %vm148_vm1, %v173_v63, %v175_v8  ;;  %v178_v31 = vrot.slane %v8857_v53, 2  ;;  %v8192_v44 = vld [vmem:[%s12647_s1 + $0x4c] sm:$0xf0]  ;;  %v8190_v46 = vld [vmem:[%s12647_s1 + $0x44] sm:$0xf] }
  0x19   :  { %8533 = vrot.lane.b32.xlu1 %v8532_v19, %s8621_s30  ;;  %v8547_v19 = vpack.i.bf16 %v119_v57, %v117_v45  ;;  %v6777_v30 = vor.u32 %v8196_v4, %v6776_v3  ;;  %v180_v32 = vrot.slane %v8871_v60, 2  ;;  %v6781_v33 = vor.u32 %v8194_v9, %v6778_v12  ;;  %v6762_v48 = vld [vmem:[%s12647_s1 + $0x50] sm:$0xf0]  ;;  %v6768_v49 = vld [vmem:[%s12647_s1 + $0x48] sm:$0xf]  ;;  %v8951_v57 = vld [vmem:[%s12646_s0 + $0xa0] sm:$0xff] }
  0x1a   :  { %630 = vmatpush.bf16.msra.mxu0 %v6793_v62  ;;  %v6785_v34 = vor.u32 %v8197_v61, %v6784_v18  ;;  %v6789_v36 = vor.u32 %v8195_v25, %v6786_v26  ;;  %v122_v37 = vsel %vm91_vm0, %v120_v15, %v121_v20  ;;  %v124_v13 = vsel %vm91_vm0, %v121_v20, %v123_v21  ;;  %v8193_v50 = vld [vmem:[%s12647_s1 + $0x54] sm:$0xf0]  ;;  %v8191_v54 = vld [vmem:[%s12647_s1 + $0x4c] sm:$0xf]  ;;  %v6770_v55 = vld [vmem:[%s12647_s1 + $0x58] sm:$0xf0] }
  0x1b   :  { %699 = vmatpush.bf16.msra.mxu1 %v6797_v6  ;;  %v8552_v38 = vpack.i.bf16 %v176_v29, %v174_v28  ;;  %v179_v39 = vsel %vm148_vm1, %v177_v27, %v178_v31  ;;  %v181_v40 = vsel %vm148_vm1, %v178_v31, %v180_v32  ;;  %v8557_v41 = vpack.i.bf16 %v124_v13, %v122_v37  ;;  %v46_v56 = vld [vmem:[%s12646_s0 + $0x98] sm:$0x3]  ;;  %v8956_v62 = vld [vmem:[%s12646_s0 + $0xa8] sm:$0xff]  ;;  %v6744_v3 = vld [vmem:[%s12647_s1 + $0x20] sm:$0xf] }
  0x1c   :  { %8538 = vrot.lane.b32.xlu2 %v8537_v52, %s8620_s23  ;;  %768 = vmatpush.bf16.msra.mxu2 %v6801_v7  ;;  %v8562_v42 = vpack.i.bf16 %v181_v40, %v179_v39  ;;  %v6761_v47 = vor.u32 %v8192_v44, %v6760_v43  ;;  %v6765_v51 = vor.u32 %v8190_v46, %v6762_v48  ;;  %v182_v63 = vrot.slane %v46_v56, 2  ;;  %v8188_v7 = vld [vmem:[%s12647_s1 + $0x2c] sm:$0xf0]  ;;  %v8186_v8 = vld [vmem:[%s12647_s1 + $0x24] sm:$0xf] }
  0x1d   :  { %837 = vmatpush.bf16.msra.mxu3 %v6805_v16  ;;  %v6769_v52 = vor.u32 %v8193_v50, %v6768_v49  ;;  %v6773_v45 = vor.u32 %v8191_v54, %v6770_v55  ;;  %v184_v4 = vrot.slane %v8951_v57, 2  ;;  %v185_v6 = vrot.slane %v8956_v62, 2  ;;  %v6752_v15 = vld [vmem:[%s12647_s1 + $0x28] sm:$0xf]  ;;  %v8189_v16 = vld [vmem:[%s12647_s1 + $0x34] sm:$0xf0] }
  0x1e   :  { %631 = vmatpush.bf16.msra.mxu0 %v6777_v30  ;;  %v183_v9 = vsel %vm148_vm1, %v180_v32, %v182_v63  ;;  %v6745_v12 = vor.u32 %v8188_v7, %v6744_v3  ;;  %v8187_v20 = vld [vmem:[%s12647_s1 + $0x2c] sm:$0xf]  ;;  %v6754_v25 = vld [vmem:[%s12647_s1 + $0x38] sm:$0xf0]  ;;  %v6728_v28 = vld [vmem:[%s12647_s1] sm:$0xf] }
  0x1f   :  { %8543 = vrot.lane.b32.xlu0 %v8542_v14, %s8621_s30  ;;  %700 = vmatpush.bf16.msra.mxu1 %v6781_v33  ;;  %v6746_v14 = vld [vmem:[%s12647_s1 + $0x30] sm:$0xf0]  ;;  %v186_v18 = vsel %vm148_vm1, %v184_v4, %v185_v6  ;;  %v6757_v27 = vor.u32 %v8187_v20, %v6754_v25  ;;  %v8184_v29 = vld [vmem:[%s12647_s1 + $0xc] sm:$0xf0]  ;;  %v8182_v30 = vld [vmem:[%s12647_s1 + $0x4] sm:$0xf] }
  0x20   :  { %769 = vmatpush.bf16.msra.mxu2 %v6785_v34  ;;  %v6749_v61 = vor.u32 %v8186_v8, %v6746_v14  ;;  %v8572_v26 = vpack.i.bf16 %v186_v18, %v183_v9  ;;  %v6729_v31 = vor.u32 %v8184_v29, %v6728_v28  ;;  %v6730_v32 = vld [vmem:[%s12647_s1 + $0x10] sm:$0xf0]  ;;  %v6736_v33 = vld [vmem:[%s12647_s1 + $0x8] sm:$0xf]  ;;  %v8185_v34 = vld [vmem:[%s12647_s1 + $0x14] sm:$0xf0] }
  0x21   :  { %8548 = vrot.lane.b32.xlu1 %v8547_v19, %s8620_s23  ;;  %838 = vmatpush.bf16.msra.mxu3 %v6789_v36  ;;  %v6753_v19 = vor.u32 %v8189_v16, %v6752_v15  ;;  %v6733_v36 = vor.u32 %v8182_v30, %v6730_v32  ;;  %v6737_v37 = vor.u32 %v8185_v34, %v6736_v33  ;;  %v8183_v13 = vld [vmem:[%s12647_s1 + $0xc] sm:$0xf]  ;;  %v9016_v40 = vld [vmem:[%s12646_s0 + $0xb0] sm:$0xff]  ;;  %v125_v43 = vrot.slane %v46_v56, 1  ;;  %v9035_v55 = vld [vmem:[%s12646_s0 + $0xc0] sm:$0xff] }
  0x22   :  { %632 = vmatpush.bf16.msra.mxu0 %v6761_v47  ;;  %v127_v44 = vrot.slane %v8951_v57, 1  ;;  %v130_v46 = vrot.slane %v9016_v40, 1  ;;  %v9045_v56 = vld [vmem:[%s12646_s0 + $0xd0] sm:$0xff]  ;;  %v134_v63 = vrot.slane %v9035_v55, 1  ;;  %v191_v7 = vrot.slane %v9035_v55, 2 }
  0x23   :  { %701 = vmatpush.bf16.msra.mxu1 %v6765_v51  ;;  %v126_v48 = vsel %vm91_vm0, %v123_v21, %v125_v43  ;;  %v9040_v21 = vld [vmem:[%s12646_s0 + $0xc8] sm:$0xff]  ;;  %v137_v4 = vrot.slane %v9045_v56, 1  ;;  %v187_v8 = vrot.slane %v9016_v40, 2  ;;  %v194_v18 = vrot.slane %v9045_v56, 2 }
  0x24   :  { %8553 = vrot.lane.b32.xlu2 %v8552_v38, %s8621_s30  ;;  %770 = vmatpush.bf16.msra.mxu2 %v6769_v52  ;;  %v6738_v38 = vld [vmem:[%s12647_s1 + $0x18] sm:$0xf0]  ;;  %v135_v3 = vrot.slane %v9040_v21, 1  ;;  %vm1121_vm7 = vcmask 1043458   ;;  %vm1124_vm8 = vcmask 1045508   ;;  %vm2058_vm9 = vcmask 1042434  }
  0x25   :  { %839 = vmatpush.bf16.msra.mxu3 %v6773_v45  ;;  %v6741_v39 = vor.u32 %v8183_v13, %v6738_v38  ;;  %v9088_v38 = vld [vmem:[%s12646_s0 + $0xe8] sm:$0xff]  ;;  %vm2060_vm10 = vcmask 1043459   ;;  %vm12688_vm11 = vcmask 1044484   ;;  %vm12660_vm12 = vcmask 1045509  }
  0x26   :  { %633 = vmatpush.bf16.msra.mxu0 %v6745_v12  ;;  %v136_v9 = vsel %vm91_vm0, %v134_v63, %v135_v3  ;;  %v192_v12 = vrot.slane %v9040_v21, 2  ;;  %v138_v15 = vsel %vm91_vm0, %v135_v3, %v137_v4  ;;  %vm2066_vm13 = vcmask 1046534  }
  0x27   :  { %8558 = vrot.lane.b32.xlu0 %v8557_v41, %s8620_s23  ;;  %702 = vmatpush.bf16.msra.mxu1 %v6749_v61  ;;  %v50_v41 = vld [vmem:[%s12646_s0 + $0xb8] sm:$0x3]  ;;  %v8587_v61 = vpack.i.bf16 %v138_v15, %v136_v9  ;;  %vm12658_vm14 = vcmask 1047559   ;;  %vm12656_vm15 = vcmask 1040384  }
  0x28   :  { %771 = vmatpush.bf16.msra.mxu2 %v6753_v19  ;;  %v132_v47 = vrot.slane %v50_v41, 1  ;;  %v189_v14 = vrot.slane %v50_v41, 2  ;;  %v193_v16 = vsel %vm148_vm1, %v191_v7, %v192_v12  ;;  %v188_v19 = vsel %vm148_vm1, %v185_v6, %v187_v8 }
  0x29   :  { %8563 = vrot.lane.b32.xlu1 %v8562_v42, %s8621_s30  ;;  %840 = vmatpush.bf16.msra.mxu3 %v6757_v27  ;;  %v128_v42 = vrot.slane %v8956_v62, 1 }
  0x2a   :  { %634 = vmatpush.bf16.msra.mxu0 %v6729_v31  ;;  %v133_v51 = vsel %vm91_vm0, %v130_v46, %v132_v47  ;;  %v190_v27 = vsel %vm148_vm1, %v187_v8, %v189_v14  ;;  %v142_v8 = vrot.slane %v9088_v38, 1 }
  0x2b   :  { %703 = vmatpush.bf16.msra.mxu1 %v6733_v36  ;;  %v129_v49 = vsel %vm91_vm0, %v127_v44, %v128_v42  ;;  %v131_v50 = vsel %vm91_vm0, %v128_v42, %v130_v46  ;;  %v8582_v29 = vpack.i.bf16 %v190_v27, %v188_v19  ;;  %v199_v42 = vrot.slane %v9088_v38, 2 }
  0x2c   :  { %772 = vmatpush.bf16.msra.mxu2 %v6737_v37  ;;  %v8577_v52 = vpack.i.bf16 %v133_v51, %v131_v50  ;;  %v8567_v54 = vpack.i.bf16 %v129_v49, %v126_v48 }
  0x2d   :  { %841 = vmatpush.bf16.msra.mxu3 %v6741_v39 }
  0x2e   :  { %8568 = vrot.lane.b32.xlu2 %v8567_v54, %s8620_s23 }
  0x2f   :  { %8573 = vrot.lane.b32.xlu0 %v8572_v26, %s8621_s30  ;;  %v195_v26 = vsel %vm148_vm1, %v192_v12, %v194_v18 }
  0x30   :  { %v8592_v28 = vpack.i.bf16 %v195_v26, %v193_v16 }
  0x31   :  { %8578 = vrot.lane.b32.xlu1 %v8577_v52, %s8620_s23 }
  0x36   :  { %8583 = vrot.lane.b32.xlu2 %v8582_v29, %s8621_s30 }
  0x37   :  { %8588 = vrot.lane.b32.xlu0 %v8587_v61, %s8620_s23 }
  0x39   :  { %8593 = vrot.lane.b32.xlu1 %v8592_v28, %s8621_s30 }
  0x79   :  { %v8499_v45 = vpop.permute.xlu0 %8498 }
  0x7a   :  { %v8501_v20 = vunpack.i.h.bf16 %v8499_v45  ;;  %v8500_v25 = vunpack.i.l.bf16 %v8499_v45  ;;  %v8519_v45 = vpop.permute.xlu2 %8518 }
  0x7b   :  { %v8509_v31 = vpop.permute.xlu1 %8508  ;;  %v8521_v61 = vunpack.i.h.bf16 %v8519_v45  ;;  %v8520_v19 = vunpack.i.l.bf16 %v8519_v45 }
  0x7c   :  { %v351_v6 = vsel %vm12655_vm3, %v8671_v1, %v8501_v20  ;;  %v350_v34 = vsel %vm12655_vm3, %v8666_v0, %v8500_v25  ;;  %v54_v1 = vld [vmem:[%s12646_s0 + $0xd8] sm:$0x3]  ;;  %v9083_v0 = vld [vmem:[%s12646_s0 + $0xe0] sm:$0xff]  ;;  %v8511_v43 = vunpack.i.h.bf16 %v8509_v31  ;;  %v8510_v44 = vunpack.i.l.bf16 %v8509_v31 }
  0x7d   :  { %v196_v39 = vrot.slane %v54_v1, 2  ;;  %v198_v41 = vrot.slane %v9083_v0, 2  ;;  %v139_v9 = vrot.slane %v54_v1, 1  ;;  %v141_v12 = vrot.slane %v9083_v0, 1 }
  0x7e   :  { %v353_v52 = vsel %vm12655_vm3, %v8690_v10, %v8511_v43  ;;  %v352_v54 = vsel %vm12655_vm3, %v8676_v2, %v8510_v44  ;;  %v9108_v10 = vld [vmem:[%s12646_s0 + $0xf0] sm:$0xff]  ;;  %v58_v2 = vld [vmem:[%s12646_s0 + $0xf8] sm:$0x3]  ;;  %v354_v31 = vsel %vm12655_vm3, %v8695_v11, %v8520_v19 }
  0x7f   :  { %v197_v47 = vsel %vm148_vm1, %v194_v18, %v196_v39  ;;  %v200_v48 = vsel %vm148_vm1, %v198_v41, %v199_v42  ;;  %v144_v14 = vrot.slane %v9108_v10, 1  ;;  %v146_v15 = vrot.slane %v58_v2, 1 }
  0x80   :  { %v8602_v49 = vpack.i.bf16 %v200_v48, %v197_v47  ;;  %v140_v16 = vsel %vm91_vm0, %v137_v4, %v139_v9  ;;  %v143_v18 = vsel %vm91_vm0, %v141_v12, %v142_v8  ;;  %v355_v4 = vsel %vm12655_vm3, %v8704_v17, %v8521_v61 }
  0x81   :  { %v8504_v30 = vpop.permute.xlu0 %8503  ;;  %v145_v25 = vsel %vm91_vm0, %v142_v8, %v144_v14  ;;  %v147_v26 = vsel %vm91_vm0, %v144_v14, %v146_v15  ;;  %v8597_v28 = vpack.i.bf16 %v143_v18, %v140_v16  ;;  %v203_v17 = vrot.slane %v58_v2, 2 }
  0x82   :  { %v8506_v32 = vunpack.i.h.bf16 %v8504_v30  ;;  %v8505_v33 = vunpack.i.l.bf16 %v8504_v30  ;;  %8603 = vrot.lane.b32.xlu0 %v8602_v49, %s8621_s30  ;;  %v8524_v20 = vpop.permute.xlu2 %8523  ;;  %v8607_v27 = vpack.i.bf16 %v147_v26, %v145_v25  ;;  %vm2339_vm0 = vcmask 1043456  }
  0x83   :  { %v8514_v46 = vpop.permute.xlu1 %8513  ;;  %v8526_v29 = vunpack.i.h.bf16 %v8524_v20  ;;  %v8525_v30 = vunpack.i.l.bf16 %v8524_v20  ;;  %8598 = vrot.lane.b32.xlu2 %v8597_v28, %s8620_s23 }
  0x84   :  { %v375_v36 = vsel %vm12654_vm4, %v350_v34, %v8505_v33  ;;  %v376_v37 = vsel %vm12654_vm4, %v351_v6, %v8506_v32  ;;  %v8516_v50 = vunpack.i.h.bf16 %v8514_v46  ;;  %v8515_v51 = vunpack.i.l.bf16 %v8514_v46  ;;  %8608 = vrot.lane.b32.xlu1 %v8607_v27, %s8620_s23 }
  0x85   :  { %v399_v13 = vpack.c.bf16 %v376_v37, %v375_v36  ;;  %v379_v32 = vsel %vm12654_vm4, %v354_v31, %v8525_v30  ;;  %v380_v33 = vsel %vm12654_vm4, %v355_v4, %v8526_v29  ;;  %v201_v36 = vrot.slane %v9108_v10, 2 }
  0x86   :  { %v377_v63 = vsel %vm12654_vm4, %v352_v54, %v8515_v51  ;;  %v378_v3 = vsel %vm12654_vm4, %v353_v52, %v8516_v50  ;;  %v401_v6 = vpack.c.bf16 %v380_v33, %v379_v32 }
  0x87   :  { %6822 = vmatmul.msk.bf16.vlgmr.msra.gmra.mxu0 %vm12657_vm5, %v399_v13  ;;  %6834 = vmatmul.msk.bf16.vlgmr.msra.gmra.mxu1 %vm12657_vm5, %v399_v13  ;;  %v400_v7 = vpack.c.bf16 %v378_v3, %v377_v63  ;;  %v202_v1 = vsel %vm148_vm1, %v199_v42, %v201_v36  ;;  %v204_v39 = vsel %vm148_vm1, %v201_v36, %v203_v17 }
  0x88   :  { %6846 = vmatmul.msk.bf16.vlgmr.msra.gmra.mxu2 %vm12657_vm5, %v399_v13  ;;  %6858 = vmatmul.msk.bf16.vlgmr.msra.gmra.mxu3 %vm12657_vm5, %v399_v13  ;;  %v8612_v41 = vpack.i.bf16 %v204_v39, %v202_v1 }
  0x89   :  { %v8529_v34 = vpop.permute.xlu0 %8528 }
  0x8a   :  { %v8531_v37 = vunpack.i.h.bf16 %v8529_v34  ;;  %v8530_v13 = vunpack.i.l.bf16 %v8529_v34  ;;  %v8539_v51 = vpop.permute.xlu2 %8538 }
  0x8b   :  { %v8534_v11 = vpop.permute.xlu1 %8533  ;;  %8613 = vrot.lane.b32.xlu2 %v8612_v41, %s8621_s30  ;;  %v8540_v42 = vunpack.i.l.bf16 %v8539_v51 }
  0x8c   :  { %v8536_v43 = vunpack.i.h.bf16 %v8534_v11  ;;  %v8535_v44 = vunpack.i.l.bf16 %v8534_v11  ;;  %v357_v46 = vsel %vm12655_vm3, %v8718_v23, %v8531_v37  ;;  %v356_v47 = vsel %vm12655_vm3, %v8713_v22, %v8530_v13 }
  0x8d   :  { %v8541_v23 = vunpack.i.h.bf16 %v8539_v51  ;;  %v358_v63 = vsel %vm12655_vm3, %v8723_v24, %v8540_v42  ;;  %v437_v51 = vld [vmem:[%s12648_s2] sm:$0xf] }
  0x8e   :  { %v381_v48 = vsel %vm12654_vm4, %v356_v47, %v8535_v44  ;;  %v382_v49 = vsel %vm12654_vm4, %v357_v46, %v8536_v43 }
  0x8f   :  { %v402_v50 = vpack.c.bf16 %v382_v49, %v381_v48  ;;  %v359_v45 = vsel %vm12655_vm3, %v8768_v58, %v8541_v23 }
  0x91   :  { %v8544_v52 = vpop.permute.xlu0 %8543 }
  0x92   :  { %v8546_v22 = vunpack.i.h.bf16 %v8544_v52  ;;  %v8545_v54 = vunpack.i.l.bf16 %v8544_v52  ;;  %v8554_v58 = vpop.permute.xlu2 %8553  ;;  %v9197_v52 = vperm.slane %v437_v51, 1 }
  0x93   :  { %v8549_v8 = vpop.permute.xlu1 %8548  ;;  %v8556_v14 = vunpack.i.h.bf16 %v8554_v58  ;;  %v8555_v15 = vunpack.i.l.bf16 %v8554_v58 }
  0x94   :  { %v384_v3 = vsel %vm12654_vm4, %v359_v45, %v8546_v22  ;;  %v8551_v9 = vunpack.i.h.bf16 %v8549_v8  ;;  %v8550_v12 = vunpack.i.l.bf16 %v8549_v8  ;;  %v9207_v45 = vperm.slane %v437_v51, 3 }
  0x96   :  { %v361_v24 = vsel %vm12655_vm3, %v8784_v5, %v8551_v9  ;;  %v360_v16 = vsel %vm12655_vm3, %v8773_v59, %v8550_v12 }
  0x97   :  { %6823 = vmatmul.msk.bf16.gmra.mxu0 %vm12657_vm5, %v400_v7  ;;  %6835 = vmatmul.msk.bf16.gmra.mxu1 %vm12657_vm5, %v400_v7  ;;  %v385_v18 = vsel %vm12654_vm4, %v360_v16, %v8555_v15  ;;  %v386_v61 = vsel %vm12654_vm4, %v361_v24, %v8556_v14 }
  0x98   :  { %6847 = vmatmul.msk.bf16.gmra.mxu2 %vm12657_vm5, %v400_v7  ;;  %6859 = vmatmul.msk.bf16.gmra.mxu3 %vm12657_vm5, %v400_v7  ;;  %v383_v7 = vsel %vm12654_vm4, %v358_v63, %v8545_v54  ;;  %v404_v19 = vpack.c.bf16 %v386_v61, %v385_v18  ;;  %v9199_v54 = vperm.slane %v437_v51, 0 }
  0x99   :  { %v403_v2 = vpack.c.bf16 %v384_v3, %v383_v7  ;;  %v8559_v20 = vpop.permute.xlu0 %8558 }
  0x9a   :  { %v8561_v25 = vunpack.i.h.bf16 %v8559_v20  ;;  %v8560_v26 = vunpack.i.l.bf16 %v8559_v20  ;;  %v8569_v32 = vpop.permute.xlu2 %8568 }
  0x9b   :  { %v8564_v5 = vpop.permute.xlu1 %8563  ;;  %v8571_v33 = vunpack.i.h.bf16 %v8569_v32 }
  0x9c   :  { %v8566_v27 = vunpack.i.h.bf16 %v8564_v5  ;;  %v8565_v28 = vunpack.i.l.bf16 %v8564_v5  ;;  %v363_v59 = vsel %vm12655_vm3, %v8857_v53, %v8561_v25  ;;  %v362_v29 = vsel %vm12655_vm3, %v8827_v35, %v8560_v26 }
  0x9d   :  { %v365_v35 = vsel %vm12655_vm3, %v8951_v57, %v8571_v33 }
  0x9e   :  { %v387_v30 = vsel %vm12654_vm4, %v362_v29, %v8565_v28  ;;  %v388_v4 = vsel %vm12654_vm4, %v363_v59, %v8566_v27 }
  0x9f   :  { %v405_v31 = vpack.c.bf16 %v388_v4, %v387_v30 }
  0xa1   :  { %v8574_v53 = vpop.permute.xlu0 %8573 }
  0xa2   :  { %v8576_v34 = vunpack.i.h.bf16 %v8574_v53  ;;  %v8575_v36 = vunpack.i.l.bf16 %v8574_v53  ;;  %v8584_v57 = vpop.permute.xlu2 %8583 }
  0xa3   :  { %v8579_v1 = vpop.permute.xlu1 %8578  ;;  %v8586_v43 = vunpack.i.h.bf16 %v8584_v57  ;;  %v8585_v44 = vunpack.i.l.bf16 %v8584_v57 }
  0xa4   :  { %v390_v37 = vsel %vm12654_vm4, %v365_v35, %v8576_v34  ;;  %v8581_v39 = vunpack.i.h.bf16 %v8579_v1  ;;  %v8580_v41 = vunpack.i.l.bf16 %v8579_v1 }
  0xa6   :  { %v366_v46 = vsel %vm12655_vm3, %v8956_v62, %v8580_v41 }
  0xa7   :  { %6824 = vmatmul.msk.bf16.gmra.mxu0 %vm12657_vm5, %v401_v6  ;;  %6836 = vmatmul.msk.bf16.gmra.mxu1 %vm12657_vm5, %v401_v6  ;;  %v391_v47 = vsel %vm12654_vm4, %v366_v46, %v8585_v44 }
  0xa8   :  { %6848 = vmatmul.msk.bf16.gmra.mxu2 %vm12657_vm5, %v401_v6  ;;  %6860 = vmatmul.msk.bf16.gmra.mxu3 %vm12657_vm5, %v401_v6  ;;  %v8570_v6 = vunpack.i.l.bf16 %v8569_v32 }
  0xa9   :  { %v8589_v49 = vpop.permute.xlu0 %8588 }
  0xaa   :  { %v364_v17 = vsel %vm12655_vm3, %v8871_v60, %v8570_v6  ;;  %v367_v60 = vsel %vm12655_vm3, %v9016_v40, %v8581_v39  ;;  %v8591_v22 = vunpack.i.h.bf16 %v8589_v49  ;;  %v8590_v62 = vunpack.i.l.bf16 %v8589_v49 }
  0xab   :  { %v389_v13 = vsel %vm12654_vm4, %v364_v17, %v8575_v36  ;;  %v392_v48 = vsel %vm12654_vm4, %v367_v60, %v8586_v43  ;;  %v9205_v40 = vperm.slane %v437_v51, 2  ;;  %v8594_v63 = vpop.permute.xlu1 %8593 }
  0xac   :  { %v406_v11 = vpack.c.bf16 %v390_v37, %v389_v13  ;;  %v368_v24 = vsel %vm12655_vm3, %v9035_v55, %v8590_v62  ;;  %v8596_v16 = vunpack.i.h.bf16 %v8594_v63  ;;  %v8595_v18 = vunpack.i.l.bf16 %v8594_v63 }
  0xae   :  { %v393_v55 = vsel %vm12654_vm4, %v368_v24, %v8595_v18 }
  0xb7   :  { %6825 = vmatmul.msk.bf16.gmra.mxu0 %vm12657_vm5, %v402_v50  ;;  %6837 = vmatmul.msk.bf16.gmra.mxu1 %vm12657_vm5, %v402_v50 }
  0xb8   :  { %6849 = vmatmul.msk.bf16.gmra.mxu2 %vm12657_vm5, %v402_v50  ;;  %6861 = vmatmul.msk.bf16.gmra.mxu3 %vm12657_vm5, %v402_v50  ;;  %v407_v50 = vpack.c.bf16 %v392_v48, %v391_v47 }
  0xc7   :  { %6826 = vmatmul.msk.bf16.gmra.mxu0 %vm12657_vm5, %v403_v2  ;;  %6838 = vmatmul.msk.bf16.gmra.mxu1 %vm12657_vm5, %v403_v2 }
  0xc8   :  { %6850 = vmatmul.msk.bf16.gmra.mxu2 %vm12657_vm5, %v403_v2  ;;  %6862 = vmatmul.msk.bf16.gmra.mxu3 %vm12657_vm5, %v403_v2  ;;  %v369_v2 = vsel %vm12655_vm3, %v9040_v21, %v8591_v22 }
  0xc9   :  { %v394_v30 = vsel %vm12654_vm4, %v369_v2, %v8596_v16 }
  0xd7   :  { %6827 = vmatmul.msk.bf16.gmra.mxu0 %vm12657_vm5, %v404_v19  ;;  %6839 = vmatmul.msk.bf16.gmra.mxu1 %vm12657_vm5, %v404_v19 }
  0xd8   :  { %6851 = vmatmul.msk.bf16.gmra.mxu2 %vm12657_vm5, %v404_v19  ;;  %6863 = vmatmul.msk.bf16.gmra.mxu3 %vm12657_vm5, %v404_v19 }
  0xdd   :  { %v8599_v3 = vpop.permute.xlu2 %8598 }
  0xde   :  { %v8601_v8 = vunpack.i.h.bf16 %v8599_v3  ;;  %v8600_v9 = vunpack.i.l.bf16 %v8599_v3 }
  0xe0   :  { %v371_v5 = vsel %vm12655_vm3, %v9083_v0, %v8601_v8  ;;  %v370_v27 = vsel %vm12655_vm3, %v9045_v56, %v8600_v9  ;;  %v408_v56 = vpack.c.bf16 %v394_v30, %v393_v55  ;;  %vm2076_vm3 = vcmask 1041409  }
  0xe7   :  { %6828 = vmatmul.msk.bf16.gmra.mxu0 %vm12657_vm5, %v405_v31  ;;  %6840 = vmatmul.msk.bf16.gmra.mxu1 %vm12657_vm5, %v405_v31 }
  0xe8   :  { %6852 = vmatmul.msk.bf16.gmra.mxu2 %vm12657_vm5, %v405_v31  ;;  %6864 = vmatmul.msk.bf16.gmra.mxu3 %vm12657_vm5, %v405_v31 }
  0xf4   :  { %v8604_v12 = vpop.permute.xlu0 %8603 }
  0xf5   :  { %v8606_v26 = vunpack.i.h.bf16 %v8604_v12  ;;  %v8605_v21 = vunpack.i.l.bf16 %v8604_v12 }
  0xf7   :  { %6829 = vmatmul.msk.bf16.gmra.mxu0 %vm12657_vm5, %v406_v11  ;;  %6841 = vmatmul.msk.bf16.gmra.mxu1 %vm12657_vm5, %v406_v11  ;;  %v396_v32 = vsel %vm12654_vm4, %v371_v5, %v8606_v26  ;;  %v395_v33 = vsel %vm12654_vm4, %v370_v27, %v8605_v21  ;;  %vm2388_vm4 = vcmask 1046532  }
  0xf8   :  { %6853 = vmatmul.msk.bf16.gmra.mxu2 %vm12657_vm5, %v406_v11  ;;  %6865 = vmatmul.msk.bf16.gmra.mxu3 %vm12657_vm5, %v406_v11  ;;  %v9227_v17 = vpack.c.bf16 %v396_v32, %v395_v33 }
 0x104   :  { %v636_v23 = vpop.f32.mrf.mxu0  ;;  %v705_v42 = vpop.f32.mrf.mxu1 }
 0x105   :  { %v706_v7 = vadd.f32 %v705_v42, %v9197_v52  ;;  %v637_v58 = vadd.f32 %v636_v23, %v9199_v54 }
 0x107   :  { %6830 = vmatmul.msk.bf16.gmra.mxu0 %vm12657_vm5, %v407_v50  ;;  %6842 = vmatmul.msk.bf16.gmra.mxu1 %vm12657_vm5, %v407_v50  ;;  %v904_v28 = vmax.f32 %v706_v7, 0.0  ;;  %v903_v4 = vmax.f32 %v637_v58, 0.0 }
 0x108   :  { %6854 = vmatmul.msk.bf16.gmra.mxu2 %vm12657_vm5, %v407_v50  ;;  %6866 = vmatmul.msk.bf16.gmra.mxu3 %vm12657_vm5, %v407_v50 }
 0x10b   :  { %v774_v14 = vpop.f32.mrf.mxu2  ;;  %v843_v15 = vpop.f32.mrf.mxu3 }
 0x10c   :  { %v775_v61 = vadd.f32 %v774_v14, %v9205_v40  ;;  %v844_v19 = vadd.f32 %v843_v15, %v9207_v45  ;;  %v638_v20 = vpop.f32.mrf.mxu0  ;;  %v707_v25 = vpop.f32.mrf.mxu1 }
 0x10d   :  { %v639_v53 = vadd.f32 %v638_v20, %v9199_v54  ;;  %v708_v34 = vadd.f32 %v707_v25, %v9197_v52 }
 0x10e   :  { %v905_v59 = vmax.f32 %v775_v61, 0.0  ;;  %v906_v29 = vmax.f32 %v844_v19, 0.0 }
 0x10f   :  { %v907_v22 = vmax.f32 %v639_v53, 0.0  ;;  %v908_v62 = vmax.f32 %v708_v34, 0.0 }
 0x110   :  { %v1000_v31 = vmax.f32 %v904_v28, %v906_v29  ;;  %v999_v0 = vmax.f32 %v903_v4, %v905_v59 }
 0x112   :  { %v1095_v6 = vrot.slane %v1000_v31, 6 }
 0x113   :  { %v776_v36 = vpop.f32.mrf.mxu2  ;;  %v845_v35 = vpop.f32.mrf.mxu3 }
 0x114   :  { %v1120_v37 = vsel %vm1119_vm6, %v999_v0, %v1095_v6  ;;  %v1122_v13 = vsel %vm1121_vm7, %v999_v0, %v1095_v6  ;;  %v1125_v11 = vsel %vm1124_vm8, %v999_v0, %v1095_v6  ;;  %v1127_v1 = vsel %vm148_vm1, %v1095_v6, %v999_v0  ;;  %v641_v39 = vpop.f32.mrf.mxu0  ;;  %v710_v41 = vpop.f32.mrf.mxu1 }
 0x115   :  { %v1123_v57 = vrot.slane %v1122_v13, 2  ;;  %v1126_v43 = vrot.slane %v1125_v11, 4  ;;  %v1128_v44 = vrot.slane %v1127_v1, 6  ;;  %v6870_v60 = vrot.slane %v1120_v37, 9  ;;  %v7352_v13 = vld [vmem:[%s12649_s3 + $0x2e0] sm:$0xf] }
 0x116   :  { %v777_v46 = vadd.f32 %v776_v36, %v9205_v40  ;;  %v846_v47 = vadd.f32 %v845_v35, %v9207_v45  ;;  %v9236_v48 = vadd.f32 %v641_v39, %v9199_v54  ;;  %v9239_v49 = vadd.f32 %v710_v41, %v9197_v52 }
 0x117   :  { %v6871_v50 = vrot.slane %v1123_v57, 9  ;;  %v6872_v51 = vrot.slane %v1126_v43, 9  ;;  %v6873_v23 = vrot.slane %v1128_v44, 9  ;;  %v1674_v42 = vmax.f32 %v1120_v37, %v6870_v60  ;;  %6831 = vmatmul.msk.bf16.gmra.mxu0 %vm12657_vm5, %v408_v56  ;;  %6843 = vmatmul.msk.bf16.gmra.mxu1 %vm12657_vm5, %v408_v56 }
 0x118   :  { %v909_v63 = vmax.f32 %v777_v46, 0.0  ;;  %v910_v3 = vmax.f32 %v846_v47, 0.0  ;;  %6855 = vmatmul.msk.bf16.gmra.mxu2 %vm12657_vm5, %v408_v56  ;;  %6867 = vmatmul.msk.bf16.gmra.mxu3 %vm12657_vm5, %v408_v56  ;;  %v911_v9 = vmax.f32 %v9236_v48, 0.0  ;;  %v912_v15 = vmax.f32 %v9239_v49, 0.0 }
 0x119   :  { %v1675_v7 = vmax.f32 %v1123_v57, %v6871_v50  ;;  %v1676_v2 = vmax.f32 %v1126_v43, %v6872_v51  ;;  %v1677_v8 = vmax.f32 %v1128_v44, %v6873_v23  ;;  %v1866_v12 = vperm.slane %v1674_v42, 0  ;;  %v8300_v57 = vld [vmem:[%s12649_s3 + $0x2ec] sm:$0xf0] }
 0x11a   :  { %v1867_v58 = vperm.slane %v1674_v42, 2  ;;  %v1002_v14 = vmax.f32 %v908_v62, %v910_v3  ;;  %v1001_v26 = vmax.f32 %v907_v22, %v909_v63  ;;  %v7353_v50 = vor.u32 %v8300_v57, %v7352_v13 }
 0x11b   :  { %v1868_v24 = vperm.slane %v1675_v7, 0  ;;  %v1869_v16 = vperm.slane %v1675_v7, 2  ;;  %v1870_v18 = vperm.slane %v1676_v2, 0  ;;  %v1871_v61 = vperm.slane %v1676_v2, 2  ;;  %v779_v19 = vpop.f32.mrf.mxu2  ;;  %v848_v20 = vpop.f32.mrf.mxu3 }
 0x11c   :  { %v1872_v25 = vperm.slane %v1677_v8, 0  ;;  %v1096_v21 = vrot.slane %v1002_v14, 6  ;;  %v780_v5 = vadd.f32 %v779_v19, %v9205_v40  ;;  %v643_v27 = vpop.f32.mrf.mxu0  ;;  %v849_v29 = vadd.f32 %v848_v20, %v9207_v45  ;;  %v712_v37 = vpop.f32.mrf.mxu1  ;;  %4064 = vmatpush.bf16.msrb.mxu2 %v7353_v50 }
 0x11d   :  { %v2059_v28 = vsel %vm2058_vm9, %v1868_v24, %v1866_v12  ;;  %v2070_v59 = vsel %vm2058_vm9, %v1869_v16, %v1867_v58  ;;  %v9252_v55 = vadd.f32 %v643_v27, %v9199_v54  ;;  %v1873_v33 = vperm.slane %v1677_v8, 2  ;;  %v7096_v16 = vld [vmem:[%s12649_s3 + $0xe0] sm:$0xf] }
 0x11e   :  { %v2061_v30 = vsel %vm2060_vm10, %v1870_v18, %v2059_v28  ;;  %v2071_v4 = vsel %vm2060_vm10, %v1871_v61, %v2070_v59  ;;  %v1129_v31 = vsel %vm1119_vm6, %v1001_v26, %v1096_v21  ;;  %v1130_v32 = vsel %vm1121_vm7, %v1001_v26, %v1096_v21 }
 0x11f   :  { %v2063_v0 = vsel %vm12688_vm11, %v1872_v25, %v2061_v30  ;;  %v1131_v6 = vrot.slane %v1130_v32, 2  ;;  %v1132_v56 = vsel %vm1124_vm8, %v1001_v26, %v1096_v21  ;;  %v1134_v34 = vsel %vm148_vm1, %v1096_v21, %v1001_v26  ;;  %v8236_v25 = vld [vmem:[%s12649_s3 + $0xec] sm:$0xf0]  ;;  %v7480_v26 = vld [vmem:[%s12649_s3 + $0x3e0] sm:$0xf] }
 0x120   :  { %v1133_v53 = vrot.slane %v1132_v56, 4  ;;  %v6874_v36 = vrot.slane %v1129_v31, 9  ;;  %v913_v35 = vmax.f32 %v780_v5, 0.0  ;;  %v2072_v11 = vsel %vm12688_vm11, %v1873_v33, %v2071_v4  ;;  %v8332_v21 = vld [vmem:[%s12649_s3 + $0x3ec] sm:$0xf0] }
 0x121   :  { %v1135_v1 = vrot.slane %v1134_v34, 6  ;;  %v6875_v39 = vrot.slane %v1131_v6, 9  ;;  %v914_v41 = vmax.f32 %v849_v29, 0.0  ;;  %v915_v46 = vmax.f32 %v9252_v55, 0.0 }
 0x122   :  { %v6876_v43 = vrot.slane %v1133_v53, 9  ;;  %v1678_v44 = vmax.f32 %v1129_v31, %v6874_v36  ;;  %v1003_v60 = vmax.f32 %v911_v9, %v913_v35  ;;  %v9270_v22 = vadd.f32 %v712_v37, %v9197_v52 }
 0x123   :  { %v6877_v47 = vrot.slane %v1135_v1, 9  ;;  %v1679_v48 = vmax.f32 %v1131_v6, %v6875_v39  ;;  %v1004_v49 = vmax.f32 %v912_v15, %v914_v41  ;;  %v781_v5 = vpop.f32.mrf.mxu2  ;;  %v850_v30 = vpop.f32.mrf.mxu3  ;;  %v7097_v34 = vor.u32 %v8236_v25, %v7096_v16  ;;  %v8214_v39 = vld [vmem:[%s12649_s3 + $0x44] sm:$0xf] }
 0x124   :  { %v1680_v51 = vmax.f32 %v1133_v53, %v6876_v43  ;;  %v1874_v23 = vperm.slane %v1678_v44, 0  ;;  %v1875_v42 = vperm.slane %v1678_v44, 2  ;;  %v646_v4 = vpop.f32.mrf.mxu0  ;;  %v715_v6 = vpop.f32.mrf.mxu1  ;;  %v7481_v36 = vor.u32 %v8332_v21, %v7480_v26 }
 0x125   :  { %v9272_v62 = vmax.f32 %v1135_v1, %v6877_v47  ;;  %v1876_v63 = vperm.slane %v1679_v48, 0  ;;  %v1877_v3 = vperm.slane %v1679_v48, 2  ;;  %v1097_v7 = vrot.slane %v1004_v49, 6  ;;  %v8268_v1 = vld [vmem:[%s12649_s3 + $0x1ec] sm:$0xf0]  ;;  %3986 = vmatpush.bf16.msrb.mxu0 %v7097_v34 }
 0x126   :  { %v1878_v2 = vperm.slane %v1680_v51, 0  ;;  %v1879_v8 = vperm.slane %v1680_v51, 2  ;;  %v2065_v9 = vsel %vm12660_vm12, %v1874_v23, %v2063_v0  ;;  %v2073_v12 = vsel %vm12660_vm12, %v1875_v42, %v2072_v11  ;;  %4103 = vmatpush.bf16.msrb.mxu3 %v7481_v36 }
 0x127   :  { %v1880_v58 = vperm.slane %v9272_v62, 0  ;;  %v1881_v14 = vperm.slane %v9272_v62, 2  ;;  %v2067_v15 = vsel %vm2066_vm13, %v1876_v63, %v2065_v9  ;;  %v2074_v24 = vsel %vm2066_vm13, %v1877_v3, %v2073_v12  ;;  %6832 = vmatmul.msk.bf16.gmra.mxu0 %vm12657_vm5, %v9227_v17  ;;  %6844 = vmatmul.msk.bf16.gmra.mxu1 %vm12657_vm5, %v9227_v17 }
 0x128   :  { %v2069_v18 = vsel %vm12658_vm14, %v1878_v2, %v2067_v15  ;;  %v2075_v61 = vsel %vm12658_vm14, %v1879_v8, %v2074_v24  ;;  %v1136_v19 = vsel %vm1119_vm6, %v1003_v60, %v1097_v7  ;;  %v1137_v20 = vsel %vm1121_vm7, %v1003_v60, %v1097_v7  ;;  %6856 = vmatmul.msk.bf16.gmra.mxu2 %vm12657_vm5, %v9227_v17  ;;  %vm9324_vm14 = vmor %vm1119_vm6, %vm1124_vm8 }
 0x129   :  { %v2258_v27 = vsel %vm12656_vm15, 0.0, %v2069_v18  ;;  %v2259_v28 = vsel %vm12656_vm15, 0.0, %v2075_v61  ;;  %v1138_v59 = vrot.slane %v1137_v20, 2  ;;  %v1139_v29 = vsel %vm1124_vm8, %v1003_v60, %v1097_v7  ;;  %6868 = vmatmul.msk.bf16.gmra.mxu3 %vm12657_vm5, %v9227_v17  ;;  %v7224_v17 = vld [vmem:[%s12649_s3 + $0x1e0] sm:$0xf]  ;;  %vm9318_vm5 = vmor %vm614_vm2, %vm2388_vm4 }
 0x12a   :  { %v2323_v31 = vrot.slane %v2259_v28, 4  ;;  %v1140_v32 = vrot.slane %v1139_v29, 4  ;;  %v1141_v33 = vsel %vm148_vm1, %v1097_v7, %v1003_v60  ;;  %v6878_v0 = vrot.slane %v1136_v19, 9 }
 0x12b   :  { %v1142_v56 = vrot.slane %v1141_v33, 6  ;;  %v6879_v53 = vrot.slane %v1138_v59, 9  ;;  %vm12659_vm15 = vcmask 1044480   ;;  %v7225_v63 = vor.u32 %v8268_v1, %v7224_v17  ;;  %v784_v20 = vpop.f32.mrf.mxu2 }
 0x12c   :  { %v2340_v35 = vsel %vm2339_vm0, %v2258_v27, %v2323_v31  ;;  %v2341_v37 = vsel %vm2339_vm0, %v2323_v31, %v2258_v27  ;;  %v6880_v13 = vrot.slane %v1140_v32, 9  ;;  %v1682_v11 = vmax.f32 %v1136_v19, %v6878_v0  ;;  %v853_v27 = vpop.f32.mrf.mxu3  ;;  %v648_v28 = vpop.f32.mrf.mxu0 }
 0x12d   :  { %v2342_v41 = vrot.slane %v2341_v37, 4  ;;  %v6966_v57 = vrot.slane %v2340_v35, 9  ;;  %v6974_v43 = vrot.slane %v2340_v35, 10  ;;  %2551 = vst [vmem:[#allocation1] ss:$2 sm:$0xff] %v2340_v35  ;;  %v6881_v44 = vrot.slane %v1142_v56, 9  ;;  %4025 = vmatpush.bf16.msrb.mxu1 %v7225_v63  ;;  %v9363_v35 = vpop.permute.xlu1 %8608 }
 0x12e   :  { %v1683_v47 = vmax.f32 %v1138_v59, %v6879_v53  ;;  %v1684_v48 = vmax.f32 %v1140_v32, %v6880_v13  ;;  %v1882_v49 = vperm.slane %v1682_v11, 0  ;;  %v1883_v50 = vperm.slane %v1682_v11, 2 }
 0x12f   :  { %v2392_v51 = vrot.slane %v2342_v41, 5  ;;  %v2473_v23 = vrot.slane %v2342_v41, 6  ;;  %2553 = vst [vmem:[#allocation1 + $0x1] ss:$2 sm:$0xff] %v2342_v41  ;;  %v1685_v42 = vmax.f32 %v1142_v56, %v6881_v44  ;;  %v916_v24 = vmax.f32 %v9270_v22, 0.0 }
 0x130   :  { %v1884_v3 = vperm.slane %v1683_v47, 0  ;;  %v1885_v7 = vperm.slane %v1683_v47, 2  ;;  %v1886_v2 = vperm.slane %v1684_v48, 0  ;;  %v1887_v8 = vperm.slane %v1684_v48, 2 }
 0x131   :  { %v9330_v9 = vsel %vm9318_vm5, %v6966_v57, %v2392_v51  ;;  %v2394_v12 = vrot.slane %v2392_v51, 4  ;;  %v9334_v15 = vsel %vm9324_vm14, %v6974_v43, %v2473_v23  ;;  %v1888_v16 = vperm.slane %v1685_v42, 0 }
 0x132   :  { %v1889_v18 = vperm.slane %v1685_v42, 2  ;;  %v2077_v61 = vsel %vm2076_vm3, %v1882_v49, %v1880_v58  ;;  %v2081_v19 = vsel %vm2076_vm3, %v1883_v50, %v1881_v14  ;;  %v782_v21 = vadd.f32 %v781_v5, %v9205_v40  ;;  %v717_v14 = vpop.f32.mrf.mxu1 }
 0x133   :  { %v2078_v25 = vsel %vm2058_vm9, %v1884_v3, %v2077_v61  ;;  %v2082_v26 = vsel %vm2058_vm9, %v1885_v7, %v2081_v19  ;;  %v851_v22 = vadd.f32 %v850_v30, %v9207_v45  ;;  %v647_v58 = vadd.f32 %v646_v4, %v9199_v54 }
 0x134   :  { %v2079_v59 = vsel %vm2060_vm10, %v1886_v2, %v2078_v25  ;;  %v2083_v29 = vsel %vm2060_vm10, %v1887_v8, %v2082_v26  ;;  %v716_v62 = vadd.f32 %v715_v6, %v9197_v52  ;;  %v917_v33 = vmax.f32 %v782_v21, 0.0  ;;  %v7080_v21 = vld [vmem:[%s12649_s3 + $0xc0] sm:$0xf] }
 0x135   :  { %v2080_v31 = vsel %vm12688_vm11, %v1888_v16, %v2079_v59  ;;  %v2084_v32 = vsel %vm12688_vm11, %v1889_v18, %v2083_v29  ;;  %v918_v0 = vmax.f32 %v851_v22, 0.0  ;;  %v2475_v5 = vrot.slane %v2473_v23, 4  ;;  %v8232_v22 = vld [vmem:[%s12649_s3 + $0xcc] sm:$0xf0] }
 0x136   :  { %v785_v30 = vadd.f32 %v784_v20, %v9205_v40  ;;  %v854_v56 = vadd.f32 %v853_v27, %v9207_v45  ;;  %v9356_v53 = vadd.f32 %v648_v28, %v9199_v54  ;;  %v2275_v34 = vsel %vm12659_vm15, %v2080_v31, 0.0 }
 0x137   :  { %v2276_v4 = vsel %vm12659_vm15, %v2084_v32, 0.0  ;;  %v1006_v6 = vmax.f32 %v916_v24, %v918_v0  ;;  %v9361_v36 = vadd.f32 %v717_v14, %v9197_v52  ;;  %v1005_v13 = vmax.f32 %v915_v46, %v917_v33 }
 0x138   :  { %v2324_v37 = vrot.slane %v2276_v4, 4  ;;  %v919_v11 = vmax.f32 %v647_v58, 0.0  ;;  %v921_v17 = vmax.f32 %v785_v30, 0.0  ;;  %v920_v41 = vmax.f32 %v716_v62, 0.0 }
 0x139   :  { %v1098_v1 = vrot.slane %v1006_v6, 6  ;;  %v922_v57 = vmax.f32 %v854_v56, 0.0  ;;  %v923_v43 = vmax.f32 %v9356_v53, 0.0  ;;  %v8611_v49 = vunpack.i.h.bf16 %v9363_v35  ;;  %v8220_v53 = vld [vmem:[%s12649_s3 + $0x6c] sm:$0xf0] }
 0x13a   :  { %v2343_v44 = vsel %vm2339_vm0, %v2275_v34, %v2324_v37  ;;  %v2372_v47 = vsel %vm2339_vm0, %v2324_v37, %v2275_v34  ;;  %v1007_v48 = vmax.f32 %v919_v11, %v921_v17  ;;  %vm12705_vm2 = vcmask 277504  }
 0x13b   :  { %v2373_v50 = vrot.slane %v2372_v47, 4  ;;  %v2395_v51 = vrot.slane %v2343_v44, 5  ;;  %v2476_v23 = vrot.slane %v2343_v44, 6  ;;  %2555 = vst [vmem:[#allocation1 + $0x10] ss:$2 sm:$0xff] %v2343_v44  ;;  %v1143_v55 = vsel %vm1119_vm6, %v1005_v13, %v1098_v1  ;;  %vm12706_vm4 = vmmov %vm12705_vm2 }
 0x13c   :  { %v1144_v46 = vsel %vm1121_vm7, %v1005_v13, %v1098_v1  ;;  %v1146_v42 = vsel %vm1124_vm8, %v1005_v13, %v1098_v1  ;;  %v1148_v63 = vsel %vm148_vm1, %v1098_v1, %v1005_v13  ;;  %v6882_v3 = vrot.slane %v1143_v55, 9 }
 0x13d   :  { %v9377_v7 = vsel %vm9318_vm5, %v2394_v12, %v2395_v51  ;;  %v9379_v2 = vrot.slane %v2395_v51, 4  ;;  %v9381_v8 = vrot.slane %v2373_v50, 5  ;;  %v9385_v24 = vsel %vm9324_vm14, %v2475_v5, %v2476_v23 }
 0x13e   :  { %v9387_v16 = vrot.slane %v2476_v23, 4  ;;  %v9389_v18 = vrot.slane %v2373_v50, 6  ;;  %v1145_v61 = vrot.slane %v1144_v46, 2  ;;  %v1147_v19 = vrot.slane %v1146_v42, 4  ;;  %v8264_v50 = vld [vmem:[%s12649_s3 + $0x1cc] sm:$0xf0]  ;;  %v8614_v42 = vpop.permute.xlu2 %8613 }
 0x13f   :  { %v1149_v20 = vrot.slane %v1148_v63, 6  ;;  %v1686_v25 = vmax.f32 %v1143_v55, %v6882_v3  ;;  %v1008_v26 = vmax.f32 %v920_v41, %v922_v57  ;;  %v9407_v29 = vsel %vm12705_vm2, %v9108_v10, %v8611_v49  ;;  %v7208_v49 = vld [vmem:[%s12649_s3 + $0x1c0] sm:$0xf]  ;;  %v786_v63 = vpop.f32.mrf.mxu2 }
 0x140   :  { %v6883_v28 = vrot.slane %v1145_v61, 9  ;;  %v6884_v59 = vrot.slane %v1147_v19, 9  ;;  %v8610_v0 = vunpack.i.l.bf16 %v9363_v35  ;;  %v7081_v5 = vor.u32 %v8232_v22, %v7080_v21  ;;  %v855_v22 = vpop.f32.mrf.mxu3 }
 0x141   :  { %v6885_v58 = vrot.slane %v1149_v20, 9  ;;  %v1890_v62 = vperm.slane %v1686_v25, 0  ;;  %v1891_v14 = vperm.slane %v1686_v25, 2  ;;  %v1099_v31 = vrot.slane %v1008_v26, 6 }
 0x142   :  { %v1687_v32 = vmax.f32 %v1145_v61, %v6883_v28  ;;  %v1688_v33 = vmax.f32 %v1147_v19, %v6884_v59  ;;  %3987 = vmatpush.bf16.msrb.mxu0 %v7081_v5  ;;  %v372_v26 = vsel %vm12706_vm4, %v9088_v38, %v8610_v0  ;;  %v7209_v21 = vor.u32 %v8264_v50, %v7208_v49  ;;  %v651_v28 = vpop.f32.mrf.mxu0 }
 0x143   :  { %v1689_v30 = vmax.f32 %v1149_v20, %v6885_v58  ;;  %v1150_v56 = vsel %vm1119_vm6, %v1007_v48, %v1099_v31  ;;  %v1151_v34 = vsel %vm1121_vm7, %v1007_v48, %v1099_v31  ;;  %v1153_v4 = vsel %vm1124_vm8, %v1007_v48, %v1099_v31 }
 0x144   :  { %v1892_v6 = vperm.slane %v1687_v32, 0  ;;  %v1893_v37 = vperm.slane %v1687_v32, 2  ;;  %v1894_v10 = vperm.slane %v1688_v33, 0  ;;  %v1895_v13 = vperm.slane %v1688_v33, 2  ;;  %4026 = vmatpush.bf16.msrb.mxu1 %v7209_v21 }
 0x145   :  { %v1896_v11 = vperm.slane %v1689_v30, 0  ;;  %v1897_v17 = vperm.slane %v1689_v30, 2  ;;  %v1152_v1 = vrot.slane %v1151_v34, 2  ;;  %v1154_v41 = vrot.slane %v1153_v4, 4 }
 0x146   :  { %v2085_v57 = vsel %vm2058_vm9, %v1892_v6, %v1890_v62  ;;  %v2091_v35 = vsel %vm2058_vm9, %v1893_v37, %v1891_v14  ;;  %v1155_v44 = vsel %vm148_vm1, %v1099_v31, %v1007_v48  ;;  %v6886_v47 = vrot.slane %v1150_v56, 9  ;;  %v720_v31 = vpop.f32.mrf.mxu1 }
 0x147   :  { %v2086_v51 = vsel %vm2060_vm10, %v1894_v10, %v2085_v57  ;;  %v2092_v23 = vsel %vm2060_vm10, %v1895_v13, %v2091_v35  ;;  %v1156_v55 = vrot.slane %v1155_v44, 6  ;;  %v6887_v46 = vrot.slane %v1152_v1, 9  ;;  %v7064_v13 = vld [vmem:[%s12649_s3 + $0xa0] sm:$0xf]  ;;  %v8228_v57 = vld [vmem:[%s12649_s3 + $0xac] sm:$0xf0]  ;;  %v789_v21 = vpop.f32.mrf.mxu2 }
 0x148   :  { %v6888_v3 = vrot.slane %v1154_v41, 9  ;;  %v1690_v61 = vmax.f32 %v1150_v56, %v6886_v47  ;;  %v2087_v48 = vsel %vm12688_vm11, %v1896_v11, %v2086_v51  ;;  %v2093_v19 = vsel %vm12688_vm11, %v1897_v17, %v2092_v23  ;;  %v8260_v35 = vld [vmem:[%s12649_s3 + $0x1ac] sm:$0xf0] }
 0x149   :  { %v6889_v20 = vrot.slane %v1156_v55, 9  ;;  %v1691_v25 = vmax.f32 %v1152_v1, %v6887_v46  ;;  %v8616_v14 = vunpack.i.h.bf16 %v8614_v42  ;;  %v8615_v30 = vunpack.i.l.bf16 %v8614_v42  ;;  %v8296_v51 = vld [vmem:[%s12649_s3 + $0x2cc] sm:$0xf0] }
 0x14a   :  { %v1692_v59 = vmax.f32 %v1154_v41, %v6888_v3  ;;  %v1898_v58 = vperm.slane %v1690_v61, 0  ;;  %v1899_v62 = vperm.slane %v1690_v61, 2  ;;  %v924_v10 = vmax.f32 %v9361_v36, 0.0  ;;  %v7192_v36 = vld [vmem:[%s12649_s3 + $0x1a0] sm:$0xf] }
 0x14b   :  { %v9428_v32 = vmax.f32 %v1156_v55, %v6889_v20  ;;  %v1900_v33 = vperm.slane %v1691_v25, 0  ;;  %v1901_v5 = vperm.slane %v1691_v25, 2  ;;  %vm12707_vm2 = vcmask 1047559   ;;  %v8224_v3 = vld [vmem:[%s12649_s3 + $0x8c] sm:$0xf0] }
 0x14c   :  { %v1902_v56 = vperm.slane %v1692_v59, 0  ;;  %v1903_v34 = vperm.slane %v1692_v59, 2  ;;  %v2088_v4 = vsel %vm12660_vm12, %v1898_v58, %v2087_v48  ;;  %v2094_v38 = vsel %vm12660_vm12, %v1899_v62, %v2093_v19  ;;  %vm12708_vm4 = vmmov %vm12707_vm2  ;;  %v7464_v25 = vld [vmem:[%s12649_s3 + $0x3c0] sm:$0xf] }
 0x14d   :  { %v1904_v0 = vperm.slane %v9428_v32, 0  ;;  %v2089_v6 = vsel %vm2066_vm13, %v1900_v33, %v2088_v4  ;;  %v2095_v37 = vsel %vm2066_vm13, %v1901_v5, %v2094_v38  ;;  %vm12709_vm15 = vcmask 556032   ;;  %v7176_v62 = vld [vmem:[%s12649_s3 + $0x180] sm:$0xf] }
 0x14e   :  { %v2090_v11 = vsel %vm12707_vm2, %v1902_v56, %v2089_v6  ;;  %v2096_v17 = vsel %vm12708_vm4, %v1903_v34, %v2095_v37  ;;  %v397_v1 = vsel %vm12709_vm15, %v372_v26, %v8615_v30  ;;  %vm12710_vm12 = vmmov %vm12709_vm15  ;;  %vm12711_vm2 = vcmask 1040384   ;;  %v8328_v26 = vld [vmem:[%s12649_s3 + $0x3cc] sm:$0xf0]  ;;  %v858_v56 = vpop.f32.mrf.mxu3  ;;  %v653_v34 = vpop.f32.mrf.mxu0 }
 0x14f   :  { %v398_v41 = vsel %vm12710_vm12, %v9407_v29, %v8616_v14  ;;  %v2260_v44 = vsel %vm12711_vm2, 0.0, %v2090_v11  ;;  %vm12712_vm4 = vmmov %vm12711_vm2  ;;  %v787_v50 = vadd.f32 %v786_v63, %v9205_v40  ;;  %v7336_v29 = vld [vmem:[%s12649_s3 + $0x2c0] sm:$0xf]  ;;  %v856_v55 = vadd.f32 %v855_v22, %v9207_v45  ;;  %v8256_v14 = vld [vmem:[%s12649_s3 + $0x18c] sm:$0xf0] }
 0x150   :  { %v2261_v47 = vsel %vm12712_vm4, 0.0, %v2096_v17  ;;  %v410_v49 = vpack.c.bf16 %v398_v41, %v397_v1  ;;  %v9464_v46 = vadd.f32 %v651_v28, %v9199_v54  ;;  %v9467_v42 = vadd.f32 %v720_v31, %v9197_v52  ;;  %v7048_v63 = vld [vmem:[%s12649_s3 + $0x80] sm:$0xf] }
 0x151   :  { %v2325_v23 = vrot.slane %v2261_v47, 4  ;;  %v925_v61 = vmax.f32 %v787_v50, 0.0  ;;  %v7065_v48 = vor.u32 %v8228_v57, %v7064_v13  ;;  %v7193_v19 = vor.u32 %v8260_v35, %v7192_v36  ;;  %v722_v13 = vpop.f32.mrf.mxu1  ;;  %v7032_v57 = vld [vmem:[%s12649_s3 + $0x60] sm:$0xf]  ;;  %v8252_v47 = vld [vmem:[%s12649_s3 + $0x16c] sm:$0xf0] }
 0x152   :  { %v7337_v20 = vor.u32 %v8296_v51, %v7336_v29  ;;  %vm12713_vm12 = vcmask 834560   ;;  %v1905_v22 = vperm.slane %v9428_v32, 2  ;;  %v926_v58 = vmax.f32 %v856_v55, 0.0  ;;  %v8216_v55 = vld [vmem:[%s12649_s3 + $0x4c] sm:$0xf0] }
 0x153   :  { %6833 = vmatmul.msk.bf16.gmra.mxu0 %vm12713_vm12, %v410_v49  ;;  %vm12714_vm15 = vmmov %vm12713_vm12  ;;  %v2344_v28 = vsel %vm2339_vm0, %v2260_v44, %v2325_v23  ;;  %v2345_v59 = vsel %vm2339_vm0, %v2325_v23, %v2260_v44  ;;  %v927_v30 = vmax.f32 %v9464_v46, 0.0  ;;  %4027 = vmatpush.bf16.msrb.mxu1 %v7193_v19  ;;  %v1009_v4 = vmax.f32 %v923_v43, %v925_v61  ;;  %v7160_v44 = vld [vmem:[%s12649_s3 + $0x160] sm:$0xf] }
 0x154   :  { %6845 = vmatmul.msk.bf16.gmra.mxu1 %vm12714_vm15, %v410_v49  ;;  %vm12715_vm2 = vmmov %vm12713_vm12  ;;  %v2346_v31 = vrot.slane %v2345_v59, 4  ;;  %v6967_v33 = vrot.slane %v2344_v28, 9  ;;  %v6975_v5 = vrot.slane %v2344_v28, 10  ;;  %2557 = vst [vmem:[#allocation1 + $0x11] ss:$2 sm:$0xff] %v2344_v28  ;;  %3988 = vmatpush.bf16.msrb.mxu0 %v7065_v48  ;;  %v1010_v38 = vmax.f32 %v924_v10, %v926_v58 }
 0x155   :  { %6857 = vmatmul.msk.bf16.gmra.mxu2 %vm12715_vm2, %v410_v49  ;;  %vm12716_vm4 = vmmov %vm12715_vm2  ;;  %v7465_v6 = vor.u32 %v8328_v26, %v7464_v25  ;;  %v7049_v37 = vor.u32 %v8224_v3, %v7048_v63  ;;  %v928_v1 = vmax.f32 %v9467_v42, 0.0  ;;  %v7177_v41 = vor.u32 %v8256_v14, %v7176_v62  ;;  %v7016_v23 = vld [vmem:[%s12649_s3 + $0x40] sm:$0xf] }
 0x156   :  { %6869 = vmatmul.msk.bf16.gmra.mxu3 %vm12716_vm4, %v410_v49  ;;  %4065 = vmatpush.bf16.msrb.mxu2 %v7337_v20  ;;  %v2402_v11 = vrot.slane %v2346_v31, 5  ;;  %v2483_v17 = vrot.slane %v2346_v31, 6  ;;  %2559 = vst [vmem:[#allocation1 + $0x20] ss:$2 sm:$0xff] %v2346_v31  ;;  %v1100_v43 = vrot.slane %v1010_v38, 6  ;;  %v790_v10 = vadd.f32 %v789_v21, %v9205_v40 }
 0x157   :  { %4104 = vmatpush.bf16.msrb.mxu3 %v7465_v6  ;;  %v859_v36 = vadd.f32 %v858_v56, %v9207_v45  ;;  %v9507_v35 = vadd.f32 %v653_v34, %v9199_v54  ;;  %4028 = vmatpush.bf16.msrb.mxu1 %v7177_v41  ;;  %v9526_v51 = vadd.f32 %v722_v13, %v9197_v52  ;;  %v7144_v48 = vld [vmem:[%s12649_s3 + $0x140] sm:$0xf]  ;;  %v8248_v21 = vld [vmem:[%s12649_s3 + $0x14c] sm:$0xf0]  ;;  %v791_v56 = vpop.f32.mrf.mxu2  ;;  %vm12717_vm12 = vcmask 1044480  }
 0x158   :  { %v9517_v49 = vsel %vm9318_vm5, %v6967_v33, %v2402_v11  ;;  %v9519_v50 = vrot.slane %v2402_v11, 4  ;;  %v9523_v29 = vsel %vm9324_vm14, %v6975_v5, %v2483_v17  ;;  %3989 = vmatpush.bf16.msrb.mxu0 %v7049_v37  ;;  %v1157_v42 = vsel %vm1119_vm6, %v1009_v4, %v1100_v43  ;;  %vm12718_vm15 = vmmov %vm12717_vm12 }
 0x159   :  { %v1158_v63 = vsel %vm1121_vm7, %v1009_v4, %v1100_v43  ;;  %v1160_v3 = vsel %vm1124_vm8, %v1009_v4, %v1100_v43  ;;  %v1162_v61 = vsel %vm148_vm1, %v1100_v43, %v1009_v4  ;;  %v6890_v26 = vrot.slane %v1157_v42, 9 }
 0x15a   :  { %v1159_v19 = vrot.slane %v1158_v63, 2  ;;  %v1161_v20 = vrot.slane %v1160_v3, 4  ;;  %v1163_v25 = vrot.slane %v1162_v61, 6  ;;  %v9544_v28 = vrot.slane %v2483_v17, 4 }
 0x15b   :  { %v7033_v59 = vor.u32 %v8220_v53, %v7032_v57  ;;  %v7161_v58 = vor.u32 %v8252_v47, %v7160_v44  ;;  %v7017_v62 = vor.u32 %v8216_v55, %v7016_v23  ;;  %v1694_v5 = vmax.f32 %v1157_v42, %v6890_v26  ;;  %v860_v23 = vpop.f32.mrf.mxu3 }
 0x15c   :  { %v6891_v14 = vrot.slane %v1159_v19, 9  ;;  %v6892_v31 = vrot.slane %v1161_v20, 9  ;;  %v6893_v33 = vrot.slane %v1163_v25, 9  ;;  %v929_v34 = vmax.f32 %v790_v10, 0.0 }
 0x15d   :  { %v930_v4 = vmax.f32 %v859_v36, 0.0  ;;  %v931_v38 = vmax.f32 %v9507_v35, 0.0  ;;  %3990 = vmatpush.bf16.msrb.mxu0 %v7033_v59  ;;  %4029 = vmatpush.bf16.msrb.mxu1 %v7161_v58  ;;  %v7145_v6 = vor.u32 %v8248_v21, %v7144_v48  ;;  %v1906_v17 = vperm.slane %v1694_v5, 0 }
 0x15e   :  { %v1695_v37 = vmax.f32 %v1159_v19, %v6891_v14  ;;  %v1696_v13 = vmax.f32 %v1161_v20, %v6892_v31  ;;  %v1697_v11 = vmax.f32 %v1163_v25, %v6893_v33  ;;  %v1907_v41 = vperm.slane %v1694_v5, 2  ;;  %v656_v20 = vpop.f32.mrf.mxu0 }
 0x15f   :  { %v1012_v57 = vmax.f32 %v928_v1, %v930_v4  ;;  %v932_v53 = vmax.f32 %v9526_v51, 0.0  ;;  %v9549_v43 = vadd.f32 %v791_v56, %v9205_v40  ;;  %v2097_v42 = vsel %vm2076_vm3, %v1906_v17, %v1904_v0 }
 0x160   :  { %v1908_v44 = vperm.slane %v1695_v37, 0  ;;  %v1909_v47 = vperm.slane %v1695_v37, 2  ;;  %v1910_v10 = vperm.slane %v1696_v13, 0  ;;  %v1911_v36 = vperm.slane %v1696_v13, 2 }
 0x161   :  { %v1912_v55 = vperm.slane %v1697_v11, 0  ;;  %v2101_v63 = vsel %vm2076_vm3, %v1907_v41, %v1905_v22  ;;  %v1011_v1 = vmax.f32 %v927_v30, %v929_v34  ;;  %3991 = vmatpush.bf16.msrb.mxu0 %v7017_v62  ;;  %4030 = vmatpush.bf16.msrb.mxu1 %v7145_v6  ;;  %v1913_v3 = vperm.slane %v1697_v11, 2 }
 0x162   :  { %v2098_v61 = vsel %vm2058_vm9, %v1908_v44, %v2097_v42  ;;  %v2102_v48 = vsel %vm2058_vm9, %v1909_v47, %v2101_v63  ;;  %v1101_v19 = vrot.slane %v1012_v57, 6  ;;  %v933_v32 = vmax.f32 %v9549_v43, 0.0  ;;  %v725_v42 = vpop.f32.mrf.mxu1 }
 0x163   :  { %v2099_v25 = vsel %vm2060_vm10, %v1910_v10, %v2098_v61  ;;  %v2103_v0 = vsel %vm2060_vm10, %v1911_v36, %v2102_v48  ;;  %v861_v22 = vadd.f32 %v860_v23, %v9207_v45  ;;  %v9572_v14 = vadd.f32 %v656_v20, %v9199_v54  ;;  %v7000_v48 = vld [vmem:[%s12649_s3 + $0x20] sm:$0xf] }
 0x164   :  { %v2100_v46 = vsel %vm12688_vm11, %v1912_v55, %v2099_v25  ;;  %v2104_v30 = vsel %vm12688_vm11, %v1913_v3, %v2103_v0  ;;  %v1164_v26 = vsel %vm1119_vm6, %v1011_v1, %v1101_v19  ;;  %v1165_v21 = vsel %vm1121_vm7, %v1011_v1, %v1101_v19  ;;  %v8212_v0 = vld [vmem:[%s12649_s3 + $0x2c] sm:$0xf0] }
 0x165   :  { %v2278_v59 = vsel %vm12717_vm12, %v2104_v30, 0.0  ;;  %v1166_v58 = vrot.slane %v1165_v21, 2  ;;  %v1167_v62 = vsel %vm1124_vm8, %v1011_v1, %v1101_v19  ;;  %v1169_v5 = vsel %vm148_vm1, %v1101_v19, %v1011_v1  ;;  %v7128_v21 = vld [vmem:[%s12649_s3 + $0x120] sm:$0xf] }
 0x166   :  { %v2326_v31 = vrot.slane %v2278_v59, 4  ;;  %v1168_v33 = vrot.slane %v1167_v62, 4  ;;  %v6894_v56 = vrot.slane %v1164_v26, 9  ;;  %v2277_v34 = vsel %vm12718_vm15, %v2100_v46, 0.0  ;;  %v8244_v62 = vld [vmem:[%s12649_s3 + $0x12c] sm:$0xf0] }
 0x167   :  { %v1170_v4 = vrot.slane %v1169_v5, 6  ;;  %v6895_v6 = vrot.slane %v1166_v58, 9  ;;  %v934_v37 = vmax.f32 %v861_v22, 0.0  ;;  %v794_v22 = vpop.f32.mrf.mxu2  ;;  %v726_v51 = vadd.f32 %v725_v42, %v9197_v52 }
 0x168   :  { %v2347_v13 = vsel %vm2339_vm0, %v2277_v34, %v2326_v31  ;;  %v2374_v11 = vsel %vm2339_vm0, %v2326_v31, %v2277_v34  ;;  %v6896_v17 = vrot.slane %v1168_v33, 9  ;;  %v1698_v41 = vmax.f32 %v1164_v26, %v6894_v56  ;;  %v6984_v31 = vld [vmem:[%s12649_s3] sm:$0xf] }
 0x169   :  { %v2375_v57 = vrot.slane %v2374_v11, 4  ;;  %v2405_v43 = vrot.slane %v2347_v13, 5  ;;  %v2486_v44 = vrot.slane %v2347_v13, 6  ;;  %2561 = vst [vmem:[#allocation1 + $0x21] ss:$2 sm:$0xff] %v2347_v13  ;;  %v6897_v47 = vrot.slane %v1170_v4, 9  ;;  %v863_v11 = vpop.f32.mrf.mxu3 }
 0x16a   :  { %v1699_v10 = vmax.f32 %v1166_v58, %v6895_v6  ;;  %v1700_v36 = vmax.f32 %v1168_v33, %v6896_v17  ;;  %v1914_v23 = vperm.slane %v1698_v41, 0  ;;  %v1915_v55 = vperm.slane %v1698_v41, 2  ;;  %v8208_v33 = vld [vmem:[%s12649_s3 + $0xc] sm:$0xf0]  ;;  %v7112_v6 = vld [vmem:[%s12649_s3 + $0x100] sm:$0xf] }
 0x16b   :  { %v9581_v63 = vsel %vm9318_vm5, %v9519_v50, %v2405_v43  ;;  %v9583_v1 = vrot.slane %v2405_v43, 4  ;;  %v9585_v3 = vrot.slane %v2375_v57, 5  ;;  %v9590_v61 = vsel %vm9324_vm14, %v9544_v28, %v2486_v44  ;;  %v8240_v13 = vld [vmem:[%s12649_s3 + $0x10c] sm:$0xf0] }
 0x16c   :  { %12719 = vst [vmem:[#allocation2_spill] sm:$0xff] %v9581_v63  ;;  %v9595_v19 = vrot.slane %v2486_v44, 4  ;;  %v9597_v20 = vrot.slane %v2375_v57, 6  ;;  %v1701_v25 = vmax.f32 %v1170_v4, %v6897_v47  ;;  %v1916_v50 = vperm.slane %v1699_v10, 0 }
 0x16d   :  { %12720 = vst [vmem:[#allocation3_spill] sm:$0xff] %v9583_v1  ;;  %v1917_v46 = vperm.slane %v1699_v10, 2  ;;  %v1918_v30 = vperm.slane %v1700_v36, 0  ;;  %v1919_v26 = vperm.slane %v1700_v36, 2  ;;  %v1013_v34 = vmax.f32 %v931_v38, %v933_v32 }
 0x16e   :  { %12721 = vst [vmem:[#allocation4_spill] sm:$0xff] %v9585_v3  ;;  %v2105_v58 = vsel %vm2058_vm9, %v1916_v50, %v1914_v23  ;;  %v1920_v5 = vperm.slane %v1701_v25, 0  ;;  %v1014_v4 = vmax.f32 %v932_v53, %v934_v37  ;;  %v1921_v17 = vperm.slane %v1701_v25, 2  ;;  %v658_v50 = vpop.f32.mrf.mxu0 }
 0x16f   :  { %12722 = vst [vmem:[#allocation5_spill] sm:$0xff] %v9590_v61  ;;  %v2111_v56 = vsel %vm2058_vm9, %v1917_v46, %v1915_v55  ;;  %v2106_v41 = vsel %vm2060_vm10, %v1918_v30, %v2105_v58  ;;  %v935_v57 = vmax.f32 %v9572_v14, 0.0  ;;  %v7001_v43 = vor.u32 %v8212_v0, %v7000_v48  ;;  %v727_v0 = vpop.f32.mrf.mxu1  ;;  %v2568_v46 = vld.sshfl [vmem:[#allocation1 + $0x10] sm:$0xff pattern:$0x75316420] }
 0x170   :  { %12723 = vst [vmem:[#allocation6_spill] sm:$0xff] %v9595_v19  ;;  %v2112_v35 = vsel %vm2060_vm10, %v1919_v26, %v2111_v56  ;;  %v1102_v38 = vrot.slane %v1014_v4, 6  ;;  %v7129_v53 = vor.u32 %v8244_v62, %v7128_v21  ;;  %v6985_v32 = vor.u32 %v8208_v33, %v6984_v31  ;;  %v2569_v58 = vld.sshfl [vmem:[#allocation1 + $0x18] sm:$0xff pattern:$0x75316420] }
 0x171   :  { %12724 = vst [vmem:[#allocation7_spill] sm:$0xff] %v9597_v20  ;;  %3992 = vmatpush.bf16.msrb.mxu0 %v7001_v43  ;;  %v7113_v37 = vor.u32 %v8240_v13, %v7112_v6  ;;  %v795_v44 = vadd.f32 %v794_v22, %v9205_v40  ;;  %v864_v47 = vadd.f32 %v863_v11, %v9207_v45  ;;  %v936_v30 = vmax.f32 %v726_v51, 0.0  ;;  %v2566_v4 = vld.sshfl [vmem:[#allocation1] sm:$0xff pattern:$0x75316420] }
 0x172   :  { %v1171_v10 = vsel %vm1119_vm6, %v1013_v34, %v1102_v38  ;;  %v1172_v36 = vsel %vm1121_vm7, %v1013_v34, %v1102_v38  ;;  %v1174_v14 = vsel %vm1124_vm8, %v1013_v34, %v1102_v38  ;;  %v1176_v23 = vsel %vm148_vm1, %v1102_v38, %v1013_v34  ;;  %4031 = vmatpush.bf16.msrb.mxu1 %v7129_v53  ;;  %v796_v34 = vpop.f32.mrf.mxu2 }
 0x173   :  { %v1173_v55 = vrot.slane %v1172_v36, 2  ;;  %v1175_v48 = vrot.slane %v1174_v14, 4  ;;  %v1177_v42 = vrot.slane %v1176_v23, 6  ;;  %v6898_v25 = vrot.slane %v1171_v10, 9 }
 0x174   :  { %v2107_v22 = vsel %vm12688_vm11, %v1920_v5, %v2106_v41  ;;  %v937_v26 = vmax.f32 %v795_v44, 0.0  ;;  %v938_v21 = vmax.f32 %v864_v47, 0.0  ;;  %v2113_v62 = vsel %vm12688_vm11, %v1921_v17, %v2112_v35  ;;  %v2567_v41 = vld.sshfl [vmem:[#allocation1 + $0x8] sm:$0xff pattern:$0x75316420] }
 0x175   :  { %v6899_v31 = vrot.slane %v1173_v55, 9  ;;  %v6900_v33 = vrot.slane %v1175_v48, 9  ;;  %v1702_v56 = vmax.f32 %v1171_v10, %v6898_v25  ;;  %3993 = vmatpush.bf16.msrb.mxu0 %v6985_v32  ;;  %v6901_v6 = vrot.slane %v1177_v42, 9 }
 0x176   :  { %4032 = vmatpush.bf16.msrb.mxu1 %v7113_v37  ;;  %v1016_v13 = vmax.f32 %v936_v30, %v938_v21  ;;  %v9647_v11 = vadd.f32 %v658_v50, %v9199_v54  ;;  %v9650_v5 = vadd.f32 %v727_v0, %v9197_v52  ;;  %v1015_v17 = vmax.f32 %v935_v57, %v937_v26 }
 0x177   :  { %v1703_v43 = vmax.f32 %v1173_v55, %v6899_v31  ;;  %v1704_v38 = vmax.f32 %v1175_v48, %v6900_v33  ;;  %v1922_v51 = vperm.slane %v1702_v56, 0  ;;  %v1923_v35 = vperm.slane %v1702_v56, 2 }
 0x178   :  { %v1103_v53 = vrot.slane %v1016_v13, 6  ;;  %v9652_v44 = vpack.c.bf16 %v2568_v46, %v2566_v4  ;;  %v9654_v32 = vpack.c.bf16 %v2569_v58, %v2567_v41  ;;  %v9656_v14 = vmax.f32 %v1177_v42, %v6901_v6  ;;  %v7320_v42 = vld [vmem:[%s12649_s3 + $0x2a0] sm:$0xf]  ;;  %v8292_v46 = vld [vmem:[%s12649_s3 + $0x2ac] sm:$0xf0]  ;;  %v865_v6 = vpop.f32.mrf.mxu3  ;;  %v661_v13 = vpop.f32.mrf.mxu0 }
 0x179   :  { %v1924_v47 = vperm.slane %v1703_v43, 0  ;;  %v1925_v37 = vperm.slane %v1703_v43, 2  ;;  %v1926_v10 = vperm.slane %v1704_v38, 0  ;;  %v1927_v36 = vperm.slane %v1704_v38, 2  ;;  %v7448_v58 = vld [vmem:[%s12649_s3 + $0x3a0] sm:$0xf] }
 0x17a   :  { %12725 = vst [vmem:[#allocation8_spill] sm:$0xff] %v9652_v44  ;;  %vm12727_vm2 = vcmask 1045509   ;;  %v939_v55 = vmax.f32 %v9647_v11, 0.0  ;;  %3994 = vmatmul.bf16.vlgmr.msrb.gmra.mxu0 %v9652_v44  ;;  %4033 = vmatmul.bf16.vlgmr.msrb.gmra.mxu1 %v9654_v32  ;;  %v1178_v50 = vsel %vm1119_vm6, %v1015_v17, %v1103_v53  ;;  %v1179_v0 = vsel %vm1121_vm7, %v1015_v17, %v1103_v53 }
 0x17b   :  { %12726 = vst [vmem:[#allocation9_spill] sm:$0xff] %v9654_v32  ;;  %v2108_v23 = vsel %vm12727_vm2, %v1922_v51, %v2107_v22  ;;  %vm12728_vm4 = vmmov %vm12727_vm2  ;;  %vm12729_vm12 = vcmask 1047559   ;;  %v1180_v26 = vrot.slane %v1179_v0, 2  ;;  %v1181_v21 = vsel %vm1124_vm8, %v1015_v17, %v1103_v53  ;;  %v730_v0 = vpop.f32.mrf.mxu1 }
 0x17c   :  { %v2114_v25 = vsel %vm12728_vm4, %v1923_v35, %v2113_v62  ;;  %v2109_v57 = vsel %vm2066_vm13, %v1924_v47, %v2108_v23  ;;  %vm12730_vm15 = vmmov %vm12729_vm12  ;;  %v8324_v62 = vld [vmem:[%s12649_s3 + $0x3ac] sm:$0xf0]  ;;  %vm12731_vm2 = vcmask 1040384   ;;  %v1182_v56 = vrot.slane %v1181_v21, 4 }
 0x17d   :  { %v2115_v48 = vsel %vm2066_vm13, %v1925_v37, %v2114_v25  ;;  %v2110_v22 = vsel %vm12729_vm12, %v1926_v10, %v2109_v57  ;;  %vm12732_vm4 = vmmov %vm12731_vm2  ;;  %v1183_v4 = vsel %vm148_vm1, %v1103_v53, %v1015_v17  ;;  %v6902_v38 = vrot.slane %v1178_v50, 9 }
 0x17e   :  { %v2116_v30 = vsel %vm12730_vm15, %v1927_v36, %v2115_v48  ;;  %v2262_v31 = vsel %vm12731_vm2, 0.0, %v2110_v22  ;;  %v1184_v43 = vrot.slane %v1183_v4, 6  ;;  %v6903_v51 = vrot.slane %v1180_v26, 9  ;;  %v799_v36 = vpop.f32.mrf.mxu2 }
 0x17f   :  { %v2263_v33 = vsel %vm12732_vm4, 0.0, %v2116_v30  ;;  %v6904_v35 = vrot.slane %v1182_v56, 9  ;;  %v7321_v47 = vor.u32 %v8292_v46, %v7320_v42  ;;  %v7449_v37 = vor.u32 %v8324_v62, %v7448_v58 }
 0x180   :  { %v2327_v41 = vrot.slane %v2263_v33, 4  ;;  %v797_v10 = vadd.f32 %v796_v34, %v9205_v40  ;;  %v6905_v57 = vrot.slane %v1184_v43, 9  ;;  %v1706_v48 = vmax.f32 %v1178_v50, %v6902_v38 }
 0x181   :  { %v1707_v30 = vmax.f32 %v1180_v26, %v6903_v51  ;;  %4066 = vmatpush.bf16.msrb.mxu2 %v7321_v47  ;;  %4105 = vmatpush.bf16.msrb.mxu3 %v7449_v37  ;;  %v1708_v21 = vmax.f32 %v1182_v56, %v6904_v35  ;;  %v1929_v50 = vperm.slane %v9656_v14, 2  ;;  %vm12735_vm12 = vcmask 1044480  }
 0x182   :  { %v2348_v23 = vsel %vm2339_vm0, %v2262_v31, %v2327_v41  ;;  %v2349_v25 = vsel %vm2339_vm0, %v2327_v41, %v2262_v31  ;;  %v1709_v42 = vmax.f32 %v1184_v43, %v6905_v57  ;;  %v1930_v46 = vperm.slane %v1706_v48, 0  ;;  %vm12736_vm15 = vmmov %vm12735_vm12 }
 0x183   :  { %v2350_v17 = vrot.slane %v2349_v25, 4  ;;  %v6968_v53 = vrot.slane %v2348_v23, 9  ;;  %v6976_v22 = vrot.slane %v2348_v23, 10  ;;  %2563 = vst [vmem:[#allocation1 + $0x30] ss:$2 sm:$0xff] %v2348_v23  ;;  %v1931_v58 = vperm.slane %v1706_v48, 2 }
 0x184   :  { %v1932_v33 = vperm.slane %v1707_v30, 0  ;;  %v1933_v4 = vperm.slane %v1707_v30, 2  ;;  %v1928_v31 = vperm.slane %v9656_v14, 0  ;;  %v1934_v41 = vperm.slane %v1708_v21, 0 }
 0x185   :  { %v2412_v34 = vrot.slane %v2350_v17, 5  ;;  %v2493_v62 = vrot.slane %v2350_v17, 6  ;;  %2565 = vst [vmem:[#allocation1 + $0x31] ss:$2 sm:$0xff] %v2350_v17  ;;  %v1935_v38 = vperm.slane %v1708_v21, 2  ;;  %v1936_v43 = vperm.slane %v1709_v42, 0  ;;  %v868_v17 = vpop.f32.mrf.mxu3 }
 0x186   :  { %v1937_v51 = vperm.slane %v1709_v42, 2  ;;  %v2117_v35 = vsel %vm2076_vm3, %v1930_v46, %v1928_v31  ;;  %v2121_v47 = vsel %vm2076_vm3, %v1931_v58, %v1929_v50  ;;  %v941_v37 = vmax.f32 %v797_v10, 0.0  ;;  %v732_v50 = vpop.f32.mrf.mxu1 }
 0x187   :  { %v9692_v26 = vsel %vm9318_vm5, %v6968_v53, %v2412_v34  ;;  %v9696_v56 = vsel %vm9324_vm14, %v6976_v22, %v2493_v62  ;;  %v866_v23 = vadd.f32 %v865_v6, %v9207_v45  ;;  %v2118_v14 = vsel %vm2058_vm9, %v1932_v33, %v2117_v35  ;;  %v663_v53 = vpop.f32.mrf.mxu0  ;;  %v801_v33 = vpop.f32.mrf.mxu2 }
 0x188   :  { %12733 = vst [vmem:[#allocation10_spill] sm:$0xff] %v9692_v26  ;;  %v2122_v25 = vsel %vm2058_vm9, %v1933_v4, %v2121_v47  ;;  %v662_v57 = vadd.f32 %v661_v13, %v9199_v54  ;;  %v731_v48 = vadd.f32 %v730_v0, %v9197_v52  ;;  %v2119_v22 = vsel %vm2060_vm10, %v1934_v41, %v2118_v14 }
 0x189   :  { %12734 = vst [vmem:[#allocation11_spill] sm:$0xff] %v9696_v56  ;;  %v2123_v30 = vsel %vm2060_vm10, %v1935_v38, %v2122_v25  ;;  %v940_v21 = vmax.f32 %v9650_v5, 0.0  ;;  %v942_v42 = vmax.f32 %v866_v23, 0.0  ;;  %v2414_v10 = vrot.slane %v2412_v34, 4 }
 0x18a   :  { %v2495_v46 = vrot.slane %v2493_v62, 4  ;;  %v2120_v6 = vsel %vm12688_vm11, %v1936_v43, %v2119_v22  ;;  %v2124_v58 = vsel %vm12688_vm11, %v1937_v51, %v2123_v30  ;;  %v800_v13 = vadd.f32 %v799_v36, %v9205_v40 }
 0x18b   :  { %v1018_v4 = vmax.f32 %v940_v21, %v942_v42  ;;  %v869_v0 = vadd.f32 %v868_v17, %v9207_v45  ;;  %v664_v31 = vadd.f32 %v663_v53, %v9199_v54  ;;  %v2280_v41 = vsel %vm12735_vm12, %v2124_v58, 0.0 }
 0x18c   :  { %v1017_v5 = vmax.f32 %v939_v55, %v941_v37  ;;  %v943_v34 = vmax.f32 %v662_v57, 0.0  ;;  %v944_v62 = vmax.f32 %v731_v48, 0.0  ;;  %v2279_v38 = vsel %vm12736_vm15, %v2120_v6, 0.0 }
 0x18d   :  { %v2328_v43 = vrot.slane %v2280_v41, 4  ;;  %v1104_v51 = vrot.slane %v1018_v4, 6  ;;  %v802_v35 = vadd.f32 %v801_v33, %v9205_v40  ;;  %v945_v47 = vmax.f32 %v800_v13, 0.0  ;;  %v870_v13 = vpop.f32.mrf.mxu3 }
 0x18e   :  { %v946_v36 = vmax.f32 %v869_v0, 0.0  ;;  %v947_v23 = vmax.f32 %v664_v31, 0.0  ;;  %v9719_v14 = vadd.f32 %v732_v50, %v9197_v52  ;;  %vm12740_vm2 = vcmask 1045509  }
 0x18f   :  { %v2351_v25 = vsel %vm2339_vm0, %v2279_v38, %v2328_v43  ;;  %v2376_v17 = vsel %vm2339_vm0, %v2328_v43, %v2279_v38  ;;  %v1185_v11 = vsel %vm1119_vm6, %v1017_v5, %v1104_v51  ;;  %v1186_v55 = vsel %vm1121_vm7, %v1017_v5, %v1104_v51  ;;  %v666_v28 = vpop.f32.mrf.mxu0  ;;  %vm12741_vm4 = vmmov %vm12740_vm2 }
 0x190   :  { %v2377_v37 = vrot.slane %v2376_v17, 4  ;;  %v2415_v57 = vrot.slane %v2351_v25, 5  ;;  %v2496_v48 = vrot.slane %v2351_v25, 6  ;;  %2574 = vst [vmem:[#allocation1] ss:$2 sm:$0xff] %v2351_v25  ;;  %v1187_v53 = vrot.slane %v1186_v55, 2 }
 0x191   :  { %v1188_v22 = vsel %vm1124_vm8, %v1017_v5, %v1104_v51  ;;  %v1190_v30 = vsel %vm148_vm1, %v1104_v51, %v1017_v5  ;;  %v6906_v21 = vrot.slane %v1185_v11, 9  ;;  %v949_v42 = vmax.f32 %v802_v35, 0.0 }
 0x192   :  { %v9729_v6 = vsel %vm9318_vm5, %v2414_v10, %v2415_v57  ;;  %v9731_v58 = vrot.slane %v2415_v57, 4  ;;  %v9733_v33 = vrot.slane %v2377_v37, 5  ;;  %v9737_v4 = vsel %vm9324_vm14, %v2495_v46, %v2496_v48 }
 0x193   :  { %12737 = vst [vmem:[#allocation12_spill] sm:$0xff] %v9729_v6  ;;  %v9739_v0 = vrot.slane %v2496_v48, 4  ;;  %v9741_v31 = vrot.slane %v2377_v37, 6  ;;  %v1189_v50 = vrot.slane %v1188_v22, 4  ;;  %v1191_v41 = vrot.slane %v1190_v30, 6 }
 0x194   :  { %12738 = vst [vmem:[#allocation13_spill] sm:$0xff] %v9737_v4  ;;  %v6907_v5 = vrot.slane %v1187_v53, 9  ;;  %v1710_v38 = vmax.f32 %v1185_v11, %v6906_v21  ;;  %v1020_v43 = vmax.f32 %v944_v62, %v946_v36  ;;  %v871_v25 = vadd.f32 %v870_v13, %v9207_v45 }
 0x195   :  { %v6908_v51 = vrot.slane %v1189_v50, 9  ;;  %v6909_v35 = vrot.slane %v1191_v41, 9  ;;  %v1019_v55 = vmax.f32 %v943_v34, %v945_v47  ;;  %v948_v57 = vmax.f32 %v9719_v14, 0.0 }
 0x196   :  { %v1711_v17 = vmax.f32 %v1187_v53, %v6907_v5  ;;  %v1105_v37 = vrot.slane %v1020_v43, 6  ;;  %v1938_v22 = vperm.slane %v1710_v38, 0  ;;  %v1939_v30 = vperm.slane %v1710_v38, 2 }
 0x197   :  { %v1712_v48 = vmax.f32 %v1189_v50, %v6908_v51  ;;  %v9753_v59 = vmax.f32 %v947_v23, %v949_v42  ;;  %v1713_v62 = vmax.f32 %v1191_v41, %v6909_v35  ;;  %v950_v53 = vmax.f32 %v871_v25, 0.0  ;;  %v2572_v23 = vld.sshfl [vmem:[#allocation1 + $0x30] sm:$0xff pattern:$0x75316420] }
 0x198   :  { %v1940_v36 = vperm.slane %v1711_v17, 0  ;;  %v1941_v11 = vperm.slane %v1711_v17, 2  ;;  %v1193_v21 = vsel %vm1121_vm7, %v1019_v55, %v1105_v37  ;;  %v1192_v13 = vsel %vm1119_vm6, %v1019_v55, %v1105_v37 }
 0x199   :  { %v1942_v27 = vperm.slane %v1712_v48, 0  ;;  %v1943_v46 = vperm.slane %v1712_v48, 2  ;;  %v1194_v14 = vrot.slane %v1193_v21, 2  ;;  %v1195_v50 = vsel %vm1124_vm8, %v1019_v55, %v1105_v37 }
 0x19a   :  { %v2125_v34 = vsel %vm2058_vm9, %v1940_v36, %v1938_v22  ;;  %v2131_v47 = vsel %vm2058_vm9, %v1941_v11, %v1939_v30  ;;  %v1196_v41 = vrot.slane %v1195_v50, 4  ;;  %v1197_v5 = vsel %vm148_vm1, %v1105_v37, %v1019_v55  ;;  %v7304_v36 = vld [vmem:[%s12649_s3 + $0x280] sm:$0xf]  ;;  %v735_v50 = vpop.f32.mrf.mxu1 }
 0x19b   :  { %v2126_v42 = vsel %vm2060_vm10, %v1942_v27, %v2125_v34  ;;  %v9763_v38 = vadd.f32 %v666_v28, %v9199_v54  ;;  %v1944_v43 = vperm.slane %v1713_v62, 0  ;;  %v1198_v51 = vrot.slane %v1197_v5, 6  ;;  %v8288_v27 = vld [vmem:[%s12649_s3 + $0x28c] sm:$0xf0] }
 0x19c   :  { %v6910_v35 = vrot.slane %v1192_v13, 9  ;;  %v6911_v25 = vrot.slane %v1194_v14, 9  ;;  %v1945_v17 = vperm.slane %v1713_v62, 2  ;;  %v2132_v48 = vsel %vm2060_vm10, %v1943_v46, %v2131_v47  ;;  %v2570_v55 = vld.sshfl [vmem:[#allocation1 + $0x20] sm:$0xff pattern:$0x75316420] }
 0x19d   :  { %v6912_v22 = vrot.slane %v1196_v41, 9  ;;  %v1022_v30 = vmax.f32 %v948_v57, %v950_v53  ;;  %v6913_v28 = vrot.slane %v1198_v51, 9  ;;  %v2127_v21 = vsel %vm12688_vm11, %v1944_v43, %v2126_v42 }
 0x19e   :  { %v1714_v37 = vmax.f32 %v1192_v13, %v6910_v35  ;;  %v1715_v11 = vmax.f32 %v1194_v14, %v6911_v25  ;;  %v7305_v46 = vor.u32 %v8288_v27, %v7304_v36  ;;  %v9773_v47 = vpack.c.bf16 %v2572_v23, %v2570_v55  ;;  %v7432_v27 = vld [vmem:[%s12649_s3 + $0x380] sm:$0xf]  ;;  %v2571_v55 = vld.sshfl [vmem:[#allocation1 + $0x28] sm:$0xff pattern:$0x75316420] }
 0x19f   :  { %v1716_v34 = vmax.f32 %v1196_v41, %v6912_v22  ;;  %v1106_v62 = vrot.slane %v1022_v30, 6  ;;  %v2133_v12 = vsel %vm12688_vm11, %v1945_v17, %v2132_v48  ;;  %v9776_v10 = vmax.f32 %v1198_v51, %v6913_v28  ;;  %v2573_v41 = vld.sshfl [vmem:[#allocation1 + $0x38] sm:$0xff pattern:$0x75316420]  ;;  %v804_v17 = vpop.f32.mrf.mxu2  ;;  %v873_v48 = vpop.f32.mrf.mxu3 }
 0x1a0   :  { %12739 = vst [vmem:[#allocation14_spill] sm:$0xff] %v9773_v47  ;;  %v1946_v57 = vperm.slane %v1714_v37, 0  ;;  %v1947_v53 = vperm.slane %v1714_v37, 2  ;;  %v1948_v5 = vperm.slane %v1715_v11, 0  ;;  %v1949_v32 = vperm.slane %v1715_v11, 2  ;;  %4067 = vmatpush.bf16.msrb.mxu2 %v7305_v46  ;;  %3999 = vmatmul.bf16.gmra.mxu0 %v9773_v47 }
 0x1a1   :  { %v1950_v44 = vperm.slane %v1716_v34, 0  ;;  %v1951_v4 = vperm.slane %v1716_v34, 2  ;;  %v1199_v23 = vsel %vm1119_vm6, %v9753_v59, %v1106_v62  ;;  %v9784_v42 = vadd.f32 %v735_v50, %v9197_v52 }
 0x1a2   :  { %v2128_v13 = vsel %vm12740_vm2, %v1946_v57, %v2127_v21  ;;  %v2134_v14 = vsel %vm12741_vm4, %v1947_v53, %v2133_v12  ;;  %v1200_v35 = vsel %vm1121_vm7, %v9753_v59, %v1106_v62  ;;  %v1202_v25 = vsel %vm1124_vm8, %v9753_v59, %v1106_v62 }
 0x1a3   :  { %v2129_v43 = vsel %vm2066_vm13, %v1948_v5, %v2128_v13  ;;  %v2135_v51 = vsel %vm2066_vm13, %v1949_v32, %v2134_v14  ;;  %vm12742_vm12 = vcmask 1047559   ;;  %v1201_v30 = vrot.slane %v1200_v35, 2  ;;  %v8320_v32 = vld [vmem:[%s12649_s3 + $0x38c] sm:$0xf0]  ;;  %v668_v35 = vpop.f32.mrf.mxu0 }
 0x1a4   :  { %v2130_v12 = vsel %vm12742_vm12, %v1950_v44, %v2129_v43  ;;  %vm12743_vm15 = vmmov %vm12742_vm12  ;;  %v1203_v36 = vrot.slane %v1202_v25, 4  ;;  %v1952_v28 = vperm.slane %v9776_v10, 0  ;;  %vm12744_vm2 = vcmask 1040384  }
 0x1a5   :  { %v2136_v22 = vsel %vm12743_vm15, %v1951_v4, %v2135_v51  ;;  %v1204_v44 = vsel %vm148_vm1, %v1106_v62, %v9753_v59  ;;  %v6914_v11 = vrot.slane %v1199_v23, 9  ;;  %v6915_v34 = vrot.slane %v1201_v30, 9  ;;  %vm12745_vm4 = vmmov %vm12744_vm2 }
 0x1a6   :  { %v2265_v37 = vsel %vm12744_vm2, 0.0, %v2136_v22  ;;  %v1205_v21 = vrot.slane %v1204_v44, 6  ;;  %v6916_v50 = vrot.slane %v1203_v36, 9  ;;  %v2264_v46 = vsel %vm12745_vm4, 0.0, %v2130_v12 }
 0x1a7   :  { %v2329_v4 = vrot.slane %v2265_v37, 4  ;;  %v1718_v57 = vmax.f32 %v1199_v23, %v6914_v11  ;;  %v9805_v53 = vpack.c.bf16 %v2573_v41, %v2571_v55  ;;  %v7433_v5 = vor.u32 %v8320_v32, %v7432_v27 }
 0x1a8   :  { %v6917_v43 = vrot.slane %v1205_v21, 9  ;;  %v1719_v51 = vmax.f32 %v1201_v30, %v6915_v34  ;;  %v1720_v22 = vmax.f32 %v1203_v36, %v6916_v50  ;;  %v1953_v30 = vperm.slane %v9776_v10, 2  ;;  %v737_v36 = vpop.f32.mrf.mxu1 }
 0x1a9   :  { %12746 = vst [vmem:[#allocation15_spill] sm:$0xff] %v9805_v53  ;;  %v2352_v13 = vsel %vm2339_vm0, %v2264_v46, %v2329_v4  ;;  %v2353_v14 = vsel %vm2339_vm0, %v2329_v4, %v2264_v46  ;;  %4038 = vmatmul.bf16.gmra.mxu1 %v9805_v53  ;;  %4106 = vmatpush.bf16.msrb.mxu3 %v7433_v5  ;;  %v1954_v23 = vperm.slane %v1718_v57, 0  ;;  %v1955_v41 = vperm.slane %v1718_v57, 2  ;;  %v806_v5 = vpop.f32.mrf.mxu2 }
 0x1aa   :  { %v2354_v25 = vrot.slane %v2353_v14, 4  ;;  %v6969_v59 = vrot.slane %v2352_v13, 9  ;;  %v6977_v62 = vrot.slane %v2352_v13, 10  ;;  %2575 = vst [vmem:[#allocation1 + $0x1] ss:$2 sm:$0xff] %v2352_v13  ;;  %v1721_v12 = vmax.f32 %v1205_v21, %v6917_v43  ;;  %v875_v13 = vpop.f32.mrf.mxu3 }
 0x1ab   :  { %v1956_v55 = vperm.slane %v1719_v51, 0  ;;  %v1957_v37 = vperm.slane %v1719_v51, 2  ;;  %v1958_v44 = vperm.slane %v1720_v22, 0  ;;  %v1959_v11 = vperm.slane %v1720_v22, 2 }
 0x1ac   :  { %v2422_v27 = vrot.slane %v2354_v25, 5  ;;  %v2503_v32 = vrot.slane %v2354_v25, 6  ;;  %2576 = vst [vmem:[#allocation1 + $0x10] ss:$2 sm:$0xff] %v2354_v25  ;;  %v2137_v4 = vsel %vm2076_vm3, %v1954_v23, %v1952_v28  ;;  %v951_v34 = vmax.f32 %v9763_v38, 0.0 }
 0x1ad   :  { %v1960_v46 = vperm.slane %v1721_v12, 0  ;;  %v952_v57 = vmax.f32 %v9784_v42, 0.0  ;;  %v2138_v10 = vsel %vm2058_vm9, %v1956_v55, %v2137_v4  ;;  %v2141_v28 = vsel %vm2076_vm3, %v1955_v41, %v1953_v30 }
 0x1ae   :  { %v9815_v50 = vsel %vm9318_vm5, %v6969_v59, %v2422_v27  ;;  %v9819_v21 = vsel %vm9324_vm14, %v6977_v62, %v2503_v32  ;;  %v805_v38 = vadd.f32 %v804_v17, %v9205_v40  ;;  %v874_v14 = vadd.f32 %v873_v48, %v9207_v45 }
 0x1af   :  { %v1961_v43 = vperm.slane %v1721_v12, 2  ;;  %v2139_v51 = vsel %vm2060_vm10, %v1958_v44, %v2138_v10  ;;  %v2142_v25 = vsel %vm2058_vm9, %v1957_v37, %v2141_v28  ;;  %v669_v59 = vadd.f32 %v668_v35, %v9199_v54  ;;  %v671_v35 = vpop.f32.mrf.mxu0 }
 0x1b0   :  { %v2143_v62 = vsel %vm2060_vm10, %v1959_v11, %v2142_v25  ;;  %v738_v42 = vadd.f32 %v737_v36, %v9197_v52  ;;  %v807_v22 = vadd.f32 %v806_v5, %v9205_v40  ;;  %v876_v23 = vadd.f32 %v875_v13, %v9207_v45 }
 0x1b1   :  { %v2140_v41 = vsel %vm12688_vm11, %v1960_v46, %v2139_v51  ;;  %v2144_v17 = vsel %vm12688_vm11, %v1961_v43, %v2143_v62  ;;  %v953_v48 = vmax.f32 %v805_v38, 0.0  ;;  %v954_v12 = vmax.f32 %v874_v14, 0.0 }
 0x1b2   :  { %v2424_v55 = vrot.slane %v2422_v27, 4  ;;  %vm12747_vm12 = vcmask 1044480   ;;  %v955_v37 = vmax.f32 %v669_v59, 0.0  ;;  %v957_v30 = vmax.f32 %v807_v22, 0.0 }
 0x1b3   :  { %v2282_v44 = vsel %vm12747_vm12, %v2144_v17, 0.0  ;;  %v2505_v4 = vrot.slane %v2503_v32, 4  ;;  %v1024_v10 = vmax.f32 %v952_v57, %v954_v12  ;;  %v958_v36 = vmax.f32 %v876_v23, 0.0  ;;  %vm12748_vm15 = vmmov %vm12747_vm12 }
 0x1b4   :  { %v2330_v11 = vrot.slane %v2282_v44, 4  ;;  %v2281_v5 = vsel %vm12748_vm15, %v2140_v41, 0.0  ;;  %v1023_v28 = vmax.f32 %v951_v34, %v953_v48  ;;  %v956_v13 = vmax.f32 %v738_v42, 0.0  ;;  %v740_v48 = vpop.f32.mrf.mxu1 }
 0x1b5   :  { %v1025_v25 = vmax.f32 %v955_v37, %v957_v30  ;;  %v1107_v14 = vrot.slane %v1024_v10, 6  ;;  %v9840_v27 = vadd.f32 %v671_v35, %v9199_v54  ;;  %vm12752_vm2 = vcmask 1045509  }
 0x1b6   :  { %v2355_v46 = vsel %vm2339_vm0, %v2281_v5, %v2330_v11  ;;  %v2378_v38 = vsel %vm2339_vm0, %v2330_v11, %v2281_v5  ;;  %v1026_v32 = vmax.f32 %v956_v13, %v958_v36  ;;  %vm12753_vm4 = vmmov %vm12752_vm2  ;;  %vm12754_vm12 = vcmask 1047559  }
 0x1b7   :  { %v2379_v43 = vrot.slane %v2378_v38, 4  ;;  %v2425_v51 = vrot.slane %v2355_v46, 5  ;;  %v2506_v59 = vrot.slane %v2355_v46, 6  ;;  %2577 = vst [vmem:[#allocation1 + $0x11] ss:$2 sm:$0xff] %v2355_v46  ;;  %v1206_v57 = vsel %vm1119_vm6, %v1023_v28, %v1107_v14  ;;  %v673_v26 = vpop.f32.mrf.mxu0  ;;  %vm12755_vm15 = vmmov %vm12754_vm12 }
 0x1b8   :  { %v1207_v62 = vsel %vm1121_vm7, %v1023_v28, %v1107_v14  ;;  %v1209_v34 = vsel %vm1124_vm8, %v1023_v28, %v1107_v14  ;;  %v1211_v42 = vsel %vm148_vm1, %v1107_v14, %v1023_v28  ;;  %v6918_v11 = vrot.slane %v1206_v57, 9 }
 0x1b9   :  { %v9848_v22 = vsel %vm9318_vm5, %v2424_v55, %v2425_v51  ;;  %v9850_v23 = vrot.slane %v2425_v51, 4  ;;  %v9852_v41 = vrot.slane %v2379_v43, 5  ;;  %v9856_v17 = vsel %vm9324_vm14, %v2505_v4, %v2506_v59 }
 0x1ba   :  { %12749 = vst [vmem:[#allocation16_spill] sm:$0xff] %v9856_v17  ;;  %v9858_v12 = vrot.slane %v2506_v59, 4  ;;  %v9860_v44 = vrot.slane %v2379_v43, 6  ;;  %v1208_v37 = vrot.slane %v1207_v62, 2  ;;  %v1210_v30 = vrot.slane %v1209_v34, 4  ;;  %v809_v62 = vpop.f32.mrf.mxu2  ;;  %v878_v34 = vpop.f32.mrf.mxu3 }
 0x1bb   :  { %v1212_v35 = vrot.slane %v1211_v42, 6  ;;  %v1108_v10 = vrot.slane %v1026_v32, 6  ;;  %v9871_v28 = vadd.f32 %v740_v48, %v9197_v52  ;;  %v1722_v46 = vmax.f32 %v1206_v57, %v6918_v11 }
 0x1bc   :  { %12750 = vst [vmem:[#allocation17_spill] sm:$0xff] %v9858_v12  ;;  %v6919_v36 = vrot.slane %v1208_v37, 9  ;;  %v6920_v5 = vrot.slane %v1210_v30, 9  ;;  %v959_v19 = vmax.f32 %v9840_v27, 0.0 }
 0x1bd   :  { %12751 = vst [vmem:[#allocation18_spill] sm:$0xff] %v9860_v44  ;;  %v6921_v13 = vrot.slane %v1212_v35, 9  ;;  %v1213_v38 = vsel %vm1119_vm6, %v1025_v25, %v1108_v10  ;;  %v1214_v14 = vsel %vm1121_vm7, %v1025_v25, %v1108_v10  ;;  %v1216_v59 = vsel %vm1124_vm8, %v1025_v25, %v1108_v10 }
 0x1be   :  { %v1723_v43 = vmax.f32 %v1208_v37, %v6919_v36  ;;  %v1724_v51 = vmax.f32 %v1210_v30, %v6920_v5  ;;  %v1218_v32 = vsel %vm148_vm1, %v1108_v10, %v1025_v25  ;;  %v1962_v4 = vperm.slane %v1722_v46, 0 }
 0x1bf   :  { %v1725_v42 = vmax.f32 %v1212_v35, %v6921_v13  ;;  %v1963_v55 = vperm.slane %v1722_v46, 2  ;;  %v1215_v53 = vrot.slane %v1214_v14, 2  ;;  %v1217_v11 = vrot.slane %v1216_v59, 4 }
 0x1c0   :  { %v1964_v48 = vperm.slane %v1723_v43, 0  ;;  %v1965_v47 = vperm.slane %v1723_v43, 2  ;;  %v1966_v56 = vperm.slane %v1724_v51, 0  ;;  %v1967_v57 = vperm.slane %v1724_v51, 2 }
 0x1c1   :  { %v1219_v20 = vrot.slane %v1218_v32, 6  ;;  %v810_v37 = vadd.f32 %v809_v62, %v9205_v40  ;;  %v6922_v10 = vrot.slane %v1213_v38, 9  ;;  %v6923_v36 = vrot.slane %v1215_v53, 9 }
 0x1c2   :  { %v2145_v30 = vsel %vm2058_vm9, %v1964_v48, %v1962_v4  ;;  %v2151_v25 = vsel %vm2058_vm9, %v1965_v47, %v1963_v55  ;;  %v1968_v35 = vperm.slane %v1725_v42, 0  ;;  %v1969_v5 = vperm.slane %v1725_v42, 2  ;;  %v742_v42 = vpop.f32.mrf.mxu1 }
 0x1c3   :  { %v6924_v13 = vrot.slane %v1217_v11, 9  ;;  %v6925_v46 = vrot.slane %v1219_v20, 9  ;;  %v2146_v14 = vsel %vm2060_vm10, %v1966_v56, %v2145_v30  ;;  %v2152_v43 = vsel %vm2060_vm10, %v1967_v57, %v2151_v25  ;;  %v880_v25 = vpop.f32.mrf.mxu3 }
 0x1c4   :  { %v1726_v51 = vmax.f32 %v1213_v38, %v6922_v10  ;;  %v1727_v59 = vmax.f32 %v1215_v53, %v6923_v36  ;;  %v961_v62 = vmax.f32 %v810_v37, 0.0  ;;  %v879_v4 = vadd.f32 %v878_v34, %v9207_v45  ;;  %v8284_v53 = vld [vmem:[%s12649_s3 + $0x26c] sm:$0xf0]  ;;  %v2583_v10 = vld.sshfl [vmem:[#allocation1 + $0x8] sm:$0xff pattern:$0x75316420] }
 0x1c5   :  { %v1728_v32 = vmax.f32 %v1217_v11, %v6924_v13  ;;  %v9883_v27 = vmax.f32 %v1219_v20, %v6925_v46  ;;  %v2147_v6 = vsel %vm12688_vm11, %v1968_v35, %v2146_v14  ;;  %v2153_v56 = vsel %vm12688_vm11, %v1969_v5, %v2152_v43  ;;  %v7288_v20 = vld [vmem:[%s12649_s3 + $0x260] sm:$0xf]  ;;  %v811_v46 = vpop.f32.mrf.mxu2 }
 0x1c6   :  { %v1970_v48 = vperm.slane %v1726_v51, 0  ;;  %v1971_v47 = vperm.slane %v1726_v51, 2  ;;  %v1972_v55 = vperm.slane %v1727_v59, 0  ;;  %v1973_v61 = vperm.slane %v1727_v59, 2  ;;  %v7416_v13 = vld [vmem:[%s12649_s3 + $0x360] sm:$0xf] }
 0x1c7   :  { %v1974_v30 = vperm.slane %v1728_v32, 0  ;;  %v1975_v57 = vperm.slane %v1728_v32, 2  ;;  %v960_v11 = vmax.f32 %v9871_v28, 0.0  ;;  %v962_v37 = vmax.f32 %v879_v4, 0.0 }
 0x1c8   :  { %v2148_v38 = vsel %vm12752_vm2, %v1970_v48, %v2147_v6  ;;  %v2154_v34 = vsel %vm12753_vm4, %v1971_v47, %v2153_v56  ;;  %v674_v5 = vadd.f32 %v673_v26, %v9199_v54  ;;  %v8316_v6 = vld [vmem:[%s12649_s3 + $0x36c] sm:$0xf0]  ;;  %v7289_v59 = vor.u32 %v8284_v53, %v7288_v20  ;;  %v2582_v48 = vld.sshfl [vmem:[#allocation1] sm:$0xff pattern:$0x75316420] }
 0x1c9   :  { %v2149_v36 = vsel %vm2066_vm13, %v1972_v55, %v2148_v38  ;;  %v2155_v35 = vsel %vm2066_vm13, %v1973_v61, %v2154_v34  ;;  %v2584_v28 = vld.sshfl [vmem:[#allocation1 + $0x10] sm:$0xff pattern:$0x75316420]  ;;  %v1028_v51 = vmax.f32 %v960_v11, %v962_v37  ;;  %v1977_v61 = vperm.slane %v9883_v27, 2 }
 0x1ca   :  { %v2150_v14 = vsel %vm12754_vm12, %v1974_v30, %v2149_v36  ;;  %v2156_v43 = vsel %vm12755_vm15, %v1975_v57, %v2155_v35  ;;  %vm12756_vm2 = vcmask 1040384   ;;  %v1027_v32 = vmax.f32 %v959_v19, %v961_v62  ;;  %4068 = vmatpush.bf16.msrb.mxu2 %v7289_v59 }
 0x1cb   :  { %v2267_v26 = vsel %vm12756_vm2, 0.0, %v2156_v43  ;;  %v743_v4 = vadd.f32 %v742_v42, %v9197_v52  ;;  %v1109_v55 = vrot.slane %v1028_v51, 6  ;;  %v7417_v56 = vor.u32 %v8316_v6, %v7416_v13  ;;  %vm12757_vm4 = vmmov %vm12756_vm2 }
 0x1cc   :  { %v2331_v47 = vrot.slane %v2267_v26, 4  ;;  %v812_v38 = vadd.f32 %v811_v46, %v9205_v40  ;;  %v2266_v30 = vsel %vm12757_vm4, 0.0, %v2150_v14  ;;  %v963_v34 = vmax.f32 %v674_v5, 0.0  ;;  %v676_v46 = vpop.f32.mrf.mxu0 }
 0x1cd   :  { %v881_v57 = vadd.f32 %v880_v25, %v9207_v45  ;;  %v9915_v20 = vpack.c.bf16 %v2584_v28, %v2582_v48  ;;  %v1220_v62 = vsel %vm1119_vm6, %v1027_v32, %v1109_v55  ;;  %v1221_v42 = vsel %vm1121_vm7, %v1027_v32, %v1109_v55  ;;  %4107 = vmatpush.bf16.msrb.mxu3 %v7417_v56  ;;  %v745_v28 = vpop.f32.mrf.mxu1 }
 0x1ce   :  { %v2356_v53 = vsel %vm2339_vm0, %v2266_v30, %v2331_v47  ;;  %v2357_v19 = vsel %vm2339_vm0, %v2331_v47, %v2266_v30  ;;  %v1222_v35 = vrot.slane %v1221_v42, 2  ;;  %v1223_v25 = vsel %vm1124_vm8, %v1027_v32, %v1109_v55  ;;  %v883_v30 = vpop.f32.mrf.mxu3 }
 0x1cf   :  { %12758 = vst [vmem:[#allocation19_spill] sm:$0xff] %v9915_v20  ;;  %v9921_v11 = vrot.slane %v2357_v19, 4  ;;  %v6970_v37 = vrot.slane %v2356_v53, 9  ;;  %v6978_v36 = vrot.slane %v2356_v53, 10  ;;  %4004 = vmatmul.bf16.gmra.mxu0 %v9915_v20  ;;  %v1225_v5 = vsel %vm148_vm1, %v1109_v55, %v1027_v32 }
 0x1d0   :  { %2578 = vst [vmem:[#allocation1 + $0x20] ss:$2 sm:$0xff] %v2356_v53  ;;  %v6926_v13 = vrot.slane %v1220_v62, 9  ;;  %v965_v6 = vmax.f32 %v812_v38, 0.0  ;;  %v1224_v51 = vrot.slane %v1223_v25, 4  ;;  %v1226_v59 = vrot.slane %v1225_v5, 6 }
 0x1d1   :  { %v2432_v14 = vrot.slane %v9921_v11, 5  ;;  %v2513_v43 = vrot.slane %v9921_v11, 6  ;;  %2579 = vst [vmem:[#allocation1 + $0x21] ss:$2 sm:$0xff] %v9921_v11  ;;  %v6927_v26 = vrot.slane %v1222_v35, 9  ;;  %v964_v47 = vmax.f32 %v743_v4, 0.0 }
 0x1d2   :  { %v1730_v48 = vmax.f32 %v1220_v62, %v6926_v13  ;;  %v966_v56 = vmax.f32 %v881_v57, 0.0  ;;  %v9938_v38 = vadd.f32 %v676_v46, %v9199_v54  ;;  %v9941_v53 = vadd.f32 %v745_v28, %v9197_v52  ;;  %v2585_v19 = vld.sshfl [vmem:[#allocation1 + $0x18] sm:$0xff pattern:$0x75316420]  ;;  %v814_v13 = vpop.f32.mrf.mxu2 }
 0x1d3   :  { %v9931_v32 = vsel %vm9318_vm5, %v6970_v37, %v2432_v14  ;;  %v9935_v55 = vsel %vm9324_vm14, %v6978_v36, %v2513_v43  ;;  %v6928_v42 = vrot.slane %v1224_v51, 9  ;;  %v6929_v62 = vrot.slane %v1226_v59, 9 }
 0x1d4   :  { %12759 = vst [vmem:[#allocation20_spill] sm:$0xff] %v9931_v32  ;;  %v1731_v4 = vmax.f32 %v1222_v35, %v6927_v26  ;;  %v1978_v57 = vperm.slane %v1730_v48, 0  ;;  %v9943_v11 = vrot.slane %v2432_v14, 4  ;;  %v1979_v25 = vperm.slane %v1730_v48, 2 }
 0x1d5   :  { %12760 = vst [vmem:[#allocation21_spill] sm:$0xff] %v9935_v55  ;;  %v1029_v37 = vmax.f32 %v963_v34, %v965_v6  ;;  %v1030_v5 = vmax.f32 %v964_v47, %v966_v56  ;;  %v1732_v36 = vmax.f32 %v1224_v51, %v6928_v42  ;;  %v1733_v20 = vmax.f32 %v1226_v59, %v6929_v62 }
 0x1d6   :  { %v1980_v55 = vperm.slane %v1731_v4, 0  ;;  %v1981_v46 = vperm.slane %v1731_v4, 2  ;;  %v12761_v32 = vperm.slane %v9883_v27, 0  ;;  %v2161_v63 = vsel %vm2076_vm3, %v1979_v25, %v1977_v61  ;;  %v678_v4 = vpop.f32.mrf.mxu0 }
 0x1d7   :  { %v1110_v3 = vrot.slane %v1030_v5, 6  ;;  %v9949_v35 = vpack.c.bf16 %v2585_v19, %v2583_v10  ;;  %v9954_v6 = vadd.f32 %v814_v13, %v9205_v40  ;;  %v884_v51 = vadd.f32 %v883_v30, %v9207_v45 }
 0x1d8   :  { %v2157_v28 = vsel %vm2076_vm3, %v1978_v57, %v12761_v32  ;;  %v2162_v34 = vsel %vm2058_vm9, %v1981_v46, %v2161_v63  ;;  %v1982_v59 = vperm.slane %v1732_v36, 0  ;;  %v1983_v26 = vperm.slane %v1732_v36, 2  ;;  %v885_v57 = vpop.f32.mrf.mxu3 }
 0x1d9   :  { %12762 = vst [vmem:[#allocation22_spill] sm:$0xff] %v9949_v35  ;;  %v2158_v14 = vsel %vm2058_vm9, %v1980_v55, %v2157_v28  ;;  %v1984_v48 = vperm.slane %v1733_v20, 0  ;;  %v1985_v27 = vperm.slane %v1733_v20, 2  ;;  %4043 = vmatmul.bf16.gmra.mxu1 %v9949_v35  ;;  %v1227_v61 = vsel %vm1119_vm6, %v1029_v37, %v1110_v3 }
 0x1da   :  { %v1228_v10 = vsel %vm1121_vm7, %v1029_v37, %v1110_v3  ;;  %v1230_v47 = vsel %vm1124_vm8, %v1029_v37, %v1110_v3  ;;  %v1232_v56 = vsel %vm148_vm1, %v1110_v3, %v1029_v37  ;;  %v2159_v63 = vsel %vm2060_vm10, %v1982_v59, %v2158_v14  ;;  %v747_v14 = vpop.f32.mrf.mxu1 }
 0x1db   :  { %v2163_v32 = vsel %vm2060_vm10, %v1983_v26, %v2162_v34  ;;  %v1229_v55 = vrot.slane %v1228_v10, 2  ;;  %v1231_v30 = vrot.slane %v1230_v47, 4  ;;  %v2160_v19 = vsel %vm12688_vm11, %v1984_v48, %v2159_v63 }
 0x1dc   :  { %v2164_v20 = vsel %vm12688_vm11, %v1985_v27, %v2163_v32  ;;  %v1233_v42 = vrot.slane %v1232_v56, 6  ;;  %v6930_v62 = vrot.slane %v1227_v61, 9  ;;  %v2515_v25 = vrot.slane %v2513_v43, 4 }
 0x1dd   :  { %vm12763_vm12 = vcmask 1044480   ;;  %v6931_v13 = vrot.slane %v1229_v55, 9  ;;  %v6932_v36 = vrot.slane %v1231_v30, 9  ;;  %v969_v26 = vmax.f32 %v9954_v6, 0.0 }
 0x1de   :  { %v2284_v5 = vsel %vm12763_vm12, %v2164_v20, 0.0  ;;  %vm12764_vm15 = vmmov %vm12763_vm12  ;;  %v6933_v46 = vrot.slane %v1233_v42, 9  ;;  %v1734_v28 = vmax.f32 %v1227_v61, %v6930_v62  ;;  %v970_v48 = vmax.f32 %v884_v51, 0.0  ;;  %v816_v20 = vpop.f32.mrf.mxu2 }
 0x1df   :  { %v2283_v3 = vsel %vm12764_vm15, %v2160_v19, 0.0  ;;  %v2332_v37 = vrot.slane %v2284_v5, 4  ;;  %v1735_v34 = vmax.f32 %v1229_v55, %v6931_v13  ;;  %v1736_v59 = vmax.f32 %v1231_v30, %v6932_v36 }
 0x1e0   :  { %v1737_v43 = vmax.f32 %v1233_v42, %v6933_v46  ;;  %v1986_v47 = vperm.slane %v1734_v28, 0  ;;  %v1987_v19 = vperm.slane %v1734_v28, 2  ;;  %v967_v28 = vmax.f32 %v9938_v38, 0.0 }
 0x1e1   :  { %v2359_v27 = vsel %vm2339_vm0, %v2283_v3, %v2332_v37  ;;  %v2380_v10 = vsel %vm2339_vm0, %v2332_v37, %v2283_v3  ;;  %v1988_v5 = vperm.slane %v1735_v34, 0  ;;  %v1989_v61 = vperm.slane %v1735_v34, 2 }
 0x1e2   :  { %v2381_v56 = vrot.slane %v2380_v10, 4  ;;  %v2435_v63 = vrot.slane %v2359_v27, 5  ;;  %v2516_v32 = vrot.slane %v2359_v27, 6  ;;  %2580 = vst [vmem:[#allocation1 + $0x30] ss:$2 sm:$0xff] %v2359_v27  ;;  %v1990_v62 = vperm.slane %v1736_v59, 0  ;;  %v681_v27 = vpop.f32.mrf.mxu0  ;;  %v888_v10 = vpop.f32.mrf.mxu3 }
 0x1e3   :  { %v1991_v55 = vperm.slane %v1736_v59, 2  ;;  %v968_v3 = vmax.f32 %v9941_v53, 0.0  ;;  %v2165_v37 = vsel %vm2058_vm9, %v1988_v5, %v1986_v47  ;;  %v2171_v46 = vsel %vm2058_vm9, %v1989_v61, %v1987_v19 }
 0x1e4   :  { %v9974_v6 = vsel %vm9318_vm5, %v9943_v11, %v2435_v63  ;;  %v9976_v51 = vrot.slane %v2435_v63, 4  ;;  %v9978_v30 = vrot.slane %v2381_v56, 5  ;;  %v9982_v42 = vsel %vm9324_vm14, %v2515_v25, %v2516_v32  ;;  %v750_v25 = vpop.f32.mrf.mxu1 }
 0x1e5   :  { %12765 = vst [vmem:[#allocation23_spill] sm:$0xff] %v9974_v6  ;;  %v9984_v13 = vrot.slane %v2516_v32, 4  ;;  %v9986_v36 = vrot.slane %v2381_v56, 6  ;;  %v2166_v34 = vsel %vm2060_vm10, %v1990_v62, %v2165_v37  ;;  %v2172_v53 = vsel %vm2060_vm10, %v1991_v55, %v2171_v46 }
 0x1e6   :  { %12766 = vst [vmem:[#allocation24_spill] sm:$0xff] %v9976_v51  ;;  %v1032_v59 = vmax.f32 %v968_v3, %v970_v48  ;;  %v1992_v56 = vperm.slane %v1737_v43, 0  ;;  %v1993_v63 = vperm.slane %v1737_v43, 2  ;;  %v1031_v32 = vmax.f32 %v967_v28, %v969_v26  ;;  %v819_v28 = vpop.f32.mrf.mxu2 }
 0x1e7   :  { %12767 = vst [vmem:[#allocation25_spill] sm:$0xff] %v9978_v30  ;;  %v679_v47 = vadd.f32 %v678_v4, %v9199_v54  ;;  %v748_v38 = vadd.f32 %v747_v14, %v9197_v52  ;;  %v817_v5 = vadd.f32 %v816_v20, %v9205_v40  ;;  %v886_v61 = vadd.f32 %v885_v57, %v9207_v45 }
 0x1e8   :  { %12768 = vst [vmem:[#allocation26_spill] sm:$0xff] %v9982_v42  ;;  %v1111_v19 = vrot.slane %v1032_v59, 6  ;;  %v2167_v62 = vsel %vm12688_vm11, %v1992_v56, %v2166_v34  ;;  %v2173_v55 = vsel %vm12688_vm11, %v1993_v63, %v2172_v53  ;;  %v682_v48 = vadd.f32 %v681_v27, %v9199_v54 }
 0x1e9   :  { %12769 = vst [vmem:[#allocation27_spill] sm:$0xff] %v9984_v13  ;;  %v889_v3 = vadd.f32 %v888_v10, %v9207_v45  ;;  %v751_v46 = vadd.f32 %v750_v25, %v9197_v52  ;;  %v972_v53 = vmax.f32 %v748_v38, 0.0  ;;  %v973_v59 = vmax.f32 %v817_v5, 0.0 }
 0x1ea   :  { %12770 = vst [vmem:[#allocation28_spill] sm:$0xff] %v9986_v36  ;;  %v1234_v26 = vsel %vm1119_vm6, %v1031_v32, %v1111_v19  ;;  %v1235_v4 = vsel %vm1121_vm7, %v1031_v32, %v1111_v19  ;;  %v1237_v43 = vsel %vm1124_vm8, %v1031_v32, %v1111_v19  ;;  %v1239_v14 = vsel %vm148_vm1, %v1111_v19, %v1031_v32 }
 0x1eb   :  { %v1236_v20 = vrot.slane %v1235_v4, 2  ;;  %v1238_v37 = vrot.slane %v1237_v43, 4  ;;  %v6934_v57 = vrot.slane %v1234_v26, 9  ;;  %v1240_v34 = vrot.slane %v1239_v14, 6 }
 0x1ec   :  { %v974_v27 = vmax.f32 %v886_v61, 0.0  ;;  %v971_v11 = vmax.f32 %v679_v47, 0.0  ;;  %v975_v36 = vmax.f32 %v682_v48, 0.0  ;;  %v820_v13 = vadd.f32 %v819_v28, %v9205_v40 }
 0x1ed   :  { %v6935_v56 = vrot.slane %v1236_v20, 9  ;;  %v6936_v10 = vrot.slane %v1238_v37, 9  ;;  %v1738_v63 = vmax.f32 %v1234_v26, %v6934_v57  ;;  %v978_v42 = vmax.f32 %v889_v3, 0.0 }
 0x1ee   :  { %v1034_v35 = vmax.f32 %v972_v53, %v974_v27  ;;  %v976_v43 = vmax.f32 %v751_v46, 0.0  ;;  %v6937_v30 = vrot.slane %v1240_v34, 9  ;;  %v1033_v51 = vmax.f32 %v971_v11, %v973_v59 }
 0x1ef   :  { %v1739_v32 = vmax.f32 %v1236_v20, %v6935_v56  ;;  %v1740_v19 = vmax.f32 %v1238_v37, %v6936_v10  ;;  %v1994_v4 = vperm.slane %v1738_v63, 0  ;;  %v1995_v25 = vperm.slane %v1738_v63, 2 }
 0x1f0   :  { %v1112_v14 = vrot.slane %v1034_v35, 6  ;;  %vm12771_vm2 = vcmask 1045509   ;;  %v977_v48 = vmax.f32 %v820_v13, 0.0  ;;  %v1036_v57 = vmax.f32 %v976_v43, %v978_v42 }
 0x1f1   :  { %v1996_v38 = vperm.slane %v1739_v32, 0  ;;  %v1997_v5 = vperm.slane %v1739_v32, 2  ;;  %v1998_v61 = vperm.slane %v1740_v19, 0  ;;  %v1999_v6 = vperm.slane %v1740_v19, 2  ;;  %vm12772_vm4 = vmmov %vm12771_vm2 }
 0x1f2   :  { %v2168_v26 = vsel %vm12771_vm2, %v1994_v4, %v2167_v62  ;;  %v2174_v47 = vsel %vm12772_vm4, %v1995_v25, %v2173_v55  ;;  %v1241_v37 = vsel %vm1119_vm6, %v1033_v51, %v1112_v14  ;;  %v1242_v46 = vsel %vm1121_vm7, %v1033_v51, %v1112_v14 }
 0x1f3   :  { %v2169_v3 = vsel %vm2066_vm13, %v1996_v38, %v2168_v26  ;;  %v2175_v20 = vsel %vm2066_vm13, %v1997_v5, %v2174_v47  ;;  %vm12773_vm12 = vcmask 1047559   ;;  %v1243_v28 = vrot.slane %v1242_v46, 2 }
 0x1f4   :  { %v2170_v35 = vsel %vm12773_vm12, %v1998_v61, %v2169_v3  ;;  %vm12774_vm15 = vmmov %vm12773_vm12  ;;  %v1244_v53 = vsel %vm1124_vm8, %v1033_v51, %v1112_v14  ;;  %v1741_v62 = vmax.f32 %v1240_v34, %v6937_v30  ;;  %vm12775_vm2 = vcmask 1040384  }
 0x1f5   :  { %v2176_v11 = vsel %vm12774_vm15, %v1999_v6, %v2175_v20  ;;  %v1245_v13 = vrot.slane %v1244_v53, 4  ;;  %v1246_v42 = vsel %vm148_vm1, %v1112_v14, %v1033_v51  ;;  %v6938_v56 = vrot.slane %v1241_v37, 9  ;;  %vm12776_vm4 = vmmov %vm12775_vm2 }
 0x1f6   :  { %v2269_v55 = vsel %vm12775_vm2, 0.0, %v2176_v11  ;;  %v1247_v27 = vrot.slane %v1246_v42, 6  ;;  %v6939_v10 = vrot.slane %v1243_v28, 9  ;;  %v2268_v63 = vsel %vm12776_vm4, 0.0, %v2170_v35 }
 0x1f7   :  { %v2333_v59 = vrot.slane %v2269_v55, 4  ;;  %v6940_v32 = vrot.slane %v1245_v13, 9  ;;  %v1035_v19 = vmax.f32 %v975_v36, %v977_v48  ;;  %v1113_v4 = vrot.slane %v1036_v57, 6  ;;  %v752_v55 = vpop.f32.mrf.mxu1 }
 0x1f8   :  { %v6941_v25 = vrot.slane %v1247_v27, 9  ;;  %v1742_v30 = vmax.f32 %v1241_v37, %v6938_v56  ;;  %v1743_v51 = vmax.f32 %v1243_v28, %v6939_v10  ;;  %v2000_v20 = vperm.slane %v1741_v62, 0 }
 0x1f9   :  { %v2360_v6 = vsel %vm2339_vm0, %v2268_v63, %v2333_v59  ;;  %v2361_v43 = vsel %vm2339_vm0, %v2333_v59, %v2268_v63  ;;  %v1744_v14 = vmax.f32 %v1245_v13, %v6940_v32  ;;  %v2001_v37 = vperm.slane %v1741_v62, 2  ;;  %v683_v32 = vpop.f32.mrf.mxu0 }
 0x1fa   :  { %v10030_v34 = vrot.slane %v2361_v43, 4  ;;  %v6971_v38 = vrot.slane %v2360_v6, 9  ;;  %v6979_v5 = vrot.slane %v2360_v6, 10  ;;  %2581 = vst [vmem:[#allocation1 + $0x31] ss:$2 sm:$0xff] %v2360_v6  ;;  %v1745_v61 = vmax.f32 %v1247_v27, %v6941_v25  ;;  %v890_v6 = vpop.f32.mrf.mxu3 }
 0x1fb   :  { %v2002_v26 = vperm.slane %v1742_v30, 0  ;;  %v2003_v47 = vperm.slane %v1742_v30, 2  ;;  %v2004_v48 = vperm.slane %v1743_v51, 0  ;;  %v2005_v57 = vperm.slane %v1743_v51, 2 }
 0x1fc   :  { %v2442_v3 = vrot.slane %v10030_v34, 5  ;;  %v2523_v36 = vrot.slane %v10030_v34, 6  ;;  %2590 = vst [vmem:[#allocation1] ss:$2 sm:$0xff] %v10030_v34  ;;  %v2006_v46 = vperm.slane %v1744_v14, 0  ;;  %v2007_v35 = vperm.slane %v1744_v14, 2 }
 0x1fd   :  { %v2008_v53 = vperm.slane %v1745_v61, 0  ;;  %v2009_v13 = vperm.slane %v1745_v61, 2  ;;  %v2177_v42 = vsel %vm2076_vm3, %v2002_v26, %v2000_v20  ;;  %v2181_v59 = vsel %vm2076_vm3, %v2003_v47, %v2001_v37  ;;  %v7272_v14 = vld [vmem:[%s12649_s3 + $0x240] sm:$0xf]  ;;  %v8280_v61 = vld [vmem:[%s12649_s3 + $0x24c] sm:$0xf0] }
 0x1fe   :  { %v10037_v11 = vsel %vm9318_vm5, %v6971_v38, %v2442_v3  ;;  %v10041_v28 = vsel %vm9324_vm14, %v6979_v5, %v2523_v36  ;;  %v1249_v27 = vsel %vm1121_vm7, %v1035_v19, %v1113_v4  ;;  %v2178_v62 = vsel %vm2058_vm9, %v2004_v48, %v2177_v42  ;;  %v821_v38 = vpop.f32.mrf.mxu2  ;;  %v7400_v26 = vld [vmem:[%s12649_s3 + $0x340] sm:$0xf] }
 0x1ff   :  { %12777 = vst [vmem:[#allocation29_spill] sm:$0xff] %v10037_v11  ;;  %v2182_v56 = vsel %vm2058_vm9, %v2005_v57, %v2181_v59  ;;  %v1248_v10 = vsel %vm1119_vm6, %v1035_v19, %v1113_v4  ;;  %v1251_v63 = vsel %vm1124_vm8, %v1035_v19, %v1113_v4  ;;  %v2179_v43 = vsel %vm2060_vm10, %v2006_v46, %v2178_v62 }
 0x200   :  { %12778 = vst [vmem:[#allocation30_spill] sm:$0xff] %v10041_v28  ;;  %v2183_v25 = vsel %vm2060_vm10, %v2007_v35, %v2182_v56  ;;  %v1250_v30 = vrot.slane %v1249_v27, 2  ;;  %v1253_v34 = vsel %vm148_vm1, %v1113_v4, %v1035_v19  ;;  %v2180_v5 = vsel %vm12688_vm11, %v2008_v53, %v2179_v43  ;;  %v8312_v4 = vld [vmem:[%s12649_s3 + $0x34c] sm:$0xf0] }
 0x201   :  { %v2184_v51 = vsel %vm12688_vm11, %v2009_v13, %v2183_v25  ;;  %vm12779_vm12 = vcmask 1044480   ;;  %v7273_v19 = vor.u32 %v8280_v61, %v7272_v14  ;;  %v1252_v48 = vrot.slane %v1251_v63, 4 }
 0x202   :  { %v2286_v47 = vsel %vm12779_vm12, %v2184_v51, 0.0  ;;  %v7401_v20 = vor.u32 %v8312_v4, %v7400_v26  ;;  %v1254_v37 = vrot.slane %v1253_v34, 6  ;;  %v6942_v46 = vrot.slane %v1248_v10, 9  ;;  %vm12780_vm15 = vmmov %vm12779_vm12 }
 0x203   :  { %v2334_v57 = vrot.slane %v2286_v47, 4  ;;  %v2285_v35 = vsel %vm12780_vm15, %v2180_v5, 0.0  ;;  %4069 = vmatpush.bf16.msrb.mxu2 %v7273_v19  ;;  %v6943_v53 = vrot.slane %v1250_v30, 9  ;;  %v6944_v13 = vrot.slane %v1252_v48, 9  ;;  %v755_v5 = vpop.f32.mrf.mxu1  ;;  %v893_v47 = vpop.f32.mrf.mxu3 }
 0x204   :  { %4108 = vmatpush.bf16.msrb.mxu3 %v7401_v20  ;;  %v1746_v59 = vmax.f32 %v1248_v10, %v6942_v46  ;;  %v684_v27 = vadd.f32 %v683_v32, %v9199_v54  ;;  %v753_v56 = vadd.f32 %v752_v55, %v9197_v52  ;;  %v10075_v63 = vrot.slane %v2442_v3, 4  ;;  %v686_v3 = vpop.f32.mrf.mxu0  ;;  %v2586_v19 = vld.sshfl [vmem:[#allocation1 + $0x20] sm:$0xff pattern:$0x75316420] }
 0x205   :  { %v10070_v42 = vsel %vm2339_vm0, %v2285_v35, %v2334_v57  ;;  %v1747_v62 = vmax.f32 %v1250_v30, %v6943_v53  ;;  %v10078_v43 = vsel %vm2339_vm0, %v2334_v57, %v2285_v35  ;;  %v6945_v25 = vrot.slane %v1254_v37, 9  ;;  %v2589_v53 = vld.sshfl [vmem:[#allocation1 + $0x38] sm:$0xff pattern:$0x75316420] }
 0x206   :  { %2591 = vst [vmem:[#allocation1 + $0x1] ss:$2 sm:$0xff] %v10070_v42  ;;  %v1748_v34 = vmax.f32 %v1252_v48, %v6944_v13  ;;  %v10080_v51 = vrot.slane %v2523_v36, 4  ;;  %v12680_v14 = vrot.slane %v10070_v42, 5  ;;  %v822_v10 = vadd.f32 %v821_v38, %v9205_v40  ;;  %v824_v20 = vpop.f32.mrf.mxu2 }
 0x207   :  { %v891_v32 = vadd.f32 %v890_v6, %v9207_v45  ;;  %v2010_v61 = vperm.slane %v1746_v59, 0  ;;  %v2012_v30 = vperm.slane %v1747_v62, 0  ;;  %v2013_v26 = vperm.slane %v1747_v62, 2  ;;  %v2588_v36 = vld.sshfl [vmem:[#allocation1 + $0x30] sm:$0xff pattern:$0x75316420] }
 0x208   :  { %v979_v55 = vmax.f32 %v684_v27, 0.0  ;;  %v2011_v4 = vperm.slane %v1746_v59, 2  ;;  %v2014_v57 = vperm.slane %v1748_v34, 0  ;;  %v980_v48 = vmax.f32 %v753_v56, 0.0 }
 0x209   :  { %v10087_v35 = vmax.f32 %v1254_v37, %v6945_v25  ;;  %v2015_v38 = vperm.slane %v1748_v34, 2  ;;  %v2185_v6 = vsel %vm2058_vm9, %v2012_v30, %v2010_v61  ;;  %v10092_v13 = vrot.slane %v12680_v14, 4  ;;  %v2587_v61 = vld.sshfl [vmem:[#allocation1 + $0x28] sm:$0xff pattern:$0x75316420] }
 0x20a   :  { %v2191_v27 = vsel %vm2058_vm9, %v2013_v26, %v2011_v4  ;;  %v981_v62 = vmax.f32 %v822_v10, 0.0  ;;  %v982_v59 = vmax.f32 %v891_v32, 0.0  ;;  %v687_v37 = vadd.f32 %v686_v3, %v9199_v54 }
 0x20b   :  { %v756_v25 = vadd.f32 %v755_v5, %v9197_v52  ;;  %v825_v34 = vadd.f32 %v824_v20, %v9205_v40  ;;  %v12781_v30 = vrot.slane %v10078_v43, 4  ;;  %v2186_v10 = vsel %vm2060_vm10, %v2014_v57, %v2185_v6  ;;  %v757_v6 = vpop.f32.mrf.mxu1 }
 0x20c   :  { %v1038_v32 = vmax.f32 %v980_v48, %v982_v59  ;;  %v894_v26 = vadd.f32 %v893_v47, %v9207_v45  ;;  %v2016_v3 = vperm.slane %v10087_v35, 0  ;;  %v2017_v5 = vperm.slane %v10087_v35, 2 }
 0x20d   :  { %v10095_v56 = vld.sshfl [vmem:[#allocation1] sm:$0xff pattern:$0x75316420]  ;;  %v10097_v28 = vld.sshfl [vmem:[#allocation1 + $0x8] sm:$0xff pattern:$0x75316420]  ;;  %v2192_v4 = vsel %vm2060_vm10, %v2015_v38, %v2191_v27  ;;  %v1037_v20 = vmax.f32 %v979_v55, %v981_v62  ;;  %v10115_v1 = vpack.c.bf16 %v2589_v53, %v2587_v61 }
 0x20e   :  { %v10104_v46 = vrot.slane %v12781_v30, 5  ;;  %2630 = vst [vmem:[#allocation1] ss:$2 sm:$0xff] %v9330_v9  ;;  %v1114_v14 = vrot.slane %v1038_v32, 6  ;;  %v986_v11 = vmax.f32 %v894_v26, 0.0  ;;  %v10113_v30 = vpack.c.bf16 %v2588_v36, %v2586_v19 }
 0x20f   :  { %2632 = vst [vmem:[#allocation1 + $0x1] ss:$2 sm:$0xff] %v9377_v7  ;;  %v2187_v9 = vsel %vm12688_vm11, %v2016_v3, %v2186_v10  ;;  %v983_v57 = vmax.f32 %v687_v37, 0.0  ;;  %v984_v48 = vmax.f32 %v756_v25, 0.0  ;;  %v985_v47 = vmax.f32 %v825_v34, 0.0  ;;  %v688_v25 = vpop.f32.mrf.mxu0  ;;  %4048 = vmatmul.bf16.gmra.mxu1 %v10115_v1  ;;  %v895_v34 = vpop.f32.mrf.mxu3 }
 0x210   :  { %12782 = vst [vmem:[#allocation31_spill] sm:$0xff] %v10113_v30  ;;  %v1255_v7 = vsel %vm1119_vm6, %v1037_v20, %v1114_v14  ;;  %v1256_v59 = vsel %vm1121_vm7, %v1037_v20, %v1114_v14  ;;  %v1258_v35 = vsel %vm1124_vm8, %v1037_v20, %v1114_v14  ;;  %v1260_v55 = vsel %vm148_vm1, %v1114_v14, %v1037_v20  ;;  %v7256_v19 = vld [vmem:[%s12649_s3 + $0x220] sm:$0xf]  ;;  %v8276_v36 = vld [vmem:[%s12649_s3 + $0x22c] sm:$0xf0] }
 0x211   :  { %12783 = vst [vmem:[#allocation32_spill] sm:$0xff] %v10115_v1  ;;  %4009 = vmatmul.bf16.gmra.mxu0 %v10113_v30  ;;  %v7384_v38 = vld [vmem:[%s12649_s3 + $0x320] sm:$0xf]  ;;  %v1257_v53 = vrot.slane %v1256_v59, 2  ;;  %v1259_v27 = vrot.slane %v1258_v35, 4  ;;  %v1261_v62 = vrot.slane %v1260_v55, 6  ;;  %v1040_v61 = vmax.f32 %v984_v48, %v986_v11  ;;  %v826_v35 = vpop.f32.mrf.mxu2 }
 0x212   :  { %v6946_v37 = vrot.slane %v1255_v7, 9  ;;  %v8308_v14 = vld [vmem:[%s12649_s3 + $0x32c] sm:$0xf0]  ;;  %v758_v10 = vadd.f32 %v757_v6, %v9197_v52  ;;  %v7257_v32 = vor.u32 %v8276_v36, %v7256_v19  ;;  %v2193_v1 = vsel %vm12688_vm11, %v2017_v5, %v2192_v4 }
 0x213   :  { %v7385_v26 = vor.u32 %v8308_v14, %v7384_v38  ;;  %v6947_v3 = vrot.slane %v1257_v53, 9  ;;  %v6948_v20 = vrot.slane %v1259_v27, 9  ;;  %v6949_v30 = vrot.slane %v1261_v62, 9 }
 0x214   :  { %v1750_v59 = vmax.f32 %v1255_v7, %v6946_v37  ;;  %v10143_v12 = vadd.f32 %v688_v25, %v9199_v54  ;;  %4070 = vmatpush.bf16.msrb.mxu2 %v7257_v32  ;;  %v896_v11 = vadd.f32 %v895_v34, %v9207_v45  ;;  %v12784_v48 = vsel %vm9318_vm5, %v9731_v58, %v9733_v33 }
 0x215   :  { %4109 = vmatpush.bf16.msrb.mxu3 %v7385_v26  ;;  %v1751_v6 = vmax.f32 %v1257_v53, %v6947_v3  ;;  %v1752_v7 = vmax.f32 %v1259_v27, %v6948_v20  ;;  %v1039_v36 = vmax.f32 %v983_v57, %v985_v47  ;;  %v1115_v4 = vrot.slane %v1040_v61, 6 }
 0x216   :  { %v10137_v55 = vld.sshfl [vmem:[#allocation1] sm:$0xff pattern:$0x75316420]  ;;  %v10139_v44 = vld.sshfl [vmem:[#allocation1 + $0x8] sm:$0xff pattern:$0x75316420]  ;;  %v827_v37 = vadd.f32 %v826_v35, %v9205_v40  ;;  %v1753_v26 = vmax.f32 %v1261_v62, %v6949_v30 }
 0x217   :  { %2653 = vst [vmem:[#allocation1] ss:$2 sm:$0xff] %v12784_v48  ;;  %v2018_v19 = vperm.slane %v1750_v59, 0  ;;  %v2019_v5 = vperm.slane %v1750_v59, 2  ;;  %v988_v38 = vmax.f32 %v758_v10, 0.0  ;;  %v2020_v25 = vperm.slane %v1751_v6, 0 }
 0x218   :  { %2654 = vst [vmem:[#allocation1 + $0x1] ss:$2 sm:$0xff] %v9815_v50  ;;  %v2021_v14 = vperm.slane %v1751_v6, 2  ;;  %v2022_v34 = vperm.slane %v1752_v7, 0  ;;  %v2023_v32 = vperm.slane %v1752_v7, 2  ;;  %vm12785_vm2 = vcmask 1045509  }
 0x219   :  { %v2188_v17 = vsel %vm12785_vm2, %v2018_v19, %v2187_v9  ;;  %vm12786_vm4 = vmmov %vm12785_vm2  ;;  %v990_v33 = vmax.f32 %v896_v11, 0.0  ;;  %v1262_v50 = vsel %vm1119_vm6, %v1039_v36, %v1115_v4  ;;  %v1263_v47 = vsel %vm1121_vm7, %v1039_v36, %v1115_v4 }
 0x21a   :  { %v2194_v58 = vsel %vm12786_vm4, %v2019_v5, %v2193_v1  ;;  %v2189_v53 = vsel %vm2066_vm13, %v2020_v25, %v2188_v17  ;;  %vm12787_vm12 = vcmask 1047559   ;;  %v1264_v10 = vrot.slane %v1263_v47, 2 }
 0x21b   :  { %v2195_v57 = vsel %vm2066_vm13, %v2021_v14, %v2194_v58  ;;  %v2190_v27 = vsel %vm12787_vm12, %v2022_v34, %v2189_v53  ;;  %vm12788_vm15 = vmmov %vm12787_vm12  ;;  %v1265_v30 = vsel %vm1124_vm8, %v1039_v36, %v1115_v4  ;;  %vm12789_vm11 = vcmask 1040384   ;;  %v691_v53 = vpop.f32.mrf.mxu0 }
 0x21c   :  { %v2196_v61 = vsel %vm12788_vm15, %v2023_v32, %v2195_v57  ;;  %v2270_v9 = vsel %vm12789_vm11, 0.0, %v2190_v27  ;;  %vm12790_vm2 = vmmov %vm12789_vm11  ;;  %v1266_v62 = vrot.slane %v1265_v30, 4  ;;  %v1267_v17 = vsel %vm148_vm1, %v1115_v4, %v1039_v36 }
 0x21d   :  { %v2271_v1 = vsel %vm12790_vm2, 0.0, %v2196_v61  ;;  %v1268_v20 = vrot.slane %v1267_v17, 6  ;;  %v6950_v59 = vrot.slane %v1262_v50, 9  ;;  %v6951_v35 = vrot.slane %v1264_v10, 9  ;;  %v760_v17 = vpop.f32.mrf.mxu1 }
 0x21e   :  { %v2335_v3 = vrot.slane %v2271_v1, 4  ;;  %v12791_v11 = vrot.slane %v10070_v42, 5  ;;  %v2449_v6 = vsel %vm9318_vm5, %v10092_v13, %v10104_v46  ;;  %v1042_v36 = vmax.f32 %v988_v38, %v990_v33 }
 0x21f   :  { %v10174_v7 = vld.sshfl [vmem:[#allocation1] sm:$0xff pattern:$0x75316420]  ;;  %v10176_v19 = vld.sshfl [vmem:[#allocation1 + $0x8] sm:$0xff pattern:$0x75316420]  ;;  %v1754_v34 = vmax.f32 %v1262_v50, %v6950_v59  ;;  %v1755_v58 = vmax.f32 %v1264_v10, %v6951_v35  ;;  %v898_v59 = vpop.f32.mrf.mxu3 }
 0x220   :  { %v2446_v48 = vsel %vm9318_vm5, %v10075_v63, %v12791_v11  ;;  %v10179_v5 = vsel %vm2339_vm0, %v2270_v9, %v2335_v3  ;;  %v2365_v4 = vsel %vm2339_vm0, %v2335_v3, %v2270_v9  ;;  %v6952_v25 = vrot.slane %v1266_v62, 9  ;;  %2670 = vst [vmem:[#allocation1 + $0x1] ss:$2 sm:$0xff] %v2449_v6 }
 0x221   :  { %2669 = vst [vmem:[#allocation1] ss:$2 sm:$0xff] %v2446_v48  ;;  %v6953_v14 = vrot.slane %v1268_v20, 9  ;;  %v10182_v63 = vrot.slane %v2365_v4, 4  ;;  %v987_v32 = vmax.f32 %v10143_v12, 0.0  ;;  %v989_v46 = vmax.f32 %v827_v37, 0.0 }
 0x222   :  { %v2024_v13 = vperm.slane %v1753_v26, 0  ;;  %2592 = vst [vmem:[#allocation1 + $0x10] ss:$2 sm:$0xff] %v10179_v5  ;;  %v1756_v38 = vmax.f32 %v1266_v62, %v6952_v25  ;;  %v2025_v57 = vperm.slane %v1753_v26, 2  ;;  %v2026_v47 = vperm.slane %v1754_v34, 0 }
 0x223   :  { %v1757_v33 = vmax.f32 %v1268_v20, %v6953_v14  ;;  %2593 = vst [vmem:[#allocation1 + $0x11] ss:$2 sm:$0xff] %v10182_v63  ;;  %v2027_v27 = vperm.slane %v1754_v34, 2  ;;  %v1116_v61 = vrot.slane %v1042_v36, 6  ;;  %v2028_v30 = vperm.slane %v1755_v58, 0  ;;  %v829_v36 = vpop.f32.mrf.mxu2 }
 0x224   :  { %v2029_v9 = vperm.slane %v1755_v58, 2  ;;  %v2030_v1 = vperm.slane %v1756_v38, 0  ;;  %v2031_v50 = vperm.slane %v1756_v38, 2  ;;  %v12792_v12 = vrot.slane %v10070_v42, 6 }
 0x225   :  { %v1041_v10 = vmax.f32 %v987_v32, %v989_v46  ;;  %v2032_v62 = vperm.slane %v1757_v33, 0  ;;  %v2033_v26 = vperm.slane %v1757_v33, 2  ;;  %v2197_v3 = vsel %vm2076_vm3, %v2026_v47, %v2024_v13 }
 0x226   :  { %v10192_v37 = vsel %vm9324_vm14, %v10080_v51, %v12792_v12  ;;  %v2201_v20 = vsel %vm2076_vm3, %v2027_v27, %v2025_v57  ;;  %v2198_v35 = vsel %vm2058_vm9, %v2028_v30, %v2197_v3  ;;  %vm12793_vm11 = vcmask 1044484  }
 0x227   :  { %v2202_v11 = vsel %vm2058_vm9, %v2029_v9, %v2201_v20  ;;  %v1269_v48 = vsel %vm1119_vm6, %v1041_v10, %v1116_v61  ;;  %v1270_v6 = vsel %vm1121_vm7, %v1041_v10, %v1116_v61  ;;  %v2199_v25 = vsel %vm2060_vm10, %v2030_v1, %v2198_v35  ;;  %vm12795_vm4 = vmmov %vm12793_vm11 }
 0x228   :  { %v10200_v4 = vld.sshfl [vmem:[#allocation1] sm:$0xff pattern:$0x75316420]  ;;  %v10202_v51 = vld.sshfl [vmem:[#allocation1 + $0x8] sm:$0xff pattern:$0x75316420]  ;;  %v2203_v14 = vsel %vm2060_vm10, %v2031_v50, %v2202_v11  ;;  %v1272_v34 = vsel %vm1124_vm8, %v1041_v10, %v1116_v61  ;;  %v1274_v32 = vsel %vm148_vm1, %v1116_v61, %v1041_v10  ;;  %v899_v38 = vadd.f32 %v898_v59, %v9207_v45  ;;  %vm12802_vm2 = vmmov %vm12795_vm4 }
 0x229   :  { %2709 = vst [vmem:[#allocation1] ss:$2 sm:$0xff] %v9334_v15  ;;  %v2204_v46 = vsel %vm12793_vm11, %v2033_v26, %v2203_v14  ;;  %v1271_v13 = vrot.slane %v1270_v6, 2  ;;  %v1273_v58 = vrot.slane %v1272_v34, 4  ;;  %v12794_v33 = vmov %v12792_v12  ;;  %vm12803_vm11 = vmmov %vm12802_vm2 }
 0x22a   :  { %v10213_v57 = vrot.slane %v12794_v33, 4  ;;  %2711 = vst [vmem:[#allocation1 + $0x1] ss:$2 sm:$0xff] %v9385_v24  ;;  %v10216_v47 = vld.sshfl [vmem:[#allocation1 + $0x10] sm:$0xff pattern:$0x75316420]  ;;  %v2200_v27 = vsel %vm12795_vm4, %v2032_v62, %v2199_v25  ;;  %v692_v61 = vadd.f32 %v691_v53, %v9199_v54  ;;  %v761_v15 = vadd.f32 %v760_v17, %v9197_v52  ;;  %v693_v62 = vpop.f32.mrf.mxu0 }
 0x22b   :  { %v10221_v30 = vld.sshfl [vmem:[#allocation1 + $0x18] sm:$0xff pattern:$0x75316420]  ;;  %vm12796_vm12 = vcmask 1044480   ;;  %v1275_v1 = vrot.slane %v1274_v32, 6  ;;  %v6954_v50 = vrot.slane %v1269_v48, 9  ;;  %v830_v42 = vadd.f32 %v829_v36, %v9205_v40  ;;  %v762_v36 = vpop.f32.mrf.mxu1 }
 0x22c   :  { %v10224_v9 = vsel %vm12796_vm12, %v2204_v46, 0.0  ;;  %v2452_v12 = vrot.slane %v10182_v63, 5  ;;  %v12797_v24 = vsel %vm9318_vm5, %v9379_v2, %v9381_v8  ;;  %v6955_v17 = vrot.slane %v1271_v13, 9  ;;  %2636 = vst [vmem:[#allocation1 + $0x11] ss:$2 sm:$0xff] %v9517_v49  ;;  %vm12799_vm15 = vmmov %vm12796_vm12 }
 0x22d   :  { %2634 = vst [vmem:[#allocation1 + $0x10] ss:$2 sm:$0xff] %v12797_v24  ;;  %v2336_v53 = vrot.slane %v10224_v9, 4  ;;  %v6956_v10 = vrot.slane %v1273_v58, 9  ;;  %v12798_v26 = vrot.slane %v10078_v43, 4  ;;  %v10240_v20 = vsel %vm12799_vm15, %v2200_v27, 0.0 }
 0x22e   :  { %v6957_v59 = vrot.slane %v1275_v1, 9  ;;  %v994_v35 = vmax.f32 %v899_v38, 0.0  ;;  %v1758_v8 = vmax.f32 %v1269_v48, %v6954_v50  ;;  %v1759_v11 = vmax.f32 %v1271_v13, %v6955_v17 }
 0x22f   :  { %v10236_v3 = vrot.slane %v12798_v26, 6  ;;  %v10246_v2 = vsel %vm2339_vm0, %v10240_v20, %v2336_v53  ;;  %v991_v6 = vmax.f32 %v692_v61, 0.0  ;;  %v6972_v43 = vrot.slane %v10179_v5, 9 }
 0x230   :  { %2594 = vst [vmem:[#allocation1 + $0x20] ss:$2 sm:$0xff] %v10246_v2  ;;  %v1760_v49 = vmax.f32 %v1273_v58, %v6956_v10  ;;  %v1761_v25 = vmax.f32 %v1275_v1, %v6957_v59  ;;  %v992_v14 = vmax.f32 %v761_v15, 0.0  ;;  %v2454_v34 = vrot.slane %v2452_v12, 4  ;;  %v831_v15 = vpop.f32.mrf.mxu2  ;;  %v900_v1 = vpop.f32.mrf.mxu3 }
 0x231   :  { %v2036_v32 = vperm.slane %v1759_v11, 0  ;;  %v2037_v46 = vperm.slane %v1759_v11, 2  ;;  %v993_v38 = vmax.f32 %v830_v42, 0.0  ;;  %v2530_v33 = vsel %vm9324_vm14, %v10213_v57, %v10236_v3  ;;  %v10254_v48 = vld.sshfl [vmem:[#allocation1] sm:$0xff pattern:$0x75316420] }
 0x232   :  { %v10256_v13 = vld.sshfl [vmem:[#allocation1 + $0x8] sm:$0xff pattern:$0x75316420]  ;;  %v10260_v27 = vsel %vm9318_vm5, %v6972_v43, %v2452_v12  ;;  %v1044_v58 = vmax.f32 %v992_v14, %v994_v35  ;;  %v10263_v61 = vadd.f32 %v693_v62, %v9199_v54  ;;  %v12800_v50 = vsel %vm9324_vm14, %v9739_v0, %v9741_v31  ;;  %v3995_v14 = vpop.f32.mrf.mxu0 }
 0x233   :  { %2732 = vst [vmem:[#allocation1] ss:$2 sm:$0xff] %v12800_v50  ;;  %v2455_v42 = vrot.slane %v10246_v2, 5  ;;  %v2034_v24 = vperm.slane %v1758_v8, 0  ;;  %v2035_v17 = vperm.slane %v1758_v8, 2  ;;  %v763_v10 = vadd.f32 %v762_v36, %v9197_v52 }
 0x234   :  { %2733 = vst [vmem:[#allocation1 + $0x1] ss:$2 sm:$0xff] %v9819_v21  ;;  %v2038_v12 = vperm.slane %v1760_v49, 0  ;;  %v2039_v26 = vperm.slane %v1760_v49, 2  ;;  %v2040_v54 = vperm.slane %v1761_v25, 0  ;;  %v2041_v62 = vperm.slane %v1761_v25, 2 }
 0x235   :  { %v2647_v59 = vld.sshfl [vmem:[#allocation1 + $0x10] sm:$0xff pattern:$0x75316420]  ;;  %v2648_v35 = vld.sshfl [vmem:[#allocation1 + $0x18] sm:$0xff pattern:$0x75316420]  ;;  %v2205_v11 = vsel %vm2058_vm9, %v2036_v32, %v2034_v24  ;;  %v2211_v43 = vsel %vm2058_vm9, %v2037_v46, %v2035_v17  ;;  %v832_v0 = vadd.f32 %v831_v15, %v9205_v40  ;;  %v901_v31 = vadd.f32 %v900_v1, %v9207_v45  ;;  %v10298_v46 = vpop.f32.mrf.mxu1 }
 0x236   :  { %2655 = vst [vmem:[#allocation1 + $0x10] ss:$2 sm:$0xff] %v9848_v22  ;;  %v2206_v52 = vsel %vm2060_vm10, %v2038_v12, %v2205_v11  ;;  %v2212_v21 = vsel %vm2060_vm10, %v2039_v26, %v2211_v43  ;;  %v1043_v8 = vmax.f32 %v991_v6, %v993_v38  ;;  %v1117_v36 = vrot.slane %v1044_v58, 6  ;;  %v7240_v49 = vld [vmem:[%s12649_s3 + $0x200] sm:$0xf] }
 0x237   :  { %v12801_v40 = vsel %vm9318_vm5, %v9850_v23, %v9852_v41  ;;  %v2456_v45 = vsel %vm9318_vm5, %v2454_v34, %v2455_v42  ;;  %v2207_v22 = vsel %vm12802_vm2, %v2040_v54, %v2206_v52  ;;  %v2213_v6 = vsel %vm12803_vm11, %v2041_v62, %v2212_v21  ;;  %v8272_v32 = vld [vmem:[%s12649_s3 + $0x20c] sm:$0xf0]  ;;  %v7368_v34 = vld [vmem:[%s12649_s3 + $0x300] sm:$0xf] }
 0x238   :  { %2656 = vst [vmem:[#allocation1 + $0x11] ss:$2 sm:$0xff] %v12801_v40  ;;  %v995_v25 = vmax.f32 %v10263_v61, 0.0  ;;  %v1276_v23 = vsel %vm1119_vm6, %v1043_v8, %v1117_v36  ;;  %v1277_v41 = vsel %vm1121_vm7, %v1043_v8, %v1117_v36  ;;  %v1279_v38 = vsel %vm1124_vm8, %v1043_v8, %v1117_v36  ;;  %v8304_v61 = vld [vmem:[%s12649_s3 + $0x30c] sm:$0xf0] }
 0x239   :  { %v996_v58 = vmax.f32 %v763_v10, 0.0  ;;  %v1278_v15 = vrot.slane %v1277_v41, 2  ;;  %v1280_v1 = vrot.slane %v1279_v38, 4  ;;  %v10310_v50 = vsel %vm148_vm1, %v1117_v36, %v1043_v8  ;;  %v3016_v17 = vld [vmem:[%s12650_s4] sm:$0xf] }
 0x23a   :  { %v6958_v24 = vrot.slane %v1276_v23, 9  ;;  %v997_v12 = vmax.f32 %v832_v0, 0.0  ;;  %v998_v10 = vmax.f32 %v901_v31, 0.0  ;;  %v7241_v26 = vor.u32 %v8272_v32, %v7240_v49  ;;  %v7608_v62 = vld [vmem:[%s12649_s3 + $0x4e0] sm:$0xf] }
 0x23b   :  { %v10317_v54 = vpack.c.bf16 %v10216_v47, %v10095_v56  ;;  %v8364_v11 = vld [vmem:[%s12649_s3 + $0x4ec] sm:$0xf0]  ;;  %v10325_v43 = vld.sshfl [vmem:[#allocation1] sm:$0xff pattern:$0x75316420]  ;;  %v10331_v0 = vpack.c.bf16 %v10221_v30, %v10097_v28  ;;  %v7369_v31 = vor.u32 %v8304_v61, %v7368_v34  ;;  %v10334_v56 = vpack.c.bf16 %v2647_v59, %v10137_v55 }
 0x23c   :  { %v10327_v52 = vld.sshfl [vmem:[#allocation1 + $0x8] sm:$0xff pattern:$0x75316420]  ;;  %v1762_v21 = vmax.f32 %v1276_v23, %v6958_v24  ;;  %v1282_v47 = vrot.slane %v10310_v50, 6  ;;  %v6959_v8 = vrot.slane %v1278_v15, 9  ;;  %v6960_v36 = vrot.slane %v1280_v1, 9  ;;  %4071 = vmatpush.bf16.msrb.mxu2 %v7241_v26 }
 0x23d   :  { %12804 = vst [vmem:[#allocation33_spill] sm:$0xff] %v10334_v56  ;;  %v1046_v49 = vmax.f32 %v996_v58, %v998_v10  ;;  %4014 = vmatmul.bf16.gmra.mxu0 %v10317_v54  ;;  %4053 = vmatmul.bf16.gmra.mxu1 %v10331_v0  ;;  %v10345_v55 = vperm.slane %v3016_v17, 0  ;;  %v1045_v41 = vmax.f32 %v995_v25, %v997_v12  ;;  %vm12806_vm4 = vcmask 1045509   ;;  %v8396_v25 = vld [vmem:[%s12649_s3 + $0x5ec] sm:$0xf0] }
 0x23e   :  { %2748 = vst [vmem:[#allocation1] ss:$2 sm:$0xff] %v10192_v37  ;;  %v2042_v28 = vperm.slane %v1762_v21, 0  ;;  %v2043_v30 = vperm.slane %v1762_v21, 2  ;;  %4110 = vmatpush.bf16.msrb.mxu3 %v7369_v31  ;;  %v10348_v37 = vpack.c.bf16 %v2648_v35, %v10139_v44  ;;  %v1763_v32 = vmax.f32 %v1278_v15, %v6959_v8  ;;  %vm12807_vm12 = vmmov %vm12806_vm4  ;;  %v10359_v44 = vpop.f32.mrf.mxu0  ;;  %v7736_v35 = vld [vmem:[%s12649_s3 + $0x5e0] sm:$0xf] }
 0x23f   :  { %2749 = vst [vmem:[#allocation1 + $0x1] ss:$2 sm:$0xff] %v2530_v33  ;;  %v10350_v59 = vld.sshfl [vmem:[#allocation1 + $0x10] sm:$0xff pattern:$0x75316420]  ;;  %v1764_v23 = vmax.f32 %v1280_v1, %v6960_v36  ;;  %v7609_v38 = vor.u32 %v8364_v11, %v7608_v62  ;;  %v1118_v33 = vrot.slane %v1046_v49, 6  ;;  %v3996_v58 = vadd.f32 %v3995_v14, %v10345_v55  ;;  %4072 = vmatmul.bf16.vlgmr.msrb.gmra.mxu2 %v10334_v56  ;;  %v10370_v1 = vpop.f32.mrf.mxu1 }
 0x240   :  { %12805 = vst [vmem:[#allocation34_spill] sm:$0xff] %v10348_v37  ;;  %v10352_v40 = vld.sshfl [vmem:[#allocation1 + $0x18] sm:$0xff pattern:$0x75316420]  ;;  %v2208_v57 = vsel %vm12806_vm4, %v2042_v28, %v2207_v22  ;;  %v2214_v3 = vsel %vm12807_vm12, %v2043_v30, %v2213_v6  ;;  %v2045_v22 = vperm.slane %v1763_v32, 2  ;;  %v6961_v14 = vrot.slane %v1282_v47, 9 }
 0x241   :  { %2671 = vst [vmem:[#allocation1 + $0x10] ss:$2 sm:$0xff] %v10260_v27  ;;  %v2044_v27 = vperm.slane %v1763_v32, 0  ;;  %v2046_v34 = vperm.slane %v1764_v23, 0  ;;  %v2047_v6 = vperm.slane %v1764_v23, 2  ;;  %4111 = vmatmul.bf16.vlgmr.msrb.gmra.mxu3 %v10348_v37  ;;  %4142 = vmatpush.bf16.msra.mxu0 %v7609_v38  ;;  %v1283_v61 = vsel %vm1119_vm6, %v1045_v41, %v1118_v33 }
 0x242   :  { %2672 = vst [vmem:[#allocation1 + $0x11] ss:$2 sm:$0xff] %v2456_v45  ;;  %v1284_v15 = vsel %vm1121_vm7, %v1045_v41, %v1118_v33  ;;  %v7592_v50 = vld [vmem:[%s12649_s3 + $0x4c0] sm:$0xf]  ;;  %v8360_v45 = vld [vmem:[%s12649_s3 + $0x4cc] sm:$0xf0]  ;;  %v2215_v17 = vsel %vm2066_vm13, %v2045_v22, %v2214_v3  ;;  %v1286_v10 = vsel %vm1124_vm8, %v1045_v41, %v1118_v33  ;;  %v1288_v31 = vsel %vm148_vm1, %v1118_v33, %v1045_v41 }
 0x243   :  { %v2209_v24 = vsel %vm2066_vm13, %v2044_v27, %v2208_v57  ;;  %v1285_v12 = vrot.slane %v1284_v15, 2  ;;  %v7720_v26 = vld [vmem:[%s12649_s3 + $0x5c0] sm:$0xf]  ;;  %vm12808_vm15 = vcmask 1047559   ;;  %v1287_v21 = vrot.slane %v1286_v10, 4 }
 0x244   :  { %v2210_v62 = vsel %vm12808_vm15, %v2046_v34, %v2209_v24  ;;  %vm12809_vm2 = vmmov %vm12808_vm15  ;;  %v8392_v8 = vld [vmem:[%s12649_s3 + $0x5cc] sm:$0xf0]  ;;  %v7576_v36 = vld [vmem:[%s12649_s3 + $0x4a0] sm:$0xf]  ;;  %v10394_v49 = vadd.f32 %v10298_v46, %v3996_v58  ;;  %v7737_v28 = vor.u32 %v8396_v25, %v7736_v35  ;;  %v7593_v30 = vor.u32 %v8360_v45, %v7592_v50 }
 0x245   :  { %v2216_v11 = vsel %vm12809_vm2, %v2047_v6, %v2215_v17  ;;  %v8234_v32 = vld [vmem:[%s12649_s3 + $0xe4] sm:$0xf]  ;;  %v7098_v23 = vld [vmem:[%s12649_s3 + $0xf0] sm:$0xf0]  ;;  %v8356_v41 = vld [vmem:[%s12649_s3 + $0x4ac] sm:$0xf0]  ;;  %v1765_v38 = vmax.f32 %v1282_v47, %v6961_v14  ;;  %v7721_v6 = vor.u32 %v8392_v8, %v7720_v26  ;;  %v12812_v14 = vsel %vm9324_vm14, %v9387_v16, %v9389_v18 }
 0x246   :  { %vm12810_vm13 = vcmask 1040384   ;;  %v1289_v3 = vrot.slane %v1288_v31, 6  ;;  %v6962_v46 = vrot.slane %v1283_v61, 9  ;;  %v6963_v35 = vrot.slane %v1285_v12, 9  ;;  %4181 = vmatpush.bf16.msra.mxu1 %v7737_v28  ;;  %4143 = vmatpush.bf16.msra.mxu0 %v7593_v30  ;;  %v4000_v47 = vpop.f32.mrf.mxu0  ;;  %v8388_v16 = vld [vmem:[%s12649_s3 + $0x5ac] sm:$0xf0] }
 0x247   :  { %v2273_v57 = vsel %vm12810_vm13, 0.0, %v2216_v11  ;;  %vm12811_vm11 = vmmov %vm12810_vm13  ;;  %v6964_v25 = vrot.slane %v1287_v21, 9  ;;  %v7101_v15 = vor.u32 %v8234_v32, %v7098_v23  ;;  %v7577_v50 = vor.u32 %v8356_v41, %v7576_v36  ;;  %v7704_v11 = vld [vmem:[%s12649_s3 + $0x5a0] sm:$0xf]  ;;  %v8266_v18 = vld [vmem:[%s12649_s3 + $0x1e4] sm:$0xf] }
 0x248   :  { %v2272_v33 = vsel %vm12811_vm11, 0.0, %v2210_v62  ;;  %v2337_v58 = vrot.slane %v2273_v57, 4  ;;  %v1766_v34 = vmax.f32 %v1283_v61, %v6962_v46  ;;  %v6965_v17 = vrot.slane %v1289_v3, 9  ;;  %v7226_v30 = vld [vmem:[%s12649_s3 + $0x1f0] sm:$0xf0] }
 0x249   :  { %v10407_v27 = vld.sshfl [vmem:[#allocation1 + $0x10] sm:$0xff pattern:$0x75316420]  ;;  %v10409_v22 = vld.sshfl [vmem:[#allocation1 + $0x18] sm:$0xff pattern:$0x75316420]  ;;  %v1767_v10 = vmax.f32 %v1285_v12, %v6963_v35  ;;  %v1768_v62 = vmax.f32 %v1287_v21, %v6964_v25  ;;  %4220 = vmatpush.bf16.msra.mxu2 %v7101_v15  ;;  %v4039_v12 = vpop.f32.mrf.mxu1 }
 0x24a   :  { %2713 = vst [vmem:[#allocation1 + $0x10] ss:$2 sm:$0xff] %v12812_v14  ;;  %v10417_v45 = vsel %vm2339_vm0, %v2272_v33, %v2337_v58  ;;  %v2369_v24 = vsel %vm2339_vm0, %v2337_v58, %v2272_v33  ;;  %v2048_v61 = vperm.slane %v1765_v38, 0  ;;  %v2050_v31 = vperm.slane %v1766_v34, 0  ;;  %4182 = vmatpush.bf16.msra.mxu1 %v7721_v6  ;;  %4144 = vmatpush.bf16.msra.mxu0 %v7577_v50  ;;  %v7560_v57 = vld [vmem:[%s12649_s3 + $0x480] sm:$0xf] }
 0x24b   :  { %2715 = vst [vmem:[#allocation1 + $0x11] ss:$2 sm:$0xff] %v9523_v29  ;;  %v10421_v26 = vrot.slane %v2369_v24, 4  ;;  %v1769_v29 = vmax.f32 %v1289_v3, %v6965_v17  ;;  %v2051_v8 = vperm.slane %v1766_v34, 2  ;;  %v2052_v21 = vperm.slane %v1767_v10, 0 }
 0x24c   :  { %2595 = vst [vmem:[#allocation1 + $0x21] ss:$2 sm:$0xff] %v10417_v45  ;;  %v2053_v36 = vperm.slane %v1767_v10, 2  ;;  %v2054_v28 = vperm.slane %v1768_v62, 0  ;;  %v2049_v32 = vperm.slane %v1765_v38, 2  ;;  %v2055_v23 = vperm.slane %v1768_v62, 2 }
 0x24d   :  { %2596 = vst [vmem:[#allocation1 + $0x30] ss:$2 sm:$0xff] %v10421_v26  ;;  %v2217_v41 = vsel %vm2076_vm3, %v2050_v31, %v2048_v61  ;;  %v8352_v3 = vld [vmem:[%s12649_s3 + $0x48c] sm:$0xf0]  ;;  %v2056_v46 = vperm.slane %v1769_v29, 0  ;;  %v2057_v33 = vperm.slane %v1769_v29, 2  ;;  %v7705_v34 = vor.u32 %v8388_v16, %v7704_v11 }
 0x24e   :  { %v7688_v58 = vld [vmem:[%s12649_s3 + $0x580] sm:$0xf]  ;;  %v8384_v38 = vld [vmem:[%s12649_s3 + $0x58c] sm:$0xf0]  ;;  %v2218_v35 = vsel %vm2058_vm9, %v2052_v21, %v2217_v41  ;;  %v2221_v25 = vsel %vm2076_vm3, %v2051_v8, %v2049_v32  ;;  %v7229_v6 = vor.u32 %v8266_v18, %v7226_v30  ;;  %v7561_v17 = vor.u32 %v8352_v3, %v7560_v57  ;;  %v8230_v62 = vld [vmem:[%s12649_s3 + $0xc4] sm:$0xf]  ;;  %v10489_v57 = vpop.f32.mrf.mxu0 }
 0x24f   :  { %v7544_v15 = vld [vmem:[%s12649_s3 + $0x460] sm:$0xf]  ;;  %v8348_v50 = vld [vmem:[%s12649_s3 + $0x46c] sm:$0xf0]  ;;  %v2219_v14 = vsel %vm2060_vm10, %v2054_v28, %v2218_v35  ;;  %v2222_v24 = vsel %vm2058_vm9, %v2053_v36, %v2221_v25  ;;  %v7082_v11 = vld [vmem:[%s12649_s3 + $0xd0] sm:$0xf0]  ;;  %4183 = vmatpush.bf16.msra.mxu1 %v7705_v34  ;;  %v7689_v31 = vor.u32 %v8384_v38, %v7688_v58  ;;  %v4001_v8 = vadd.f32 %v4000_v47, %v10345_v55 }
 0x250   :  { %v7672_v10 = vld [vmem:[%s12649_s3 + $0x560] sm:$0xf]  ;;  %v8380_v61 = vld [vmem:[%s12649_s3 + $0x56c] sm:$0xf0]  ;;  %v2223_v29 = vsel %vm2060_vm10, %v2055_v23, %v2222_v24  ;;  %4259 = vmatpush.bf16.msra.mxu3 %v7229_v6  ;;  %v12813_v28 = vld [vmem:[#allocation16_spill] sm:$0xff]  ;;  %vm12814_vm9 = vcmask 1044484   ;;  %4145 = vmatpush.bf16.msra.mxu0 %v7561_v17  ;;  %v7545_v41 = vor.u32 %v8348_v50, %v7544_v15  ;;  %v7085_v34 = vor.u32 %v8230_v62, %v7082_v11 }
 0x251   :  { %v7528_v21 = vld [vmem:[%s12649_s3 + $0x440] sm:$0xf]  ;;  %v8344_v36 = vld [vmem:[%s12649_s3 + $0x44c] sm:$0xf0]  ;;  %v2220_v32 = vsel %vm12814_vm9, %v2056_v46, %v2219_v14  ;;  %vm12815_vm4 = vmmov %vm12814_vm9  ;;  %vm12819_vm12 = vcmask 1044480   ;;  %v10499_v25 = vadd.f32 %v4039_v12, %v4001_v8  ;;  %v2533_v46 = vrot.slane %v10182_v63, 6  ;;  %v10508_v14 = vpop.f32.mrf.mxu1 }
 0x252   :  { %v10472_v16 = vld.sshfl [vmem:[#allocation1 + $0x10] sm:$0xff pattern:$0x75316420]  ;;  %v10474_v18 = vld.sshfl [vmem:[#allocation1 + $0x18] sm:$0xff pattern:$0x75316420]  ;;  %v2224_v23 = vsel %vm12815_vm4, %v2057_v33, %v2223_v29  ;;  %vm12824_vm15 = vmmov %vm12819_vm12  ;;  %v7673_v62 = vor.u32 %v8380_v61, %v7672_v10  ;;  %4221 = vmatpush.bf16.msra.mxu2 %v7085_v34  ;;  %v7529_v29 = vor.u32 %v8344_v36, %v7528_v21 }
 0x253   :  { %2734 = vst [vmem:[#allocation1 + $0x10] ss:$2 sm:$0xff] %v12813_v28  ;;  %v10485_v30 = vld.sshfl [vmem:[#allocation1 + $0x20] sm:$0xff pattern:$0x75316420]  ;;  %v12817_v3 = vld [vmem:[#allocation18_spill] sm:$0xff]  ;;  %4184 = vmatpush.bf16.msra.mxu1 %v7689_v31 }
 0x254   :  { %v12816_v47 = vld [vmem:[#allocation17_spill] sm:$0xff]  ;;  %v2603_v38 = vld.sshfl [vmem:[#allocation1 + $0x28] sm:$0xff pattern:$0x75316420]  ;;  %v10497_v35 = vsel %vm12819_vm12, %v2224_v23, 0.0  ;;  %v12820_v33 = vld [vmem:[#allocation3_spill] sm:$0xff]  ;;  %4146 = vmatpush.bf16.msra.mxu0 %v7545_v41 }
 0x255   :  { %v12818_v58 = vsel %vm9324_vm14, %v12816_v47, %v12817_v3  ;;  %v12821_v6 = vld [vmem:[#allocation4_spill] sm:$0xff]  ;;  %v2338_v50 = vrot.slane %v10497_v35, 4  ;;  %v2536_v24 = vrot.slane %v10246_v2, 6  ;;  %v12823_v17 = vld [vmem:[#allocation2_spill] sm:$0xff]  ;;  %v10513_v12 = vsel %vm12824_vm15, %v2220_v32, 0.0 }
 0x256   :  { %2735 = vst [vmem:[#allocation1 + $0x11] ss:$2 sm:$0xff] %v12818_v58  ;;  %v12822_v15 = vsel %vm9318_vm5, %v12820_v33, %v12821_v6  ;;  %v8262_v63 = vld [vmem:[%s12649_s3 + $0x1c4] sm:$0xf]  ;;  %v7656_v8 = vld [vmem:[%s12649_s3 + $0x540] sm:$0xf]  ;;  %v4005_v33 = vpop.f32.mrf.mxu0 }
 0x257   :  { %2640 = vst [vmem:[#allocation1 + $0x21] ss:$2 sm:$0xff] %v12822_v15  ;;  %v10522_v11 = vsel %vm2339_vm0, %v10513_v12, %v2338_v50  ;;  %v8376_v10 = vld [vmem:[%s12649_s3 + $0x54c] sm:$0xf0]  ;;  %v7210_v61 = vld [vmem:[%s12649_s3 + $0x1d0] sm:$0xf0]  ;;  %4185 = vmatpush.bf16.msra.mxu1 %v7673_v62 }
 0x258   :  { %2638 = vst [vmem:[#allocation1 + $0x20] ss:$2 sm:$0xff] %v12823_v17  ;;  %v7213_v31 = vor.u32 %v8262_v63, %v7210_v61  ;;  %v7512_v28 = vld [vmem:[%s12649_s3 + $0x420] sm:$0xf]  ;;  %v8340_v21 = vld [vmem:[%s12649_s3 + $0x42c] sm:$0xf0]  ;;  %v7657_v23 = vor.u32 %v8376_v10, %v7656_v8  ;;  %4147 = vmatpush.bf16.msra.mxu0 %v7529_v29  ;;  %v4006_v17 = vadd.f32 %v4005_v33, %v10345_v55 }
 0x259   :  { %2597 = vst [vmem:[#allocation1 + $0x31] ss:$2 sm:$0xff] %v10522_v11  ;;  %v6980_v36 = vrot.slane %v10179_v5, 10  ;;  %v2535_v32 = vrot.slane %v2533_v46, 4  ;;  %v7640_v41 = vld [vmem:[%s12649_s3 + $0x520] sm:$0xf]  ;;  %v7513_v5 = vor.u32 %v8340_v21, %v7512_v28  ;;  %v4044_v63 = vpop.f32.mrf.mxu1 }
 0x25a   :  { %4260 = vmatpush.bf16.msra.mxu3 %v7213_v31  ;;  %v8372_v47 = vld [vmem:[%s12649_s3 + $0x52c] sm:$0xf0]  ;;  %v7496_v15 = vld [vmem:[%s12649_s3 + $0x400] sm:$0xf]  ;;  %v8226_v61 = vld [vmem:[%s12649_s3 + $0xa4] sm:$0xf]  ;;  %v10573_v31 = vadd.f32 %v4044_v63, %v4006_v17 }
 0x25b   :  { %v2534_v3 = vsel %vm9324_vm14, %v6980_v36, %v2533_v46  ;;  %v2537_v6 = vsel %vm9324_vm14, %v2535_v32, %v2536_v24  ;;  %v8336_v46 = vld [vmem:[%s12649_s3 + $0x40c] sm:$0xf0]  ;;  %4186 = vmatpush.bf16.msra.mxu1 %v7657_v23  ;;  %v7624_v8 = vld [vmem:[%s12649_s3 + $0x500] sm:$0xf]  ;;  %v7641_v36 = vor.u32 %v8372_v47, %v7640_v41  ;;  %v10579_v23 = vsel %vm2339_vm0, %v2336_v53, %v10240_v20  ;;  %v7066_v17 = vld [vmem:[%s12649_s3 + $0xb0] sm:$0xf0] }
 0x25c   :  { %v8368_v10 = vld [vmem:[%s12649_s3 + $0x50c] sm:$0xf0]  ;;  %4148 = vmatpush.bf16.msra.mxu0 %v7513_v5  ;;  %v7497_v32 = vor.u32 %v8336_v46, %v7496_v15  ;;  %v8258_v41 = vld [vmem:[%s12649_s3 + $0x1a4] sm:$0xf]  ;;  %v12828_v47 = vld [vmem:[#allocation10_spill] sm:$0xff]  ;;  %v7069_v9 = vor.u32 %v8226_v61, %v7066_v17  ;;  %v2385_v46 = vrot.slane %v10579_v23, 4  ;;  %v10618_v17 = vsel %vm2339_vm0, %v2338_v50, %v10513_v12 }
 0x25d   :  { %v10549_v58 = vld.sshfl [vmem:[#allocation1 + $0x10] sm:$0xff pattern:$0x75316420]  ;;  %v10551_v34 = vld.sshfl [vmem:[#allocation1 + $0x18] sm:$0xff pattern:$0x75316420]  ;;  %v7625_v61 = vor.u32 %v8368_v10, %v7624_v8  ;;  %vm12895_vm0 = vmmov %vm12809_vm2 }
 0x25e   :  { %2750 = vst [vmem:[#allocation1 + $0x10] ss:$2 sm:$0xff] %v2534_v3  ;;  %v12825_v3 = vld [vmem:[#allocation12_spill] sm:$0xff]  ;;  %v7194_v53 = vld [vmem:[%s12649_s3 + $0x1b0] sm:$0xf0]  ;;  %4222 = vmatpush.bf16.msra.mxu2 %v7069_v9  ;;  %v2458_v8 = vrot.slane %v2385_v46, 5  ;;  %v10792_v60 = vpack.c.bf16 %v10551_v34, %v10327_v52  ;;  %vm12896_vm2 = vmmov %vm12895_vm0 }
 0x25f   :  { %2751 = vst [vmem:[#allocation1 + $0x11] ss:$2 sm:$0xff] %v2537_v6  ;;  %v2649_v62 = vld.sshfl [vmem:[#allocation1 + $0x20] sm:$0xff pattern:$0x75316420]  ;;  %v12830_v63 = vld [vmem:[#allocation23_spill] sm:$0xff]  ;;  %4187 = vmatpush.bf16.msra.mxu1 %v7641_v36  ;;  %vm12899_vm11 = vmmov %vm12895_vm0 }
 0x260   :  { %v2650_v29 = vld.sshfl [vmem:[#allocation1 + $0x28] sm:$0xff pattern:$0x75316420]  ;;  %v2604_v28 = vld.sshfl [vmem:[#allocation1 + $0x30] sm:$0xff pattern:$0x75316420]  ;;  %4149 = vmatpush.bf16.msra.mxu0 %v7497_v32  ;;  %vm12901_vm4 = vmmov %vm12895_vm0 }
 0x261   :  { %v2605_v21 = vld.sshfl [vmem:[#allocation1 + $0x38] sm:$0xff pattern:$0x75316420]  ;;  %v10583_v33 = vpack.c.bf16 %v2604_v28, %v10485_v30  ;;  %v8222_v20 = vld [vmem:[%s12649_s3 + $0x84] sm:$0xf]  ;;  %v2462_v10 = vrot.slane %v10421_v26, 5 }
 0x262   :  { %2644 = vst [vmem:[#allocation1 + $0x31] ss:$2 sm:$0xff] %v12825_v3  ;;  %v10585_v6 = vpack.c.bf16 %v2605_v21, %v2603_v38  ;;  %v12829_v30 = vld [vmem:[#allocation20_spill] sm:$0xff]  ;;  %v7197_v38 = vor.u32 %v8258_v41, %v7194_v53  ;;  %v7050_v5 = vld [vmem:[%s12649_s3 + $0x90] sm:$0xf0]  ;;  %v2457_v41 = vrot.slane %v2455_v42, 4 }
 0x263   :  { %12826 = vst [vmem:[#allocation16_spill] sm:$0xff] %v10583_v33  ;;  %4019 = vmatmul.bf16.gmra.mxu0 %v10583_v33  ;;  %v8254_v15 = vld [vmem:[%s12649_s3 + $0x184] sm:$0xf]  ;;  %v7178_v28 = vld [vmem:[%s12649_s3 + $0x190] sm:$0xf0]  ;;  %v7053_v21 = vor.u32 %v8222_v20, %v7050_v5  ;;  %4188 = vmatpush.bf16.msra.mxu1 %v7625_v61  ;;  %v2387_v35 = vrot.slane %v10618_v17, 4 }
 0x264   :  { %12827 = vst [vmem:[#allocation17_spill] sm:$0xff] %v10585_v6  ;;  %4058 = vmatmul.bf16.gmra.mxu1 %v10585_v6  ;;  %4261 = vmatpush.bf16.msra.mxu3 %v7197_v38  ;;  %v7181_v3 = vor.u32 %v8254_v15, %v7178_v28  ;;  %v12832_v50 = vld [vmem:[#allocation24_spill] sm:$0xff]  ;;  %v12833_v42 = vld [vmem:[#allocation25_spill] sm:$0xff]  ;;  %v2465_v20 = vrot.slane %v10522_v11, 5  ;;  %v2459_v5 = vsel %vm9318_vm5, %v2457_v41, %v2458_v8  ;;  %v6981_v2 = vrot.slane %v10417_v45, 10 }
 0x265   :  { %2642 = vst [vmem:[#allocation1 + $0x30] ss:$2 sm:$0xff] %v12828_v47  ;;  %4223 = vmatpush.bf16.msra.mxu2 %v7053_v21  ;;  %v6973_v47 = vrot.slane %v10417_v45, 9  ;;  %v12834_v12 = vsel %vm9318_vm5, %v12832_v50, %v12833_v42  ;;  %v8250_v61 = vld [vmem:[%s12649_s3 + $0x164] sm:$0xf]  ;;  %v2468_v41 = vrot.slane %v2387_v35, 5 }
 0x266   :  { %2657 = vst [vmem:[#allocation1 + $0x20] ss:$2 sm:$0xff] %v12829_v30  ;;  %v12836_v30 = vld [vmem:[#allocation29_spill] sm:$0xff]  ;;  %v7162_v21 = vld [vmem:[%s12649_s3 + $0x170] sm:$0xf0]  ;;  %vm5595_vm12 = vcmask 1047556  }
 0x267   :  { %2658 = vst [vmem:[#allocation1 + $0x21] ss:$2 sm:$0xff] %v12830_v63  ;;  %v2463_v15 = vsel %vm9318_vm5, %v6973_v47, %v2462_v10  ;;  %v7034_v63 = vld [vmem:[%s12649_s3 + $0x70] sm:$0xf0]  ;;  %v7165_v8 = vor.u32 %v8250_v61, %v7162_v21  ;;  %v10668_v47 = vpack.c.bf16 %v10474_v18, %v10256_v13  ;;  %v12837_v13 = vld [vmem:[#allocation5_spill] sm:$0xff]  ;;  %v12838_v18 = vld [vmem:[#allocation6_spill] sm:$0xff]  ;;  %v10704_v21 = vpack.c.bf16 %v10352_v40, %v10176_v19 }
 0x268   :  { %4262 = vmatpush.bf16.msra.mxu3 %v7181_v3  ;;  %v2467_v3 = vrot.slane %v2465_v20, 4  ;;  %v12844_v19 = vld [vmem:[#allocation26_spill] sm:$0xff]  ;;  %v2546_v40 = vrot.slane %v10522_v11, 6  ;;  %v8210_v45 = vld [vmem:[%s12649_s3 + $0x24] sm:$0xf] }
 0x269   :  { %v12848_v11 = vld [vmem:[#allocation30_spill] sm:$0xff]  ;;  %v8206_v17 = vld [vmem:[%s12649_s3 + $0x4] sm:$0xf]  ;;  %v7482_v34 = vld [vmem:[%s12649_s3 + $0x3f0] sm:$0xf0] }
 0x26a   :  { %v8330_v52 = vld [vmem:[%s12649_s3 + $0x3e4] sm:$0xf] }
 0x26c   :  { %v2651_v36 = vld.sshfl [vmem:[#allocation1 + $0x30] sm:$0xff pattern:$0x75316420]  ;;  %v2652_v32 = vld.sshfl [vmem:[#allocation1 + $0x38] sm:$0xff pattern:$0x75316420]  ;;  %4263 = vmatpush.bf16.msra.mxu3 %v7165_v8 }
 0x26d   :  { %v10627_v9 = vpack.c.bf16 %v2651_v36, %v2649_v62  ;;  %2659 = vst [vmem:[#allocation1 + $0x30] ss:$2 sm:$0xff] %v12834_v12  ;;  %v10634_v53 = vpack.c.bf16 %v2652_v32, %v2650_v29  ;;  %v8218_v29 = vld [vmem:[%s12649_s3 + $0x64] sm:$0xf]  ;;  %v2464_v36 = vrot.slane %v2462_v10, 4  ;;  %v10664_v32 = vpack.c.bf16 %v10472_v16, %v10254_v48  ;;  %v12839_v10 = vld [vmem:[#allocation7_spill] sm:$0xff] }
 0x26e   :  { %2660 = vst [vmem:[#allocation1 + $0x31] ss:$2 sm:$0xff] %v12836_v30  ;;  %v10638_v38 = vld.sshfl [vmem:[#allocation1 + $0x20] sm:$0xff pattern:$0x75316420]  ;;  %v7037_v28 = vor.u32 %v8218_v29, %v7034_v63  ;;  %v2469_v30 = vsel %vm9318_vm5, %v2467_v3, %v2468_v41  ;;  %v12841_v8 = vld [vmem:[#allocation11_spill] sm:$0xff] }
 0x26f   :  { %12831 = vst [vmem:[#allocation18_spill] sm:$0xff] %v10627_v9  ;;  %4077 = vmatmul.bf16.gmra.mxu2 %v10627_v9  ;;  %v10643_v62 = vld.sshfl [vmem:[#allocation1 + $0x28] sm:$0xff pattern:$0x75316420]  ;;  %4116 = vmatmul.bf16.gmra.mxu3 %v10634_v53  ;;  %v2466_v50 = vsel %vm9318_vm5, %v2464_v36, %v2465_v20  ;;  %v12840_v20 = vsel %vm9324_vm14, %v12838_v18, %v12839_v10  ;;  %v7146_v63 = vld [vmem:[%s12649_s3 + $0x150] sm:$0xf0] }
 0x270   :  { %12835 = vst [vmem:[#allocation3_spill] sm:$0xff] %v10634_v53  ;;  %4224 = vmatpush.bf16.msra.mxu2 %v7037_v28  ;;  %v10700_v28 = vpack.c.bf16 %v10350_v59, %v10174_v7  ;;  %v12842_v36 = vld [vmem:[#allocation13_spill] sm:$0xff]  ;;  %v2543_v18 = vrot.slane %v10421_v26, 6  ;;  %vm12893_vm5 = vcmask 1045509  }
 0x271   :  { %2673 = vst [vmem:[#allocation1 + $0x20] ss:$2 sm:$0xff] %v2459_v5  ;;  %v7018_v5 = vld [vmem:[%s12649_s3 + $0x50] sm:$0xf0]  ;;  %vm12898_vm13 = vmmov %vm12893_vm5 }
 0x272   :  { %2674 = vst [vmem:[#allocation1 + $0x21] ss:$2 sm:$0xff] %v2463_v15  ;;  %v7021_v29 = vor.u32 %v8214_v39, %v7018_v5  ;;  %v8246_v15 = vld [vmem:[%s12649_s3 + $0x144] sm:$0xf]  ;;  %vm12900_vm9 = vmmov %vm12893_vm5 }
 0x273   :  { %4150 = vmatmul.bf16.vlgmr.msra.gmra.mxu0 %v10664_v32  ;;  %v7149_v61 = vor.u32 %v8246_v15, %v7146_v63  ;;  %v12846_v15 = vld [vmem:[#allocation28_spill] sm:$0xff]  ;;  %vm12902_vm15 = vmmov %vm12893_vm5 }
 0x274   :  { %4189 = vmatmul.bf16.vlgmr.msra.gmra.mxu1 %v10668_v47  ;;  %4225 = vmatpush.bf16.msra.mxu2 %v7021_v29  ;;  %v12845_v29 = vld [vmem:[#allocation27_spill] sm:$0xff] }
 0x275   :  { %v2667_v42 = vld.sshfl [vmem:[#allocation1 + $0x30] sm:$0xff pattern:$0x75316420]  ;;  %v2668_v12 = vld.sshfl [vmem:[#allocation1 + $0x38] sm:$0xff pattern:$0x75316420]  ;;  %4264 = vmatpush.bf16.msra.mxu3 %v7149_v61  ;;  %v12847_v63 = vsel %vm9324_vm14, %v12845_v29, %v12846_v15  ;;  %v2544_v61 = vsel %vm9324_vm14, %v6981_v2, %v2543_v18 }
 0x276   :  { %2675 = vst [vmem:[#allocation1 + $0x30] ss:$2 sm:$0xff] %v2466_v50  ;;  %v12843_v50 = vld [vmem:[#allocation21_spill] sm:$0xff] }
 0x277   :  { %2676 = vst [vmem:[#allocation1 + $0x31] ss:$2 sm:$0xff] %v2469_v30  ;;  %v2538_v30 = vrot.slane %v2536_v24, 4  ;;  %v2548_v24 = vrot.slane %v2546_v40, 4 }
 0x279   :  { %v10676_v48 = vld.sshfl [vmem:[#allocation1 + $0x20] sm:$0xff pattern:$0x75316420]  ;;  %v10678_v16 = vld.sshfl [vmem:[#allocation1 + $0x28] sm:$0xff pattern:$0x75316420] }
 0x27a   :  { %2717 = vst [vmem:[#allocation1 + $0x20] ss:$2 sm:$0xff] %v12837_v13  ;;  %v2539_v13 = vrot.slane %v2385_v46, 6 }
 0x27b   :  { %2719 = vst [vmem:[#allocation1 + $0x21] ss:$2 sm:$0xff] %v12840_v20 }
 0x27c   :  { %v2540_v26 = vsel %vm9324_vm14, %v2538_v30, %v2539_v13  ;;  %v10761_v30 = vpack.c.bf16 %v2668_v12, %v10643_v62 }
 0x27e   :  { %v10706_v3 = vld.sshfl [vmem:[#allocation1 + $0x30] sm:$0xff pattern:$0x75316420]  ;;  %v10708_v41 = vld.sshfl [vmem:[#allocation1 + $0x38] sm:$0xff pattern:$0x75316420] }
 0x27f   :  { %4082 = vmatmul.bf16.gmra.mxu2 %v10700_v28  ;;  %4121 = vmatmul.bf16.gmra.mxu3 %v10704_v21  ;;  %2721 = vst [vmem:[#allocation1 + $0x30] ss:$2 sm:$0xff] %v12841_v8  ;;  %v7002_v8 = vld [vmem:[%s12649_s3 + $0x30] sm:$0xf0] }
 0x280   :  { %2723 = vst [vmem:[#allocation1 + $0x31] ss:$2 sm:$0xff] %v12842_v36  ;;  %v7005_v36 = vor.u32 %v8210_v45, %v7002_v8  ;;  %v8298_v45 = vld [vmem:[%s12649_s3 + $0x2e4] sm:$0xf] }
 0x281   :  { %v8294_v8 = vld [vmem:[%s12649_s3 + $0x2c4] sm:$0xf] }
 0x282   :  { %v2728_v7 = vld.sshfl [vmem:[#allocation1 + $0x20] sm:$0xff pattern:$0x75316420]  ;;  %v2729_v59 = vld.sshfl [vmem:[#allocation1 + $0x28] sm:$0xff pattern:$0x75316420]  ;;  %4226 = vmatpush.bf16.msra.mxu2 %v7005_v36 }
 0x283   :  { %2736 = vst [vmem:[#allocation1 + $0x20] ss:$2 sm:$0xff] %v12843_v50  ;;  %v2549_v50 = vrot.slane %v2387_v35, 6  ;;  %v6986_v35 = vld [vmem:[%s12649_s3 + $0x10] sm:$0xf0] }
 0x284   :  { %2737 = vst [vmem:[#allocation1 + $0x21] ss:$2 sm:$0xff] %v12844_v19  ;;  %v10758_v19 = vpack.c.bf16 %v2667_v42, %v10638_v38  ;;  %v8238_v38 = vld [vmem:[%s12649_s3 + $0x104] sm:$0xf]  ;;  %v10778_v42 = vpop.f32.mrf.mxu1  ;;  %v6989_v29 = vor.u32 %v8206_v17, %v6986_v35  ;;  %v7338_v36 = vld [vmem:[%s12649_s3 + $0x2d0] sm:$0xf0] }
 0x285   :  { %v2550_v15 = vsel %vm9324_vm14, %v2548_v24, %v2549_v50  ;;  %v7466_v50 = vld [vmem:[%s12649_s3 + $0x3d0] sm:$0xf0]  ;;  %v7341_v17 = vor.u32 %v8294_v8, %v7338_v36 }
 0x286   :  { %4227 = vmatpush.bf16.msra.mxu2 %v6989_v29  ;;  %v7450_v29 = vld [vmem:[%s12649_s3 + $0x3b0] sm:$0xf0] }
 0x287   :  { %v2730_v10 = vld.sshfl [vmem:[#allocation1 + $0x30] sm:$0xff pattern:$0x75316420]  ;;  %v2731_v20 = vld.sshfl [vmem:[#allocation1 + $0x38] sm:$0xff pattern:$0x75316420] }
 0x288   :  { %v10722_v39 = vpack.c.bf16 %v2730_v10, %v2728_v7  ;;  %v10724_v5 = vpack.c.bf16 %v2731_v20, %v2729_v59  ;;  %2738 = vst [vmem:[#allocation1 + $0x30] ss:$2 sm:$0xff] %v12847_v63  ;;  %v8242_v7 = vld [vmem:[%s12649_s3 + $0x124] sm:$0xf]  ;;  %v7130_v59 = vld [vmem:[%s12649_s3 + $0x130] sm:$0xf0]  ;;  %v10763_v20 = vpop.f32.mrf.mxu0 }
 0x289   :  { %2739 = vst [vmem:[#allocation1 + $0x31] ss:$2 sm:$0xff] %v12848_v11  ;;  %v7133_v13 = vor.u32 %v8242_v7, %v7130_v59  ;;  %v2545_v10 = vrot.slane %v2543_v18, 4  ;;  %v7114_v63 = vld [vmem:[%s12649_s3 + $0x110] sm:$0xf0]  ;;  %v7485_v7 = vor.u32 %v8330_v52, %v7482_v34 }
 0x28a   :  { %4155 = vmatmul.bf16.gmra.mxu0 %v10722_v39  ;;  %4194 = vmatmul.bf16.gmra.mxu1 %v10724_v5  ;;  %v7117_v2 = vor.u32 %v8238_v38, %v7114_v63  ;;  %v8326_v59 = vld [vmem:[%s12649_s3 + $0x3c4] sm:$0xf]  ;;  %v7434_v52 = vld [vmem:[%s12649_s3 + $0x390] sm:$0xf0] }
 0x28b   :  { %v10737_v23 = vld.sshfl [vmem:[#allocation1 + $0x20] sm:$0xff pattern:$0x75316420]  ;;  %v10739_v46 = vld.sshfl [vmem:[#allocation1 + $0x28] sm:$0xff pattern:$0x75316420]  ;;  %v2547_v62 = vsel %vm9324_vm14, %v2545_v10, %v2546_v40  ;;  %4265 = vmatpush.bf16.msra.mxu3 %v7133_v13  ;;  %v10824_v13 = vpack.c.bf16 %v10407_v27, %v10200_v4  ;;  %v10828_v10 = vpack.c.bf16 %v10409_v22, %v10202_v51  ;;  %4337 = vmatpush.bf16.msrb.mxu1 %v7485_v7  ;;  %vm12894_vm14 = vmmov %vm12893_vm5 }
 0x28c   :  { %2752 = vst [vmem:[#allocation1 + $0x20] ss:$2 sm:$0xff] %v2540_v26  ;;  %v10788_v26 = vpack.c.bf16 %v10549_v58, %v10325_v43  ;;  %v4049_v24 = vpop.f32.mrf.mxu1  ;;  %v7354_v43 = vld [vmem:[%s12649_s3 + $0x2f0] sm:$0xf0]  ;;  %v7469_v35 = vor.u32 %v8326_v59, %v7466_v50  ;;  %v8362_v38 = vld [vmem:[%s12649_s3 + $0x4e4] sm:$0xf] }
 0x28d   :  { %2753 = vst [vmem:[#allocation1 + $0x21] ss:$2 sm:$0xff] %v2544_v61  ;;  %v7357_v58 = vor.u32 %v8298_v45, %v7354_v43  ;;  %v7610_v4 = vld [vmem:[%s12649_s3 + $0x4f0] sm:$0xf0]  ;;  %v8290_v51 = vld [vmem:[%s12649_s3 + $0x2a4] sm:$0xf] }
 0x28e   :  { %v7613_v27 = vor.u32 %v8362_v38, %v7610_v4  ;;  %v7322_v22 = vld [vmem:[%s12649_s3 + $0x2b0] sm:$0xf0]  ;;  %v8394_v63 = vld [vmem:[%s12649_s3 + $0x5e4] sm:$0xf] }
 0x28f   :  { %4087 = vmatmul.bf16.gmra.mxu2 %v10758_v19  ;;  %4126 = vmatmul.bf16.gmra.mxu3 %v10761_v30  ;;  %v7306_v45 = vld [vmem:[%s12649_s3 + $0x290] sm:$0xf0]  ;;  %v8318_v43 = vld [vmem:[%s12649_s3 + $0x384] sm:$0xf] }
 0x290   :  { %v2746_v12 = vld.sshfl [vmem:[#allocation1 + $0x30] sm:$0xff pattern:$0x75316420]  ;;  %v2747_v18 = vld.sshfl [vmem:[#allocation1 + $0x38] sm:$0xff pattern:$0x75316420]  ;;  %4266 = vmatpush.bf16.msra.mxu3 %v7117_v2  ;;  %v4010_v11 = vpop.f32.mrf.mxu0  ;;  %4298 = vmatpush.bf16.msrb.mxu0 %v7357_v58  ;;  %v7437_v34 = vor.u32 %v8318_v43, %v7434_v52 }
 0x291   :  { %2754 = vst [vmem:[#allocation1 + $0x30] ss:$2 sm:$0xff] %v2547_v62  ;;  %v4011_v40 = vadd.f32 %v4010_v11, %v10345_v55  ;;  %v8322_v62 = vld [vmem:[%s12649_s3 + $0x3a4] sm:$0xf]  ;;  %v7738_v2 = vld [vmem:[%s12649_s3 + $0x5f0] sm:$0xf0]  ;;  %4338 = vmatpush.bf16.msrb.mxu1 %v7469_v35  ;;  %4376 = vmatpush.bf16.msrb.mxu2 %v7613_v27  ;;  %v10869_v8 = vpack.c.bf16 %v2746_v12, %v10737_v23 }
 0x292   :  { %2755 = vst [vmem:[#allocation1 + $0x31] ss:$2 sm:$0xff] %v2550_v15  ;;  %v7325_v15 = vor.u32 %v8290_v51, %v7322_v22  ;;  %v7453_v11 = vor.u32 %v8322_v62, %v7450_v29  ;;  %v10872_v36 = vpack.c.bf16 %v2747_v18, %v10739_v46  ;;  %v8282_v7 = vld [vmem:[%s12649_s3 + $0x264] sm:$0xf]  ;;  %v7290_v59 = vld [vmem:[%s12649_s3 + $0x270] sm:$0xf0]  ;;  %v10905_v27 = vpack.c.bf16 %v10706_v3, %v10676_v48 }
 0x293   :  { %v10794_v61 = vadd.f32 %v4049_v24, %v4011_v40  ;;  %v7741_v40 = vor.u32 %v8394_v63, %v7738_v2  ;;  %v8286_v24 = vld [vmem:[%s12649_s3 + $0x284] sm:$0xf]  ;;  %v7293_v46 = vor.u32 %v8282_v7, %v7290_v59  ;;  %v7418_v12 = vld [vmem:[%s12649_s3 + $0x370] sm:$0xf0]  ;;  %v10909_v22 = vpack.c.bf16 %v10708_v41, %v10678_v16 }
 0x294   :  { %4299 = vmatpush.bf16.msrb.mxu0 %v7341_v17  ;;  %v7309_v58 = vor.u32 %v8286_v24, %v7306_v45  ;;  %v8314_v23 = vld [vmem:[%s12649_s3 + $0x364] sm:$0xf]  ;;  %v7594_v50 = vld [vmem:[%s12649_s3 + $0x4d0] sm:$0xf0] }
 0x295   :  { %4415 = vmatpush.bf16.msrb.mxu3 %v7741_v40  ;;  %4339 = vmatpush.bf16.msrb.mxu1 %v7453_v11  ;;  %v8358_v18 = vld [vmem:[%s12649_s3 + $0x4c4] sm:$0xf]  ;;  %v7421_v17 = vor.u32 %v8314_v23, %v7418_v12  ;;  %v7274_v4 = vld [vmem:[%s12649_s3 + $0x250] sm:$0xf0] }
 0x296   :  { %v7597_v35 = vor.u32 %v8358_v18, %v7594_v50  ;;  %v8278_v38 = vld [vmem:[%s12649_s3 + $0x244] sm:$0xf]  ;;  %v7402_v29 = vld [vmem:[%s12649_s3 + $0x350] sm:$0xf0] }
 0x297   :  { %v8310_v51 = vld [vmem:[%s12649_s3 + $0x344] sm:$0xf]  ;;  %v7277_v62 = vor.u32 %v8278_v38, %v7274_v4  ;;  %v7722_v63 = vld [vmem:[%s12649_s3 + $0x5d0] sm:$0xf0] }
 0x298   :  { %4300 = vmatpush.bf16.msrb.mxu0 %v7325_v15  ;;  %v8390_v15 = vld [vmem:[%s12649_s3 + $0x5c4] sm:$0xf]  ;;  %4377 = vmatpush.bf16.msrb.mxu2 %v7597_v35  ;;  %v7258_v3 = vld [vmem:[%s12649_s3 + $0x230] sm:$0xf0]  ;;  %v7405_v41 = vor.u32 %v8310_v51, %v7402_v29  ;;  %v10946_v12 = vpop.f32.mrf.mxu0  ;;  %v10952_v35 = vpop.f32.mrf.mxu1 }
 0x299   :  { %4340 = vmatpush.bf16.msrb.mxu1 %v7437_v34  ;;  %v7725_v48 = vor.u32 %v8390_v15, %v7722_v63  ;;  %v8274_v16 = vld [vmem:[%s12649_s3 + $0x224] sm:$0xf]  ;;  %v7386_v40 = vld [vmem:[%s12649_s3 + $0x330] sm:$0xf0]  ;;  %v12849_v63 = vld [vmem:[#allocation8_spill] sm:$0xff] }
 0x29a   :  { %4160 = vmatmul.bf16.gmra.mxu0 %v10788_v26  ;;  %4199 = vmatmul.bf16.gmra.mxu1 %v10792_v60  ;;  %v7261_v2 = vor.u32 %v8274_v16, %v7258_v3  ;;  %v8306_v11 = vld [vmem:[%s12649_s3 + $0x324] sm:$0xf]  ;;  %v7242_v45 = vld [vmem:[%s12649_s3 + $0x210] sm:$0xf0] }
 0x29b   :  { %4416 = vmatpush.bf16.msrb.mxu3 %v7725_v48  ;;  %v8270_v24 = vld [vmem:[%s12649_s3 + $0x204] sm:$0xf]  ;;  %v2758_v43 = vld.sshfl [vmem:[#allocation1 + $0x10] sm:$0xff pattern:$0x75316420] }
 0x29c   :  { %4301 = vmatpush.bf16.msrb.mxu0 %v7309_v58  ;;  %v2759_v52 = vld.sshfl [vmem:[#allocation1 + $0x18] sm:$0xff pattern:$0x75316420]  ;;  %v7389_v58 = vor.u32 %v8306_v11, %v7386_v40  ;;  %v7245_v34 = vor.u32 %v8270_v24, %v7242_v45  ;;  %v8302_v7 = vld [vmem:[%s12649_s3 + $0x304] sm:$0xf] }
 0x29d   :  { %4341 = vmatpush.bf16.msrb.mxu1 %v7421_v17  ;;  %v7370_v59 = vld [vmem:[%s12649_s3 + $0x310] sm:$0xf0]  ;;  %v2756_v23 = vld.sshfl [vmem:[#allocation1] sm:$0xff pattern:$0x75316420] }
 0x29e   :  { %v10948_v18 = vpack.c.bf16 %v2758_v43, %v2756_v23  ;;  %v7373_v17 = vor.u32 %v8302_v7, %v7370_v59  ;;  %v8354_v38 = vld [vmem:[%s12649_s3 + $0x4a4] sm:$0xf]  ;;  %v7578_v4 = vld [vmem:[%s12649_s3 + $0x4b0] sm:$0xf0] }
 0x29f   :  { %4092 = vmatmul.bf16.gmra.mxu2 %v10824_v13  ;;  %4131 = vmatmul.bf16.gmra.mxu3 %v10828_v10  ;;  %v8386_v51 = vld [vmem:[%s12649_s3 + $0x5a4] sm:$0xf]  ;;  %v7706_v29 = vld [vmem:[%s12649_s3 + $0x5b0] sm:$0xf0] }
 0x2a0   :  { %4302 = vmatpush.bf16.msrb.mxu0 %v7293_v46  ;;  %v2757_v46 = vld.sshfl [vmem:[#allocation1 + $0x8] sm:$0xff pattern:$0x75316420]  ;;  %v7709_v15 = vor.u32 %v8386_v51, %v7706_v29  ;;  %v12850_v48 = vld [vmem:[#allocation9_spill] sm:$0xff]  ;;  %v12853_v29 = vld [vmem:[#allocation15_spill] sm:$0xff] }
 0x2a1   :  { %4342 = vmatpush.bf16.msrb.mxu1 %v7405_v41  ;;  %v10950_v50 = vpack.c.bf16 %v2759_v52, %v2757_v46  ;;  %v8350_v3 = vld [vmem:[%s12649_s3 + $0x484] sm:$0xf]  ;;  %v7562_v41 = vld [vmem:[%s12649_s3 + $0x490] sm:$0xf0] }
 0x2a2   :  { %4417 = vmatpush.bf16.msrb.mxu3 %v7709_v15  ;;  %v7565_v11 = vor.u32 %v8350_v3, %v7562_v41  ;;  %v2762_v45 = vld.sshfl [vmem:[#allocation1 + $0x30] sm:$0xff pattern:$0x75316420]  ;;  %v2763_v43 = vld.sshfl [vmem:[#allocation1 + $0x38] sm:$0xff pattern:$0x75316420] }
 0x2a3   :  { %v8382_v52 = vld [vmem:[%s12649_s3 + $0x584] sm:$0xf]  ;;  %v2761_v7 = vld.sshfl [vmem:[#allocation1 + $0x28] sm:$0xff pattern:$0x75316420] }
 0x2a4   :  { %4303 = vmatpush.bf16.msrb.mxu0 %v7277_v62  ;;  %v7581_v62 = vor.u32 %v8354_v38, %v7578_v4  ;;  %v10987_v46 = vpack.c.bf16 %v2763_v43, %v2761_v7  ;;  %v8346_v15 = vld [vmem:[%s12649_s3 + $0x464] sm:$0xf]  ;;  %v7674_v41 = vld [vmem:[%s12649_s3 + $0x570] sm:$0xf0] }
 0x2a5   :  { %4343 = vmatpush.bf16.msrb.mxu1 %v7389_v58  ;;  %v7690_v58 = vld [vmem:[%s12649_s3 + $0x590] sm:$0xf0]  ;;  %v8374_v7 = vld [vmem:[%s12649_s3 + $0x544] sm:$0xf] }
 0x2a6   :  { %4378 = vmatpush.bf16.msrb.mxu2 %v7581_v62  ;;  %v7693_v59 = vor.u32 %v8382_v52, %v7690_v58  ;;  %12851 = vst [vmem:[#allocation4_spill] sm:$0xff] %v10987_v46  ;;  %v12852_v62 = vld [vmem:[#allocation14_spill] sm:$0xff]  ;;  %v7530_v43 = vld [vmem:[%s12649_s3 + $0x450] sm:$0xf0] }
 0x2a7   :  { %v12854_v58 = vld [vmem:[#allocation19_spill] sm:$0xff] }
 0x2a8   :  { %4304 = vmatpush.bf16.msrb.mxu0 %v7261_v2  ;;  %4418 = vmatpush.bf16.msrb.mxu3 %v7693_v59  ;;  %v7658_v59 = vld [vmem:[%s12649_s3 + $0x550] sm:$0xf0] }
 0x2a9   :  { %4344 = vmatpush.bf16.msrb.mxu1 %v7373_v17 }
 0x2aa   :  { %4165 = vmatmul.bf16.gmra.mxu0 %v10869_v8  ;;  %4204 = vmatmul.bf16.gmra.mxu1 %v10872_v36 }
 0x2ab   :  { %4379 = vmatpush.bf16.msrb.mxu2 %v7565_v11 }
 0x2ac   :  { %4305 = vmatpush.bf16.msrb.mxu0 %v7245_v34  ;;  %v2760_v34 = vld.sshfl [vmem:[#allocation1 + $0x20] sm:$0xff pattern:$0x75316420] }
 0x2ad   :  { %v10985_v23 = vpack.c.bf16 %v2762_v45, %v2760_v34  ;;  %v8342_v45 = vld [vmem:[%s12649_s3 + $0x444] sm:$0xf]  ;;  %v12855_v34 = vld [vmem:[#allocation22_spill] sm:$0xff] }
 0x2ae   :  { %v7533_v52 = vor.u32 %v8342_v45, %v7530_v43  ;;  %v8338_v43 = vld [vmem:[%s12649_s3 + $0x424] sm:$0xf] }
 0x2af   :  { %4097 = vmatmul.bf16.gmra.mxu2 %v10905_v27  ;;  %4136 = vmatmul.bf16.gmra.mxu3 %v10909_v22 }
 0x2ba   :  { %4170 = vmatmul.bf16.gmra.mxu0 %v10948_v18  ;;  %4209 = vmatmul.bf16.gmra.mxu1 %v10950_v50  ;;  %v4015_v16 = vpop.f32.mrf.mxu0  ;;  %v4054_v40 = vpop.f32.mrf.mxu1 }
 0x2bb   :  { %v4016_v2 = vadd.f32 %v4015_v16, %v10345_v55  ;;  %v7546_v16 = vld [vmem:[%s12649_s3 + $0x470] sm:$0xf0] }
 0x2bc   :  { %v7549_v3 = vor.u32 %v8346_v15, %v7546_v16 }
 0x2bd   :  { %v10977_v24 = vadd.f32 %v4054_v40, %v4016_v2 }
 0x2be   :  { %4380 = vmatpush.bf16.msrb.mxu2 %v7549_v3 }
 0x2bf   :  { %4228 = vmatmul.bf16.vlgmr.msra.gmra.mxu2 %v12849_v63  ;;  %4267 = vmatmul.bf16.vlgmr.msra.gmra.mxu3 %v12850_v48 }
 0x2c2   :  { %v4073_v17 = vpop.f32.mrf.mxu2  ;;  %v11008_v11 = vpop.f32.mrf.mxu0  ;;  %4381 = vmatpush.bf16.msrb.mxu2 %v7533_v52  ;;  %v7514_v52 = vld [vmem:[%s12649_s3 + $0x430] sm:$0xf0] }
 0x2c3   :  { %v4074_v38 = vadd.f32 %v4073_v17, %v10394_v49  ;;  %v8378_v49 = vld [vmem:[%s12649_s3 + $0x564] sm:$0xf]  ;;  %v11010_v40 = vpop.f32.mrf.mxu1  ;;  %v7661_v17 = vor.u32 %v8374_v7, %v7658_v59  ;;  %v7517_v59 = vor.u32 %v8338_v43, %v7514_v52 }
 0x2c4   :  { %v4112_v4 = vpop.f32.mrf.mxu3  ;;  %v7677_v2 = vor.u32 %v8378_v49, %v7674_v41  ;;  %v8370_v7 = vld [vmem:[%s12649_s3 + $0x524] sm:$0xf] }
 0x2c5   :  { %v4113_v51 = vadd.f32 %v4112_v4, %v4074_v38 }
 0x2c6   :  { %4419 = vmatpush.bf16.msrb.mxu3 %v7677_v2  ;;  %4382 = vmatpush.bf16.msrb.mxu2 %v7517_v59 }
 0x2ca   :  { %4175 = vmatmul.bf16.gmra.mxu0 %v10985_v23  ;;  %4214 = vmatmul.bf16.gmra.mxu1 %v10987_v46  ;;  %v4075_v49 = vpop.f32.mrf.mxu2 }
 0x2cb   :  { %4420 = vmatpush.bf16.msrb.mxu3 %v7661_v17  ;;  %v7642_v17 = vld [vmem:[%s12649_s3 + $0x530] sm:$0xf0] }
 0x2cc   :  { %v4114_v3 = vpop.f32.mrf.mxu3 }
 0x2cf   :  { %4233 = vmatmul.bf16.gmra.mxu2 %v12852_v62  ;;  %4272 = vmatmul.bf16.gmra.mxu3 %v12853_v29 }
 0x2da   :  { %4306 = vmatmul.bf16.vlgmr.msrb.gmra.mxu0 %v10334_v56  ;;  %4345 = vmatmul.bf16.vlgmr.msrb.gmra.mxu1 %v10348_v37 }
 0x2df   :  { %4238 = vmatmul.bf16.gmra.mxu2 %v12854_v58  ;;  %4277 = vmatmul.bf16.gmra.mxu3 %v12855_v34 }
 0x2e0   :  { %v4020_v38 = vpop.f32.mrf.mxu0 }
 0x2e1   :  { %v4059_v4 = vpop.f32.mrf.mxu1  ;;  %v4021_v15 = vadd.f32 %v4020_v38, %v10345_v55 }
 0x2e3   :  { %v11027_v16 = vadd.f32 %v4059_v4, %v4021_v15  ;;  %v7645_v4 = vor.u32 %v8370_v7, %v7642_v17  ;;  %v12856_v15 = vld [vmem:[#allocation31_spill] sm:$0xff]  ;;  %v8334_v17 = vld [vmem:[%s12649_s3 + $0x404] sm:$0xf] }
 0x2e5   :  { %4421 = vmatpush.bf16.msrb.mxu3 %v7645_v4 }
 0x2e8   :  { %v4022_v41 = vpop.f32.mrf.mxu0 }
 0x2e9   :  { %v4061_v2 = vpop.f32.mrf.mxu1  ;;  %v4023_v45 = vadd.f32 %v4022_v41, %v10345_v55  ;;  %v12857_v41 = vld [vmem:[#allocation32_spill] sm:$0xff] }
 0x2ea   :  { %4311 = vmatmul.bf16.gmra.mxu0 %v10627_v9  ;;  %4350 = vmatmul.bf16.gmra.mxu1 %v10634_v53  ;;  %v3998_v53 = vadd.f32 %v10359_v44, %v10345_v55  ;;  %v7498_v44 = vld [vmem:[%s12649_s3 + $0x410] sm:$0xf0] }
 0x2eb   :  { %v11044_v38 = vadd.f32 %v4061_v2, %v4023_v45  ;;  %v4003_v45 = vadd.f32 %v10489_v57, %v10345_v55 }
 0x2ec   :  { %v4037_v46 = vadd.f32 %v10370_v1, %v3998_v53 }
 0x2ed   :  { %v4042_v1 = vadd.f32 %v10508_v14, %v4003_v45  ;;  %v7104_v14 = vld [vmem:[%s12649_s3 + $0xe8] sm:$0xf] }
 0x2ee   :  { %v4076_v59 = vadd.f32 %v4075_v49, %v4037_v46  ;;  %v8366_v46 = vld [vmem:[%s12649_s3 + $0x504] sm:$0xf]  ;;  %v7232_v45 = vld [vmem:[%s12649_s3 + $0x1e8] sm:$0xf] }
 0x2ef   :  { %4243 = vmatmul.bf16.gmra.mxu2 %v12856_v15  ;;  %4282 = vmatmul.bf16.gmra.mxu3 %v12857_v41 }
 0x2f0   :  { %v4151_v52 = vpop.f32.mrf.mxu0 }
 0x2f1   :  { %v4190_v56 = vpop.f32.mrf.mxu1  ;;  %v4152_v2 = vadd.f32 %v4151_v52, %v4113_v51 }
 0x2f2   :  { %v4078_v9 = vpop.f32.mrf.mxu2  ;;  %v4117_v37 = vpop.f32.mrf.mxu3 }
 0x2f3   :  { %v4079_v43 = vadd.f32 %v4078_v9, %v10499_v25  ;;  %v11060_v4 = vadd.f32 %v4190_v56, %v4152_v2  ;;  %v7501_v25 = vor.u32 %v8334_v17, %v7498_v44  ;;  %v4115_v9 = vadd.f32 %v4114_v3, %v4076_v59  ;;  %v7626_v56 = vld [vmem:[%s12649_s3 + $0x510] sm:$0xf0]  ;;  %v8237_v2 = vld [vmem:[%s12649_s3 + $0xf4] sm:$0xf0] }
 0x2f4   :  { %v7629_v52 = vor.u32 %v8366_v46, %v7626_v56  ;;  %v8269_v17 = vld [vmem:[%s12649_s3 + $0x1f4] sm:$0xf0]  ;;  %v7105_v59 = vor.u32 %v8237_v2, %v7104_v14  ;;  %v7360_v14 = vld [vmem:[%s12649_s3 + $0x2e8] sm:$0xf]  ;;  %v4008_v2 = vadd.f32 %v10763_v20, %v10345_v55 }
 0x2f5   :  { %v4118_v7 = vadd.f32 %v4117_v37, %v4079_v43  ;;  %4383 = vmatpush.bf16.msrb.mxu2 %v7501_v25  ;;  %v7233_v25 = vor.u32 %v8269_v17, %v7232_v45  ;;  %v8229_v17 = vld [vmem:[%s12649_s3 + $0xb4] sm:$0xf0]  ;;  %v7488_v20 = vld [vmem:[%s12649_s3 + $0x3e8] sm:$0xf] }
 0x2f6   :  { %4422 = vmatpush.bf16.msrb.mxu3 %v7629_v52  ;;  %4454 = vmatpush.bf16.msra.mxu0 %v7105_v59  ;;  %v7072_v52 = vld [vmem:[%s12649_s3 + $0xa8] sm:$0xf] }
 0x2f7   :  { %4493 = vmatpush.bf16.msra.mxu1 %v7233_v25  ;;  %v7200_v59 = vld [vmem:[%s12649_s3 + $0x1a8] sm:$0xf]  ;;  %v8261_v25 = vld [vmem:[%s12649_s3 + $0x1b4] sm:$0xf0] }
 0x2f8   :  { %v4153_v51 = vpop.f32.mrf.mxu0 }
 0x2f9   :  { %v4154_v43 = vadd.f32 %v4153_v51, %v4115_v9  ;;  %v4192_v3 = vpop.f32.mrf.mxu1  ;;  %v8233_v9 = vld [vmem:[%s12649_s3 + $0xd4] sm:$0xf0] }
 0x2fa   :  { %4316 = vmatmul.bf16.gmra.mxu0 %v10700_v28  ;;  %4355 = vmatmul.bf16.gmra.mxu1 %v10704_v21  ;;  %v4080_v37 = vpop.f32.mrf.mxu2  ;;  %v4119_v57 = vpop.f32.mrf.mxu3 }
 0x2fb   :  { %v4081_v53 = vadd.f32 %v4080_v37, %v4042_v1  ;;  %v11085_v44 = vadd.f32 %v4192_v3, %v4154_v43  ;;  %v7088_v1 = vld [vmem:[%s12649_s3 + $0xc8] sm:$0xf]  ;;  %v8265_v43 = vld [vmem:[%s12649_s3 + $0x1d4] sm:$0xf0] }
 0x2fc   :  { %v7216_v37 = vld [vmem:[%s12649_s3 + $0x1c8] sm:$0xf]  ;;  %v7089_v51 = vor.u32 %v8233_v9, %v7088_v1  ;;  %v8301_v3 = vld [vmem:[%s12649_s3 + $0x2f4] sm:$0xf0]  ;;  %v7073_v1 = vor.u32 %v8229_v17, %v7072_v52  ;;  %v7201_v9 = vor.u32 %v8261_v25, %v7200_v59 }
 0x2fd   :  { %v11074_v49 = vadd.f32 %v4119_v57, %v4081_v53  ;;  %12858 = vst [vmem:[#allocation2_spill] sm:$0xff] %v11085_v44  ;;  %v7217_v56 = vor.u32 %v8265_v43, %v7216_v37  ;;  %v8333_v37 = vld [vmem:[%s12649_s3 + $0x3f4] sm:$0xf0]  ;;  %v7040_v25 = vld [vmem:[%s12649_s3 + $0x68] sm:$0xf] }
 0x2fe   :  { %4455 = vmatpush.bf16.msra.mxu0 %v7089_v51  ;;  %v7489_v51 = vor.u32 %v8333_v37, %v7488_v20  ;;  %v7168_v37 = vld [vmem:[%s12649_s3 + $0x168] sm:$0xf] }
 0x2ff   :  { %4248 = vmatmul.bf16.gmra.mxu2 %v10317_v54  ;;  %4287 = vmatmul.bf16.gmra.mxu3 %v10331_v0 }
 0x300   :  { %4494 = vmatpush.bf16.msra.mxu1 %v7217_v56  ;;  %4571 = vmatpush.bf16.msra.mxu3 %v7489_v51  ;;  %v7056_v56 = vld [vmem:[%s12649_s3 + $0x88] sm:$0xf] }
 0x302   :  { %v4083_v57 = vpop.f32.mrf.mxu2  ;;  %v4122_v53 = vpop.f32.mrf.mxu3  ;;  %4456 = vmatpush.bf16.msra.mxu0 %v7073_v1  ;;  %v8221_v1 = vld [vmem:[%s12649_s3 + $0x74] sm:$0xf0] }
 0x303   :  { %v4084_v46 = vadd.f32 %v4083_v57, %v10573_v31  ;;  %v7361_v31 = vor.u32 %v8301_v3, %v7360_v14  ;;  %v8225_v14 = vld [vmem:[%s12649_s3 + $0x94] sm:$0xf0]  ;;  %v7184_v3 = vld [vmem:[%s12649_s3 + $0x188] sm:$0xf]  ;;  %v7041_v20 = vor.u32 %v8221_v1, %v7040_v25 }
 0x304   :  { %4495 = vmatpush.bf16.msra.mxu1 %v7201_v9  ;;  %v8249_v25 = vld [vmem:[%s12649_s3 + $0x154] sm:$0xf0] }
 0x305   :  { %v11113_v45 = vadd.f32 %v4122_v53, %v4084_v46  ;;  %4532 = vmatpush.bf16.msra.mxu2 %v7361_v31  ;;  %v4047_v46 = vadd.f32 %v10778_v42, %v4008_v2  ;;  %v7057_v2 = vor.u32 %v8225_v14, %v7056_v56  ;;  %v8257_v31 = vld [vmem:[%s12649_s3 + $0x194] sm:$0xf0] }
 0x306   :  { %v7185_v59 = vor.u32 %v8257_v31, %v7184_v3 }
 0x307   :  { %v4156_v57 = vpop.f32.mrf.mxu0  ;;  %v4195_v53 = vpop.f32.mrf.mxu1  ;;  %4457 = vmatpush.bf16.msra.mxu0 %v7057_v2  ;;  %v7152_v2 = vld [vmem:[%s12649_s3 + $0x148] sm:$0xf] }
 0x308   :  { %v4157_v43 = vadd.f32 %v4156_v57, %v4118_v7  ;;  %4496 = vmatpush.bf16.msra.mxu1 %v7185_v59  ;;  %v8253_v57 = vld [vmem:[%s12649_s3 + $0x174] sm:$0xf0] }
 0x309   :  { %v7169_v51 = vor.u32 %v8253_v57, %v7168_v37  ;;  %v7472_v37 = vld [vmem:[%s12649_s3 + $0x3c8] sm:$0xf]  ;;  %v8329_v57 = vld [vmem:[%s12649_s3 + $0x3d4] sm:$0xf0] }
 0x30a   :  { %v11140_v52 = vadd.f32 %v4195_v53, %v4157_v43  ;;  %4321 = vmatmul.bf16.gmra.mxu0 %v10758_v19  ;;  %4360 = vmatmul.bf16.gmra.mxu1 %v10761_v30  ;;  %v4085_v42 = vpop.f32.mrf.mxu2  ;;  %v4124_v7 = vpop.f32.mrf.mxu3  ;;  %v7344_v53 = vld [vmem:[%s12649_s3 + $0x2c8] sm:$0xf]  ;;  %v8297_v43 = vld [vmem:[%s12649_s3 + $0x2d4] sm:$0xf0] }
 0x30b   :  { %v4086_v17 = vadd.f32 %v4085_v42, %v4047_v46  ;;  %v7345_v14 = vor.u32 %v8297_v43, %v7344_v53  ;;  %4458 = vmatpush.bf16.msra.mxu0 %v7041_v20  ;;  %v7024_v42 = vld [vmem:[%s12649_s3 + $0x48] sm:$0xf]  ;;  %v7153_v20 = vor.u32 %v8249_v25, %v7152_v2  ;;  %v4013_v53 = vadd.f32 %v10946_v12, %v10345_v55  ;;  %v8245_v12 = vld [vmem:[%s12649_s3 + $0x134] sm:$0xf0] }
 0x30c   :  { %12859 = vst [vmem:[#allocation12_spill] sm:$0xff] %v11140_v52  ;;  %4497 = vmatpush.bf16.msra.mxu1 %v7169_v51  ;;  %v7473_v43 = vor.u32 %v8329_v57, %v7472_v37  ;;  %v7120_v25 = vld [vmem:[%s12649_s3 + $0x108] sm:$0xf]  ;;  %v8241_v37 = vld [vmem:[%s12649_s3 + $0x114] sm:$0xf0] }
 0x30d   :  { %v11153_v9 = vadd.f32 %v4124_v7, %v4086_v17  ;;  %4533 = vmatpush.bf16.msra.mxu2 %v7345_v14  ;;  %v8217_v7 = vld [vmem:[%s12649_s3 + $0x54] sm:$0xf0] }
 0x30e   :  { %4572 = vmatpush.bf16.msra.mxu3 %v7473_v43  ;;  %v7328_v43 = vld [vmem:[%s12649_s3 + $0x2a8] sm:$0xf] }
 0x30f   :  { %v4158_v46 = vpop.f32.mrf.mxu0  ;;  %v4197_v56 = vpop.f32.mrf.mxu1  ;;  %4253 = vmatmul.bf16.gmra.mxu2 %v10583_v33  ;;  %4292 = vmatmul.bf16.gmra.mxu3 %v10585_v6 }
 0x310   :  { %v4159_v3 = vadd.f32 %v4158_v46, %v11074_v49  ;;  %v7025_v49 = vor.u32 %v8217_v7, %v7024_v42  ;;  %4498 = vmatpush.bf16.msra.mxu1 %v7153_v20  ;;  %v8213_v46 = vld [vmem:[%s12649_s3 + $0x34] sm:$0xf0] }
 0x312   :  { %v11179_v31 = vadd.f32 %v4197_v56, %v4159_v3  ;;  %v4088_v17 = vpop.f32.mrf.mxu2  ;;  %v4127_v59 = vpop.f32.mrf.mxu3  ;;  %4459 = vmatpush.bf16.msra.mxu0 %v7025_v49  ;;  %v7136_v56 = vld [vmem:[%s12649_s3 + $0x128] sm:$0xf]  ;;  %v8209_v49 = vld [vmem:[%s12649_s3 + $0x14] sm:$0xf0] }
 0x313   :  { %v4089_v1 = vadd.f32 %v4088_v17, %v10794_v61  ;;  %v7008_v61 = vld [vmem:[%s12649_s3 + $0x28] sm:$0xf]  ;;  %v7137_v7 = vor.u32 %v8245_v12, %v7136_v56  ;;  %v4052_v17 = vadd.f32 %v10952_v35, %v4013_v53  ;;  %v7121_v53 = vor.u32 %v8241_v37, %v7120_v25  ;;  %v8325_v12 = vld [vmem:[%s12649_s3 + $0x3b4] sm:$0xf0] }
 0x314   :  { %12860 = vst [vmem:[#allocation10_spill] sm:$0xff] %v11179_v31  ;;  %v7009_v14 = vor.u32 %v8213_v46, %v7008_v61  ;;  %v8293_v61 = vld [vmem:[%s12649_s3 + $0x2b4] sm:$0xf0] }
 0x315   :  { %v4128_v51 = vadd.f32 %v4127_v59, %v4089_v1  ;;  %4499 = vmatpush.bf16.msra.mxu1 %v7137_v7  ;;  %v6992_v59 = vld [vmem:[%s12649_s3 + $0x8] sm:$0xf]  ;;  %v7329_v56 = vor.u32 %v8293_v61, %v7328_v43 }
 0x316   :  { %4460 = vmatpush.bf16.msra.mxu0 %v7009_v14  ;;  %v6993_v20 = vor.u32 %v8209_v49, %v6992_v59  ;;  %v7456_v14 = vld [vmem:[%s12649_s3 + $0x3a8] sm:$0xf] }
 0x317   :  { %v4161_v3 = vpop.f32.mrf.mxu0  ;;  %v4200_v42 = vpop.f32.mrf.mxu1  ;;  %4534 = vmatpush.bf16.msra.mxu2 %v7329_v56 }
 0x318   :  { %v4162_v2 = vadd.f32 %v4161_v3, %v11113_v45  ;;  %v7457_v3 = vor.u32 %v8325_v12, %v7456_v14  ;;  %v7440_v14 = vld [vmem:[%s12649_s3 + $0x388] sm:$0xf] }
 0x319   :  { %4500 = vmatpush.bf16.msra.mxu1 %v7121_v53 }
 0x31a   :  { %v11216_v1 = vadd.f32 %v4200_v42, %v4162_v2  ;;  %4326 = vmatmul.bf16.gmra.mxu0 %v10824_v13  ;;  %4365 = vmatmul.bf16.gmra.mxu1 %v10828_v10  ;;  %v4090_v35 = vpop.f32.mrf.mxu2  ;;  %v4129_v45 = vpop.f32.mrf.mxu3 }
 0x31b   :  { %v4091_v57 = vadd.f32 %v4090_v35, %v4052_v17  ;;  %4461 = vmatpush.bf16.msra.mxu0 %v6993_v20  ;;  %4573 = vmatpush.bf16.msra.mxu3 %v7457_v3  ;;  %v4018_v35 = vadd.f32 %v11008_v11, %v10345_v55  ;;  %v7312_v20 = vld [vmem:[%s12649_s3 + $0x288] sm:$0xf] }
 0x31c   :  { %12861 = vst [vmem:[#allocation20_spill] sm:$0xff] %v11216_v1 }
 0x31d   :  { %v4130_v46 = vadd.f32 %v4129_v45, %v4091_v57  ;;  %v4057_v61 = vadd.f32 %v11010_v40, %v4018_v35  ;;  %v7296_v35 = vld [vmem:[%s12649_s3 + $0x268] sm:$0xf] }
 0x31f   :  { %v4163_v42 = vpop.f32.mrf.mxu0  ;;  %v4202_v7 = vpop.f32.mrf.mxu1  ;;  %4384 = vmatmul.bf16.vlgmr.msrb.gmra.mxu2 %v10664_v32  ;;  %4423 = vmatmul.bf16.vlgmr.msrb.gmra.mxu3 %v10668_v47 }
 0x320   :  { %v4164_v2 = vadd.f32 %v4163_v42, %v11153_v9  ;;  %v8289_v9 = vld [vmem:[%s12649_s3 + $0x294] sm:$0xf0] }
 0x321   :  { %v7313_v37 = vor.u32 %v8289_v9, %v7312_v20  ;;  %v8285_v20 = vld [vmem:[%s12649_s3 + $0x274] sm:$0xf0] }
 0x322   :  { %v11238_v17 = vadd.f32 %v4202_v7, %v4164_v2  ;;  %v4093_v59 = vpop.f32.mrf.mxu2  ;;  %v4132_v49 = vpop.f32.mrf.mxu3 }
 0x323   :  { %v4094_v25 = vadd.f32 %v4093_v59, %v10977_v24  ;;  %4535 = vmatpush.bf16.msra.mxu2 %v7313_v37  ;;  %v7297_v37 = vor.u32 %v8285_v20, %v7296_v35 }
 0x324   :  { %12862 = vst [vmem:[#allocation23_spill] sm:$0xff] %v11238_v17 }
 0x325   :  { %v4133_v45 = vadd.f32 %v4132_v49, %v4094_v25 }
 0x327   :  { %v4166_v57 = vpop.f32.mrf.mxu0  ;;  %v4205_v53 = vpop.f32.mrf.mxu1  ;;  %4536 = vmatpush.bf16.msra.mxu2 %v7297_v37  ;;  %v7408_v37 = vld [vmem:[%s12649_s3 + $0x348] sm:$0xf] }
 0x328   :  { %v4167_v43 = vadd.f32 %v4166_v57, %v4128_v51  ;;  %v8321_v51 = vld [vmem:[%s12649_s3 + $0x394] sm:$0xf0] }
 0x329   :  { %v7441_v3 = vor.u32 %v8321_v51, %v7440_v14  ;;  %v8317_v57 = vld [vmem:[%s12649_s3 + $0x374] sm:$0xf0] }
 0x32a   :  { %v11250_v24 = vadd.f32 %v4205_v53, %v4167_v43  ;;  %4331 = vmatmul.bf16.gmra.mxu0 %v10905_v27  ;;  %4370 = vmatmul.bf16.gmra.mxu1 %v10909_v22  ;;  %v4095_v55 = vpop.f32.mrf.mxu2  ;;  %v4134_v11 = vpop.f32.mrf.mxu3 }
 0x32b   :  { %v4096_v56 = vadd.f32 %v4095_v55, %v4057_v61  ;;  %4574 = vmatpush.bf16.msra.mxu3 %v7441_v3  ;;  %v7280_v3 = vld [vmem:[%s12649_s3 + $0x248] sm:$0xf] }
 0x32c   :  { %12863 = vst [vmem:[#allocation24_spill] sm:$0xff] %v11250_v24  ;;  %v12870_v24 = vld [vmem:[#allocation33_spill] sm:$0xff] }
 0x32d   :  { %v4135_v12 = vadd.f32 %v4134_v11, %v4096_v56 }
 0x32f   :  { %v4168_v40 = vpop.f32.mrf.mxu0  ;;  %v4207_v42 = vpop.f32.mrf.mxu1  ;;  %4389 = vmatmul.bf16.gmra.mxu2 %v10722_v39  ;;  %4428 = vmatmul.bf16.gmra.mxu3 %v10724_v5 }
 0x330   :  { %v4169_v7 = vadd.f32 %v4168_v40, %v4130_v46  ;;  %v7424_v46 = vld [vmem:[%s12649_s3 + $0x368] sm:$0xf] }
 0x331   :  { %v7425_v53 = vor.u32 %v8317_v57, %v7424_v46  ;;  %v8313_v46 = vld [vmem:[%s12649_s3 + $0x354] sm:$0xf0] }
 0x332   :  { %v11262_v2 = vadd.f32 %v4207_v42, %v4169_v7  ;;  %v4098_v59 = vpop.f32.mrf.mxu2  ;;  %v4137_v49 = vpop.f32.mrf.mxu3 }
 0x333   :  { %v4099_v25 = vadd.f32 %v4098_v59, %v11027_v16  ;;  %4575 = vmatpush.bf16.msra.mxu3 %v7425_v53  ;;  %v7409_v53 = vor.u32 %v8313_v46, %v7408_v37 }
 0x334   :  { %12864 = vst [vmem:[#allocation25_spill] sm:$0xff] %v11262_v2 }
 0x335   :  { %v4138_v9 = vadd.f32 %v4137_v49, %v4099_v25 }
 0x337   :  { %v4171_v16 = vpop.f32.mrf.mxu0  ;;  %v4210_v43 = vpop.f32.mrf.mxu1  ;;  %4576 = vmatpush.bf16.msra.mxu3 %v7409_v53 }
 0x338   :  { %v4172_v61 = vadd.f32 %v4171_v16, %v4133_v45  ;;  %v8281_v45 = vld [vmem:[%s12649_s3 + $0x254] sm:$0xf0] }
 0x339   :  { %v7281_v40 = vor.u32 %v8281_v45, %v7280_v3  ;;  %v7264_v3 = vld [vmem:[%s12649_s3 + $0x228] sm:$0xf]  ;;  %v8277_v45 = vld [vmem:[%s12649_s3 + $0x234] sm:$0xf0] }
 0x33a   :  { %v11277_v55 = vadd.f32 %v4210_v43, %v4172_v61  ;;  %4462 = vmatmul.bf16.vlgmr.msra.gmra.mxu0 %v12849_v63  ;;  %4501 = vmatmul.bf16.vlgmr.msra.gmra.mxu1 %v12850_v48  ;;  %v4100_v11 = vpop.f32.mrf.mxu2  ;;  %v4139_v56 = vpop.f32.mrf.mxu3 }
 0x33b   :  { %v4101_v14 = vadd.f32 %v4100_v11, %v11044_v38  ;;  %v11293_v38 = vld [vmem:[%s12650_s4] sm:$0xf]  ;;  %4537 = vmatpush.bf16.msra.mxu2 %v7281_v40 }
 0x33c   :  { %12865 = vst [vmem:[#allocation29_spill] sm:$0xff] %v11277_v55  ;;  %v11296_v59 = vperm.slane %v11293_v38, 1  ;;  %v7504_v55 = vld [vmem:[%s12649_s3 + $0x408] sm:$0xf] }
 0x33d   :  { %v4140_v51 = vadd.f32 %v4139_v56, %v4101_v14 }
 0x33f   :  { %v4173_v42 = vpop.f32.mrf.mxu0  ;;  %v4212_v7 = vpop.f32.mrf.mxu1  ;;  %4394 = vmatmul.bf16.gmra.mxu2 %v10788_v26  ;;  %4433 = vmatmul.bf16.gmra.mxu3 %v10792_v60 }
 0x340   :  { %v4174_v49 = vadd.f32 %v4173_v42, %v4135_v12  ;;  %v7265_v42 = vor.u32 %v8277_v45, %v7264_v3 }
 0x342   :  { %v11298_v25 = vadd.f32 %v4212_v7, %v4174_v49  ;;  %v4229_v35 = vpop.f32.mrf.mxu2  ;;  %v4268_v20 = vpop.f32.mrf.mxu3  ;;  %v8309_v7 = vld [vmem:[%s12649_s3 + $0x334] sm:$0xf0]  ;;  %4538 = vmatpush.bf16.msra.mxu2 %v7265_v42 }
 0x343   :  { %v4230_v57 = vadd.f32 %v4229_v35, %v11296_v59 }
 0x344   :  { %12866 = vst [vmem:[#allocation5_spill] sm:$0xff] %v11298_v25  ;;  %v12869_v25 = vld [vmem:[#allocation4_spill] sm:$0xff] }
 0x345   :  { %v4269_v16 = vadd.f32 %v4268_v20, %v4230_v57 }
 0x347   :  { %v4176_v43 = vpop.f32.mrf.mxu0  ;;  %v4215_v12 = vpop.f32.mrf.mxu1 }
 0x348   :  { %v4177_v61 = vadd.f32 %v4176_v43, %v4138_v9  ;;  %v7392_v9 = vld [vmem:[%s12649_s3 + $0x328] sm:$0xf] }
 0x349   :  { %v7393_v49 = vor.u32 %v8309_v7, %v7392_v9 }
 0x34a   :  { %v11307_v11 = vadd.f32 %v4215_v12, %v4177_v61  ;;  %4467 = vmatmul.bf16.gmra.mxu0 %v12852_v62  ;;  %4506 = vmatmul.bf16.gmra.mxu1 %v12853_v29  ;;  %v4231_v56 = vpop.f32.mrf.mxu2  ;;  %v4270_v14 = vpop.f32.mrf.mxu3 }
 0x34b   :  { %v4232_v40 = vadd.f32 %v4231_v56, %v11296_v59  ;;  %4577 = vmatpush.bf16.msra.mxu3 %v7393_v49  ;;  %v7248_v56 = vld [vmem:[%s12649_s3 + $0x208] sm:$0xf] }
 0x34c   :  { %12867 = vst [vmem:[#allocation6_spill] sm:$0xff] %v11307_v11  ;;  %v7376_v49 = vld [vmem:[%s12649_s3 + $0x308] sm:$0xf]  ;;  %v8353_v11 = vld [vmem:[%s12649_s3 + $0x494] sm:$0xf0] }
 0x34d   :  { %v4271_v35 = vadd.f32 %v4270_v14, %v4232_v40  ;;  %v8273_v14 = vld [vmem:[%s12649_s3 + $0x214] sm:$0xf0] }
 0x34e   :  { %v7249_v3 = vor.u32 %v8273_v14, %v7248_v56 }
 0x34f   :  { %v4178_v20 = vpop.f32.mrf.mxu0  ;;  %v4217_v37 = vpop.f32.mrf.mxu1  ;;  %4399 = vmatmul.bf16.gmra.mxu2 %v10869_v8  ;;  %4438 = vmatmul.bf16.gmra.mxu3 %v10872_v36 }
 0x350   :  { %v4179_v46 = vadd.f32 %v4178_v20, %v4140_v51  ;;  %4539 = vmatpush.bf16.msra.mxu2 %v7249_v3  ;;  %v8305_v20 = vld [vmem:[%s12649_s3 + $0x314] sm:$0xf0] }
 0x352   :  { %v11326_v57 = vadd.f32 %v4217_v37, %v4179_v46  ;;  %v4234_v53 = vpop.f32.mrf.mxu2  ;;  %v4273_v43 = vpop.f32.mrf.mxu3  ;;  %v7377_v46 = vor.u32 %v8305_v20, %v7376_v49  ;;  %v8361_v49 = vld [vmem:[%s12649_s3 + $0x4d4] sm:$0xf0] }
 0x353   :  { %v4235_v12 = vadd.f32 %v4234_v53, %v11296_v59  ;;  %v8365_v53 = vld [vmem:[%s12649_s3 + $0x4f4] sm:$0xf0] }
 0x354   :  { %12868 = vst [vmem:[#allocation7_spill] sm:$0xff] %v11326_v57  ;;  %4578 = vmatpush.bf16.msra.mxu3 %v7377_v46  ;;  %v7568_v57 = vld [vmem:[%s12649_s3 + $0x488] sm:$0xf] }
 0x355   :  { %v4274_v61 = vadd.f32 %v4273_v43, %v4235_v12  ;;  %v7744_v43 = vld [vmem:[%s12649_s3 + $0x5e8] sm:$0xf]  ;;  %v8397_v12 = vld [vmem:[%s12649_s3 + $0x5f4] sm:$0xf0] }
 0x356   :  { %v7745_v14 = vor.u32 %v8397_v12, %v7744_v43  ;;  %v7106_v43 = vld [vmem:[%s12649_s3 + $0xf8] sm:$0xf0] }
 0x357   :  { %v4307_v45 = vpop.f32.mrf.mxu0  ;;  %v4346_v9 = vpop.f32.mrf.mxu1 }
 0x358   :  { %v4308_v40 = vadd.f32 %v4307_v45, %v4269_v16  ;;  %v7616_v16 = vld [vmem:[%s12649_s3 + $0x4e8] sm:$0xf]  ;;  %4649 = vmatpush.bf16.msrb.mxu1 %v7745_v14 }
 0x359   :  { %v7617_v56 = vor.u32 %v8365_v53, %v7616_v16  ;;  %v8235_v53 = vld [vmem:[%s12649_s3 + $0xec] sm:$0xf] }
 0x35a   :  { %v11335_v51 = vadd.f32 %v4346_v9, %v4308_v40  ;;  %4472 = vmatmul.bf16.gmra.mxu0 %v12854_v58  ;;  %4511 = vmatmul.bf16.gmra.mxu1 %v12855_v34  ;;  %v4236_v42 = vpop.f32.mrf.mxu2  ;;  %v4275_v7 = vpop.f32.mrf.mxu3  ;;  %v7109_v14 = vor.u32 %v8235_v53, %v7106_v43 }
 0x35b   :  { %v4237_v37 = vadd.f32 %v4236_v42, %v11296_v59  ;;  %4610 = vmatpush.bf16.msrb.mxu0 %v7617_v56  ;;  %v7600_v42 = vld [vmem:[%s12649_s3 + $0x4c8] sm:$0xf] }
 0x35c   :  { %v7601_v46 = vor.u32 %v8361_v49, %v7600_v42  ;;  %v8389_v49 = vld [vmem:[%s12649_s3 + $0x5b4] sm:$0xf0]  ;;  %4688 = vmatpush.bf16.msrb.mxu2 %v7109_v14  ;;  %v7569_v14 = vor.u32 %v8353_v11, %v7568_v57 }
 0x35d   :  { %v11358_v3 = vadd.f32 %v4275_v7, %v4237_v37  ;;  %v7728_v7 = vld [vmem:[%s12649_s3 + $0x5c8] sm:$0xf]  ;;  %v8381_v11 = vld [vmem:[%s12649_s3 + $0x574] sm:$0xf0] }
 0x35f   :  { %v4309_v45 = vpop.f32.mrf.mxu0  ;;  %v4348_v9 = vpop.f32.mrf.mxu1  ;;  %4404 = vmatmul.bf16.gmra.mxu2 %v10948_v18  ;;  %4443 = vmatmul.bf16.gmra.mxu3 %v10950_v50 }
 0x360   :  { %v4310_v40 = vadd.f32 %v4309_v45, %v4271_v35  ;;  %v8393_v35 = vld [vmem:[%s12649_s3 + $0x5d4] sm:$0xf0]  ;;  %v7584_v45 = vld [vmem:[%s12649_s3 + $0x4a8] sm:$0xf]  ;;  %4611 = vmatpush.bf16.msrb.mxu0 %v7601_v46 }
 0x361   :  { %v7729_v56 = vor.u32 %v8393_v35, %v7728_v7  ;;  %v8267_v7 = vld [vmem:[%s12649_s3 + $0x1ec] sm:$0xf] }
 0x362   :  { %v11371_v20 = vadd.f32 %v4348_v9, %v4310_v40  ;;  %v4239_v16 = vpop.f32.mrf.mxu2  ;;  %v4278_v37 = vpop.f32.mrf.mxu3  ;;  %v8357_v9 = vld [vmem:[%s12649_s3 + $0x4b4] sm:$0xf0]  ;;  %v7712_v40 = vld [vmem:[%s12649_s3 + $0x5a8] sm:$0xf] }
 0x363   :  { %v4240_v12 = vadd.f32 %v4239_v16, %v11296_v59  ;;  %v7585_v42 = vor.u32 %v8357_v9, %v7584_v45  ;;  %v7234_v16 = vld [vmem:[%s12649_s3 + $0x1f8] sm:$0xf0]  ;;  %4650 = vmatpush.bf16.msrb.mxu1 %v7729_v56  ;;  %v7713_v53 = vor.u32 %v8389_v49, %v7712_v40  ;;  %v8385_v40 = vld [vmem:[%s12649_s3 + $0x594] sm:$0xf0] }
 0x364   :  { %v7237_v43 = vor.u32 %v8267_v7, %v7234_v16  ;;  %v8349_v49 = vld [vmem:[%s12649_s3 + $0x474] sm:$0xf0] }
 0x365   :  { %v11401_v35 = vadd.f32 %v4278_v37, %v4240_v12  ;;  %4612 = vmatpush.bf16.msrb.mxu0 %v7585_v42  ;;  %v7696_v37 = vld [vmem:[%s12649_s3 + $0x588] sm:$0xf] }
 0x366   :  { %4727 = vmatpush.bf16.msrb.mxu3 %v7237_v43  ;;  %v7552_v42 = vld [vmem:[%s12649_s3 + $0x468] sm:$0xf]  ;;  %v7697_v16 = vor.u32 %v8385_v40, %v7696_v37 }
 0x367   :  { %v4312_v46 = vpop.f32.mrf.mxu0  ;;  %v4351_v45 = vpop.f32.mrf.mxu1  ;;  %4651 = vmatpush.bf16.msrb.mxu1 %v7713_v53  ;;  %v7680_v53 = vld [vmem:[%s12649_s3 + $0x568] sm:$0xf]  ;;  %v7553_v57 = vor.u32 %v8349_v49, %v7552_v42  ;;  %v8345_v42 = vld [vmem:[%s12649_s3 + $0x454] sm:$0xf0] }
 0x368   :  { %v4313_v9 = vadd.f32 %v4312_v46, %v4274_v61  ;;  %v7681_v46 = vor.u32 %v8381_v11, %v7680_v53  ;;  %v7664_v49 = vld [vmem:[%s12649_s3 + $0x548] sm:$0xf]  ;;  %v8377_v11 = vld [vmem:[%s12649_s3 + $0x554] sm:$0xf0] }
 0x369   :  { %4613 = vmatpush.bf16.msrb.mxu0 %v7569_v14  ;;  %v7536_v14 = vld [vmem:[%s12649_s3 + $0x448] sm:$0xf] }
 0x36a   :  { %v11412_v12 = vadd.f32 %v4351_v45, %v4313_v9  ;;  %4477 = vmatmul.bf16.gmra.mxu0 %v12856_v15  ;;  %4516 = vmatmul.bf16.gmra.mxu1 %v12857_v41  ;;  %v4241_v61 = vpop.f32.mrf.mxu2  ;;  %v4280_v56 = vpop.f32.mrf.mxu3  ;;  %v8231_v45 = vld [vmem:[%s12649_s3 + $0xcc] sm:$0xf]  ;;  %v7090_v9 = vld [vmem:[%s12649_s3 + $0xd8] sm:$0xf0] }
 0x36b   :  { %v4242_v7 = vadd.f32 %v4241_v61, %v11296_v59  ;;  %4652 = vmatpush.bf16.msrb.mxu1 %v7697_v16  ;;  %v7093_v37 = vor.u32 %v8231_v45, %v7090_v9  ;;  %v7665_v9 = vor.u32 %v8377_v11, %v7664_v49 }
 0x36d   :  { %v11432_v43 = vadd.f32 %v4280_v56, %v4242_v7  ;;  %4614 = vmatpush.bf16.msrb.mxu0 %v7553_v57  ;;  %4689 = vmatpush.bf16.msrb.mxu2 %v7093_v37  ;;  %v8263_v57 = vld [vmem:[%s12649_s3 + $0x1cc] sm:$0xf] }
 0x36f   :  { %v4314_v61 = vpop.f32.mrf.mxu0  ;;  %v4353_v40 = vpop.f32.mrf.mxu1  ;;  %4409 = vmatmul.bf16.gmra.mxu2 %v10985_v23  ;;  %4448 = vmatmul.bf16.gmra.mxu3 %v12869_v25 }
 0x370   :  { %v4315_v56 = vadd.f32 %v4314_v61, %v11358_v3  ;;  %4653 = vmatpush.bf16.msrb.mxu1 %v7681_v46  ;;  %v7537_v3 = vor.u32 %v8345_v42, %v7536_v14  ;;  %v7218_v46 = vld [vmem:[%s12649_s3 + $0x1d8] sm:$0xf0]  ;;  %v7520_v61 = vld [vmem:[%s12649_s3 + $0x428] sm:$0xf]  ;;  %v8373_v42 = vld [vmem:[%s12649_s3 + $0x534] sm:$0xf0] }
 0x371   :  { %v7221_v37 = vor.u32 %v8263_v57, %v7218_v46 }
 0x372   :  { %v11452_v7 = vadd.f32 %v4353_v40, %v4315_v56  ;;  %v4244_v16 = vpop.f32.mrf.mxu2  ;;  %v4283_v53 = vpop.f32.mrf.mxu3  ;;  %v8341_v40 = vld [vmem:[%s12649_s3 + $0x434] sm:$0xf0]  ;;  %v7648_v56 = vld [vmem:[%s12649_s3 + $0x528] sm:$0xf]  ;;  %4615 = vmatpush.bf16.msrb.mxu0 %v7537_v3 }
 0x373   :  { %v4245_v45 = vadd.f32 %v4244_v16, %v11296_v59  ;;  %v7521_v14 = vor.u32 %v8341_v40, %v7520_v61  ;;  %4728 = vmatpush.bf16.msrb.mxu3 %v7221_v37  ;;  %v7649_v16 = vor.u32 %v8373_v42, %v7648_v56  ;;  %v8337_v3 = vld [vmem:[%s12649_s3 + $0x414] sm:$0xf0]  ;;  %v8227_v40 = vld [vmem:[%s12649_s3 + $0xac] sm:$0xf]  ;;  %v7074_v56 = vld [vmem:[%s12649_s3 + $0xb8] sm:$0xf0] }
 0x374   :  { %4654 = vmatpush.bf16.msrb.mxu1 %v7665_v9  ;;  %v7505_v37 = vor.u32 %v8337_v3, %v7504_v55  ;;  %v8369_v61 = vld [vmem:[%s12649_s3 + $0x514] sm:$0xf0]  ;;  %v8259_v55 = vld [vmem:[%s12649_s3 + $0x1ac] sm:$0xf] }
 0x375   :  { %v4284_v49 = vadd.f32 %v4283_v53, %v4245_v45  ;;  %v7632_v53 = vld [vmem:[%s12649_s3 + $0x508] sm:$0xf] }
 0x376   :  { %4616 = vmatpush.bf16.msrb.mxu0 %v7521_v14  ;;  %v7633_v42 = vor.u32 %v8369_v61, %v7632_v53  ;;  %v12871_v53 = vld [vmem:[#allocation34_spill] sm:$0xff] }
 0x377   :  { %v4317_v11 = vpop.f32.mrf.mxu0  ;;  %v4356_v57 = vpop.f32.mrf.mxu1 }
 0x378   :  { %v4318_v46 = vadd.f32 %v4317_v11, %v11401_v35  ;;  %4655 = vmatpush.bf16.msrb.mxu1 %v7649_v16  ;;  %v7077_v16 = vor.u32 %v8227_v40, %v7074_v56  ;;  %v7202_v11 = vld [vmem:[%s12649_s3 + $0x1b8] sm:$0xf0] }
 0x37a   :  { %v11486_v45 = vadd.f32 %v4356_v57, %v4318_v46  ;;  %4482 = vmatmul.bf16.gmra.mxu0 %v10317_v54  ;;  %4521 = vmatmul.bf16.gmra.mxu1 %v10331_v0  ;;  %v4246_v35 = vpop.f32.mrf.mxu2  ;;  %v4285_v9 = vpop.f32.mrf.mxu3  ;;  %v7205_v57 = vor.u32 %v8259_v55, %v7202_v11 }
 0x37b   :  { %v4247_v14 = vadd.f32 %v4246_v35, %v11296_v59  ;;  %4617 = vmatpush.bf16.msrb.mxu0 %v7505_v37  ;;  %4690 = vmatpush.bf16.msrb.mxu2 %v7077_v16 }
 0x37c   :  { %4656 = vmatpush.bf16.msrb.mxu1 %v7633_v42  ;;  %4729 = vmatpush.bf16.msrb.mxu3 %v7205_v57  ;;  %v7058_v42 = vld [vmem:[%s12649_s3 + $0x98] sm:$0xf0]  ;;  %v8255_v57 = vld [vmem:[%s12649_s3 + $0x18c] sm:$0xf] }
 0x37d   :  { %v4286_v46 = vadd.f32 %v4285_v9, %v4247_v14  ;;  %v8223_v14 = vld [vmem:[%s12649_s3 + $0x8c] sm:$0xf] }
 0x37e   :  { %v7061_v11 = vor.u32 %v8223_v14, %v7058_v42  ;;  %v12873_v14 = vld [vmem:[#allocation3_spill] sm:$0xff] }
 0x37f   :  { %v4319_v3 = vpop.f32.mrf.mxu0  ;;  %v4358_v2 = vpop.f32.mrf.mxu1  ;;  %4540 = vmatmul.bf16.vlgmr.msra.gmra.mxu2 %v12870_v24  ;;  %4579 = vmatmul.bf16.vlgmr.msra.gmra.mxu3 %v12871_v53 }
 0x380   :  { %v4320_v35 = vadd.f32 %v4319_v3, %v11432_v43  ;;  %v7186_v3 = vld [vmem:[%s12649_s3 + $0x198] sm:$0xf0]  ;;  %4691 = vmatpush.bf16.msrb.mxu2 %v7061_v11 }
 0x381   :  { %v7042_v11 = vld [vmem:[%s12649_s3 + $0x78] sm:$0xf0] }
 0x382   :  { %v11509_v61 = vadd.f32 %v4358_v2, %v4320_v35  ;;  %v4249_v40 = vpop.f32.mrf.mxu2  ;;  %v4288_v56 = vpop.f32.mrf.mxu3 }
 0x383   :  { %v4250_v17 = vadd.f32 %v4249_v40, %v11296_v59 }
 0x385   :  { %v4289_v37 = vadd.f32 %v4288_v56, %v4250_v17 }
 0x387   :  { %v4322_v55 = vpop.f32.mrf.mxu0  ;;  %v4361_v9 = vpop.f32.mrf.mxu1 }
 0x388   :  { %v4323_v16 = vadd.f32 %v4322_v55, %v4284_v49  ;;  %v7189_v49 = vor.u32 %v8255_v57, %v7186_v3 }
 0x38a   :  { %v11518_v43 = vadd.f32 %v4361_v9, %v4323_v16  ;;  %4487 = vmatmul.bf16.gmra.mxu0 %v10583_v33  ;;  %4526 = vmatmul.bf16.gmra.mxu1 %v10585_v6  ;;  %v4251_v2 = vpop.f32.mrf.mxu2  ;;  %v4290_v17 = vpop.f32.mrf.mxu3  ;;  %v12872_v9 = vld [vmem:[#allocation18_spill] sm:$0xff] }
 0x38b   :  { %v4252_v35 = vadd.f32 %v4251_v2, %v11296_v59  ;;  %4730 = vmatpush.bf16.msrb.mxu3 %v7189_v49  ;;  %v8219_v6 = vld [vmem:[%s12649_s3 + $0x6c] sm:$0xf] }
 0x38c   :  { %v8251_v2 = vld [vmem:[%s12649_s3 + $0x16c] sm:$0xf]  ;;  %v7045_v57 = vor.u32 %v8219_v6, %v7042_v11 }
 0x38d   :  { %v4291_v40 = vadd.f32 %v4290_v17, %v4252_v35 }
 0x38e   :  { %4692 = vmatpush.bf16.msrb.mxu2 %v7045_v57 }
 0x38f   :  { %v4324_v56 = vpop.f32.mrf.mxu0  ;;  %v4363_v55 = vpop.f32.mrf.mxu1  ;;  %4545 = vmatmul.bf16.gmra.mxu2 %v12872_v9  ;;  %4584 = vmatmul.bf16.gmra.mxu3 %v12873_v14 }
 0x390   :  { %v4325_v42 = vadd.f32 %v4324_v56, %v4286_v46  ;;  %v7170_v46 = vld [vmem:[%s12649_s3 + $0x178] sm:$0xf0] }
 0x391   :  { %v7173_v3 = vor.u32 %v8251_v2, %v7170_v46  ;;  %v8247_v46 = vld [vmem:[%s12649_s3 + $0x14c] sm:$0xf] }
 0x392   :  { %v11531_v16 = vadd.f32 %v4363_v55, %v4325_v42  ;;  %v4254_v1 = vpop.f32.mrf.mxu2  ;;  %v4293_v31 = vpop.f32.mrf.mxu3 }
 0x393   :  { %v4255_v17 = vadd.f32 %v4254_v1, %v11296_v59  ;;  %4731 = vmatpush.bf16.msrb.mxu3 %v7173_v3  ;;  %v7154_v3 = vld [vmem:[%s12649_s3 + $0x158] sm:$0xf0] }
 0x395   :  { %v4294_v35 = vadd.f32 %v4293_v31, %v4255_v17  ;;  %v8215_v31 = vld [vmem:[%s12649_s3 + $0x4c] sm:$0xf] }
 0x397   :  { %v4327_v49 = vpop.f32.mrf.mxu0  ;;  %v4366_v56 = vpop.f32.mrf.mxu1 }
 0x398   :  { %v4328_v55 = vadd.f32 %v4327_v49, %v4289_v37  ;;  %v7026_v37 = vld [vmem:[%s12649_s3 + $0x58] sm:$0xf0] }
 0x399   :  { %v7029_v17 = vor.u32 %v8215_v31, %v7026_v37  ;;  %v8211_v37 = vld [vmem:[%s12649_s3 + $0x2c] sm:$0xf] }
 0x39a   :  { %v11546_v42 = vadd.f32 %v4366_v56, %v4328_v55  ;;  %4618 = vmatmul.bf16.vlgmr.msrb.gmra.mxu0 %v10664_v32  ;;  %4657 = vmatmul.bf16.vlgmr.msrb.gmra.mxu1 %v10668_v47  ;;  %v4256_v33 = vpop.f32.mrf.mxu2  ;;  %v4295_v1 = vpop.f32.mrf.mxu3  ;;  %v7157_v56 = vor.u32 %v8247_v46, %v7154_v3 }
 0x39b   :  { %v4257_v6 = vadd.f32 %v4256_v33, %v11296_v59  ;;  %4693 = vmatpush.bf16.msrb.mxu2 %v7029_v17 }
 0x39c   :  { %4732 = vmatpush.bf16.msrb.mxu3 %v7157_v56 }
 0x39d   :  { %v4296_v11 = vadd.f32 %v4295_v1, %v4257_v6 }
 0x39f   :  { %v4329_v52 = vpop.f32.mrf.mxu0  ;;  %v4368_v44 = vpop.f32.mrf.mxu1  ;;  %4550 = vmatmul.bf16.gmra.mxu2 %v10700_v28  ;;  %4589 = vmatmul.bf16.gmra.mxu3 %v10704_v21 }
 0x3a0   :  { %v4330_v2 = vadd.f32 %v4329_v52, %v4291_v40 }
 0x3a2   :  { %v11559_v57 = vadd.f32 %v4368_v44, %v4330_v2  ;;  %v4385_v33 = vpop.f32.mrf.mxu2  ;;  %v4424_v59 = vpop.f32.mrf.mxu3 }
 0x3a3   :  { %v4386_v49 = vadd.f32 %v4385_v33, %v11335_v51  ;;  %v7010_v51 = vld [vmem:[%s12649_s3 + $0x38] sm:$0xf0] }
 0x3a4   :  { %v7013_v17 = vor.u32 %v8211_v37, %v7010_v51  ;;  %v7138_v33 = vld [vmem:[%s12649_s3 + $0x138] sm:$0xf0] }
 0x3a5   :  { %v11568_v55 = vadd.f32 %v4424_v59, %v4386_v49 }
 0x3a6   :  { %4694 = vmatpush.bf16.msrb.mxu2 %v7013_v17 }
 0x3a7   :  { %v4332_v52 = vpop.f32.mrf.mxu0  ;;  %v4371_v44 = vpop.f32.mrf.mxu1 }
 0x3a8   :  { %v4333_v40 = vadd.f32 %v4332_v52, %v4294_v35  ;;  %v8243_v35 = vld [vmem:[%s12649_s3 + $0x12c] sm:$0xf] }
 0x3a9   :  { %v7141_v59 = vor.u32 %v8243_v35, %v7138_v33  ;;  %v8207_v35 = vld [vmem:[%s12649_s3 + $0xc] sm:$0xf] }
 0x3aa   :  { %v11570_v1 = vadd.f32 %v4371_v44, %v4333_v40  ;;  %4623 = vmatmul.bf16.gmra.mxu0 %v10722_v39  ;;  %4662 = vmatmul.bf16.gmra.mxu1 %v10724_v5  ;;  %v4387_v6 = vpop.f32.mrf.mxu2  ;;  %v4426_v31 = vpop.f32.mrf.mxu3 }
 0x3ab   :  { %v4388_v2 = vadd.f32 %v4387_v6, %v11371_v20  ;;  %4733 = vmatpush.bf16.msrb.mxu3 %v7141_v59  ;;  %v11595_v6 = vperm.slane %v11293_v38, 2  ;;  %v8239_v59 = vld [vmem:[%s12649_s3 + $0x10c] sm:$0xf] }
 0x3ad   :  { %v11587_v46 = vadd.f32 %v4426_v31, %v4388_v2 }
 0x3af   :  { %v4334_v3 = vpop.f32.mrf.mxu0  ;;  %v4373_v49 = vpop.f32.mrf.mxu1  ;;  %4555 = vmatmul.bf16.gmra.mxu2 %v10758_v19  ;;  %4594 = vmatmul.bf16.gmra.mxu3 %v10761_v30 }
 0x3b0   :  { %v4335_v56 = vadd.f32 %v4334_v3, %v4296_v11  ;;  %v6994_v11 = vld [vmem:[%s12649_s3 + $0x18] sm:$0xf0] }
 0x3b1   :  { %v6997_v17 = vor.u32 %v8207_v35, %v6994_v11  ;;  %v7122_v3 = vld [vmem:[%s12649_s3 + $0x118] sm:$0xf0] }
 0x3b2   :  { %v11591_v52 = vadd.f32 %v4373_v49, %v4335_v56  ;;  %v4390_v20 = vpop.f32.mrf.mxu2  ;;  %v4429_v44 = vpop.f32.mrf.mxu3  ;;  %v8299_v49 = vld [vmem:[%s12649_s3 + $0x2ec] sm:$0xf] }
 0x3b3   :  { %v4391_v40 = vadd.f32 %v4390_v20, %v11412_v12  ;;  %4695 = vmatpush.bf16.msrb.mxu2 %v6997_v17  ;;  %v7125_v20 = vor.u32 %v8239_v59, %v7122_v3  ;;  %v8327_v59 = vld [vmem:[%s12649_s3 + $0x3cc] sm:$0xf] }
 0x3b5   :  { %v11597_v31 = vadd.f32 %v4429_v44, %v4391_v40  ;;  %v7362_v44 = vld [vmem:[%s12649_s3 + $0x2f8] sm:$0xf0]  ;;  %v8331_v40 = vld [vmem:[%s12649_s3 + $0x3ec] sm:$0xf]  ;;  %4734 = vmatpush.bf16.msrb.mxu3 %v7125_v20 }
 0x3b7   :  { %12874 = vst [vmem:[#allocation11_spill] sm:$0xff] %v11597_v31  ;;  %v4463_v37 = vpop.f32.mrf.mxu0  ;;  %v4502_v51 = vpop.f32.mrf.mxu1 }
 0x3b8   :  { %v4464_v2 = vadd.f32 %v4463_v37, %v11595_v6  ;;  %v7490_v37 = vld [vmem:[%s12649_s3 + $0x3f8] sm:$0xf0] }
 0x3b9   :  { %v7493_v35 = vor.u32 %v8331_v40, %v7490_v37  ;;  %v8363_v40 = vld [vmem:[%s12649_s3 + $0x4ec] sm:$0xf]  ;;  %v7618_v37 = vld [vmem:[%s12649_s3 + $0x4f8] sm:$0xf0] }
 0x3ba   :  { %v11606_v33 = vadd.f32 %v4502_v51, %v4464_v2  ;;  %4628 = vmatmul.bf16.gmra.mxu0 %v10788_v26  ;;  %4667 = vmatmul.bf16.gmra.mxu1 %v10792_v60  ;;  %v4392_v38 = vpop.f32.mrf.mxu2  ;;  %v4431_v12 = vpop.f32.mrf.mxu3  ;;  %v7365_v51 = vor.u32 %v8299_v49, %v7362_v44  ;;  %v7474_v44 = vld [vmem:[%s12649_s3 + $0x3d8] sm:$0xf0] }
 0x3bb   :  { %v4393_v56 = vadd.f32 %v4392_v38, %v11452_v7  ;;  %4805 = vmatpush.bf16.msra.mxu1 %v7493_v35  ;;  %v8295_v38 = vld [vmem:[%s12649_s3 + $0x2cc] sm:$0xf]  ;;  %v7477_v35 = vor.u32 %v8327_v59, %v7474_v44 }
 0x3bc   :  { %4766 = vmatpush.bf16.msra.mxu0 %v7365_v51  ;;  %v8395_v59 = vld [vmem:[%s12649_s3 + $0x5ec] sm:$0xf] }
 0x3bd   :  { %v11629_v11 = vadd.f32 %v4431_v12, %v4393_v56  ;;  %v7346_v12 = vld [vmem:[%s12649_s3 + $0x2d8] sm:$0xf0] }
 0x3be   :  { %v7349_v20 = vor.u32 %v8295_v38, %v7346_v12  ;;  %v8323_v38 = vld [vmem:[%s12649_s3 + $0x3ac] sm:$0xf] }
 0x3bf   :  { %12875 = vst [vmem:[#allocation13_spill] sm:$0xff] %v11629_v11  ;;  %v4465_v7 = vpop.f32.mrf.mxu0  ;;  %v4504_v2 = vpop.f32.mrf.mxu1  ;;  %4560 = vmatmul.bf16.gmra.mxu2 %v10824_v13  ;;  %4599 = vmatmul.bf16.gmra.mxu3 %v10828_v10  ;;  %v8287_v11 = vld [vmem:[%s12649_s3 + $0x28c] sm:$0xf] }
 0x3c0   :  { %v4466_v17 = vadd.f32 %v4465_v7, %v11595_v6  ;;  %v7621_v7 = vor.u32 %v8363_v40, %v7618_v37  ;;  %4767 = vmatpush.bf16.msra.mxu0 %v7349_v20  ;;  %4806 = vmatpush.bf16.msra.mxu1 %v7477_v35 }
 0x3c2   :  { %v11643_v3 = vadd.f32 %v4504_v2, %v4466_v17  ;;  %v4395_v49 = vpop.f32.mrf.mxu2  ;;  %v4434_v56 = vpop.f32.mrf.mxu3  ;;  %v8291_v2 = vld [vmem:[%s12649_s3 + $0x2ac] sm:$0xf]  ;;  %v7330_v17 = vld [vmem:[%s12649_s3 + $0x2b8] sm:$0xf0]  ;;  %4844 = vmatpush.bf16.msra.mxu2 %v7621_v7 }
 0x3c3   :  { %v4396_v51 = vadd.f32 %v4395_v49, %v11486_v45  ;;  %v7333_v12 = vor.u32 %v8291_v2, %v7330_v17  ;;  %v7458_v45 = vld [vmem:[%s12649_s3 + $0x3b8] sm:$0xf0] }
 0x3c4   :  { %v7746_v49 = vld [vmem:[%s12649_s3 + $0x5f8] sm:$0xf0]  ;;  %v7461_v40 = vor.u32 %v8323_v38, %v7458_v45 }
 0x3c5   :  { %v11673_v44 = vadd.f32 %v4434_v56, %v4396_v51  ;;  %v7749_v37 = vor.u32 %v8395_v59, %v7746_v49  ;;  %4768 = vmatpush.bf16.msra.mxu0 %v7333_v12  ;;  %v7314_v56 = vld [vmem:[%s12649_s3 + $0x298] sm:$0xf0]  ;;  %v8319_v51 = vld [vmem:[%s12649_s3 + $0x38c] sm:$0xf] }
 0x3c6   :  { %4807 = vmatpush.bf16.msra.mxu1 %v7461_v40  ;;  %v7317_v12 = vor.u32 %v8287_v11, %v7314_v56  ;;  %v7442_v45 = vld [vmem:[%s12649_s3 + $0x398] sm:$0xf0]  ;;  %v8283_v59 = vld [vmem:[%s12649_s3 + $0x26c] sm:$0xf] }
 0x3c7   :  { %12876 = vst [vmem:[#allocation21_spill] sm:$0xff] %v11673_v44  ;;  %v4468_v20 = vpop.f32.mrf.mxu0  ;;  %v4507_v2 = vpop.f32.mrf.mxu1  ;;  %4883 = vmatpush.bf16.msra.mxu3 %v7749_v37  ;;  %v7298_v49 = vld [vmem:[%s12649_s3 + $0x278] sm:$0xf0]  ;;  %v7445_v37 = vor.u32 %v8319_v51, %v7442_v45 }
 0x3c8   :  { %v4469_v17 = vadd.f32 %v4468_v20, %v11595_v6  ;;  %v8315_v20 = vld [vmem:[%s12649_s3 + $0x36c] sm:$0xf]  ;;  %v7426_v11 = vld [vmem:[%s12649_s3 + $0x378] sm:$0xf0] }
 0x3c9   :  { %4769 = vmatpush.bf16.msra.mxu0 %v7317_v12  ;;  %v7429_v56 = vor.u32 %v8315_v20, %v7426_v11  ;;  %v7602_v51 = vld [vmem:[%s12649_s3 + $0x4d8] sm:$0xf0]  ;;  %v8279_v12 = vld [vmem:[%s12649_s3 + $0x24c] sm:$0xf] }
 0x3ca   :  { %v11685_v35 = vadd.f32 %v4507_v2, %v4469_v17  ;;  %4633 = vmatmul.bf16.gmra.mxu0 %v10869_v8  ;;  %4672 = vmatmul.bf16.gmra.mxu1 %v10872_v36  ;;  %v4397_v7 = vpop.f32.mrf.mxu2  ;;  %v4436_v38 = vpop.f32.mrf.mxu3  ;;  %v7301_v2 = vor.u32 %v8283_v59, %v7298_v49  ;;  %v7282_v45 = vld [vmem:[%s12649_s3 + $0x258] sm:$0xf0]  ;;  %v8311_v59 = vld [vmem:[%s12649_s3 + $0x34c] sm:$0xf] }
 0x3cb   :  { %v4398_v40 = vadd.f32 %v4397_v7, %v11509_v61  ;;  %4808 = vmatpush.bf16.msra.mxu1 %v7445_v37  ;;  %v8359_v61 = vld [vmem:[%s12649_s3 + $0x4cc] sm:$0xf]  ;;  %v7410_v20 = vld [vmem:[%s12649_s3 + $0x358] sm:$0xf0] }
 0x3cc   :  { %v8391_v11 = vld [vmem:[%s12649_s3 + $0x5cc] sm:$0xf] }
 0x3cd   :  { %v11705_v17 = vadd.f32 %v4436_v38, %v4398_v40  ;;  %4770 = vmatpush.bf16.msra.mxu0 %v7301_v2  ;;  %v7605_v38 = vor.u32 %v8359_v61, %v7602_v51  ;;  %v7730_v2 = vld [vmem:[%s12649_s3 + $0x5d8] sm:$0xf0]  ;;  %v8275_v51 = vld [vmem:[%s12649_s3 + $0x22c] sm:$0xf] }
 0x3ce   :  { %v7733_v61 = vor.u32 %v8391_v11, %v7730_v2  ;;  %v7250_v2 = vld [vmem:[%s12649_s3 + $0x218] sm:$0xf0] }
 0x3cf   :  { %12877 = vst [vmem:[#allocation26_spill] sm:$0xff] %v11705_v17  ;;  %v4470_v44 = vpop.f32.mrf.mxu0  ;;  %v4509_v31 = vpop.f32.mrf.mxu1  ;;  %4565 = vmatmul.bf16.gmra.mxu2 %v10905_v27  ;;  %4604 = vmatmul.bf16.gmra.mxu3 %v10909_v22 }
 0x3d0   :  { %v4471_v7 = vadd.f32 %v4470_v44, %v11595_v6  ;;  %4809 = vmatpush.bf16.msra.mxu1 %v7429_v56  ;;  %4845 = vmatpush.bf16.msra.mxu2 %v7605_v38  ;;  %v7285_v44 = vor.u32 %v8279_v12, %v7282_v45  ;;  %v8307_v38 = vld [vmem:[%s12649_s3 + $0x32c] sm:$0xf] }
 0x3d1   :  { %4884 = vmatpush.bf16.msra.mxu3 %v7733_v61 }
 0x3d2   :  { %v11725_v49 = vadd.f32 %v4509_v31, %v4471_v7  ;;  %v4400_v40 = vpop.f32.mrf.mxu2  ;;  %v4439_v37 = vpop.f32.mrf.mxu3  ;;  %v7413_v31 = vor.u32 %v8311_v59, %v7410_v20  ;;  %v7266_v7 = vld [vmem:[%s12649_s3 + $0x238] sm:$0xf0]  ;;  %4771 = vmatpush.bf16.msra.mxu0 %v7285_v44  ;;  %v8271_v44 = vld [vmem:[%s12649_s3 + $0x20c] sm:$0xf] }
 0x3d3   :  { %v4401_v56 = vadd.f32 %v4400_v40, %v11518_v43  ;;  %v7269_v12 = vor.u32 %v8275_v51, %v7266_v7  ;;  %v7394_v43 = vld [vmem:[%s12649_s3 + $0x338] sm:$0xf0]  ;;  %v7253_v51 = vor.u32 %v8271_v44, %v7250_v2 }
 0x3d4   :  { %4810 = vmatpush.bf16.msra.mxu1 %v7413_v31  ;;  %v7397_v59 = vor.u32 %v8307_v38, %v7394_v43  ;;  %v7378_v7 = vld [vmem:[%s12649_s3 + $0x318] sm:$0xf0]  ;;  %v8355_v38 = vld [vmem:[%s12649_s3 + $0x4ac] sm:$0xf] }
 0x3d5   :  { %v11749_v45 = vadd.f32 %v4439_v37, %v4401_v56  ;;  %v8303_v37 = vld [vmem:[%s12649_s3 + $0x30c] sm:$0xf] }
 0x3d6   :  { %4772 = vmatpush.bf16.msra.mxu0 %v7269_v12  ;;  %v7586_v12 = vld [vmem:[%s12649_s3 + $0x4b8] sm:$0xf0] }
 0x3d7   :  { %12878 = vst [vmem:[#allocation27_spill] sm:$0xff] %v11749_v45  ;;  %v4473_v40 = vpop.f32.mrf.mxu0  ;;  %v4512_v20 = vpop.f32.mrf.mxu1 }
 0x3d8   :  { %v4474_v11 = vadd.f32 %v4473_v40, %v11595_v6  ;;  %4811 = vmatpush.bf16.msra.mxu1 %v7397_v59  ;;  %v7381_v59 = vor.u32 %v8303_v37, %v7378_v7  ;;  %v7589_v40 = vor.u32 %v8355_v38, %v7586_v12 }
 0x3da   :  { %v11761_v56 = vadd.f32 %v4512_v20, %v4474_v11  ;;  %4638 = vmatmul.bf16.gmra.mxu0 %v10948_v18  ;;  %4677 = vmatmul.bf16.gmra.mxu1 %v10950_v50  ;;  %v4402_v31 = vpop.f32.mrf.mxu2  ;;  %v4441_v61 = vpop.f32.mrf.mxu3  ;;  %v8387_v20 = vld [vmem:[%s12649_s3 + $0x5ac] sm:$0xf]  ;;  %v7714_v11 = vld [vmem:[%s12649_s3 + $0x5b8] sm:$0xf0] }
 0x3db   :  { %v4403_v43 = vadd.f32 %v4402_v31, %v11531_v16  ;;  %4773 = vmatpush.bf16.msra.mxu0 %v7253_v51  ;;  %v7717_v44 = vor.u32 %v8387_v20, %v7714_v11  ;;  %4846 = vmatpush.bf16.msra.mxu2 %v7589_v40  ;;  %v8383_v40 = vld [vmem:[%s12649_s3 + $0x58c] sm:$0xf]  ;;  %v7698_v20 = vld [vmem:[%s12649_s3 + $0x598] sm:$0xf0] }
 0x3dc   :  { %4812 = vmatpush.bf16.msra.mxu1 %v7381_v59 }
 0x3dd   :  { %v11781_v2 = vadd.f32 %v4441_v61, %v4403_v43  ;;  %4885 = vmatpush.bf16.msra.mxu3 %v7717_v44  ;;  %v8351_v61 = vld [vmem:[%s12649_s3 + $0x48c] sm:$0xf]  ;;  %v7701_v44 = vor.u32 %v8383_v40, %v7698_v20 }
 0x3df   :  { %v4475_v45 = vpop.f32.mrf.mxu0  ;;  %v4514_v17 = vpop.f32.mrf.mxu1  ;;  %4696 = vmatmul.bf16.vlgmr.msrb.gmra.mxu2 %v12849_v63  ;;  %4735 = vmatmul.bf16.vlgmr.msrb.gmra.mxu3 %v12850_v48  ;;  %v7570_v63 = vld [vmem:[%s12649_s3 + $0x498] sm:$0xf0] }
 0x3e0   :  { %v4476_v16 = vadd.f32 %v4475_v45, %v11595_v6  ;;  %v7573_v12 = vor.u32 %v8351_v61, %v7570_v63 }
 0x3e1   :  { %4886 = vmatpush.bf16.msra.mxu3 %v7701_v44 }
 0x3e2   :  { %v11786_v37 = vadd.f32 %v4514_v17, %v4476_v16  ;;  %v4405_v31 = vpop.f32.mrf.mxu2  ;;  %v4444_v7 = vpop.f32.mrf.mxu3  ;;  %4847 = vmatpush.bf16.msra.mxu2 %v7573_v12 }
 0x3e3   :  { %v4406_v51 = vadd.f32 %v4405_v31, %v11546_v42 }
 0x3e5   :  { %v11789_v38 = vadd.f32 %v4444_v7, %v4406_v51 }
 0x3e7   :  { %v4478_v48 = vpop.f32.mrf.mxu0  ;;  %v4517_v43 = vpop.f32.mrf.mxu1 }
 0x3e8   :  { %v4479_v17 = vadd.f32 %v4478_v48, %v11595_v6  ;;  %v7554_v48 = vld [vmem:[%s12649_s3 + $0x478] sm:$0xf0] }
 0x3ea   :  { %v11798_v45 = vadd.f32 %v4517_v43, %v4479_v17  ;;  %4643 = vmatmul.bf16.gmra.mxu0 %v10985_v23  ;;  %4682 = vmatmul.bf16.gmra.mxu1 %v12869_v25  ;;  %v4407_v42 = vpop.f32.mrf.mxu2  ;;  %v4446_v59 = vpop.f32.mrf.mxu3  ;;  %v7682_v17 = vld [vmem:[%s12649_s3 + $0x578] sm:$0xf0] }
 0x3eb   :  { %v4408_v11 = vadd.f32 %v4407_v42, %v11559_v57  ;;  %v8347_v57 = vld [vmem:[%s12649_s3 + $0x46c] sm:$0xf] }
 0x3ec   :  { %v7557_v43 = vor.u32 %v8347_v57, %v7554_v48 }
 0x3ed   :  { %v11809_v16 = vadd.f32 %v4446_v59, %v4408_v11 }
 0x3ee   :  { %4848 = vmatpush.bf16.msra.mxu2 %v7557_v43 }
 0x3ef   :  { %v4480_v31 = vpop.f32.mrf.mxu0  ;;  %v4519_v7 = vpop.f32.mrf.mxu1  ;;  %4701 = vmatmul.bf16.gmra.mxu2 %v12852_v62  ;;  %4740 = vmatmul.bf16.gmra.mxu3 %v12853_v29  ;;  %v8379_v62 = vld [vmem:[%s12649_s3 + $0x56c] sm:$0xf] }
 0x3f0   :  { %v4481_v51 = vadd.f32 %v4480_v31, %v11595_v6  ;;  %v7685_v42 = vor.u32 %v8379_v62, %v7682_v17 }
 0x3f2   :  { %v11814_v61 = vadd.f32 %v4519_v7, %v4481_v51  ;;  %v4410_v63 = vpop.f32.mrf.mxu2  ;;  %v4449_v12 = vpop.f32.mrf.mxu3  ;;  %4887 = vmatpush.bf16.msra.mxu3 %v7685_v42  ;;  %v8375_v42 = vld [vmem:[%s12649_s3 + $0x54c] sm:$0xf] }
 0x3f3   :  { %v4411_v29 = vadd.f32 %v4410_v63, %v11570_v1  ;;  %v8343_v63 = vld [vmem:[%s12649_s3 + $0x44c] sm:$0xf] }
 0x3f5   :  { %v11829_v59 = vadd.f32 %v4449_v12, %v4411_v29  ;;  %v7538_v12 = vld [vmem:[%s12649_s3 + $0x458] sm:$0xf0] }
 0x3f7   :  { %v4483_v40 = vpop.f32.mrf.mxu0  ;;  %v4522_v20 = vpop.f32.mrf.mxu1 }
 0x3f8   :  { %v4484_v11 = vadd.f32 %v4483_v40, %v11595_v6 }
 0x3fa   :  { %v11832_v44 = vadd.f32 %v4522_v20, %v4484_v11  ;;  %4774 = vmatmul.bf16.vlgmr.msra.gmra.mxu0 %v12870_v24  ;;  %4813 = vmatmul.bf16.vlgmr.msra.gmra.mxu1 %v12871_v53  ;;  %v4412_v1 = vpop.f32.mrf.mxu2  ;;  %v4451_v31 = vpop.f32.mrf.mxu3  ;;  %v7541_v24 = vor.u32 %v8343_v63, %v7538_v12  ;;  %v8339_v12 = vld [vmem:[%s12649_s3 + $0x42c] sm:$0xf] }
 0x3fb   :  { %v4413_v7 = vadd.f32 %v4412_v1, %v11591_v52 }
 0x3fc   :  { %4849 = vmatpush.bf16.msra.mxu2 %v7541_v24 }
 0x3fd   :  { %v11837_v51 = vadd.f32 %v4451_v31, %v4413_v7 }
 0x3ff   :  { %v4485_v57 = vpop.f32.mrf.mxu0  ;;  %v4524_v48 = vpop.f32.mrf.mxu1  ;;  %4706 = vmatmul.bf16.gmra.mxu2 %v12854_v58  ;;  %4745 = vmatmul.bf16.gmra.mxu3 %v12855_v34  ;;  %v7666_v58 = vld [vmem:[%s12649_s3 + $0x558] sm:$0xf0] }
 0x400   :  { %v4486_v53 = vadd.f32 %v4485_v57, %v11595_v6  ;;  %v7669_v20 = vor.u32 %v8375_v42, %v7666_v58  ;;  %v7522_v57 = vld [vmem:[%s12649_s3 + $0x438] sm:$0xf0] }
 0x402   :  { %v11848_v52 = vadd.f32 %v4524_v48, %v4486_v53  ;;  %v4541_v62 = vpop.f32.mrf.mxu2  ;;  %v4580_v29 = vpop.f32.mrf.mxu3  ;;  %4888 = vmatpush.bf16.msra.mxu3 %v7669_v20  ;;  %v8371_v48 = vld [vmem:[%s12649_s3 + $0x52c] sm:$0xf] }
 0x403   :  { %v4542_v43 = vadd.f32 %v4541_v62, %v11606_v33 }
 0x405   :  { %v4581_v17 = vadd.f32 %v4580_v29, %v4542_v43 }
 0x407   :  { %v4488_v34 = vpop.f32.mrf.mxu0  ;;  %v4527_v40 = vpop.f32.mrf.mxu1 }
 0x408   :  { %v4489_v11 = vadd.f32 %v4488_v34, %v11595_v6 }
 0x40a   :  { %v11858_v1 = vadd.f32 %v4527_v40, %v4489_v11  ;;  %4779 = vmatmul.bf16.gmra.mxu0 %v12872_v9  ;;  %4818 = vmatmul.bf16.gmra.mxu1 %v12873_v14  ;;  %v4543_v33 = vpop.f32.mrf.mxu2  ;;  %v4582_v31 = vpop.f32.mrf.mxu3  ;;  %v7525_v14 = vor.u32 %v8339_v12, %v7522_v57  ;;  %v4922_v12 = vmax.f32 %v11060_v4, 0.0 }
 0x40b   :  { %v4544_v7 = vadd.f32 %v4543_v33, %v11643_v3  ;;  %v7650_v3 = vld [vmem:[%s12649_s3 + $0x538] sm:$0xf0] }
 0x40c   :  { %v7653_v62 = vor.u32 %v8371_v48, %v7650_v3  ;;  %4850 = vmatpush.bf16.msra.mxu2 %v7525_v14 }
 0x40d   :  { %v4583_v63 = vadd.f32 %v4582_v31, %v4544_v7 }
 0x40e   :  { %4889 = vmatpush.bf16.msra.mxu3 %v7653_v62 }
 0x40f   :  { %v4490_v9 = vpop.f32.mrf.mxu0  ;;  %v4529_v24 = vpop.f32.mrf.mxu1  ;;  %4711 = vmatmul.bf16.gmra.mxu2 %v12856_v15  ;;  %4750 = vmatmul.bf16.gmra.mxu3 %v12857_v41  ;;  %v8335_v15 = vld [vmem:[%s12649_s3 + $0x40c] sm:$0xf]  ;;  %v7506_v41 = vld [vmem:[%s12649_s3 + $0x418] sm:$0xf0] }
 0x410   :  { %v4491_v53 = vadd.f32 %v4490_v9, %v11595_v6  ;;  %v7509_v20 = vor.u32 %v8335_v15, %v7506_v41 }
 0x412   :  { %v11878_v29 = vadd.f32 %v4529_v24, %v4491_v53  ;;  %v4546_v43 = vpop.f32.mrf.mxu2  ;;  %v4585_v42 = vpop.f32.mrf.mxu3  ;;  %4851 = vmatpush.bf16.msra.mxu2 %v7509_v20 }
 0x413   :  { %v4547_v58 = vadd.f32 %v4546_v43, %v11685_v35  ;;  %v12879_v43 = vld [vmem:[#allocation2_spill] sm:$0xff] }
 0x415   :  { %v4586_v34 = vadd.f32 %v4585_v42, %v4547_v58  ;;  %v4926_v42 = vmax.f32 %v12879_v43, 0.0 }
 0x417   :  { %v4619_v40 = vpop.f32.mrf.mxu0  ;;  %v4658_v6 = vpop.f32.mrf.mxu1 }
 0x418   :  { %v4620_v11 = vadd.f32 %v4619_v40, %v4581_v17  ;;  %v8367_v17 = vld [vmem:[%s12649_s3 + $0x50c] sm:$0xf] }
 0x41a   :  { %v4659_v33 = vadd.f32 %v4658_v6, %v4620_v11  ;;  %4784 = vmatmul.bf16.gmra.mxu0 %v10700_v28  ;;  %4823 = vmatmul.bf16.gmra.mxu1 %v10704_v21  ;;  %v4548_v35 = vpop.f32.mrf.mxu2  ;;  %v4587_v31 = vpop.f32.mrf.mxu3  ;;  %v7634_v28 = vld [vmem:[%s12649_s3 + $0x518] sm:$0xf0] }
 0x41b   :  { %v4549_v7 = vadd.f32 %v4548_v35, %v11725_v49  ;;  %v7637_v49 = vor.u32 %v8367_v17, %v7634_v28  ;;  %v12881_v17 = vld [vmem:[#allocation16_spill] sm:$0xff] }
 0x41c   :  { %v4924_v57 = vmax.f32 %v4659_v33, 0.0  ;;  %v12880_v33 = vld [vmem:[#allocation12_spill] sm:$0xff] }
 0x41d   :  { %v4588_v48 = vadd.f32 %v4587_v31, %v4549_v7  ;;  %4890 = vmatpush.bf16.msra.mxu3 %v7637_v49  ;;  %v12883_v49 = vld [vmem:[#allocation10_spill] sm:$0xff] }
 0x41e   :  { %v11891_v9 = vmax.f32 %v4922_v12, %v4924_v57 }
 0x41f   :  { %v4621_v24 = vpop.f32.mrf.mxu0  ;;  %v4660_v21 = vpop.f32.mrf.mxu1  ;;  %4716 = vmatmul.bf16.gmra.mxu2 %v10317_v54  ;;  %4755 = vmatmul.bf16.gmra.mxu3 %v10331_v0 }
 0x420   :  { %v4622_v4 = vadd.f32 %v4621_v24, %v4583_v63 }
 0x422   :  { %v4661_v14 = vadd.f32 %v4660_v21, %v4622_v4  ;;  %v4551_v3 = vpop.f32.mrf.mxu2  ;;  %v4590_v53 = vpop.f32.mrf.mxu3 }
 0x423   :  { %v4552_v62 = vadd.f32 %v4551_v3, %v11761_v56  ;;  %v4930_v56 = vmax.f32 %v12880_v33, 0.0 }
 0x424   :  { %v4928_v58 = vmax.f32 %v4661_v14, 0.0 }
 0x425   :  { %v4591_v15 = vadd.f32 %v4590_v53, %v4552_v62 }
 0x426   :  { %v11903_v41 = vmax.f32 %v4926_v42, %v4928_v58 }
 0x427   :  { %v4624_v40 = vpop.f32.mrf.mxu0  ;;  %v4663_v6 = vpop.f32.mrf.mxu1 }
 0x428   :  { %v4625_v20 = vadd.f32 %v4624_v40, %v4586_v34  ;;  %v12882_v34 = vld [vmem:[#allocation17_spill] sm:$0xff] }
 0x42a   :  { %v4664_v54 = vadd.f32 %v4663_v6, %v4625_v20  ;;  %4789 = vmatmul.bf16.gmra.mxu0 %v10758_v19  ;;  %4828 = vmatmul.bf16.gmra.mxu1 %v10761_v30  ;;  %v4553_v0 = vpop.f32.mrf.mxu2  ;;  %v4592_v63 = vpop.f32.mrf.mxu3  ;;  %v12884_v6 = vld [vmem:[#allocation20_spill] sm:$0xff] }
 0x42b   :  { %v4554_v11 = vadd.f32 %v4553_v0, %v11786_v37  ;;  %v4934_v37 = vmax.f32 %v12883_v49, 0.0 }
 0x42c   :  { %v4932_v35 = vmax.f32 %v4664_v54, 0.0 }
 0x42d   :  { %v4593_v31 = vadd.f32 %v4592_v63, %v4554_v11 }
 0x42e   :  { %v11909_v7 = vmax.f32 %v4930_v56, %v4932_v35  ;;  %v12885_v35 = vld [vmem:[#allocation23_spill] sm:$0xff] }
 0x42f   :  { %v4626_v12 = vpop.f32.mrf.mxu0  ;;  %v4665_v57 = vpop.f32.mrf.mxu1  ;;  %4721 = vmatmul.bf16.gmra.mxu2 %v12881_v17  ;;  %4760 = vmatmul.bf16.gmra.mxu3 %v12882_v34 }
 0x430   :  { %v4627_v28 = vadd.f32 %v4626_v12, %v4588_v48 }
 0x432   :  { %v4666_v19 = vadd.f32 %v4665_v57, %v4627_v28  ;;  %v4556_v24 = vpop.f32.mrf.mxu2  ;;  %v4595_v30 = vpop.f32.mrf.mxu3 }
 0x433   :  { %v4557_v21 = vadd.f32 %v4556_v24, %v11798_v45  ;;  %v4938_v45 = vmax.f32 %v12884_v6, 0.0 }
 0x434   :  { %v4936_v4 = vmax.f32 %v4666_v19, 0.0 }
 0x435   :  { %v4596_v14 = vadd.f32 %v4595_v30, %v4557_v21  ;;  %v12886_v30 = vld [vmem:[#allocation24_spill] sm:$0xff] }
 0x436   :  { %v11915_v3 = vmax.f32 %v4934_v37, %v4936_v4 }
 0x437   :  { %v4629_v53 = vpop.f32.mrf.mxu0  ;;  %v4668_v62 = vpop.f32.mrf.mxu1 }
 0x438   :  { %v4630_v43 = vadd.f32 %v4629_v53, %v4591_v15 }
 0x43a   :  { %v4669_v42 = vadd.f32 %v4668_v62, %v4630_v43  ;;  %4794 = vmatmul.bf16.gmra.mxu0 %v10824_v13  ;;  %4833 = vmatmul.bf16.gmra.mxu1 %v10828_v10  ;;  %v4558_v48 = vpop.f32.mrf.mxu2  ;;  %v4597_v58 = vpop.f32.mrf.mxu3 }
 0x43b   :  { %v4559_v40 = vadd.f32 %v4558_v48, %v11814_v61  ;;  %v4942_v61 = vmax.f32 %v12885_v35, 0.0  ;;  %v8619_v35 = vld [vmem:[%s12650_s4] sm:$0xf] }
 0x43c   :  { %v4940_v20 = vmax.f32 %v4669_v42, 0.0  ;;  %v12887_v42 = vld [vmem:[#allocation25_spill] sm:$0xff] }
 0x43d   :  { %v4598_v54 = vadd.f32 %v4597_v58, %v4559_v40 }
 0x43e   :  { %v11921_v0 = vmax.f32 %v4938_v45, %v4940_v20 }
 0x43f   :  { %v4631_v63 = vpop.f32.mrf.mxu0  ;;  %v4670_v11 = vpop.f32.mrf.mxu1  ;;  %4852 = vmatmul.bf16.vlgmr.msra.gmra.mxu2 %v10664_v32  ;;  %4891 = vmatmul.bf16.vlgmr.msra.gmra.mxu3 %v10668_v47 }
 0x440   :  { %v4632_v15 = vadd.f32 %v4631_v63, %v4593_v31 }
 0x442   :  { %v4671_v13 = vadd.f32 %v4670_v11, %v4632_v15  ;;  %v4561_v33 = vpop.f32.mrf.mxu2  ;;  %v4600_v10 = vpop.f32.mrf.mxu3 }
 0x443   :  { %v4562_v56 = vadd.f32 %v4561_v33, %v11832_v44  ;;  %v4946_v44 = vmax.f32 %v12886_v30, 0.0 }
 0x444   :  { %v4944_v12 = vmax.f32 %v4671_v13, 0.0 }
 0x445   :  { %v4601_v57 = vadd.f32 %v4600_v10, %v4562_v56 }
 0x446   :  { %v11927_v17 = vmax.f32 %v4942_v61, %v4944_v12  ;;  %v11950_v61 = vperm.slane %v8619_v35, 3 }
 0x447   :  { %v4634_v34 = vpop.f32.mrf.mxu0  ;;  %v4673_v28 = vpop.f32.mrf.mxu1 }
 0x448   :  { %v4635_v19 = vadd.f32 %v4634_v34, %v4596_v14 }
 0x44a   :  { %v4674_v24 = vadd.f32 %v4673_v28, %v4635_v19  ;;  %4799 = vmatmul.bf16.gmra.mxu0 %v10905_v27  ;;  %4838 = vmatmul.bf16.gmra.mxu1 %v10909_v22  ;;  %v4563_v32 = vpop.f32.mrf.mxu2  ;;  %v4602_v47 = vpop.f32.mrf.mxu3  ;;  %v12889_v19 = vld [vmem:[#allocation5_spill] sm:$0xff] }
 0x44b   :  { %v4564_v31 = vadd.f32 %v4563_v32, %v11848_v52  ;;  %v4950_v52 = vmax.f32 %v12887_v42, 0.0 }
 0x44c   :  { %v4948_v21 = vmax.f32 %v4674_v24, 0.0  ;;  %v4958_v24 = vmax.f32 %v12889_v19, 0.0 }
 0x44d   :  { %v4603_v49 = vadd.f32 %v4602_v47, %v4564_v31 }
 0x44e   :  { %v11933_v37 = vmax.f32 %v4946_v44, %v4948_v21 }
 0x44f   :  { %v4636_v4 = vpop.f32.mrf.mxu0  ;;  %v4675_v53 = vpop.f32.mrf.mxu1  ;;  %4857 = vmatmul.bf16.gmra.mxu2 %v10722_v39  ;;  %4896 = vmatmul.bf16.gmra.mxu3 %v10724_v5 }
 0x450   :  { %v4637_v14 = vadd.f32 %v4636_v4, %v4598_v54  ;;  %v12888_v54 = vld [vmem:[#allocation29_spill] sm:$0xff] }
 0x451   :  { %v4954_v15 = vmax.f32 %v12888_v54, 0.0 }
 0x452   :  { %v4676_v27 = vadd.f32 %v4675_v53, %v4637_v14  ;;  %v4566_v62 = vpop.f32.mrf.mxu2  ;;  %v4605_v22 = vpop.f32.mrf.mxu3 }
 0x453   :  { %v4567_v43 = vadd.f32 %v4566_v62, %v11858_v1 }
 0x454   :  { %v4952_v48 = vmax.f32 %v4676_v27, 0.0 }
 0x455   :  { %v4606_v58 = vadd.f32 %v4605_v22, %v4567_v43 }
 0x456   :  { %v11939_v40 = vmax.f32 %v4950_v52, %v4952_v48 }
 0x457   :  { %v4639_v6 = vpop.f32.mrf.mxu0  ;;  %v4678_v45 = vpop.f32.mrf.mxu1 }
 0x458   :  { %v4640_v20 = vadd.f32 %v4639_v6, %v4601_v57  ;;  %v12891_v6 = vld [vmem:[#allocation7_spill] sm:$0xff] }
 0x45a   :  { %v4679_v63 = vadd.f32 %v4678_v45, %v4640_v20  ;;  %v4568_v11 = vpop.f32.mrf.mxu2  ;;  %v4607_v39 = vpop.f32.mrf.mxu3  ;;  %v4966_v45 = vmax.f32 %v12891_v6, 0.0 }
 0x45b   :  { %v4569_v5 = vadd.f32 %v4568_v11, %v11878_v29 }
 0x45c   :  { %v4956_v13 = vmax.f32 %v4679_v63, 0.0 }
 0x45d   :  { %v4608_v33 = vadd.f32 %v4607_v39, %v4569_v5 }
 0x45e   :  { %v11943_v10 = vmax.f32 %v4954_v15, %v4956_v13 }
 0x45f   :  { %v4641_v1 = vpop.f32.mrf.mxu0  ;;  %v4680_v56 = vpop.f32.mrf.mxu1  ;;  %4862 = vmatmul.bf16.gmra.mxu2 %v10788_v26  ;;  %4901 = vmatmul.bf16.gmra.mxu3 %v10792_v60 }
 0x460   :  { %v4642_v12 = vadd.f32 %v4641_v1, %v4603_v49  ;;  %v12890_v49 = vld [vmem:[#allocation6_spill] sm:$0xff] }
 0x461   :  { %v4962_v53 = vmax.f32 %v12890_v49, 0.0 }
 0x462   :  { %v4681_v29 = vadd.f32 %v4680_v56, %v4642_v12  ;;  %v4697_v57 = vpop.f32.mrf.mxu2  ;;  %v4736_v34 = vpop.f32.mrf.mxu3 }
 0x463   :  { %v4698_v28 = vadd.f32 %v4697_v57, %v11950_v61 }
 0x464   :  { %v4960_v32 = vmax.f32 %v4681_v29, 0.0 }
 0x465   :  { %v11954_v47 = vadd.f32 %v4736_v34, %v4698_v28 }
 0x466   :  { %v11956_v26 = vmax.f32 %v4958_v24, %v4960_v32 }
 0x467   :  { %v4644_v60 = vpop.f32.mrf.mxu0  ;;  %v4683_v31 = vpop.f32.mrf.mxu1 }
 0x468   :  { %v4645_v30 = vadd.f32 %v4644_v60, %v4606_v58 }
 0x46a   :  { %v4684_v44 = vadd.f32 %v4683_v31, %v4645_v30  ;;  %v11958_v21 = vpop.f32.mrf.mxu2  ;;  %v11960_v4 = vpop.f32.mrf.mxu3 }
 0x46c   :  { %v4964_v14 = vmax.f32 %v4684_v44, 0.0 }
 0x46e   :  { %v11963_v27 = vmax.f32 %v4962_v53, %v4964_v14 }
 0x46f   :  { %v4646_v62 = vpop.f32.mrf.mxu0  ;;  %v4685_v22 = vpop.f32.mrf.mxu1  ;;  %4867 = vmatmul.bf16.gmra.mxu2 %v10869_v8  ;;  %4906 = vmatmul.bf16.gmra.mxu3 %v10872_v36 }
 0x470   :  { %v4647_v43 = vadd.f32 %v4646_v62, %v4608_v33 }
 0x472   :  { %v4686_v42 = vadd.f32 %v4685_v22, %v4647_v43  ;;  %v4702_v52 = vpop.f32.mrf.mxu2  ;;  %v4741_v48 = vpop.f32.mrf.mxu3 }
 0x473   :  { %v4703_v58 = vadd.f32 %v4702_v52, %v11950_v61 }
 0x474   :  { %v4968_v20 = vmax.f32 %v4686_v42, 0.0 }
 0x475   :  { %v4742_v63 = vadd.f32 %v4741_v48, %v4703_v58 }
 0x476   :  { %v11969_v11 = vmax.f32 %v4966_v45, %v4968_v20 }
 0x477   :  { %v4775_v39 = vpop.f32.mrf.mxu0  ;;  %v4814_v5 = vpop.f32.mrf.mxu1 }
 0x47a   :  { %v11971_v54 = vpop.f32.mrf.mxu2  ;;  %v11973_v15 = vpop.f32.mrf.mxu3 }
 0x47f   :  { %v4777_v8 = vpop.f32.mrf.mxu0  ;;  %v4816_v36 = vpop.f32.mrf.mxu1  ;;  %4872 = vmatmul.bf16.gmra.mxu2 %v10948_v18  ;;  %4911 = vmatmul.bf16.gmra.mxu3 %v10950_v50 }
 0x482   :  { %v4707_v13 = vpop.f32.mrf.mxu2  ;;  %v4746_v33 = vpop.f32.mrf.mxu3 }
 0x483   :  { %v4708_v1 = vadd.f32 %v4707_v13, %v11950_v61 }
 0x485   :  { %v11978_v56 = vadd.f32 %v4746_v33, %v4708_v1 }
 0x487   :  { %v4780_v35 = vpop.f32.mrf.mxu0  ;;  %v4819_v12 = vpop.f32.mrf.mxu1 }
 0x488   :  { %v4781_v29 = vadd.f32 %v4780_v35, %v4742_v63 }
 0x48a   :  { %v11980_v57 = vadd.f32 %v4819_v12, %v4781_v29  ;;  %v4709_v34 = vpop.f32.mrf.mxu2  ;;  %v4748_v28 = vpop.f32.mrf.mxu3 }
 0x48b   :  { %v4710_v44 = vadd.f32 %v4709_v34, %v11950_v61 }
 0x48f   :  { %v11982_v19 = vpop.f32.mrf.mxu0  ;;  %v11984_v24 = vpop.f32.mrf.mxu1  ;;  %4877 = vmatmul.bf16.gmra.mxu2 %v10985_v23  ;;  %4916 = vmatmul.bf16.gmra.mxu3 %v12869_v25  ;;  %v4749_v23 = vadd.f32 %v4748_v28, %v4710_v44 }
 0x492   :  { %v4712_v18 = vpop.f32.mrf.mxu2  ;;  %v4751_v50 = vpop.f32.mrf.mxu3 }
 0x493   :  { %v4713_v32 = vadd.f32 %v4712_v18, %v11950_v61  ;;  %v4776_v18 = vadd.f32 %v4775_v39, %v11954_v47  ;;  %v4705_v39 = vadd.f32 %v11971_v54, %v11950_v61 }
 0x495   :  { %v11989_v60 = vadd.f32 %v4751_v50, %v4713_v32  ;;  %v4700_v32 = vadd.f32 %v11958_v21, %v11950_v61  ;;  %v4815_v44 = vadd.f32 %v4814_v5, %v4776_v18 }
 0x497   :  { %v11991_v31 = vpop.f32.mrf.mxu0  ;;  %v11993_v30 = vpop.f32.mrf.mxu1 }
 0x49a   :  { %v4714_v49 = vpop.f32.mrf.mxu2  ;;  %v4753_v53 = vpop.f32.mrf.mxu3 }
 0x49b   :  { %v4715_v14 = vadd.f32 %v4714_v49, %v11950_v61 }
 0x49d   :  { %v11997_v62 = vadd.f32 %v4753_v53, %v4715_v14  ;;  %v4739_v14 = vadd.f32 %v11960_v4, %v4700_v32 }
 0x49f   :  { %v4787_v25 = vpop.f32.mrf.mxu0  ;;  %v4826_v43 = vpop.f32.mrf.mxu1 }
 0x4a0   :  { %v4788_v22 = vadd.f32 %v4787_v25, %v4749_v23  ;;  %v4778_v25 = vadd.f32 %v4777_v8, %v4739_v14 }
 0x4a2   :  { %v11999_v42 = vadd.f32 %v4826_v43, %v4788_v22  ;;  %v4717_v52 = vpop.f32.mrf.mxu2  ;;  %v4756_v48 = vpop.f32.mrf.mxu3  ;;  %v4923_v43 = vmax.f32 %v11568_v55, 0.0 }
 0x4a3   :  { %v4718_v58 = vadd.f32 %v4717_v52, %v11950_v61 }
 0x4a5   :  { %v12002_v6 = vadd.f32 %v4756_v48, %v4718_v58  ;;  %v4817_v48 = vadd.f32 %v4816_v36, %v4778_v25 }
 0x4aa   :  { %v4719_v45 = vpop.f32.mrf.mxu2  ;;  %v4758_v20 = vpop.f32.mrf.mxu3 }
 0x4ab   :  { %v4720_v63 = vadd.f32 %v4719_v45, %v11950_v61 }
 0x4ad   :  { %v12005_v13 = vadd.f32 %v4758_v20, %v4720_v63 }
 0x4b2   :  { %v4722_v33 = vpop.f32.mrf.mxu2  ;;  %v4761_v1 = vpop.f32.mrf.mxu3 }
 0x4b3   :  { %v4723_v35 = vadd.f32 %v4722_v33, %v11950_v61 }
 0x4b5   :  { %v12008_v12 = vadd.f32 %v4761_v1, %v4723_v35  ;;  %v4744_v1 = vadd.f32 %v11973_v15, %v4705_v39 }
 0x4b7   :  { %v4783_v32 = vadd.f32 %v11982_v19, %v4744_v1 }
 0x4ba   :  { %v4724_v29 = vpop.f32.mrf.mxu2  ;;  %v4763_v34 = vpop.f32.mrf.mxu3 }
 0x4bb   :  { %v4725_v28 = vadd.f32 %v4724_v29, %v11950_v61 }
 0x4bd   :  { %v12012_v50 = vadd.f32 %v4763_v34, %v4725_v28  ;;  %v4927_v28 = vmax.f32 %v11587_v46, 0.0  ;;  %v4822_v46 = vadd.f32 %v11984_v24, %v4783_v32  ;;  %v8429_v24 = vld [vmem:[%s12651_s5 + $0xf8] sm:$0xff]  ;;  %v4786_v32 = vadd.f32 %v11991_v31, %v11978_v56 }
 0x4be   :  { %6604 = vmatpush.bf16.msrb.mxu3 %v8429_v24 }
 0x4c2   :  { %v4853_v49 = vpop.f32.mrf.mxu2  ;;  %v4892_v53 = vpop.f32.mrf.mxu3 }
 0x4c3   :  { %v4854_v23 = vadd.f32 %v4853_v49, %v4815_v44 }
 0x4c5   :  { %v4893_v22 = vadd.f32 %v4892_v53, %v4854_v23 }
 0x4c7   :  { %v4925_v52 = vmax.f32 %v4893_v22, 0.0 }
 0x4c9   :  { %v4971_v58 = vmax.f32 %v4923_v43, %v4925_v52 }
 0x4ca   :  { %v4855_v45 = vpop.f32.mrf.mxu2  ;;  %v4894_v47 = vpop.f32.mrf.mxu3 }
 0x4cb   :  { %v5018_v20 = vrot.slane %v4971_v58, 6  ;;  %v4856_v21 = vadd.f32 %v4855_v45, %v4817_v48  ;;  %v12892_v58 = vld [vmem:[#allocation11_spill] sm:$0xff] }
 0x4cc   :  { %v4931_v45 = vmax.f32 %v12892_v58, 0.0  ;;  %v4825_v58 = vadd.f32 %v11993_v30, %v4786_v32 }
 0x4cd   :  { %v5030_v5 = vsel %vm1119_vm6, %v11891_v9, %v5018_v20  ;;  %v5031_v4 = vsel %vm1121_vm7, %v11891_v9, %v5018_v20  ;;  %v5033_v8 = vsel %vm1124_vm8, %v11891_v9, %v5018_v20  ;;  %v5035_v55 = vsel %vm148_vm1, %v5018_v20, %v11891_v9 }
 0x4ce   :  { %v5032_v36 = vrot.slane %v5031_v4, 2  ;;  %v5034_v63 = vrot.slane %v5033_v8, 4  ;;  %v5036_v33 = vrot.slane %v5035_v55, 6  ;;  %v4895_v61 = vadd.f32 %v4894_v47, %v4856_v21 }
 0x4cf   :  { %v7750_v54 = vrot.slane %v5030_v5, 9 }
 0x4d0   :  { %v7751_v35 = vrot.slane %v5032_v36, 9  ;;  %v7752_v29 = vrot.slane %v5034_v63, 9  ;;  %v7753_v34 = vrot.slane %v5036_v33, 9  ;;  %v4929_v18 = vmax.f32 %v4895_v61, 0.0 }
 0x4d1   :  { %v5306_v25 = vmax.f32 %v5030_v5, %v7750_v54  ;;  %v8421_v5 = vld [vmem:[%s12651_s5 + $0xb8] sm:$0xff] }
 0x4d2   :  { %v5307_v44 = vmax.f32 %v5032_v36, %v7751_v35  ;;  %v5309_v49 = vmax.f32 %v5036_v33, %v7753_v34  ;;  %v4858_v53 = vpop.f32.mrf.mxu2  ;;  %v4897_v14 = vpop.f32.mrf.mxu3  ;;  %v4973_v9 = vmax.f32 %v4927_v28, %v4929_v18  ;;  %v5308_v22 = vmax.f32 %v5034_v63, %v7752_v29  ;;  %6591 = vmatpush.bf16.msrb.mxu2 %v8421_v5 }
 0x4d3   :  { %v4859_v23 = vadd.f32 %v4858_v53, %v11980_v57 }
 0x4d4   :  { %v5404_v15 = vrot.slane %v5307_v44, 7  ;;  %v5411_v43 = vrot.slane %v5309_v49, 7  ;;  %v5019_v52 = vrot.slane %v4973_v9, 6 }
 0x4d5   :  { %v4898_v48 = vadd.f32 %v4897_v14, %v4859_v23  ;;  %v12897_v23 = vld [vmem:[#allocation13_spill] sm:$0xff] }
 0x4d6   :  { %v5405_v47 = vsel %vm2076_vm3, %v5404_v15, %v5306_v25  ;;  %v5412_v19 = vsel %vm2076_vm3, %v5411_v43, %v5308_v22  ;;  %v5037_v57 = vsel %vm1119_vm6, %v11903_v41, %v5019_v52  ;;  %v5038_v21 = vsel %vm1121_vm7, %v11903_v41, %v5019_v52 }
 0x4d7   :  { %v5406_v39 = vsel %vm2060_vm10, %v5404_v15, %v5405_v47  ;;  %v5413_v20 = vsel %vm2060_vm10, %v5411_v43, %v5412_v19  ;;  %v5039_v55 = vrot.slane %v5038_v21, 2  ;;  %v5040_v36 = vsel %vm1124_vm8, %v11903_v41, %v5019_v52 }
 0x4d8   :  { %v5407_v4 = vsel %vm12893_vm5, %v5404_v15, %v5406_v39  ;;  %v5414_v8 = vsel %vm12894_vm14, %v5411_v43, %v5413_v20  ;;  %v5041_v1 = vrot.slane %v5040_v36, 4  ;;  %v5042_v61 = vsel %vm148_vm1, %v5019_v52, %v11903_v41  ;;  %v4790_v20 = vpop.f32.mrf.mxu0  ;;  %vm12903_vm5 = vmmov %vm12895_vm0 }
 0x4d9   :  { %v12053_v63 = vsel %vm12895_vm0, %v5404_v15, %v5407_v4  ;;  %v12056_v33 = vsel %vm12896_vm2, %v5411_v43, %v5414_v8  ;;  %v5043_v54 = vrot.slane %v5042_v61, 6  ;;  %v7754_v35 = vrot.slane %v5037_v57, 9  ;;  %vm12904_vm14 = vmmov %vm12900_vm9 }
 0x4da   :  { %v7755_v29 = vrot.slane %v5039_v55, 9  ;;  %v4933_v34 = vmax.f32 %v4898_v48, 0.0  ;;  %v4860_v28 = vpop.f32.mrf.mxu2  ;;  %v4899_v18 = vpop.f32.mrf.mxu3  ;;  %v7756_v44 = vrot.slane %v5041_v1, 9  ;;  %v4935_v25 = vmax.f32 %v12897_v23, 0.0  ;;  %vm12907_vm2 = vmmov %vm12900_vm9 }
 0x4db   :  { %v4861_v49 = vadd.f32 %v4860_v28, %v4822_v46  ;;  %v7757_v53 = vrot.slane %v5043_v54, 9  ;;  %v5310_v41 = vmax.f32 %v5037_v57, %v7754_v35  ;;  %v8622_v47 = vmov 1934713408  }
 0x4dc   :  { %v5311_v14 = vmax.f32 %v5039_v55, %v7755_v29  ;;  %v4975_v9 = vmax.f32 %v4931_v45, %v4933_v34  ;;  %v5312_v48 = vmax.f32 %v5041_v1, %v7756_v44  ;;  %v5598_v19 = vunpack.c.l.s4 %v8622_v47  ;;  %v8405_v47 = vld [vmem:[%s12651_s5 + $0x38] sm:$0xff] }
 0x4dd   :  { %v4900_v22 = vadd.f32 %v4899_v18, %v4861_v49  ;;  %v5313_v15 = vmax.f32 %v5043_v54, %v7757_v53  ;;  %6565 = vmatpush.bf16.msrb.mxu0 %v8405_v47 }
 0x4de   :  { %v5418_v43 = vrot.slane %v5311_v14, 7  ;;  %v5020_v52 = vrot.slane %v4975_v9, 6  ;;  %v12082_v44 = vunpack.c.0.s8 %v5598_v19  ;;  %v8413_v19 = vld [vmem:[%s12651_s5 + $0x78] sm:$0xff] }
 0x4df   :  { %v4937_v39 = vmax.f32 %v4900_v22, 0.0  ;;  %v5425_v31 = vrot.slane %v5313_v15, 7  ;;  %6578 = vmatpush.bf16.msrb.mxu1 %v8413_v19  ;;  %v8420_v19 = vld [vmem:[%s12651_s5 + $0xb0] sm:$0xff] }
 0x4e0   :  { %v5419_v56 = vsel %vm2076_vm3, %v5418_v43, %v5310_v41  ;;  %v5044_v46 = vsel %vm1119_vm6, %v11909_v7, %v5020_v52  ;;  %v5045_v45 = vsel %vm1121_vm7, %v11909_v7, %v5020_v52  ;;  %v5047_v30 = vsel %vm1124_vm8, %v11909_v7, %v5020_v52  ;;  %6592 = vmatpush.bf16.msrb.mxu2 %v8420_v19 }
 0x4e1   :  { %v5420_v57 = vsel %vm2060_vm10, %v5418_v43, %v5419_v56  ;;  %v5046_v21 = vrot.slane %v5045_v45, 2  ;;  %v5049_v5 = vsel %vm148_vm1, %v5020_v52, %v11909_v7  ;;  %v5426_v4 = vsel %vm2076_vm3, %v5425_v31, %v5312_v48 }
 0x4e2   :  { %v5421_v24 = vsel %vm12898_vm13, %v5418_v43, %v5420_v57  ;;  %v5048_v8 = vrot.slane %v5047_v30, 4  ;;  %v5050_v55 = vrot.slane %v5049_v5, 6  ;;  %v4863_v36 = vpop.f32.mrf.mxu2  ;;  %v4902_v1 = vpop.f32.mrf.mxu3  ;;  %v5427_v54 = vsel %vm2060_vm10, %v5425_v31, %v5426_v4  ;;  %vm12909_vm13 = vmmov %vm12895_vm0 }
 0x4e3   :  { %v12077_v61 = vsel %vm12899_vm11, %v5418_v43, %v5421_v24  ;;  %v7758_v35 = vrot.slane %v5044_v46, 9  ;;  %v7759_v29 = vrot.slane %v5046_v21, 9  ;;  %v5428_v34 = vsel %vm12900_vm9, %v5425_v31, %v5427_v54  ;;  %v4792_v24 = vpop.f32.mrf.mxu0  ;;  %vm12910_vm11 = vmmov %vm12907_vm2 }
 0x4e4   :  { %v7760_v28 = vrot.slane %v5048_v8, 9  ;;  %v7761_v18 = vrot.slane %v5050_v55, 9  ;;  %v4977_v7 = vmax.f32 %v4935_v25, %v4937_v39  ;;  %v5429_v32 = vsel %vm12901_vm4, %v5425_v31, %v5428_v34  ;;  %v4829_v39 = vpop.f32.mrf.mxu1  ;;  %vm12911_vm9 = vmmov %vm12895_vm0 }
 0x4e5   :  { %v5315_v49 = vmax.f32 %v5046_v21, %v7759_v29  ;;  %v5594_v53 = vrot.slane %v5429_v32, 4  ;;  %v5314_v23 = vmax.f32 %v5044_v46, %v7758_v35  ;;  %v4864_v15 = vadd.f32 %v4863_v36, %v4825_v58  ;;  %vm12912_vm4 = vmmov %vm12907_vm2 }
 0x4e6   :  { %v5317_v14 = vmax.f32 %v5050_v55, %v7761_v18  ;;  %v5021_v9 = vrot.slane %v4977_v7, 6  ;;  %v5316_v22 = vmax.f32 %v5048_v8, %v7760_v28  ;;  %v8412_v28 = vld [vmem:[%s12651_s5 + $0x70] sm:$0xff]  ;;  %v4791_v18 = vadd.f32 %v4790_v20, %v11989_v60 }
 0x4e7   :  { %v5432_v41 = vrot.slane %v5315_v49, 7  ;;  %v5596_v43 = vsel %vm5595_vm12, %v5594_v53, %v12053_v63  ;;  %v4903_v36 = vadd.f32 %v4902_v1, %v4864_v15  ;;  %6579 = vmatpush.bf16.msrb.mxu1 %v8412_v28 }
 0x4e8   :  { %v5439_v52 = vrot.slane %v5317_v14, 7  ;;  %v5051_v25 = vsel %vm1119_vm6, %v11915_v3, %v5021_v9  ;;  %v5052_v48 = vsel %vm1121_vm7, %v11915_v3, %v5021_v9  ;;  %v12097_v58 = vperm.slane %v5596_v43, %v12082_v44 }
 0x4e9   :  { %v5433_v63 = vsel %vm2076_vm3, %v5432_v41, %v5314_v23  ;;  %v5053_v56 = vrot.slane %v5052_v48, 2  ;;  %v5054_v31 = vsel %vm1124_vm8, %v11915_v3, %v5021_v9  ;;  %v5056_v21 = vsel %vm148_vm1, %v5021_v9, %v11915_v3  ;;  %v8404_v3 = vld [vmem:[%s12651_s5 + $0x30] sm:$0xff]  ;;  %v12905_v9 = vld [vmem:[#allocation21_spill] sm:$0xff] }
 0x4ea   :  { %v5434_v46 = vsel %vm2060_vm10, %v5432_v41, %v5433_v63  ;;  %v5440_v45 = vsel %vm2076_vm3, %v5439_v52, %v5316_v22  ;;  %v5055_v57 = vrot.slane %v5054_v31, 4  ;;  %v4865_v30 = vpop.f32.mrf.mxu2  ;;  %v4904_v5 = vpop.f32.mrf.mxu3  ;;  %5695 = vst [vmem:[#allocation1] ss:$4 sm:$0xff] %v12097_v58  ;;  %v5057_v55 = vrot.slane %v5056_v21, 6  ;;  %6566 = vmatpush.bf16.msrb.mxu0 %v8404_v3 }
 0x4eb   :  { %v5435_v4 = vsel %vm12902_vm15, %v5432_v41, %v5434_v46  ;;  %v5441_v8 = vsel %vm2060_vm10, %v5439_v52, %v5440_v45  ;;  %v7762_v29 = vrot.slane %v5051_v25, 9  ;;  %v7763_v34 = vrot.slane %v5053_v56, 9  ;;  %v12906_v45 = vld [vmem:[#allocation26_spill] sm:$0xff]  ;;  %vm12913_vm15 = vmmov %vm12907_vm2 }
 0x4ec   :  { %v5436_v54 = vsel %vm12903_vm5, %v5432_v41, %v5435_v4  ;;  %v5442_v35 = vsel %vm12904_vm14, %v5439_v52, %v5441_v8  ;;  %v7764_v49 = vrot.slane %v5055_v57, 9  ;;  %v7765_v53 = vrot.slane %v5057_v55, 9  ;;  %v8411_v8 = vld [vmem:[%s12651_s5 + $0x68] sm:$0xff]  ;;  %vm12914_vm5 = vmmov %vm12895_vm0 }
 0x4ed   :  { %v5443_v7 = vsel %vm12895_vm0, %v5439_v52, %v5442_v35  ;;  %v5627_v32 = vrot.slane %v5436_v54, 4  ;;  %v5319_v14 = vmax.f32 %v5053_v56, %v7763_v34  ;;  %v4939_v23 = vmax.f32 %v12905_v9, 0.0  ;;  %v12908_v35 = vld [vmem:[#allocation27_spill] sm:$0xff]  ;;  %v4795_v34 = vpop.f32.mrf.mxu0  ;;  %6580 = vmatpush.bf16.msrb.mxu1 %v8411_v8  ;;  %vm12915_vm14 = vmmov %vm12895_vm0 }
 0x4ee   :  { %v5659_v1 = vrot.slane %v5443_v7, 4  ;;  %v4941_v41 = vmax.f32 %v4903_v36, 0.0  ;;  %v4866_v15 = vadd.f32 %v4865_v30, %v11999_v42  ;;  %v5318_v20 = vmax.f32 %v5051_v25, %v7762_v29  ;;  %v8419_v25 = vld [vmem:[%s12651_s5 + $0xa8] sm:$0xff]  ;;  %vm12916_vm0 = vmmov %vm12907_vm2 }
 0x4ef   :  { %v12122_v22 = vsel %vm5595_vm12, %v5627_v32, %v12056_v33  ;;  %v5321_v43 = vmax.f32 %v5057_v55, %v7765_v53  ;;  %v5446_v52 = vrot.slane %v5319_v14, 7  ;;  %v8428_v33 = vld [vmem:[%s12651_s5 + $0xf0] sm:$0xff]  ;;  %v4830_v63 = vadd.f32 %v4829_v39, %v4791_v18  ;;  %v8427_v39 = vld [vmem:[%s12651_s5 + $0xe8] sm:$0xff]  ;;  %v4831_v55 = vpop.f32.mrf.mxu1  ;;  %6593 = vmatpush.bf16.msrb.mxu2 %v8419_v25 }
 0x4f0   :  { %v12127_v60 = vsel %vm5595_vm12, %v5659_v1, %v12077_v61  ;;  %v4979_v48 = vmax.f32 %v4939_v23, %v4941_v41  ;;  %v4905_v47 = vadd.f32 %v4904_v5, %v4866_v15  ;;  %v5320_v56 = vmax.f32 %v5055_v57, %v7764_v49  ;;  %6605 = vmatpush.bf16.msrb.mxu3 %v8428_v33  ;;  %v8403_v57 = vld [vmem:[%s12651_s5 + $0x28] sm:$0xff]  ;;  %v8402_v41 = vld [vmem:[%s12651_s5 + $0x20] sm:$0xff] }
 0x4f1   :  { %v5447_v42 = vsel %vm2076_vm3, %v5446_v52, %v5318_v20  ;;  %v5453_v31 = vrot.slane %v5321_v43, 7  ;;  %v4943_v21 = vmax.f32 %v12906_v45, 0.0  ;;  %v4793_v30 = vadd.f32 %v4792_v24, %v11997_v62  ;;  %6567 = vmatpush.bf16.msrb.mxu0 %v8403_v57  ;;  %v8410_v15 = vld [vmem:[%s12651_s5 + $0x60] sm:$0xff] }
 0x4f2   :  { %v4868_v61 = vpop.f32.mrf.mxu2  ;;  %v4907_v46 = vpop.f32.mrf.mxu3  ;;  %v5448_v5 = vsel %vm2060_vm10, %v5446_v52, %v5447_v42  ;;  %v5022_v4 = vrot.slane %v4979_v48, 6  ;;  %v4945_v36 = vmax.f32 %v4905_v47, 0.0  ;;  %v4947_v29 = vmax.f32 %v12908_v35, 0.0  ;;  %6581 = vmatpush.bf16.msrb.mxu1 %v8410_v15 }
 0x4f3   :  { %v5449_v62 = vsel %vm12907_vm2, %v5446_v52, %v5448_v5  ;;  %v5454_v24 = vsel %vm2076_vm3, %v5453_v31, %v5320_v56  ;;  %v4869_v54 = vadd.f32 %v4868_v61, %v4830_v63  ;;  %v4951_v20 = vmax.f32 %v11781_v2, 0.0  ;;  %vm12917_vm2 = vmmov %vm12914_vm5  ;;  %v8424_v2 = vld [vmem:[%s12651_s5 + $0xd0] sm:$0xff] }
 0x4f4   :  { %v12155_v3 = vsel %vm12909_vm13, %v5446_v52, %v5449_v62  ;;  %v5455_v28 = vsel %vm2060_vm10, %v5453_v31, %v5454_v24  ;;  %v5058_v18 = vsel %vm1119_vm6, %v11921_v0, %v5022_v4  ;;  %v5059_v32 = vsel %vm1121_vm7, %v11921_v0, %v5022_v4  ;;  %6606 = vmatpush.bf16.msrb.mxu3 %v8427_v39  ;;  %vm12918_vm13 = vmmov %vm12916_vm0 }
 0x4f5   :  { %v5456_v7 = vsel %vm12910_vm11, %v5453_v31, %v5455_v28  ;;  %v5061_v1 = vsel %vm1124_vm8, %v11921_v0, %v5022_v4  ;;  %v5063_v49 = vsel %vm148_vm1, %v5022_v4, %v11921_v0  ;;  %v5060_v14 = vrot.slane %v5059_v32, 2  ;;  %6568 = vmatpush.bf16.msrb.mxu0 %v8402_v41  ;;  %vm12919_vm11 = vmmov %vm12917_vm2 }
 0x4f6   :  { %v12168_v53 = vsel %vm12911_vm9, %v5453_v31, %v5456_v7  ;;  %v5062_v9 = vrot.slane %v5061_v1, 4  ;;  %v5064_v23 = vrot.slane %v5063_v49, 6  ;;  %v7766_v43 = vrot.slane %v5058_v18, 9  ;;  %v12194_v7 = vpop.f32.mrf.mxu0  ;;  %vm12920_vm9 = vmmov %vm12916_vm0 }
 0x4f7   :  { %v4981_v0 = vmax.f32 %v4943_v21, %v4945_v36  ;;  %v4908_v52 = vadd.f32 %v4907_v46, %v4869_v54  ;;  %v4832_v48 = vadd.f32 %v4831_v55, %v4793_v30  ;;  %v7767_v47 = vrot.slane %v5060_v14, 9  ;;  %v8401_v46 = vld [vmem:[%s12651_s5 + $0x18] sm:$0xff]  ;;  %v4834_v54 = vpop.f32.mrf.mxu1 }
 0x4f8   :  { %v7768_v19 = vrot.slane %v5062_v9, 9  ;;  %v7769_v33 = vrot.slane %v5064_v23, 9  ;;  %v4796_v63 = vadd.f32 %v4795_v34, %v12002_v6  ;;  %v5322_v56 = vmax.f32 %v5058_v18, %v7766_v43  ;;  %v8409_v21 = vld [vmem:[%s12651_s5 + $0x58] sm:$0xff] }
 0x4f9   :  { %v5023_v42 = vrot.slane %v4981_v0, 6  ;;  %v4949_v31 = vmax.f32 %v4908_v52, 0.0  ;;  %v5323_v25 = vmax.f32 %v5060_v14, %v7767_v47  ;;  %6569 = vmatpush.bf16.msrb.mxu0 %v8401_v46  ;;  %6582 = vmatpush.bf16.msrb.mxu1 %v8409_v21  ;;  %v8418_v14 = vld [vmem:[%s12651_s5 + $0xa0] sm:$0xff] }
 0x4fa   :  { %v4870_v61 = vpop.f32.mrf.mxu2  ;;  %v5324_v45 = vmax.f32 %v5062_v9, %v7768_v19  ;;  %v5325_v5 = vmax.f32 %v5064_v23, %v7769_v33  ;;  %v4909_v39 = vpop.f32.mrf.mxu3  ;;  %v8426_v9 = vld [vmem:[%s12651_s5 + $0xe0] sm:$0xff]  ;;  %v4835_v23 = vadd.f32 %v4834_v54, %v4796_v63  ;;  %6594 = vmatpush.bf16.msrb.mxu2 %v8418_v14  ;;  %v8400_v63 = vld [vmem:[%s12651_s5 + $0x10] sm:$0xff] }
 0x4fb   :  { %v4871_v4 = vadd.f32 %v4870_v61, %v4832_v48  ;;  %v5065_v6 = vsel %vm1119_vm6, %v11927_v17, %v5023_v42  ;;  %v5066_v30 = vsel %vm1121_vm7, %v11927_v17, %v5023_v42  ;;  %v5068_v57 = vsel %vm1124_vm8, %v11927_v17, %v5023_v42  ;;  %6607 = vmatpush.bf16.msrb.mxu3 %v8426_v9 }
 0x4fc   :  { %v5070_v8 = vsel %vm148_vm1, %v5023_v42, %v11927_v17  ;;  %v5460_v55 = vrot.slane %v5323_v25, 7  ;;  %v5467_v62 = vrot.slane %v5325_v5, 7  ;;  %v5067_v24 = vrot.slane %v5066_v30, 2 }
 0x4fd   :  { %v5069_v36 = vrot.slane %v5068_v57, 4  ;;  %v5071_v35 = vrot.slane %v5070_v8, 6  ;;  %v7770_v34 = vrot.slane %v5065_v6, 9  ;;  %v4983_v28 = vmax.f32 %v4947_v29, %v4949_v31  ;;  %v8408_v31 = vld [vmem:[%s12651_s5 + $0x50] sm:$0xff]  ;;  %6570 = vmatpush.bf16.msrb.mxu0 %v8400_v63 }
 0x4fe   :  { %v12192_v18 = vadd.f32 %v4909_v39, %v4871_v4  ;;  %v5461_v32 = vsel %vm2076_vm3, %v5460_v55, %v5322_v56  ;;  %v5468_v1 = vsel %vm2076_vm3, %v5467_v62, %v5324_v45  ;;  %v7771_v49 = vrot.slane %v5067_v24, 9  ;;  %v8417_v4 = vld [vmem:[%s12651_s5 + $0x98] sm:$0xff]  ;;  %6583 = vmatpush.bf16.msrb.mxu1 %v8408_v31  ;;  %v8398_v31 = vld [vmem:[%s12651_s5] sm:$0xff] }
 0x4ff   :  { %v7772_v17 = vrot.slane %v5069_v36, 9  ;;  %v5462_v29 = vsel %vm2060_vm10, %v5460_v55, %v5461_v32  ;;  %v5469_v41 = vsel %vm2060_vm10, %v5467_v62, %v5468_v1  ;;  %v7773_v15 = vrot.slane %v5071_v35, 9  ;;  %v8425_v39 = vld [vmem:[%s12651_s5 + $0xd8] sm:$0xff]  ;;  %6595 = vmatpush.bf16.msrb.mxu2 %v8417_v4 }
 0x500   :  { %v5463_v43 = vsel %vm12912_vm4, %v5460_v55, %v5462_v29  ;;  %v5470_v0 = vsel %vm12913_vm15, %v5467_v62, %v5469_v41  ;;  %v5326_v52 = vmax.f32 %v5065_v6, %v7770_v34  ;;  %v5327_v48 = vmax.f32 %v5067_v24, %v7771_v49  ;;  %6608 = vmatpush.bf16.msrb.mxu3 %v8425_v39  ;;  %v4800_v41 = vpop.f32.mrf.mxu0  ;;  %vm12921_vm4 = vmmov %vm12917_vm2 }
 0x501   :  { %v5464_v47 = vsel %vm12914_vm5, %v5460_v55, %v5463_v43  ;;  %v5471_v19 = vsel %vm12915_vm14, %v5467_v62, %v5470_v0  ;;  %v5329_v33 = vmax.f32 %v5071_v35, %v7773_v15  ;;  %v5024_v56 = vrot.slane %v4983_v28, 6  ;;  %v8407_v28 = vld [vmem:[%s12651_s5 + $0x48] sm:$0xff]  ;;  %vm12922_vm15 = vmmov %vm12916_vm0 }
 0x502   :  { %v4873_v42 = vpop.f32.mrf.mxu2  ;;  %v5603_v61 = vrot.slane %v5471_v19, 4  ;;  %v5328_v25 = vmax.f32 %v5069_v36, %v7772_v17  ;;  %v5474_v45 = vrot.slane %v5327_v48, 7  ;;  %v4953_v5 = vmax.f32 %v12192_v18, 0.0  ;;  %v4912_v24 = vpop.f32.mrf.mxu3  ;;  %6584 = vmatpush.bf16.msrb.mxu1 %v8407_v28  ;;  %v8436_v28 = vld [vmem:[%s12651_s5 + $0x130] sm:$0xff]  ;;  %vm12923_vm5 = vmmov %vm12917_vm2 }
 0x503   :  { %v5481_v46 = vrot.slane %v5329_v33, 7  ;;  %v5072_v21 = vsel %vm1119_vm6, %v11933_v37, %v5024_v56  ;;  %v5073_v6 = vsel %vm1121_vm7, %v11933_v37, %v5024_v56  ;;  %v5075_v30 = vsel %vm1124_vm8, %v11933_v37, %v5024_v56  ;;  %v4836_v17 = vpop.f32.mrf.mxu1  ;;  %vm12924_vm14 = vmmov %vm12916_vm0 }
 0x504   :  { %v5604_v57 = vsel %vm5595_vm12, %v5603_v61, %v12155_v3  ;;  %v5475_v8 = vsel %vm2076_vm3, %v5474_v45, %v5326_v52  ;;  %v5074_v55 = vrot.slane %v5073_v6, 2  ;;  %v5076_v62 = vrot.slane %v5075_v30, 4  ;;  %v8399_v3 = vld [vmem:[%s12651_s5 + $0x8] sm:$0xff]  ;;  %v8406_v61 = vld [vmem:[%s12651_s5 + $0x40] sm:$0xff]  ;;  %6609 = vmatpush.bf16.msrb.mxu3 %v8424_v2 }
 0x505   :  { %v12233_v36 = vperm.slane %v5604_v57, %v12082_v44  ;;  %v5476_v54 = vsel %vm2060_vm10, %v5474_v45, %v5475_v8  ;;  %v5482_v35 = vsel %vm2076_vm3, %v5481_v46, %v5328_v25  ;;  %v5077_v34 = vsel %vm148_vm1, %v5024_v56, %v11933_v37  ;;  %6571 = vmatpush.bf16.msrb.mxu0 %v8399_v3 }
 0x506   :  { %v5477_v18 = vsel %vm12916_vm0, %v5474_v45, %v5476_v54  ;;  %v5483_v32 = vsel %vm2060_vm10, %v5481_v46, %v5482_v35  ;;  %v5078_v1 = vrot.slane %v5077_v34, 6  ;;  %v4874_v49 = vadd.f32 %v4873_v42, %v4835_v23  ;;  %6585 = vmatpush.bf16.msrb.mxu1 %v8406_v61  ;;  %v8453_v61 = vld [vmem:[%s12651_s5 + $0x1b8] sm:$0xff]  ;;  %vm12925_vm0 = vmmov %vm12917_vm2 }
 0x507   :  { %5697 = vst [vmem:[#allocation1 + $0x1] ss:$4 sm:$0xff] %v12233_v36  ;;  %v5478_v37 = vsel %vm12917_vm2, %v5474_v45, %v5477_v18  ;;  %v5484_v14 = vsel %vm12918_vm13, %v5481_v46, %v5483_v32  ;;  %v7774_v9 = vrot.slane %v5072_v21, 9  ;;  %v7775_v29 = vrot.slane %v5074_v55, 9  ;;  %v8444_v18 = vld [vmem:[%s12651_s5 + $0x170] sm:$0xff]  ;;  %vm12926_vm2 = vmmov %vm12920_vm9 }
 0x508   :  { %v5485_v15 = vsel %vm12919_vm11, %v5481_v46, %v5484_v14  ;;  %v5635_v43 = vrot.slane %v5478_v37, 4  ;;  %v7776_v0 = vrot.slane %v5076_v62, 9  ;;  %v7777_v52 = vrot.slane %v5078_v1, 9  ;;  %vm12927_vm13 = vmmov %vm12925_vm0 }
 0x509   :  { %v4798_v23 = vadd.f32 %v12194_v7, %v12005_v13  ;;  %v5667_v48 = vrot.slane %v5485_v15, 4  ;;  %v5331_v19 = vmax.f32 %v5074_v55, %v7775_v29  ;;  %v4985_v63 = vmax.f32 %v4951_v20, %v4953_v5  ;;  %v8416_v13 = vld [vmem:[%s12651_s5 + $0x90] sm:$0xff]  ;;  %v8437_v20 = vld [vmem:[%s12651_s5 + $0x138] sm:$0xff]  ;;  %6572 = vmatpush.bf16.msrb.mxu0 %v8398_v31  ;;  %v8443_v31 = vld [vmem:[%s12651_s5 + $0x168] sm:$0xff] }
 0x50a   :  { %v4875_v33 = vpop.f32.mrf.mxu2  ;;  %v12255_v56 = vsel %vm5595_vm12, %v5635_v43, %v12168_v53  ;;  %v5333_v42 = vmax.f32 %v5078_v1, %v7777_v52  ;;  %v5330_v53 = vmax.f32 %v5072_v21, %v7774_v9  ;;  %v4913_v45 = vadd.f32 %v4912_v24, %v4874_v49  ;;  %v8445_v5 = vld [vmem:[%s12651_s5 + $0x178] sm:$0xff]  ;;  %6596 = vmatpush.bf16.msrb.mxu2 %v8416_v13  ;;  %v8415_v24 = vld [vmem:[%s12651_s5 + $0x88] sm:$0xff]  ;;  %vm12928_vm11 = vmmov %vm12926_vm2 }
 0x50b   :  { %v12269_v7 = vsel %vm5595_vm12, %v5667_v48, %v5464_v47  ;;  %v5488_v25 = vrot.slane %v5331_v19, 7  ;;  %v5332_v4 = vmax.f32 %v5076_v62, %v7776_v0  ;;  %v5025_v46 = vrot.slane %v4985_v63, 6  ;;  %v4914_v62 = vpop.f32.mrf.mxu3  ;;  %6630 = vmatpush.bf16.msra.mxu1 %v8445_v5  ;;  %v4839_v37 = vpop.f32.mrf.mxu1  ;;  %v8414_v48 = vld [vmem:[%s12651_s5 + $0x80] sm:$0xff]  ;;  %v8435_v63 = vld [vmem:[%s12651_s5 + $0x128] sm:$0xff] }
 0x50c   :  { %v5495_v39 = vrot.slane %v5333_v42, 7  ;;  %v4837_v47 = vadd.f32 %v4836_v17, %v4798_v23  ;;  %v4801_v21 = vadd.f32 %v4800_v41, %v12008_v12  ;;  %v4957_v55 = vmax.f32 %v4913_v45, 0.0  ;;  %v8423_v12 = vld [vmem:[%s12651_s5 + $0xc8] sm:$0xff]  ;;  %v8422_v19 = vld [vmem:[%s12651_s5 + $0xc0] sm:$0xff] }
 0x50d   :  { %v5489_v6 = vsel %vm2076_vm3, %v5488_v25, %v5330_v53  ;;  %v5079_v8 = vsel %vm1119_vm6, %v11939_v40, %v5025_v46  ;;  %6617 = vmatpush.bf16.msra.mxu0 %v8437_v20  ;;  %v5080_v34 = vsel %vm1121_vm7, %v11939_v40, %v5025_v46  ;;  %v4955_v32 = vmax.f32 %v11789_v38, 0.0  ;;  %6610 = vmatpush.bf16.msrb.mxu3 %v8423_v12  ;;  %v4802_v38 = vpop.f32.mrf.mxu0 }
 0x50e   :  { %v5490_v30 = vsel %vm2060_vm10, %v5488_v25, %v5489_v6  ;;  %v5496_v57 = vsel %vm2076_vm3, %v5495_v39, %v5332_v4  ;;  %v4876_v3 = vadd.f32 %v4875_v33, %v4837_v47  ;;  %v5081_v17 = vrot.slane %v5080_v34, 2  ;;  %6597 = vmatpush.bf16.msrb.mxu2 %v8415_v24  ;;  %v8460_v34 = vld [vmem:[%s12651_s5 + $0x1f0] sm:$0xff] }
 0x50f   :  { %v5491_v54 = vsel %vm12920_vm9, %v5488_v25, %v5490_v30  ;;  %v5497_v35 = vsel %vm2060_vm10, %v5495_v39, %v5496_v57  ;;  %v5082_v9 = vsel %vm1124_vm8, %v11939_v40, %v5025_v46  ;;  %v5084_v29 = vsel %vm148_vm1, %v5025_v46, %v11939_v40  ;;  %6631 = vmatpush.bf16.msra.mxu1 %v8444_v18  ;;  %vm12929_vm9 = vmmov %vm12925_vm0 }
 0x510   :  { %v12304_v1 = vsel %vm12921_vm4, %v5488_v25, %v5491_v54  ;;  %v5498_v49 = vsel %vm12922_vm15, %v5495_v39, %v5497_v35  ;;  %v7778_v41 = vrot.slane %v5079_v8, 9  ;;  %v5083_v15 = vrot.slane %v5082_v9, 4  ;;  %vm12930_vm4 = vmmov %vm12926_vm2 }
 0x511   :  { %v12308_v14 = vsel %vm12923_vm5, %v5495_v39, %v5498_v49  ;;  %v5085_v43 = vrot.slane %v5084_v29, 6  ;;  %v7779_v0 = vrot.slane %v5081_v17, 9  ;;  %v4987_v52 = vmax.f32 %v4955_v32, %v4957_v55  ;;  %6618 = vmatpush.bf16.msra.mxu0 %v8436_v28  ;;  %6611 = vmatpush.bf16.msrb.mxu3 %v8422_v19  ;;  %v8442_v55 = vld [vmem:[%s12651_s5 + $0x160] sm:$0xff]  ;;  %vm12931_vm15 = vmmov %vm12925_vm0 }
 0x512   :  { %v4878_v23 = vpop.f32.mrf.mxu2  ;;  %v4959_v40 = vmax.f32 %v11809_v16, 0.0  ;;  %v4840_v33 = vadd.f32 %v4839_v37, %v4801_v21  ;;  %v4915_v42 = vadd.f32 %v4914_v62, %v4876_v3  ;;  %v7780_v13 = vrot.slane %v5083_v15, 9  ;;  %v8461_v16 = vld [vmem:[%s12651_s5 + $0x1f8] sm:$0xff]  ;;  %6598 = vmatpush.bf16.msrb.mxu2 %v8414_v48  ;;  %v8452_v62 = vld [vmem:[%s12651_s5 + $0x1b0] sm:$0xff]  ;;  %vm12932_vm5 = vmmov %vm12926_vm2 }
 0x513   :  { %v7781_v53 = vrot.slane %v5085_v43, 9  ;;  %v5335_v25 = vmax.f32 %v5081_v17, %v7779_v0  ;;  %v5026_v45 = vrot.slane %v4987_v52, 6  ;;  %v12334_v2 = vadd.f32 %v4802_v38, %v12012_v50  ;;  %6632 = vmatpush.bf16.msra.mxu1 %v8443_v31  ;;  %v4917_v35 = vpop.f32.mrf.mxu3  ;;  %v8441_v0 = vld [vmem:[%s12651_s5 + $0x158] sm:$0xff]  ;;  %v8451_v52 = vld [vmem:[%s12651_s5 + $0x1a8] sm:$0xff] }
 0x514   :  { %v5334_v20 = vmax.f32 %v5079_v8, %v7778_v41  ;;  %v4961_v5 = vmax.f32 %v4915_v42, 0.0  ;;  %v4879_v4 = vadd.f32 %v4878_v23, %v4840_v33  ;;  %v5336_v39 = vmax.f32 %v5083_v15, %v7780_v13  ;;  %v8434_v8 = vld [vmem:[%s12651_s5 + $0x120] sm:$0xff]  ;;  %v8459_v33 = vld [vmem:[%s12651_s5 + $0x1e8] sm:$0xff] }
 0x515   :  { %v5337_v46 = vmax.f32 %v5085_v43, %v7781_v53  ;;  %v5502_v47 = vrot.slane %v5335_v25, 7  ;;  %v5086_v21 = vsel %vm1119_vm6, %v11943_v10, %v5026_v45  ;;  %6619 = vmatpush.bf16.msra.mxu0 %v8435_v63  ;;  %v5087_v6 = vsel %vm1121_vm7, %v11943_v10, %v5026_v45  ;;  %6656 = vmatpush.bf16.msra.mxu3 %v8461_v16  ;;  %v8433_v43 = vld [vmem:[%s12651_s5 + $0x118] sm:$0xff] }
 0x516   :  { %v5089_v50 = vsel %vm1124_vm8, %v11943_v10, %v5026_v45  ;;  %v5091_v30 = vsel %vm148_vm1, %v5026_v45, %v11943_v10  ;;  %v7782_v57 = vrot.slane %v5086_v21, 9  ;;  %6643 = vmatpush.bf16.msra.mxu2 %v8453_v61  ;;  %v5088_v54 = vrot.slane %v5087_v6, 2 }
 0x517   :  { %v5503_v24 = vsel %vm2076_vm3, %v5502_v47, %v5334_v20  ;;  %v5509_v12 = vrot.slane %v5337_v46, 7  ;;  %v5090_v10 = vrot.slane %v5089_v50, 4  ;;  %v5092_v28 = vrot.slane %v5091_v30, 6  ;;  %6633 = vmatpush.bf16.msra.mxu1 %v8442_v55  ;;  %v8440_v46 = vld [vmem:[%s12651_s5 + $0x150] sm:$0xff]  ;;  %v8458_v30 = vld [vmem:[%s12651_s5 + $0x1e0] sm:$0xff] }
 0x518   :  { %v5504_v3 = vsel %vm2060_vm10, %v5502_v47, %v5503_v24  ;;  %v4989_v18 = vmax.f32 %v4959_v40, %v4961_v5  ;;  %v12358_v32 = vadd.f32 %v4917_v35, %v4879_v4  ;;  %v7783_v37 = vrot.slane %v5088_v54, 9  ;;  %v4841_v35 = vpop.f32.mrf.mxu1 }
 0x519   :  { %v5505_v49 = vsel %vm12924_vm14, %v5502_v47, %v5504_v3  ;;  %v5510_v17 = vsel %vm2076_vm3, %v5509_v12, %v5336_v39  ;;  %v7784_v9 = vrot.slane %v5090_v10, 9  ;;  %6620 = vmatpush.bf16.msra.mxu0 %v8434_v8  ;;  %v7785_v38 = vrot.slane %v5092_v28, 9  ;;  %6657 = vmatpush.bf16.msra.mxu3 %v8460_v34  ;;  %v8432_v39 = vld [vmem:[%s12651_s5 + $0x110] sm:$0xff]  ;;  %vm12933_vm14 = vmmov %vm12925_vm0 }
 0x51a   :  { %v12363_v29 = vsel %vm12925_vm0, %v5502_v47, %v5505_v49  ;;  %v5511_v41 = vsel %vm2060_vm10, %v5509_v12, %v5510_v17  ;;  %v5027_v15 = vrot.slane %v4989_v18, 6  ;;  %6644 = vmatpush.bf16.msra.mxu2 %v8452_v62  ;;  %v5338_v48 = vmax.f32 %v5086_v21, %v7782_v57  ;;  %v8450_v47 = vld [vmem:[%s12651_s5 + $0x1a0] sm:$0xff]  ;;  %v4880_v18 = vpop.f32.mrf.mxu2  ;;  %v8439_v49 = vld [vmem:[%s12651_s5 + $0x148] sm:$0xff]  ;;  %vm12934_vm0 = vmmov %vm12926_vm2 }
 0x51b   :  { %v5512_v23 = vsel %vm12926_vm2, %v5509_v12, %v5511_v41  ;;  %v5339_v19 = vmax.f32 %v5088_v54, %v7783_v37  ;;  %v5340_v40 = vmax.f32 %v5090_v10, %v7784_v9  ;;  %v5341_v63 = vmax.f32 %v5092_v28, %v7785_v38  ;;  %6634 = vmatpush.bf16.msra.mxu1 %v8441_v0  ;;  %v8457_v38 = vld [vmem:[%s12651_s5 + $0x1d8] sm:$0xff]  ;;  %vm12935_vm2 = vmmov %vm12929_vm9 }
 0x51c   :  { %v5513_v42 = vsel %vm12927_vm13, %v5509_v12, %v5512_v23  ;;  %v5093_v31 = vsel %vm1119_vm6, %v11956_v26, %v5027_v15  ;;  %v5094_v61 = vsel %vm1121_vm7, %v11956_v26, %v5027_v15  ;;  %v5096_v45 = vsel %vm1124_vm8, %v11956_v26, %v5027_v15  ;;  %vm12936_vm13 = vmmov %vm12934_vm0 }
 0x51d   :  { %v5611_v13 = vrot.slane %v5513_v42, 4  ;;  %v5516_v53 = vrot.slane %v5339_v19, 7  ;;  %v5095_v25 = vrot.slane %v5094_v61, 2  ;;  %6621 = vmatpush.bf16.msra.mxu0 %v8433_v43  ;;  %v5523_v16 = vrot.slane %v5341_v63, 7  ;;  %6658 = vmatpush.bf16.msra.mxu3 %v8459_v33  ;;  %v4919_v61 = vpop.f32.mrf.mxu3 }
 0x51e   :  { %v5097_v20 = vrot.slane %v5096_v45, 4  ;;  %v5098_v5 = vsel %vm148_vm1, %v5027_v15, %v11956_v26  ;;  %v4965_v4 = vmax.f32 %v12358_v32, 0.0  ;;  %6645 = vmatpush.bf16.msra.mxu2 %v8451_v52  ;;  %v7786_v62 = vrot.slane %v5093_v31, 9  ;;  %v8431_v32 = vld [vmem:[%s12651_s5 + $0x108] sm:$0xff] }
 0x51f   :  { %v5612_v21 = vsel %vm5595_vm12, %v5611_v13, %v12304_v1  ;;  %v5517_v26 = vsel %vm2076_vm3, %v5516_v53, %v5338_v48  ;;  %v5099_v6 = vrot.slane %v5098_v5, 6  ;;  %v7787_v50 = vrot.slane %v5095_v25, 9  ;;  %6635 = vmatpush.bf16.msra.mxu1 %v8440_v46  ;;  %v8438_v5 = vld [vmem:[%s12651_s5 + $0x140] sm:$0xff] }
 0x520   :  { %v12405_v57 = vperm.slane %v5612_v21, %v12082_v44  ;;  %v5518_v8 = vsel %vm2060_vm10, %v5516_v53, %v5517_v26  ;;  %v5524_v55 = vsel %vm2076_vm3, %v5523_v16, %v5340_v40  ;;  %v7788_v12 = vrot.slane %v5097_v20, 9  ;;  %v8456_v21 = vld [vmem:[%s12651_s5 + $0x1d0] sm:$0xff] }
 0x521   :  { %v5519_v24 = vsel %vm12928_vm11, %v5516_v53, %v5518_v8  ;;  %v5525_v1 = vsel %vm2060_vm10, %v5523_v16, %v5524_v55  ;;  %v7789_v54 = vrot.slane %v5099_v6, 9  ;;  %6622 = vmatpush.bf16.msra.mxu0 %v8432_v39  ;;  %v4963_v10 = vmax.f32 %v11829_v59, 0.0  ;;  %v8449_v59 = vld [vmem:[%s12651_s5 + $0x198] sm:$0xff]  ;;  %6659 = vmatpush.bf16.msra.mxu3 %v8458_v30  ;;  %vm12941_vm11 = vmmov %vm12935_vm2 }
 0x522   :  { %5699 = vst [vmem:[#allocation1 + $0x2] ss:$4 sm:$0xff] %v12405_v57  ;;  %v5520_v34 = vsel %vm12929_vm9, %v5516_v53, %v5519_v24  ;;  %v5526_v3 = vsel %vm12930_vm4, %v5523_v16, %v5525_v1  ;;  %v5343_v28 = vmax.f32 %v5095_v25, %v7787_v50  ;;  %6646 = vmatpush.bf16.msra.mxu2 %v8450_v47  ;;  %v4967_v26 = vmax.f32 %v11837_v51, 0.0  ;;  %v8447_v24 = vld [vmem:[%s12651_s5 + $0x188] sm:$0xff]  ;;  %vm12942_vm9 = vmmov %vm12934_vm0 }
 0x523   :  { %v4842_v17 = vadd.f32 %v4841_v35, %v12334_v2  ;;  %v5527_v37 = vsel %vm12931_vm15, %v5523_v16, %v5526_v3  ;;  %v5643_v9 = vrot.slane %v5520_v34, 4  ;;  %v5345_v41 = vmax.f32 %v5099_v6, %v7789_v54  ;;  %6636 = vmatpush.bf16.msra.mxu1 %v8439_v49  ;;  %v8455_v51 = vld [vmem:[%s12651_s5 + $0x1c8] sm:$0xff]  ;;  %vm12943_vm4 = vmmov %vm12935_vm2 }
 0x524   :  { %v5675_v15 = vrot.slane %v5527_v37, 4  ;;  %v5342_v43 = vmax.f32 %v5093_v31, %v7786_v62  ;;  %v5530_v0 = vrot.slane %v5343_v28, 7  ;;  %v4991_v52 = vmax.f32 %v4963_v10, %v4965_v4  ;;  %v8448_v4 = vld [vmem:[%s12651_s5 + $0x190] sm:$0xff] }
 0x525   :  { %v12431_v23 = vsel %vm5595_vm12, %v5643_v9, %v12308_v14  ;;  %v5344_v48 = vmax.f32 %v5097_v20, %v7788_v12  ;;  %v5537_v19 = vrot.slane %v5345_v41, 7  ;;  %v4881_v2 = vadd.f32 %v4880_v18, %v4842_v17  ;;  %6623 = vmatpush.bf16.msra.mxu0 %v8431_v32  ;;  %6660 = vmatpush.bf16.msra.mxu3 %v8457_v38  ;;  %v8430_v20 = vld [vmem:[%s12651_s5 + $0x100] sm:$0xff] }
 0x526   :  { %v12435_v40 = vsel %vm5595_vm12, %v5675_v15, %v12363_v29  ;;  %v5531_v33 = vsel %vm2076_vm3, %v5530_v0, %v5342_v43  ;;  %v5028_v42 = vrot.slane %v4991_v52, 6  ;;  %6647 = vmatpush.bf16.msra.mxu2 %v8449_v59  ;;  %v8446_v52 = vld [vmem:[%s12651_s5 + $0x180] sm:$0xff] }
 0x527   :  { %v5532_v63 = vsel %vm2060_vm10, %v5530_v0, %v5531_v33  ;;  %v5538_v31 = vsel %vm2076_vm3, %v5537_v19, %v5344_v48  ;;  %v4920_v25 = vadd.f32 %v4919_v61, %v4881_v2  ;;  %6637 = vmatpush.bf16.msra.mxu1 %v8438_v5  ;;  %v8454_v48 = vld [vmem:[%s12651_s5 + $0x1c0] sm:$0xff] }
 0x528   :  { %v5533_v14 = vsel %vm12932_vm5, %v5530_v0, %v5532_v63  ;;  %v5539_v13 = vsel %vm2060_vm10, %v5537_v19, %v5538_v31  ;;  %v5100_v53 = vsel %vm1119_vm6, %v11963_v27, %v5028_v42  ;;  %v5101_v16 = vsel %vm1121_vm7, %v11963_v27, %v5028_v42 }
 0x529   :  { %v12445_v29 = vsel %vm12933_vm14, %v5530_v0, %v5533_v14  ;;  %v5540_v45 = vsel %vm12934_vm0, %v5537_v19, %v5539_v13  ;;  %v5102_v46 = vrot.slane %v5101_v16, 2  ;;  %v5103_v47 = vsel %vm1124_vm8, %v11963_v27, %v5028_v42  ;;  %6624 = vmatpush.bf16.msra.mxu0 %v8430_v20  ;;  %6661 = vmatpush.bf16.msra.mxu3 %v8456_v21 }
 0x52a   :  { %v12460_v39 = vsel %vm12935_vm2, %v5537_v19, %v5540_v45  ;;  %v5104_v6 = vrot.slane %v5103_v47, 4  ;;  %v5105_v50 = vsel %vm148_vm1, %v5028_v42, %v11963_v27  ;;  %v7790_v8 = vrot.slane %v5100_v53, 9  ;;  %6648 = vmatpush.bf16.msra.mxu2 %v8448_v4 }
 0x52b   :  { %v5106_v30 = vrot.slane %v5105_v50, 6  ;;  %v7791_v55 = vrot.slane %v5102_v46, 9  ;;  %v4969_v62 = vmax.f32 %v4920_v25, 0.0 }
 0x52c   :  { %v7792_v1 = vrot.slane %v5104_v6, 9  ;;  %v5346_v10 = vmax.f32 %v5100_v53, %v7790_v8 }
 0x52d   :  { %v7793_v12 = vrot.slane %v5106_v30, 9  ;;  %v5347_v54 = vmax.f32 %v5102_v46, %v7791_v55  ;;  %v4993_v27 = vmax.f32 %v4967_v26, %v4969_v62  ;;  %6662 = vmatpush.bf16.msra.mxu3 %v8455_v51  ;;  %v5601_v62 = vrot.slane %v12097_v58, 4 }
 0x52e   :  { %6649 = vmatpush.bf16.msra.mxu2 %v8447_v24  ;;  %v5348_v28 = vmax.f32 %v5104_v6, %v7792_v1  ;;  %v5609_v51 = vrot.slane %v12233_v36, 4 }
 0x52f   :  { %v5349_v35 = vmax.f32 %v5106_v30, %v7793_v12  ;;  %v5544_v34 = vrot.slane %v5347_v54, 7  ;;  %v5029_v3 = vrot.slane %v4993_v27, 6  ;;  %v5617_v12 = vrot.slane %v12405_v57, 4 }
 0x530   :  { %v5610_v36 = vsel %vm5595_vm12, 0.0, %v5609_v51  ;;  %v5664_v51 = vperm.slane %v12127_v60, %v12082_v44  ;;  %v8479_v60 = vld [vmem:[%s12651_s5 + $0x288] sm:$0xff] }
 0x531   :  { %v5545_v18 = vsel %vm2076_vm3, %v5544_v34, %v5346_v10  ;;  %v5551_v32 = vrot.slane %v5349_v35, 7  ;;  %v5107_v49 = vsel %vm1119_vm6, %v11969_v11, %v5029_v3  ;;  %v5108_v59 = vsel %vm1121_vm7, %v11969_v11, %v5029_v3  ;;  %vm12937_vm6 = vmmov %vm12935_vm2  ;;  %6663 = vmatpush.bf16.msra.mxu3 %v8454_v48  ;;  %v8469_v10 = vld [vmem:[%s12651_s5 + $0x238] sm:$0xff]  ;;  %v8474_v48 = vld [vmem:[%s12651_s5 + $0x260] sm:$0xff] }
 0x532   :  { %v5546_v17 = vsel %vm2060_vm10, %v5544_v34, %v5545_v18  ;;  %v5109_v37 = vrot.slane %v5108_v59, 2  ;;  %v5110_v9 = vsel %vm1124_vm8, %v11969_v11, %v5029_v3  ;;  %v5112_v41 = vsel %vm148_vm1, %v5029_v3, %v11969_v11  ;;  %vm12938_vm1 = vmmov %vm12934_vm0  ;;  %6650 = vmatpush.bf16.msra.mxu2 %v8446_v52  ;;  %v8468_v18 = vld [vmem:[%s12651_s5 + $0x230] sm:$0xff]  ;;  %v8475_v59 = vld [vmem:[%s12651_s5 + $0x268] sm:$0xff] }
 0x533   :  { %v5547_v38 = vsel %vm12936_vm13, %v5544_v34, %v5546_v17  ;;  %v5552_v15 = vsel %vm2076_vm3, %v5551_v32, %v5348_v28  ;;  %v5111_v43 = vrot.slane %v5110_v9, 4  ;;  %v5113_v0 = vrot.slane %v5112_v41, 6  ;;  %vm12939_vm7 = vmmov %vm12935_vm2  ;;  %v8493_v9 = vld [vmem:[%s12651_s5 + $0x2f8] sm:$0xff] }
 0x534   :  { %v5548_v19 = vsel %vm12937_vm6, %v5544_v34, %v5547_v38  ;;  %v5553_v2 = vsel %vm2060_vm10, %v5551_v32, %v5552_v15  ;;  %v7794_v33 = vrot.slane %v5107_v49, 9  ;;  %v7795_v11 = vrot.slane %v5109_v37, 9  ;;  %vm12940_vm8 = vmmov %vm12934_vm0 }
 0x535   :  { %v5554_v42 = vsel %vm12938_vm1, %v5551_v32, %v5553_v2  ;;  %v7796_v63 = vrot.slane %v5111_v43, 9  ;;  %v7797_v31 = vrot.slane %v5113_v0, 9  ;;  %v5602_v35 = vsel %vm5595_vm12, 0.0, %v5601_v62  ;;  %v8465_v2 = vld [vmem:[%s12651_s5 + $0x218] sm:$0xff]  ;;  %v8480_v62 = vld [vmem:[%s12651_s5 + $0x290] sm:$0xff] }
 0x536   :  { %v5555_v61 = vsel %vm12939_vm7, %v5551_v32, %v5554_v42  ;;  %v5351_v14 = vmax.f32 %v5109_v37, %v7795_v11  ;;  %v5350_v25 = vmax.f32 %v5107_v49, %v7794_v33  ;;  %v5618_v57 = vsel %vm5595_vm12, 0.0, %v5617_v12  ;;  %v8476_v32 = vld [vmem:[%s12651_s5 + $0x270] sm:$0xff]  ;;  %v8467_v49 = vld [vmem:[%s12651_s5 + $0x228] sm:$0xff]  ;;  %v8485_v37 = vld [vmem:[%s12651_s5 + $0x2b8] sm:$0xff] }
 0x537   :  { %v5619_v13 = vrot.slane %v5555_v61, 4  ;;  %v5353_v53 = vmax.f32 %v5113_v0, %v7797_v31  ;;  %v5352_v20 = vmax.f32 %v5111_v43, %v7796_v63  ;;  %v5632_v17 = vperm.slane %v12122_v22, %v12082_v44  ;;  %v8466_v22 = vld [vmem:[%s12651_s5 + $0x220] sm:$0xff]  ;;  %v8473_v33 = vld [vmem:[%s12651_s5 + $0x258] sm:$0xff]  ;;  %v8483_v63 = vld [vmem:[%s12651_s5 + $0x2a8] sm:$0xff] }
 0x538   :  { %v5558_v45 = vrot.slane %v5351_v14, 7  ;;  %v5640_v41 = vperm.slane %v12255_v56, %v12082_v44  ;;  %v5648_v43 = vperm.slane %v12431_v23, %v12082_v44  ;;  %v8484_v23 = vld [vmem:[%s12651_s5 + $0x2b0] sm:$0xff]  ;;  %v8491_v31 = vld [vmem:[%s12651_s5 + $0x2e8] sm:$0xff]  ;;  %v5672_v12 = vperm.slane %v12269_v7, %v12082_v44 }
 0x539   :  { %v5620_v16 = vsel %vm5595_vm12, %v5619_v13, %v12445_v29  ;;  %v5565_v5 = vrot.slane %v5353_v53, 7  ;;  %v5633_v11 = vrot.slane %v5632_v17, 4  ;;  %v8464_v14 = vld [vmem:[%s12651_s5 + $0x210] sm:$0xff]  ;;  %v8487_v7 = vld [vmem:[%s12651_s5 + $0x2c8] sm:$0xff] }
 0x53a   :  { %v5624_v4 = vperm.slane %v5620_v16, %v12082_v44  ;;  %v5559_v46 = vsel %vm2076_vm3, %v5558_v45, %v5350_v25  ;;  %v5641_v42 = vrot.slane %v5640_v41, 4  ;;  %v5649_v61 = vrot.slane %v5648_v43, 4  ;;  %v8472_v13 = vld [vmem:[%s12651_s5 + $0x250] sm:$0xff] }
 0x53b   :  { %v5560_v47 = vsel %vm2060_vm10, %v5558_v45, %v5559_v46  ;;  %v5566_v21 = vsel %vm2076_vm3, %v5565_v5, %v5352_v20  ;;  %v5634_v53 = vsel %vm5595_vm12, 0.0, %v5633_v11  ;;  %v8482_v46 = vld [vmem:[%s12651_s5 + $0x2a0] sm:$0xff] }
 0x53c   :  { %5701 = vst [vmem:[#allocation1 + $0x3] ss:$4 sm:$0xff] %v5624_v4  ;;  %v5561_v26 = vsel %vm12940_vm8, %v5558_v45, %v5560_v47  ;;  %v5567_v6 = vsel %vm2060_vm10, %v5565_v5, %v5566_v21  ;;  %v5625_v54 = vrot.slane %v5624_v4, 4  ;;  %v5642_v20 = vsel %vm5595_vm12, 0.0, %v5641_v42  ;;  %v8490_v47 = vld [vmem:[%s12651_s5 + $0x2e0] sm:$0xff] }
 0x53d   :  { %v5562_v50 = vsel %vm12941_vm11, %v5558_v45, %v5561_v26  ;;  %v5568_v30 = vsel %vm12942_vm9, %v5565_v5, %v5567_v6  ;;  %v5650_v21 = vsel %vm5595_vm12, 0.0, %v5649_v61  ;;  %v8463_v26 = vld [vmem:[%s12651_s5 + $0x208] sm:$0xff] }
 0x53e   :  { %v5569_v29 = vsel %vm12943_vm4, %v5565_v5, %v5568_v30  ;;  %v5651_v8 = vrot.slane %v5562_v50, 4  ;;  %v5626_v28 = vsel %vm5595_vm12, 0.0, %v5625_v54  ;;  %v8471_v6 = vld [vmem:[%s12651_s5 + $0x248] sm:$0xff]  ;;  %v8481_v30 = vld [vmem:[%s12651_s5 + $0x298] sm:$0xff] }
 0x53f   :  { %v5683_v55 = vrot.slane %v5569_v29, 4  ;;  %v8489_v29 = vld [vmem:[%s12651_s5 + $0x2d8] sm:$0xff] }
 0x540   :  { %v5652_v24 = vsel %vm5595_vm12, %v5651_v8, %v12460_v39  ;;  %v8477_v39 = vld [vmem:[%s12651_s5 + $0x278] sm:$0xff]  ;;  %v8462_v8 = vld [vmem:[%s12651_s5 + $0x200] sm:$0xff] }
 0x541   :  { %v12514_v1 = vsel %vm5595_vm12, %v5683_v55, %v5548_v19  ;;  %v5656_v56 = vperm.slane %v5652_v24, %v12082_v44  ;;  %v8492_v19 = vld [vmem:[%s12651_s5 + $0x2f0] sm:$0xff]  ;;  %v8470_v55 = vld [vmem:[%s12651_s5 + $0x240] sm:$0xff] }
 0x542   :  { %v8488_v24 = vld [vmem:[%s12651_s5 + $0x2d0] sm:$0xff] }
 0x543   :  { %v5702_v27 = vld.sshfl [vmem:[#allocation1] sm:$0xff pattern:$0x73625140]  ;;  %v5703_v58 = vld.sshfl [vmem:[#allocation1 + $0x8] sm:$0xff pattern:$0x73625140] }
 0x544   :  { %v5781_v34 = vpack.c.bf16 %v5702_v27, %v5702_v27  ;;  %v5782_v3 = vpack.c.bf16 %v5703_v58, %v5703_v58  ;;  %5710 = vst [vmem:[#allocation1] ss:$4 sm:$0xff] %v5602_v35  ;;  %v5657_v25 = vrot.slane %v5656_v56, 4  ;;  %v5688_v58 = vperm.slane %v12514_v1, %v12082_v44  ;;  %v8486_v1 = vld [vmem:[%s12651_s5 + $0x2c0] sm:$0xff] }
 0x545   :  { %5712 = vst [vmem:[#allocation1 + $0x1] ss:$4 sm:$0xff] %v5610_v36 }
 0x546   :  { %6573 = vmatmul.bf16.vlgmr.msrb.gmra.mxu0 %v5781_v34  ;;  %6586 = vmatmul.bf16.vlgmr.msrb.gmra.mxu1 %v5782_v3  ;;  %5714 = vst [vmem:[#allocation1 + $0x2] ss:$4 sm:$0xff] %v5618_v57  ;;  %v5658_v50 = vsel %vm5595_vm12, 0.0, %v5657_v25  ;;  %v5689_v57 = vrot.slane %v5688_v58, 4 }
 0x547   :  { %6669 = vmatpush.bf16.msrb.mxu0 %v8469_v10  ;;  %5716 = vst [vmem:[#allocation1 + $0x3] ss:$4 sm:$0xff] %v5626_v28  ;;  %6682 = vmatpush.bf16.msrb.mxu1 %v8477_v39  ;;  %v5680_v10 = vperm.slane %v12435_v40, %v12082_v44  ;;  %v5665_v40 = vrot.slane %v5664_v51, 4  ;;  %v8478_v44 = vld [vmem:[%s12651_s5 + $0x280] sm:$0xff]  ;;  %v5673_v39 = vrot.slane %v5672_v12, 4 }
 0x549   :  { %v5681_v36 = vrot.slane %v5680_v10, 4  ;;  %v5666_v3 = vsel %vm5595_vm12, 0.0, %v5665_v40 }
 0x54b   :  { %6670 = vmatpush.bf16.msrb.mxu0 %v8468_v18  ;;  %6683 = vmatpush.bf16.msrb.mxu1 %v8476_v32  ;;  %v5674_v32 = vsel %vm5595_vm12, 0.0, %v5673_v39 }
 0x54e   :  { %v5717_v38 = vld.sshfl [vmem:[#allocation1] sm:$0xff pattern:$0x73625140]  ;;  %v5718_v15 = vld.sshfl [vmem:[#allocation1 + $0x8] sm:$0xff pattern:$0x73625140] }
 0x54f   :  { %6671 = vmatpush.bf16.msrb.mxu0 %v8467_v49  ;;  %v5783_v0 = vpack.c.bf16 %v5717_v38, %v5717_v38  ;;  %v5784_v52 = vpack.c.bf16 %v5718_v15, %v5718_v15  ;;  %5725 = vst [vmem:[#allocation1] ss:$4 sm:$0xff] %v5632_v17  ;;  %6684 = vmatpush.bf16.msrb.mxu1 %v8475_v59  ;;  %v5682_v17 = vsel %vm5595_vm12, 0.0, %v5681_v36 }
 0x550   :  { %5727 = vst [vmem:[#allocation1 + $0x1] ss:$4 sm:$0xff] %v5640_v41 }
 0x551   :  { %6599 = vmatmul.bf16.vlgmr.msrb.gmra.mxu2 %v5783_v0  ;;  %6612 = vmatmul.bf16.vlgmr.msrb.gmra.mxu3 %v5784_v52  ;;  %5729 = vst [vmem:[#allocation1 + $0x2] ss:$4 sm:$0xff] %v5648_v43 }
 0x552   :  { %5731 = vst [vmem:[#allocation1 + $0x3] ss:$4 sm:$0xff] %v5656_v56  ;;  %6695 = vmatpush.bf16.msrb.mxu2 %v8485_v37  ;;  %6708 = vmatpush.bf16.msrb.mxu3 %v8493_v9  ;;  %v5690_v37 = vsel %vm5595_vm12, 0.0, %v5689_v57 }
 0x553   :  { %6672 = vmatpush.bf16.msrb.mxu0 %v8466_v22  ;;  %6685 = vmatpush.bf16.msrb.mxu1 %v8474_v48 }
 0x556   :  { %6696 = vmatpush.bf16.msrb.mxu2 %v8484_v23  ;;  %6709 = vmatpush.bf16.msrb.mxu3 %v8492_v19 }
 0x557   :  { %6673 = vmatpush.bf16.msrb.mxu0 %v8465_v2  ;;  %6686 = vmatpush.bf16.msrb.mxu1 %v8473_v33  ;;  %v8617_v2 = vld [vmem:[%s12652_s6] ss:$0 sm:$0xff] }
 0x559   :  { %v5732_v45 = vld.sshfl [vmem:[#allocation1] sm:$0xff pattern:$0x73625140]  ;;  %v5733_v16 = vld.sshfl [vmem:[#allocation1 + $0x8] sm:$0xff pattern:$0x73625140] }
 0x55a   :  { %v5785_v5 = vpack.c.bf16 %v5732_v45, %v5732_v45  ;;  %v5786_v4 = vpack.c.bf16 %v5733_v16, %v5733_v16  ;;  %5740 = vst [vmem:[#allocation1] ss:$4 sm:$0xff] %v5634_v53  ;;  %6697 = vmatpush.bf16.msrb.mxu2 %v8483_v63  ;;  %6710 = vmatpush.bf16.msrb.mxu3 %v8491_v31 }
 0x55b   :  { %5742 = vst [vmem:[#allocation1 + $0x1] ss:$4 sm:$0xff] %v5642_v20  ;;  %6674 = vmatpush.bf16.msrb.mxu0 %v8464_v14  ;;  %6687 = vmatpush.bf16.msrb.mxu1 %v8472_v13 }
 0x55c   :  { %6625 = vmatmul.bf16.vlgmr.msra.gmra.mxu0 %v5785_v5  ;;  %6638 = vmatmul.bf16.vlgmr.msra.gmra.mxu1 %v5786_v4  ;;  %5744 = vst [vmem:[#allocation1 + $0x2] ss:$4 sm:$0xff] %v5650_v21 }
 0x55d   :  { %5746 = vst [vmem:[#allocation1 + $0x3] ss:$4 sm:$0xff] %v5658_v50 }
 0x55e   :  { %6698 = vmatpush.bf16.msrb.mxu2 %v8482_v46  ;;  %6711 = vmatpush.bf16.msrb.mxu3 %v8490_v47 }
 0x55f   :  { %6675 = vmatpush.bf16.msrb.mxu0 %v8463_v26  ;;  %6688 = vmatpush.bf16.msrb.mxu1 %v8471_v6 }
 0x562   :  { %6699 = vmatpush.bf16.msrb.mxu2 %v8481_v30  ;;  %6712 = vmatpush.bf16.msrb.mxu3 %v8489_v29 }
 0x563   :  { %6676 = vmatpush.bf16.msrb.mxu0 %v8462_v8  ;;  %6689 = vmatpush.bf16.msrb.mxu1 %v8470_v55 }
 0x564   :  { %v5747_v54 = vld.sshfl [vmem:[#allocation1] sm:$0xff pattern:$0x73625140]  ;;  %v5748_v27 = vld.sshfl [vmem:[#allocation1 + $0x8] sm:$0xff pattern:$0x73625140] }
 0x565   :  { %v5787_v35 = vpack.c.bf16 %v5747_v54, %v5747_v54  ;;  %v5788_v34 = vpack.c.bf16 %v5748_v27, %v5748_v27  ;;  %5755 = vst [vmem:[#allocation1] ss:$4 sm:$0xff] %v5664_v51 }
 0x566   :  { %5757 = vst [vmem:[#allocation1 + $0x1] ss:$4 sm:$0xff] %v5672_v12  ;;  %6700 = vmatpush.bf16.msrb.mxu2 %v8480_v62  ;;  %6713 = vmatpush.bf16.msrb.mxu3 %v8488_v24 }
 0x567   :  { %6651 = vmatmul.bf16.vlgmr.msra.gmra.mxu2 %v5787_v35  ;;  %6664 = vmatmul.bf16.vlgmr.msra.gmra.mxu3 %v5788_v34  ;;  %5759 = vst [vmem:[#allocation1 + $0x2] ss:$4 sm:$0xff] %v5680_v10 }
 0x568   :  { %5761 = vst [vmem:[#allocation1 + $0x3] ss:$4 sm:$0xff] %v5688_v58 }
 0x56a   :  { %6701 = vmatpush.bf16.msrb.mxu2 %v8479_v60  ;;  %6714 = vmatpush.bf16.msrb.mxu3 %v8487_v7 }
 0x56e   :  { %6702 = vmatpush.bf16.msrb.mxu2 %v8478_v44  ;;  %6715 = vmatpush.bf16.msrb.mxu3 %v8486_v1 }
 0x56f   :  { %v5762_v28 = vld.sshfl [vmem:[#allocation1] sm:$0xff pattern:$0x73625140]  ;;  %v5763_v18 = vld.sshfl [vmem:[#allocation1 + $0x8] sm:$0xff pattern:$0x73625140] }
 0x570   :  { %v5789_v49 = vpack.c.bf16 %v5762_v28, %v5762_v28  ;;  %v5790_v59 = vpack.c.bf16 %v5763_v18, %v5763_v18  ;;  %5770 = vst [vmem:[#allocation1] ss:$4 sm:$0xff] %v5666_v3 }
 0x571   :  { %5772 = vst [vmem:[#allocation1 + $0x1] ss:$4 sm:$0xff] %v5674_v32 }
 0x572   :  { %6677 = vmatmul.bf16.vlgmr.msrb.gmra.mxu0 %v5789_v49  ;;  %6690 = vmatmul.bf16.vlgmr.msrb.gmra.mxu1 %v5790_v59  ;;  %5774 = vst [vmem:[#allocation1 + $0x2] ss:$4 sm:$0xff] %v5682_v17 }
 0x573   :  { %5776 = vst [vmem:[#allocation1 + $0x3] ss:$4 sm:$0xff] %v5690_v37 }
 0x57a   :  { %v5777_v9 = vld.sshfl [vmem:[#allocation1] sm:$0xff pattern:$0x73625140]  ;;  %v5778_v41 = vld.sshfl [vmem:[#allocation1 + $0x8] sm:$0xff pattern:$0x73625140] }
 0x57b   :  { %v5791_v38 = vpack.c.bf16 %v5777_v9, %v5777_v9  ;;  %v5792_v15 = vpack.c.bf16 %v5778_v41, %v5778_v41 }
 0x57d   :  { %6703 = vmatmul.bf16.vlgmr.msrb.gmra.mxu2 %v5791_v38  ;;  %6716 = vmatmul.bf16.vlgmr.msrb.gmra.mxu3 %v5792_v15 }
 0x5c3   :  { %v6574_v43 = vpop.f32.mrf.mxu0  ;;  %v6587_v0 = vpop.f32.mrf.mxu1 }
 0x5c4   :  { %v6575_v42 = vadd.f32 %v8617_v2, %v6574_v43 }
 0x5c6   :  { %v6588_v61 = vadd.f32 %v6587_v0, %v6575_v42 }
 0x5cb   :  { %v6576_v52 = vpop.f32.mrf.mxu0  ;;  %v6589_v22 = vpop.f32.mrf.mxu1 }
 0x5d4   :  { %v6600_v48 = vpop.f32.mrf.mxu2  ;;  %v6613_v56 = vpop.f32.mrf.mxu3 }
 0x5d5   :  { %v6601_v14 = vadd.f32 %v6600_v48, %v6588_v61 }
 0x5d7   :  { %v6614_v13 = vadd.f32 %v6613_v56, %v6601_v14 }
 0x5d9   :  { %v6626_v23 = vpop.f32.mrf.mxu0  ;;  %v6639_v19 = vpop.f32.mrf.mxu1 }
 0x5da   :  { %v6627_v45 = vadd.f32 %v6626_v23, %v6614_v13 }
 0x5dc   :  { %v6602_v33 = vpop.f32.mrf.mxu2  ;;  %v6615_v11 = vpop.f32.mrf.mxu3  ;;  %v6640_v5 = vadd.f32 %v6639_v19, %v6627_v45 }
 0x5e1   :  { %v6628_v63 = vpop.f32.mrf.mxu0  ;;  %v6641_v31 = vpop.f32.mrf.mxu1 }
 0x5ea   :  { %v6652_v53 = vpop.f32.mrf.mxu2  ;;  %v6665_v25 = vpop.f32.mrf.mxu3 }
 0x5eb   :  { %v6653_v47 = vadd.f32 %v6652_v53, %v6640_v5 }
 0x5ed   :  { %v6666_v21 = vadd.f32 %v6665_v25, %v6653_v47 }
 0x5ef   :  { %v6678_v16 = vpop.f32.mrf.mxu0  ;;  %v6691_v20 = vpop.f32.mrf.mxu1 }
 0x5f0   :  { %v6679_v50 = vadd.f32 %v6678_v16, %v6666_v21 }
 0x5f2   :  { %v6654_v4 = vpop.f32.mrf.mxu2  ;;  %v6667_v46 = vpop.f32.mrf.mxu3  ;;  %v6692_v30 = vadd.f32 %v6691_v20, %v6679_v50 }
 0x5f7   :  { %v6680_v26 = vpop.f32.mrf.mxu0  ;;  %v6693_v6 = vpop.f32.mrf.mxu1 }
 0x600   :  { %v6704_v29 = vpop.f32.mrf.mxu2  ;;  %v6717_v8 = vpop.f32.mrf.mxu3 }
 0x601   :  { %v6705_v55 = vadd.f32 %v6704_v29, %v6692_v30 }
 0x603   :  { %v6718_v62 = vadd.f32 %v6717_v8, %v6705_v55 }
 0x605   :  { %6721 = vst [vmem:[%s12653_s7] sm:$0xff] %v6718_v62 }
 0x608   :  { %v6706_v24 = vpop.f32.mrf.mxu2  ;;  %v6719_v51 = vpop.f32.mrf.mxu3 }

</bundles_post_ra>
